<compile_context>
chip_gen: v6e
topology: v6e:2x2x1
jax: 0.10.0
libtpu: 0.0.40
codegen_flags: <defaults>
</compile_context>

<pallas_src>
import functools

import jax
import jax.numpy as jnp
from jax import lax
from jax.experimental import pallas as pl
from jax.experimental.pallas import tpu as pltpu


def _round_up(x, m):
    return (x + m - 1) // m * m


def _basic_block_kernel(x_ref, w1_ref, w2_ref, sh1_ref, sh2_ref, out_ref,
                        xpad_ref, mid_ref, *, H, W, Cin, Cmid, Cout):
    """Fused BasicBlock forward for one batch element.

    Refs:
      x_ref    : (1, H, W, Cin)   f32 input tile
      w1_ref   : (3, 3, Cin, Cmid)  bf16, BN1 scale pre-folded
      w2_ref   : (3, 3, Cmid, Cout) bf16, BN2 scale pre-folded
      sh1_ref  : (1, Cmid) f32 folded BN1 shift
      sh2_ref  : (1, Cout) f32 folded BN2 shift
      out_ref  : (1, H, W, Cout) f32
      xpad_ref : (NP, Cin)  bf16 scratch — zero-padded input, flat (h*(W+2)+w) rows
      mid_ref  : (NP, Cmid) bf16 scratch — zero-padded conv1 activation, same layout
    """
    WP = W + 2
    L = H * WP                     # rows of the padded-width flat activation
    NP = xpad_ref.shape[0]

    # Zero the padded scratch buffers (this provides the conv zero-halo).
    xpad_ref[...] = jnp.zeros((NP, Cin), xpad_ref.dtype)
    mid_ref[...] = jnp.zeros((NP, Cmid), mid_ref.dtype)

    # Scatter the (H, W, Cin) input into the interior of the padded flat buffer.
    for h in range(H):
        r0 = (h + 1) * WP + 1
        xpad_ref[r0:r0 + W, :] = x_ref[0, h].astype(xpad_ref.dtype)

    # Validity mask over padded-width rows: column (p mod WP) < W is a real pixel.
    col = lax.broadcasted_iota(jnp.int32, (L, 1), 0) % WP
    valid = col < W

    def conv3x3_flat(src_ref, w_ref, c_out):
        # 9 relayout-free taps: each tap is a contiguous row-offset slice of the
        # flat padded buffer, fed straight to the MXU (bf16 x bf16 -> f32 acc).
        acc = jnp.zeros((L, c_out), jnp.float32)
        for dy in range(3):
            for dx in range(3):
                off = dy * WP + dx
                slab = src_ref[off:off + L, :]
                acc = acc + jnp.dot(slab, w_ref[dy, dx],
                                    preferred_element_type=jnp.float32)
        return acc

    # conv1 + bn1 (scale folded into w1) + relu
    acc1 = conv3x3_flat(xpad_ref, w1_ref, Cmid)
    act1 = jnp.maximum(acc1 + sh1_ref[0], 0.0)
    act1 = jnp.where(valid, act1, 0.0)      # keep conv2's zero halo intact
    # One contiguous store places every valid (h, w) at padded position (h+1, w+1).
    mid_ref[W + 3:W + 3 + L, :] = act1.astype(mid_ref.dtype)

    # conv2 + bn2 (scale folded into w2)
    acc2 = conv3x3_flat(mid_ref, w2_ref, Cout) + sh2_ref[0]

    # Residual add in fp32 (straight from the unrounded input block) + relu + store.
    for h in range(H):
        row = acc2[h * WP:h * WP + W, :] + x_ref[0, h].astype(jnp.float32)
        out_ref[0, h] = jnp.maximum(row, 0.0).astype(out_ref.dtype)


def _fold_bn(bn, eps):
    scale = bn["gamma"] / jnp.sqrt(bn["var"] + eps)
    shift = bn["beta"] - bn["mean"] * scale
    return scale, shift


def basic_block_forward_nhwc(x_nhwc, params):
    """x_nhwc: (N, H, W, C) float32. Single fused pallas_call for the whole block."""
    N, H, W, Cin = x_nhwc.shape
    w1, w2 = params["w1"], params["w2"]
    Cmid, Cout = w1.shape[-1], w2.shape[-1]
    # stride=1, downsample=None  =>  inplanes == planes (residual shapes match).
    assert Cin == Cmid == Cout, "BasicBlock with downsample=None needs inplanes==planes"
    eps = params["eps"]

    s1, b1 = _fold_bn(params["bn1"], eps)
    s2, b2 = _fold_bn(params["bn2"], eps)
    # Fold BN scale into the conv weights (host-side, one-time), bf16 for the MXU.
    w1f = (w1 * s1[None, None, None, :]).astype(jnp.bfloat16)
    w2f = (w2 * s2[None, None, None, :]).astype(jnp.bfloat16)
    sh1 = b1.reshape(1, Cmid).astype(jnp.float32)
    sh2 = b2.reshape(1, Cout).astype(jnp.float32)

    NP = _round_up((H + 2) * (W + 2) + 2, 8)   # +2 slack rows for the dy=2,dx=2 tap

    kernel = functools.partial(_basic_block_kernel, H=H, W=W,
                               Cin=Cin, Cmid=Cmid, Cout=Cout)

    return pl.pallas_call(
        kernel,
        out_shape=jax.ShapeDtypeStruct((N, H, W, Cout), jnp.float32),
        grid_spec=pltpu.PrefetchScalarGridSpec(
            num_scalar_prefetch=0,
            grid=(N,),
            in_specs=[
                pl.BlockSpec((1, H, W, Cin), lambda n: (n, 0, 0, 0)),
                pl.BlockSpec((3, 3, Cin, Cmid), lambda n: (0, 0, 0, 0)),
                pl.BlockSpec((3, 3, Cmid, Cout), lambda n: (0, 0, 0, 0)),
                pl.BlockSpec((1, Cmid), lambda n: (0, 0)),
                pl.BlockSpec((1, Cout), lambda n: (0, 0)),
            ],
            out_specs=pl.BlockSpec((1, H, W, Cout), lambda n: (n, 0, 0, 0)),
            scratch_shapes=[
                pltpu.VMEM((NP, Cin), jnp.bfloat16),    # padded input, flat rows
                pltpu.VMEM((NP, Cmid), jnp.bfloat16),   # padded conv1 activation
            ],
        ),
        compiler_params=pltpu.CompilerParams(
            dimension_semantics=("parallel",)),
    )(x_nhwc.astype(jnp.float32), w1f, w2f, sh1, sh2)


def basic_block_forward(x_nchw, params):
    """PyTorch-layout interface. NOTE: in a full NHWC model, call
    basic_block_forward_nhwc directly and drop these two HBM transpose passes."""
    x = jnp.transpose(x_nchw, (0, 2, 3, 1)).astype(jnp.float32)   # NCHW -> NHWC
    y = basic_block_forward_nhwc(x, params)
    return jnp.transpose(y, (0, 3, 1, 2))                         # NHWC -> NCHW


def init_basic_block_params(key, inplanes, planes, eps=1e-5):
    """Deterministic synthetic params mirroring BasicBlock.__init__ shapes (HWIO)."""
    k1, k2, k3, k4 = jax.random.split(key, 4)
    w1 = jax.random.normal(k1, (3, 3, inplanes, planes), jnp.float32) * 0.1
    w2 = jax.random.normal(k2, (3, 3, planes, planes), jnp.float32) * 0.1
    bn1 = dict(gamma=jnp.ones((planes,), jnp.float32),
               beta=jnp.zeros((planes,), jnp.float32),
               mean=jax.random.normal(k3, (planes,), jnp.float32) * 0.05,
               var=jnp.abs(jax.random.normal(k4, (planes,), jnp.float32)) * 0.1 + 1.0)
    bn2 = dict(gamma=jnp.ones((planes,), jnp.float32) * 0.9,
               beta=jnp.full((planes,), 0.05, jnp.float32),
               mean=jnp.zeros((planes,), jnp.float32),
               var=jnp.ones((planes,), jnp.float32))
    return dict(w1=w1, w2=w2, bn1=bn1, bn2=bn2, eps=eps)


def _reference_forward_nhwc(x, params):
    """Pure-JAX fp32 reference (eval-mode BasicBlock, downsample=None)."""
    eps = params["eps"]

    def conv_bn(h, w, bn):
        y = lax.conv_general_dilated(h, w, (1, 1), ((1, 1), (1, 1)),
                                     dimension_numbers=("NHWC", "HWIO", "NHWC"))
        s = bn["gamma"] / jnp.sqrt(bn["var"] + eps)
        return y * s + (bn["beta"] - bn["mean"] * s)

    o = jnp.maximum(conv_bn(x, params["w1"], params["bn1"]), 0.0)
    o = conv_bn(o, params["w2"], params["bn2"]) + x
    return jnp.maximum(o, 0.0)


if __name__ == "__main__":
    key = jax.random.PRNGKey(0)
    kx, kp = jax.random.split(key)

    N, C, H, W = 2, 4, 16, 16          # inplanes == planes == 4, stride=1
    x = jax.random.normal(kx, (N, C, H, W), jnp.float32)
    params = init_basic_block_params(kp, inplanes=C, planes=C)

    y = basic_block_forward(x, params)
    jax.block_until_ready(y)
    assert y.shape == (N, C, H, W), y.shape

    # Loose tolerance: kernel uses bf16 matmul inputs with fp32 accumulation.
    x_nhwc = jnp.transpose(x, (0, 2, 3, 1))
    ref = jnp.transpose(_reference_forward_nhwc(x_nhwc, params), (0, 3, 1, 2))
    assert jnp.allclose(y, ref, atol=1e-1, rtol=1e-1), float(jnp.max(jnp.abs(y - ref)))

    print("KERNEL_OK")
</pallas_src>

<mosaic_0001>
module attributes {stable_mosaic.version = 11 : i64} {
  func.func @_basic_block_kernel(%arg0: i32, %arg1: memref<1x16x16x4xf32, #tpu.memory_space<vmem>>, %arg2: memref<3x3x4x4xbf16, #tpu.memory_space<vmem>>, %arg3: memref<3x3x4x4xbf16, #tpu.memory_space<vmem>>, %arg4: memref<1x4xf32, #tpu.memory_space<vmem>>, %arg5: memref<1x4xf32, #tpu.memory_space<vmem>>, %arg6: memref<1x16x16x4xf32, #tpu.memory_space<vmem>>, %arg7: memref<328x4xbf16, #tpu.memory_space<vmem>>, %arg8: memref<328x4xbf16, #tpu.memory_space<vmem>>) attributes {dimension_semantics = [#tpu.dimension_semantics<parallel>], iteration_bounds = array<i64: 2>, scalar_prefetch = 0 : i64, scratch_operands = 2 : i64, tpu.core_type = #tpu.core_type<tc>, window_params = [{transform_indices = @transform_0, window_bounds = array<i64: 1, 16, 16, 4>}, {pipeline_mode = #tpu.pipeline_mode<synchronous>, transform_indices = @transform_1, window_bounds = array<i64: 3, 3, 4, 4>}, {pipeline_mode = #tpu.pipeline_mode<synchronous>, transform_indices = @transform_2, window_bounds = array<i64: 3, 3, 4, 4>}, {pipeline_mode = #tpu.pipeline_mode<synchronous>, transform_indices = @transform_3, window_bounds = array<i64: 1, 4>}, {pipeline_mode = #tpu.pipeline_mode<synchronous>, transform_indices = @transform_4, window_bounds = array<i64: 1, 4>}, {transform_indices = @transform_5, window_bounds = array<i64: 1, 16, 16, 4>}]} {
    %cst = arith.constant 0.000000e+00 : bf16
    %0 = vector.broadcast %cst : bf16 to vector<328x4xbf16>
    %c0 = arith.constant 0 : index
    %c0_0 = arith.constant 0 : index
    %1 = vector.load %arg7[%c0, %c0_0] : memref<328x4xbf16, #tpu.memory_space<vmem>>, vector<328x4xbf16>
    tpu.vector_store %arg7[%c0, %c0_0], %0 {strides = array<i32>} : memref<328x4xbf16, #tpu.memory_space<vmem>>, vector<328x4xbf16>,
    %cst_1 = arith.constant 0.000000e+00 : bf16
    %2 = vector.broadcast %cst_1 : bf16 to vector<328x4xbf16>
    %c0_2 = arith.constant 0 : index
    %c0_3 = arith.constant 0 : index
    %3 = vector.load %arg8[%c0_2, %c0_3] : memref<328x4xbf16, #tpu.memory_space<vmem>>, vector<328x4xbf16>
    tpu.vector_store %arg8[%c0_2, %c0_3], %2 {strides = array<i32>} : memref<328x4xbf16, #tpu.memory_space<vmem>>, vector<328x4xbf16>,
    %c0_4 = arith.constant 0 : index
    %c0_5 = arith.constant 0 : index
    %c0_6 = arith.constant 0 : index
    %c0_7 = arith.constant 0 : index
    %4 = vector.load %arg1[%c0_4, %c0_5, %c0_6, %c0_7] : memref<1x16x16x4xf32, #tpu.memory_space<vmem>>, vector<1x1x16x4xf32>
    %5 = vector.shape_cast %4 : vector<1x1x16x4xf32> to vector<16x4xf32>
    %6 = arith.truncf %5 : vector<16x4xf32> to vector<16x4xbf16>
    %c19 = arith.constant 19 : index
    %c0_8 = arith.constant 0 : index
    %7 = vector.load %arg7[%c19, %c0_8] : memref<328x4xbf16, #tpu.memory_space<vmem>>, vector<16x4xbf16>
    tpu.vector_store %arg7[%c19, %c0_8], %6 {strides = array<i32>} : memref<328x4xbf16, #tpu.memory_space<vmem>>, vector<16x4xbf16>,
    %c0_9 = arith.constant 0 : index
    %c1 = arith.constant 1 : index
    %c0_10 = arith.constant 0 : index
    %c0_11 = arith.constant 0 : index
    %8 = vector.load %arg1[%c0_9, %c1, %c0_10, %c0_11] : memref<1x16x16x4xf32, #tpu.memory_space<vmem>>, vector<1x1x16x4xf32>
    %9 = vector.shape_cast %8 : vector<1x1x16x4xf32> to vector<16x4xf32>
    %10 = arith.truncf %9 : vector<16x4xf32> to vector<16x4xbf16>
    %c37 = arith.constant 37 : index
    %c0_12 = arith.constant 0 : index
    %11 = vector.load %arg7[%c37, %c0_12] : memref<328x4xbf16, #tpu.memory_space<vmem>>, vector<16x4xbf16>
    tpu.vector_store %arg7[%c37, %c0_12], %10 {strides = array<i32>} : memref<328x4xbf16, #tpu.memory_space<vmem>>, vector<16x4xbf16>,
    %c0_13 = arith.constant 0 : index
    %c2 = arith.constant 2 : index
    %c0_14 = arith.constant 0 : index
    %c0_15 = arith.constant 0 : index
    %12 = vector.load %arg1[%c0_13, %c2, %c0_14, %c0_15] : memref<1x16x16x4xf32, #tpu.memory_space<vmem>>, vector<1x1x16x4xf32>
    %13 = vector.shape_cast %12 : vector<1x1x16x4xf32> to vector<16x4xf32>
    %14 = arith.truncf %13 : vector<16x4xf32> to vector<16x4xbf16>
    %c55 = arith.constant 55 : index
    %c0_16 = arith.constant 0 : index
    %15 = vector.load %arg7[%c55, %c0_16] : memref<328x4xbf16, #tpu.memory_space<vmem>>, vector<16x4xbf16>
    tpu.vector_store %arg7[%c55, %c0_16], %14 {strides = array<i32>} : memref<328x4xbf16, #tpu.memory_space<vmem>>, vector<16x4xbf16>,
    %c0_17 = arith.constant 0 : index
    %c3 = arith.constant 3 : index
    %c0_18 = arith.constant 0 : index
    %c0_19 = arith.constant 0 : index
    %16 = vector.load %arg1[%c0_17, %c3, %c0_18, %c0_19] : memref<1x16x16x4xf32, #tpu.memory_space<vmem>>, vector<1x1x16x4xf32>
    %17 = vector.shape_cast %16 : vector<1x1x16x4xf32> to vector<16x4xf32>
    %18 = arith.truncf %17 : vector<16x4xf32> to vector<16x4xbf16>
    %c73 = arith.constant 73 : index
    %c0_20 = arith.constant 0 : index
    %19 = vector.load %arg7[%c73, %c0_20] : memref<328x4xbf16, #tpu.memory_space<vmem>>, vector<16x4xbf16>
    tpu.vector_store %arg7[%c73, %c0_20], %18 {strides = array<i32>} : memref<328x4xbf16, #tpu.memory_space<vmem>>, vector<16x4xbf16>,
    %c0_21 = arith.constant 0 : index
    %c4 = arith.constant 4 : index
    %c0_22 = arith.constant 0 : index
    %c0_23 = arith.constant 0 : index
    %20 = vector.load %arg1[%c0_21, %c4, %c0_22, %c0_23] : memref<1x16x16x4xf32, #tpu.memory_space<vmem>>, vector<1x1x16x4xf32>
    %21 = vector.shape_cast %20 : vector<1x1x16x4xf32> to vector<16x4xf32>
    %22 = arith.truncf %21 : vector<16x4xf32> to vector<16x4xbf16>
    %c91 = arith.constant 91 : index
    %c0_24 = arith.constant 0 : index
    %23 = vector.load %arg7[%c91, %c0_24] : memref<328x4xbf16, #tpu.memory_space<vmem>>, vector<16x4xbf16>
    tpu.vector_store %arg7[%c91, %c0_24], %22 {strides = array<i32>} : memref<328x4xbf16, #tpu.memory_space<vmem>>, vector<16x4xbf16>,
    %c0_25 = arith.constant 0 : index
    %c5 = arith.constant 5 : index
    %c0_26 = arith.constant 0 : index
    %c0_27 = arith.constant 0 : index
    %24 = vector.load %arg1[%c0_25, %c5, %c0_26, %c0_27] : memref<1x16x16x4xf32, #tpu.memory_space<vmem>>, vector<1x1x16x4xf32>
    %25 = vector.shape_cast %24 : vector<1x1x16x4xf32> to vector<16x4xf32>
    %26 = arith.truncf %25 : vector<16x4xf32> to vector<16x4xbf16>
    %c109 = arith.constant 109 : index
    %c0_28 = arith.constant 0 : index
    %27 = vector.load %arg7[%c109, %c0_28] : memref<328x4xbf16, #tpu.memory_space<vmem>>, vector<16x4xbf16>
    tpu.vector_store %arg7[%c109, %c0_28], %26 {strides = array<i32>} : memref<328x4xbf16, #tpu.memory_space<vmem>>, vector<16x4xbf16>,
    %c0_29 = arith.constant 0 : index
    %c6 = arith.constant 6 : index
    %c0_30 = arith.constant 0 : index
    %c0_31 = arith.constant 0 : index
    %28 = vector.load %arg1[%c0_29, %c6, %c0_30, %c0_31] : memref<1x16x16x4xf32, #tpu.memory_space<vmem>>, vector<1x1x16x4xf32>
    %29 = vector.shape_cast %28 : vector<1x1x16x4xf32> to vector<16x4xf32>
    %30 = arith.truncf %29 : vector<16x4xf32> to vector<16x4xbf16>
    %c127 = arith.constant 127 : index
    %c0_32 = arith.constant 0 : index
    %31 = vector.load %arg7[%c127, %c0_32] : memref<328x4xbf16, #tpu.memory_space<vmem>>, vector<16x4xbf16>
    tpu.vector_store %arg7[%c127, %c0_32], %30 {strides = array<i32>} : memref<328x4xbf16, #tpu.memory_space<vmem>>, vector<16x4xbf16>,
    %c0_33 = arith.constant 0 : index
    %c7 = arith.constant 7 : index
    %c0_34 = arith.constant 0 : index
    %c0_35 = arith.constant 0 : index
    %32 = vector.load %arg1[%c0_33, %c7, %c0_34, %c0_35] : memref<1x16x16x4xf32, #tpu.memory_space<vmem>>, vector<1x1x16x4xf32>
    %33 = vector.shape_cast %32 : vector<1x1x16x4xf32> to vector<16x4xf32>
    %34 = arith.truncf %33 : vector<16x4xf32> to vector<16x4xbf16>
    %c145 = arith.constant 145 : index
    %c0_36 = arith.constant 0 : index
    %35 = vector.load %arg7[%c145, %c0_36] : memref<328x4xbf16, #tpu.memory_space<vmem>>, vector<16x4xbf16>
    tpu.vector_store %arg7[%c145, %c0_36], %34 {strides = array<i32>} : memref<328x4xbf16, #tpu.memory_space<vmem>>, vector<16x4xbf16>,
    %c0_37 = arith.constant 0 : index
    %c8 = arith.constant 8 : index
    %c0_38 = arith.constant 0 : index
    %c0_39 = arith.constant 0 : index
    %36 = vector.load %arg1[%c0_37, %c8, %c0_38, %c0_39] : memref<1x16x16x4xf32, #tpu.memory_space<vmem>>, vector<1x1x16x4xf32>
    %37 = vector.shape_cast %36 : vector<1x1x16x4xf32> to vector<16x4xf32>
    %38 = arith.truncf %37 : vector<16x4xf32> to vector<16x4xbf16>
    %c163 = arith.constant 163 : index
    %c0_40 = arith.constant 0 : index
    %39 = vector.load %arg7[%c163, %c0_40] : memref<328x4xbf16, #tpu.memory_space<vmem>>, vector<16x4xbf16>
    tpu.vector_store %arg7[%c163, %c0_40], %38 {strides = array<i32>} : memref<328x4xbf16, #tpu.memory_space<vmem>>, vector<16x4xbf16>,
    %c0_41 = arith.constant 0 : index
    %c9 = arith.constant 9 : index
    %c0_42 = arith.constant 0 : index
    %c0_43 = arith.constant 0 : index
    %40 = vector.load %arg1[%c0_41, %c9, %c0_42, %c0_43] : memref<1x16x16x4xf32, #tpu.memory_space<vmem>>, vector<1x1x16x4xf32>
    %41 = vector.shape_cast %40 : vector<1x1x16x4xf32> to vector<16x4xf32>
    %42 = arith.truncf %41 : vector<16x4xf32> to vector<16x4xbf16>
    %c181 = arith.constant 181 : index
    %c0_44 = arith.constant 0 : index
    %43 = vector.load %arg7[%c181, %c0_44] : memref<328x4xbf16, #tpu.memory_space<vmem>>, vector<16x4xbf16>
    tpu.vector_store %arg7[%c181, %c0_44], %42 {strides = array<i32>} : memref<328x4xbf16, #tpu.memory_space<vmem>>, vector<16x4xbf16>,
    %c0_45 = arith.constant 0 : index
    %c10 = arith.constant 10 : index
    %c0_46 = arith.constant 0 : index
    %c0_47 = arith.constant 0 : index
    %44 = vector.load %arg1[%c0_45, %c10, %c0_46, %c0_47] : memref<1x16x16x4xf32, #tpu.memory_space<vmem>>, vector<1x1x16x4xf32>
    %45 = vector.shape_cast %44 : vector<1x1x16x4xf32> to vector<16x4xf32>
    %46 = arith.truncf %45 : vector<16x4xf32> to vector<16x4xbf16>
    %c199 = arith.constant 199 : index
    %c0_48 = arith.constant 0 : index
    %47 = vector.load %arg7[%c199, %c0_48] : memref<328x4xbf16, #tpu.memory_space<vmem>>, vector<16x4xbf16>
    tpu.vector_store %arg7[%c199, %c0_48], %46 {strides = array<i32>} : memref<328x4xbf16, #tpu.memory_space<vmem>>, vector<16x4xbf16>,
    %c0_49 = arith.constant 0 : index
    %c11 = arith.constant 11 : index
    %c0_50 = arith.constant 0 : index
    %c0_51 = arith.constant 0 : index
    %48 = vector.load %arg1[%c0_49, %c11, %c0_50, %c0_51] : memref<1x16x16x4xf32, #tpu.memory_space<vmem>>, vector<1x1x16x4xf32>
    %49 = vector.shape_cast %48 : vector<1x1x16x4xf32> to vector<16x4xf32>
    %50 = arith.truncf %49 : vector<16x4xf32> to vector<16x4xbf16>
    %c217 = arith.constant 217 : index
    %c0_52 = arith.constant 0 : index
    %51 = vector.load %arg7[%c217, %c0_52] : memref<328x4xbf16, #tpu.memory_space<vmem>>, vector<16x4xbf16>
    tpu.vector_store %arg7[%c217, %c0_52], %50 {strides = array<i32>} : memref<328x4xbf16, #tpu.memory_space<vmem>>, vector<16x4xbf16>,
    %c0_53 = arith.constant 0 : index
    %c12 = arith.constant 12 : index
    %c0_54 = arith.constant 0 : index
    %c0_55 = arith.constant 0 : index
    %52 = vector.load %arg1[%c0_53, %c12, %c0_54, %c0_55] : memref<1x16x16x4xf32, #tpu.memory_space<vmem>>, vector<1x1x16x4xf32>
    %53 = vector.shape_cast %52 : vector<1x1x16x4xf32> to vector<16x4xf32>
    %54 = arith.truncf %53 : vector<16x4xf32> to vector<16x4xbf16>
    %c235 = arith.constant 235 : index
    %c0_56 = arith.constant 0 : index
    %55 = vector.load %arg7[%c235, %c0_56] : memref<328x4xbf16, #tpu.memory_space<vmem>>, vector<16x4xbf16>
    tpu.vector_store %arg7[%c235, %c0_56], %54 {strides = array<i32>} : memref<328x4xbf16, #tpu.memory_space<vmem>>, vector<16x4xbf16>,
    %c0_57 = arith.constant 0 : index
    %c13 = arith.constant 13 : index
    %c0_58 = arith.constant 0 : index
    %c0_59 = arith.constant 0 : index
    %56 = vector.load %arg1[%c0_57, %c13, %c0_58, %c0_59] : memref<1x16x16x4xf32, #tpu.memory_space<vmem>>, vector<1x1x16x4xf32>
    %57 = vector.shape_cast %56 : vector<1x1x16x4xf32> to vector<16x4xf32>
    %58 = arith.truncf %57 : vector<16x4xf32> to vector<16x4xbf16>
    %c253 = arith.constant 253 : index
    %c0_60 = arith.constant 0 : index
    %59 = vector.load %arg7[%c253, %c0_60] : memref<328x4xbf16, #tpu.memory_space<vmem>>, vector<16x4xbf16>
    tpu.vector_store %arg7[%c253, %c0_60], %58 {strides = array<i32>} : memref<328x4xbf16, #tpu.memory_space<vmem>>, vector<16x4xbf16>,
    %c0_61 = arith.constant 0 : index
    %c14 = arith.constant 14 : index
    %c0_62 = arith.constant 0 : index
    %c0_63 = arith.constant 0 : index
    %60 = vector.load %arg1[%c0_61, %c14, %c0_62, %c0_63] : memref<1x16x16x4xf32, #tpu.memory_space<vmem>>, vector<1x1x16x4xf32>
    %61 = vector.shape_cast %60 : vector<1x1x16x4xf32> to vector<16x4xf32>
    %62 = arith.truncf %61 : vector<16x4xf32> to vector<16x4xbf16>
    %c271 = arith.constant 271 : index
    %c0_64 = arith.constant 0 : index
    %63 = vector.load %arg7[%c271, %c0_64] : memref<328x4xbf16, #tpu.memory_space<vmem>>, vector<16x4xbf16>
    tpu.vector_store %arg7[%c271, %c0_64], %62 {strides = array<i32>} : memref<328x4xbf16, #tpu.memory_space<vmem>>, vector<16x4xbf16>,
    %c0_65 = arith.constant 0 : index
    %c15 = arith.constant 15 : index
    %c0_66 = arith.constant 0 : index
    %c0_67 = arith.constant 0 : index
    %64 = vector.load %arg1[%c0_65, %c15, %c0_66, %c0_67] : memref<1x16x16x4xf32, #tpu.memory_space<vmem>>, vector<1x1x16x4xf32>
    %65 = vector.shape_cast %64 : vector<1x1x16x4xf32> to vector<16x4xf32>
    %66 = arith.truncf %65 : vector<16x4xf32> to vector<16x4xbf16>
    %c289 = arith.constant 289 : index
    %c0_68 = arith.constant 0 : index
    %67 = vector.load %arg7[%c289, %c0_68] : memref<328x4xbf16, #tpu.memory_space<vmem>>, vector<16x4xbf16>
    tpu.vector_store %arg7[%c289, %c0_68], %66 {strides = array<i32>} : memref<328x4xbf16, #tpu.memory_space<vmem>>, vector<16x4xbf16>,
    %68 = tpu.iota {dimensions = array<i32: 0>} : vector<288x1xi32>
    %c18_i32 = arith.constant 18 : i32
    %c0_i32 = arith.constant 0 : i32
    %69 = arith.cmpi eq, %c18_i32, %c0_i32 : i32
    %c1_i32 = arith.constant 1 : i32
    %70 = arith.select %69, %c1_i32, %c18_i32 : i32
    %71 = vector.broadcast %70 : i32 to vector<288x1xi32>
    %72 = arith.remsi %68, %71 : vector<288x1xi32>
    %c0_i32_69 = arith.constant 0 : i32
    %73 = vector.broadcast %c0_i32_69 : i32 to vector<288x1xi32>
    %74 = arith.cmpi ne, %72, %73 : vector<288x1xi32>
    %c0_i32_70 = arith.constant 0 : i32
    %75 = vector.broadcast %c0_i32_70 : i32 to vector<288x1xi32>
    %76 = arith.cmpi slt, %72, %75 : vector<288x1xi32>
    %c0_i32_71 = arith.constant 0 : i32
    %77 = arith.cmpi slt, %70, %c0_i32_71 : i32
    %78 = vector.broadcast %77 : i1 to vector<288x1xi1>
    %79 = vector.broadcast %78 : vector<288x1xi1> to vector<288x1xi1>
    %80 = arith.xori %76, %79 : vector<288x1xi1>
    %81 = arith.andi %80, %74 : vector<288x1xi1>
    %82 = vector.broadcast %70 : i32 to vector<288x1xi32>
    %83 = arith.addi %72, %82 : vector<288x1xi32>
    %84 = arith.select %81, %83, %72 : vector<288x1xi1>, vector<288x1xi32>
    %c16_i32 = arith.constant 16 : i32
    %85 = vector.broadcast %c16_i32 : i32 to vector<288x1xi32>
    %86 = arith.cmpi slt, %84, %85 : vector<288x1xi32>
    %cst_72 = arith.constant 0.000000e+00 : f32
    %87 = vector.broadcast %cst_72 : f32 to vector<288x4xf32>
    %c0_73 = arith.constant 0 : index
    %c0_74 = arith.constant 0 : index
    %88 = vector.load %arg7[%c0_73, %c0_74] : memref<328x4xbf16, #tpu.memory_space<vmem>>, vector<288x4xbf16>
    %c0_75 = arith.constant 0 : index
    %c0_76 = arith.constant 0 : index
    %c0_77 = arith.constant 0 : index
    %c0_78 = arith.constant 0 : index
    %89 = vector.load %arg2[%c0_75, %c0_76, %c0_77, %c0_78] : memref<3x3x4x4xbf16, #tpu.memory_space<vmem>>, vector<1x1x4x4xbf16>
    %90 = vector.shape_cast %89 : vector<1x1x4x4xbf16> to vector<4x4xbf16>
    %cst_79 = arith.constant dense<0.000000e+00> : vector<288x4xf32>
    %91 = tpu.matmul %88, %90, %cst_79 {dimension_numbers = #tpu.dot_dimension_numbers<[1], [0], [0], [1], [0, 0, 1, 1], [], []>} : vector<288x4xbf16>, vector<4x4xbf16>, vector<288x4xf32> -> vector<288x4xf32>
    %92 = arith.addf %87, %91 : vector<288x4xf32>
    %c1_80 = arith.constant 1 : index
    %c0_81 = arith.constant 0 : index
    %93 = vector.load %arg7[%c1_80, %c0_81] : memref<328x4xbf16, #tpu.memory_space<vmem>>, vector<288x4xbf16>
    %c0_82 = arith.constant 0 : index
    %c1_83 = arith.constant 1 : index
    %c0_84 = arith.constant 0 : index
    %c0_85 = arith.constant 0 : index
    %94 = vector.load %arg2[%c0_82, %c1_83, %c0_84, %c0_85] : memref<3x3x4x4xbf16, #tpu.memory_space<vmem>>, vector<1x1x4x4xbf16>
    %95 = vector.shape_cast %94 : vector<1x1x4x4xbf16> to vector<4x4xbf16>
    %cst_86 = arith.constant dense<0.000000e+00> : vector<288x4xf32>
    %96 = tpu.matmul %93, %95, %cst_86 {dimension_numbers = #tpu.dot_dimension_numbers<[1], [0], [0], [1], [0, 0, 1, 1], [], []>} : vector<288x4xbf16>, vector<4x4xbf16>, vector<288x4xf32> -> vector<288x4xf32>
    %97 = arith.addf %92, %96 : vector<288x4xf32>
    %c2_87 = arith.constant 2 : index
    %c0_88 = arith.constant 0 : index
    %98 = vector.load %arg7[%c2_87, %c0_88] : memref<328x4xbf16, #tpu.memory_space<vmem>>, vector<288x4xbf16>
    %c0_89 = arith.constant 0 : index
    %c2_90 = arith.constant 2 : index
    %c0_91 = arith.constant 0 : index
    %c0_92 = arith.constant 0 : index
    %99 = vector.load %arg2[%c0_89, %c2_90, %c0_91, %c0_92] : memref<3x3x4x4xbf16, #tpu.memory_space<vmem>>, vector<1x1x4x4xbf16>
    %100 = vector.shape_cast %99 : vector<1x1x4x4xbf16> to vector<4x4xbf16>
    %cst_93 = arith.constant dense<0.000000e+00> : vector<288x4xf32>
    %101 = tpu.matmul %98, %100, %cst_93 {dimension_numbers = #tpu.dot_dimension_numbers<[1], [0], [0], [1], [0, 0, 1, 1], [], []>} : vector<288x4xbf16>, vector<4x4xbf16>, vector<288x4xf32> -> vector<288x4xf32>
    %102 = arith.addf %97, %101 : vector<288x4xf32>
    %c18 = arith.constant 18 : index
    %c0_94 = arith.constant 0 : index
    %103 = vector.load %arg7[%c18, %c0_94] : memref<328x4xbf16, #tpu.memory_space<vmem>>, vector<288x4xbf16>
    %c1_95 = arith.constant 1 : index
    %c0_96 = arith.constant 0 : index
    %c0_97 = arith.constant 0 : index
    %c0_98 = arith.constant 0 : index
    %104 = vector.load %arg2[%c1_95, %c0_96, %c0_97, %c0_98] : memref<3x3x4x4xbf16, #tpu.memory_space<vmem>>, vector<1x1x4x4xbf16>
    %105 = vector.shape_cast %104 : vector<1x1x4x4xbf16> to vector<4x4xbf16>
    %cst_99 = arith.constant dense<0.000000e+00> : vector<288x4xf32>
    %106 = tpu.matmul %103, %105, %cst_99 {dimension_numbers = #tpu.dot_dimension_numbers<[1], [0], [0], [1], [0, 0, 1, 1], [], []>} : vector<288x4xbf16>, vector<4x4xbf16>, vector<288x4xf32> -> vector<288x4xf32>
    %107 = arith.addf %102, %106 : vector<288x4xf32>
    %c19_100 = arith.constant 19 : index
    %c0_101 = arith.constant 0 : index
    %108 = vector.load %arg7[%c19_100, %c0_101] : memref<328x4xbf16, #tpu.memory_space<vmem>>, vector<288x4xbf16>
    %c1_102 = arith.constant 1 : index
    %c1_103 = arith.constant 1 : index
    %c0_104 = arith.constant 0 : index
    %c0_105 = arith.constant 0 : index
    %109 = vector.load %arg2[%c1_102, %c1_103, %c0_104, %c0_105] : memref<3x3x4x4xbf16, #tpu.memory_space<vmem>>, vector<1x1x4x4xbf16>
    %110 = vector.shape_cast %109 : vector<1x1x4x4xbf16> to vector<4x4xbf16>
    %cst_106 = arith.constant dense<0.000000e+00> : vector<288x4xf32>
    %111 = tpu.matmul %108, %110, %cst_106 {dimension_numbers = #tpu.dot_dimension_numbers<[1], [0], [0], [1], [0, 0, 1, 1], [], []>} : vector<288x4xbf16>, vector<4x4xbf16>, vector<288x4xf32> -> vector<288x4xf32>
    %112 = arith.addf %107, %111 : vector<288x4xf32>
    %c20 = arith.constant 20 : index
    %c0_107 = arith.constant 0 : index
    %113 = vector.load %arg7[%c20, %c0_107] : memref<328x4xbf16, #tpu.memory_space<vmem>>, vector<288x4xbf16>
    %c1_108 = arith.constant 1 : index
    %c2_109 = arith.constant 2 : index
    %c0_110 = arith.constant 0 : index
    %c0_111 = arith.constant 0 : index
    %114 = vector.load %arg2[%c1_108, %c2_109, %c0_110, %c0_111] : memref<3x3x4x4xbf16, #tpu.memory_space<vmem>>, vector<1x1x4x4xbf16>
    %115 = vector.shape_cast %114 : vector<1x1x4x4xbf16> to vector<4x4xbf16>
    %cst_112 = arith.constant dense<0.000000e+00> : vector<288x4xf32>
    %116 = tpu.matmul %113, %115, %cst_112 {dimension_numbers = #tpu.dot_dimension_numbers<[1], [0], [0], [1], [0, 0, 1, 1], [], []>} : vector<288x4xbf16>, vector<4x4xbf16>, vector<288x4xf32> -> vector<288x4xf32>
    %117 = arith.addf %112, %116 : vector<288x4xf32>
    %c36 = arith.constant 36 : index
    %c0_113 = arith.constant 0 : index
    %118 = vector.load %arg7[%c36, %c0_113] : memref<328x4xbf16, #tpu.memory_space<vmem>>, vector<288x4xbf16>
    %c2_114 = arith.constant 2 : index
    %c0_115 = arith.constant 0 : index
    %c0_116 = arith.constant 0 : index
    %c0_117 = arith.constant 0 : index
    %119 = vector.load %arg2[%c2_114, %c0_115, %c0_116, %c0_117] : memref<3x3x4x4xbf16, #tpu.memory_space<vmem>>, vector<1x1x4x4xbf16>
    %120 = vector.shape_cast %119 : vector<1x1x4x4xbf16> to vector<4x4xbf16>
    %cst_118 = arith.constant dense<0.000000e+00> : vector<288x4xf32>
    %121 = tpu.matmul %118, %120, %cst_118 {dimension_numbers = #tpu.dot_dimension_numbers<[1], [0], [0], [1], [0, 0, 1, 1], [], []>} : vector<288x4xbf16>, vector<4x4xbf16>, vector<288x4xf32> -> vector<288x4xf32>
    %122 = arith.addf %117, %121 : vector<288x4xf32>
    %c37_119 = arith.constant 37 : index
    %c0_120 = arith.constant 0 : index
    %123 = vector.load %arg7[%c37_119, %c0_120] : memref<328x4xbf16, #tpu.memory_space<vmem>>, vector<288x4xbf16>
    %c2_121 = arith.constant 2 : index
    %c1_122 = arith.constant 1 : index
    %c0_123 = arith.constant 0 : index
    %c0_124 = arith.constant 0 : index
    %124 = vector.load %arg2[%c2_121, %c1_122, %c0_123, %c0_124] : memref<3x3x4x4xbf16, #tpu.memory_space<vmem>>, vector<1x1x4x4xbf16>
    %125 = vector.shape_cast %124 : vector<1x1x4x4xbf16> to vector<4x4xbf16>
    %cst_125 = arith.constant dense<0.000000e+00> : vector<288x4xf32>
    %126 = tpu.matmul %123, %125, %cst_125 {dimension_numbers = #tpu.dot_dimension_numbers<[1], [0], [0], [1], [0, 0, 1, 1], [], []>} : vector<288x4xbf16>, vector<4x4xbf16>, vector<288x4xf32> -> vector<288x4xf32>
    %127 = arith.addf %122, %126 : vector<288x4xf32>
    %c38 = arith.constant 38 : index
    %c0_126 = arith.constant 0 : index
    %128 = vector.load %arg7[%c38, %c0_126] : memref<328x4xbf16, #tpu.memory_space<vmem>>, vector<288x4xbf16>
    %c2_127 = arith.constant 2 : index
    %c2_128 = arith.constant 2 : index
    %c0_129 = arith.constant 0 : index
    %c0_130 = arith.constant 0 : index
    %129 = vector.load %arg2[%c2_127, %c2_128, %c0_129, %c0_130] : memref<3x3x4x4xbf16, #tpu.memory_space<vmem>>, vector<1x1x4x4xbf16>
    %130 = vector.shape_cast %129 : vector<1x1x4x4xbf16> to vector<4x4xbf16>
    %cst_131 = arith.constant dense<0.000000e+00> : vector<288x4xf32>
    %131 = tpu.matmul %128, %130, %cst_131 {dimension_numbers = #tpu.dot_dimension_numbers<[1], [0], [0], [1], [0, 0, 1, 1], [], []>} : vector<288x4xbf16>, vector<4x4xbf16>, vector<288x4xf32> -> vector<288x4xf32>
    %132 = arith.addf %127, %131 : vector<288x4xf32>
    %c0_132 = arith.constant 0 : index
    %c0_133 = arith.constant 0 : index
    %133 = vector.load %arg4[%c0_132, %c0_133] : memref<1x4xf32, #tpu.memory_space<vmem>>, vector<1x4xf32>
    %134 = vector.shape_cast %133 : vector<1x4xf32> to vector<4xf32>
    %135 = vector.shape_cast %134 : vector<4xf32> to vector<1x4xf32>
    %136 = vector.broadcast %135 : vector<1x4xf32> to vector<288x4xf32>
    %137 = arith.addf %132, %136 : vector<288x4xf32>
    %cst_134 = arith.constant 0.000000e+00 : f32
    %138 = vector.broadcast %cst_134 : f32 to vector<288x4xf32>
    %139 = arith.maximumf %137, %138 : vector<288x4xf32>
    %cst_135 = arith.constant 0.000000e+00 : f32
    %140 = vector.shape_cast %86 : vector<288x1xi1> to vector<288x1xi1>
    %141 = vector.broadcast %140 : vector<288x1xi1> to vector<288x4xi1>
    %142 = vector.broadcast %cst_135 : f32 to vector<288x4xf32>
    %143 = arith.select %141, %139, %142 : vector<288x4xi1>, vector<288x4xf32>
    %144 = arith.truncf %143 : vector<288x4xf32> to vector<288x4xbf16>
    %c19_136 = arith.constant 19 : index
    %c0_137 = arith.constant 0 : index
    %145 = vector.load %arg8[%c19_136, %c0_137] : memref<328x4xbf16, #tpu.memory_space<vmem>>, vector<288x4xbf16>
    tpu.vector_store %arg8[%c19_136, %c0_137], %144 {strides = array<i32>} : memref<328x4xbf16, #tpu.memory_space<vmem>>, vector<288x4xbf16>,
    %cst_138 = arith.constant 0.000000e+00 : f32
    %146 = vector.broadcast %cst_138 : f32 to vector<288x4xf32>
    %c0_139 = arith.constant 0 : index
    %c0_140 = arith.constant 0 : index
    %147 = vector.load %arg8[%c0_139, %c0_140] : memref<328x4xbf16, #tpu.memory_space<vmem>>, vector<288x4xbf16>
    %c0_141 = arith.constant 0 : index
    %c0_142 = arith.constant 0 : index
    %c0_143 = arith.constant 0 : index
    %c0_144 = arith.constant 0 : index
    %148 = vector.load %arg3[%c0_141, %c0_142, %c0_143, %c0_144] : memref<3x3x4x4xbf16, #tpu.memory_space<vmem>>, vector<1x1x4x4xbf16>
    %149 = vector.shape_cast %148 : vector<1x1x4x4xbf16> to vector<4x4xbf16>
    %cst_145 = arith.constant dense<0.000000e+00> : vector<288x4xf32>
    %150 = tpu.matmul %147, %149, %cst_145 {dimension_numbers = #tpu.dot_dimension_numbers<[1], [0], [0], [1], [0, 0, 1, 1], [], []>} : vector<288x4xbf16>, vector<4x4xbf16>, vector<288x4xf32> -> vector<288x4xf32>
    %151 = arith.addf %146, %150 : vector<288x4xf32>
    %c1_146 = arith.constant 1 : index
    %c0_147 = arith.constant 0 : index
    %152 = vector.load %arg8[%c1_146, %c0_147] : memref<328x4xbf16, #tpu.memory_space<vmem>>, vector<288x4xbf16>
    %c0_148 = arith.constant 0 : index
    %c1_149 = arith.constant 1 : index
    %c0_150 = arith.constant 0 : index
    %c0_151 = arith.constant 0 : index
    %153 = vector.load %arg3[%c0_148, %c1_149, %c0_150, %c0_151] : memref<3x3x4x4xbf16, #tpu.memory_space<vmem>>, vector<1x1x4x4xbf16>
    %154 = vector.shape_cast %153 : vector<1x1x4x4xbf16> to vector<4x4xbf16>
    %cst_152 = arith.constant dense<0.000000e+00> : vector<288x4xf32>
    %155 = tpu.matmul %152, %154, %cst_152 {dimension_numbers = #tpu.dot_dimension_numbers<[1], [0], [0], [1], [0, 0, 1, 1], [], []>} : vector<288x4xbf16>, vector<4x4xbf16>, vector<288x4xf32> -> vector<288x4xf32>
    %156 = arith.addf %151, %155 : vector<288x4xf32>
    %c2_153 = arith.constant 2 : index
    %c0_154 = arith.constant 0 : index
    %157 = vector.load %arg8[%c2_153, %c0_154] : memref<328x4xbf16, #tpu.memory_space<vmem>>, vector<288x4xbf16>
    %c0_155 = arith.constant 0 : index
    %c2_156 = arith.constant 2 : index
    %c0_157 = arith.constant 0 : index
    %c0_158 = arith.constant 0 : index
    %158 = vector.load %arg3[%c0_155, %c2_156, %c0_157, %c0_158] : memref<3x3x4x4xbf16, #tpu.memory_space<vmem>>, vector<1x1x4x4xbf16>
    %159 = vector.shape_cast %158 : vector<1x1x4x4xbf16> to vector<4x4xbf16>
    %cst_159 = arith.constant dense<0.000000e+00> : vector<288x4xf32>
    %160 = tpu.matmul %157, %159, %cst_159 {dimension_numbers = #tpu.dot_dimension_numbers<[1], [0], [0], [1], [0, 0, 1, 1], [], []>} : vector<288x4xbf16>, vector<4x4xbf16>, vector<288x4xf32> -> vector<288x4xf32>
    %161 = arith.addf %156, %160 : vector<288x4xf32>
    %c18_160 = arith.constant 18 : index
    %c0_161 = arith.constant 0 : index
    %162 = vector.load %arg8[%c18_160, %c0_161] : memref<328x4xbf16, #tpu.memory_space<vmem>>, vector<288x4xbf16>
    %c1_162 = arith.constant 1 : index
    %c0_163 = arith.constant 0 : index
    %c0_164 = arith.constant 0 : index
    %c0_165 = arith.constant 0 : index
    %163 = vector.load %arg3[%c1_162, %c0_163, %c0_164, %c0_165] : memref<3x3x4x4xbf16, #tpu.memory_space<vmem>>, vector<1x1x4x4xbf16>
    %164 = vector.shape_cast %163 : vector<1x1x4x4xbf16> to vector<4x4xbf16>
    %cst_166 = arith.constant dense<0.000000e+00> : vector<288x4xf32>
    %165 = tpu.matmul %162, %164, %cst_166 {dimension_numbers = #tpu.dot_dimension_numbers<[1], [0], [0], [1], [0, 0, 1, 1], [], []>} : vector<288x4xbf16>, vector<4x4xbf16>, vector<288x4xf32> -> vector<288x4xf32>
    %166 = arith.addf %161, %165 : vector<288x4xf32>
    %c19_167 = arith.constant 19 : index
    %c0_168 = arith.constant 0 : index
    %167 = vector.load %arg8[%c19_167, %c0_168] : memref<328x4xbf16, #tpu.memory_space<vmem>>, vector<288x4xbf16>
    %c1_169 = arith.constant 1 : index
    %c1_170 = arith.constant 1 : index
    %c0_171 = arith.constant 0 : index
    %c0_172 = arith.constant 0 : index
    %168 = vector.load %arg3[%c1_169, %c1_170, %c0_171, %c0_172] : memref<3x3x4x4xbf16, #tpu.memory_space<vmem>>, vector<1x1x4x4xbf16>
    %169 = vector.shape_cast %168 : vector<1x1x4x4xbf16> to vector<4x4xbf16>
    %cst_173 = arith.constant dense<0.000000e+00> : vector<288x4xf32>
    %170 = tpu.matmul %167, %169, %cst_173 {dimension_numbers = #tpu.dot_dimension_numbers<[1], [0], [0], [1], [0, 0, 1, 1], [], []>} : vector<288x4xbf16>, vector<4x4xbf16>, vector<288x4xf32> -> vector<288x4xf32>
    %171 = arith.addf %166, %170 : vector<288x4xf32>
    %c20_174 = arith.constant 20 : index
    %c0_175 = arith.constant 0 : index
    %172 = vector.load %arg8[%c20_174, %c0_175] : memref<328x4xbf16, #tpu.memory_space<vmem>>, vector<288x4xbf16>
    %c1_176 = arith.constant 1 : index
    %c2_177 = arith.constant 2 : index
    %c0_178 = arith.constant 0 : index
    %c0_179 = arith.constant 0 : index
    %173 = vector.load %arg3[%c1_176, %c2_177, %c0_178, %c0_179] : memref<3x3x4x4xbf16, #tpu.memory_space<vmem>>, vector<1x1x4x4xbf16>
    %174 = vector.shape_cast %173 : vector<1x1x4x4xbf16> to vector<4x4xbf16>
    %cst_180 = arith.constant dense<0.000000e+00> : vector<288x4xf32>
    %175 = tpu.matmul %172, %174, %cst_180 {dimension_numbers = #tpu.dot_dimension_numbers<[1], [0], [0], [1], [0, 0, 1, 1], [], []>} : vector<288x4xbf16>, vector<4x4xbf16>, vector<288x4xf32> -> vector<288x4xf32>
    %176 = arith.addf %171, %175 : vector<288x4xf32>
    %c36_181 = arith.constant 36 : index
    %c0_182 = arith.constant 0 : index
    %177 = vector.load %arg8[%c36_181, %c0_182] : memref<328x4xbf16, #tpu.memory_space<vmem>>, vector<288x4xbf16>
    %c2_183 = arith.constant 2 : index
    %c0_184 = arith.constant 0 : index
    %c0_185 = arith.constant 0 : index
    %c0_186 = arith.constant 0 : index
    %178 = vector.load %arg3[%c2_183, %c0_184, %c0_185, %c0_186] : memref<3x3x4x4xbf16, #tpu.memory_space<vmem>>, vector<1x1x4x4xbf16>
    %179 = vector.shape_cast %178 : vector<1x1x4x4xbf16> to vector<4x4xbf16>
    %cst_187 = arith.constant dense<0.000000e+00> : vector<288x4xf32>
    %180 = tpu.matmul %177, %179, %cst_187 {dimension_numbers = #tpu.dot_dimension_numbers<[1], [0], [0], [1], [0, 0, 1, 1], [], []>} : vector<288x4xbf16>, vector<4x4xbf16>, vector<288x4xf32> -> vector<288x4xf32>
    %181 = arith.addf %176, %180 : vector<288x4xf32>
    %c37_188 = arith.constant 37 : index
    %c0_189 = arith.constant 0 : index
    %182 = vector.load %arg8[%c37_188, %c0_189] : memref<328x4xbf16, #tpu.memory_space<vmem>>, vector<288x4xbf16>
    %c2_190 = arith.constant 2 : index
    %c1_191 = arith.constant 1 : index
    %c0_192 = arith.constant 0 : index
    %c0_193 = arith.constant 0 : index
    %183 = vector.load %arg3[%c2_190, %c1_191, %c0_192, %c0_193] : memref<3x3x4x4xbf16, #tpu.memory_space<vmem>>, vector<1x1x4x4xbf16>
    %184 = vector.shape_cast %183 : vector<1x1x4x4xbf16> to vector<4x4xbf16>
    %cst_194 = arith.constant dense<0.000000e+00> : vector<288x4xf32>
    %185 = tpu.matmul %182, %184, %cst_194 {dimension_numbers = #tpu.dot_dimension_numbers<[1], [0], [0], [1], [0, 0, 1, 1], [], []>} : vector<288x4xbf16>, vector<4x4xbf16>, vector<288x4xf32> -> vector<288x4xf32>
    %186 = arith.addf %181, %185 : vector<288x4xf32>
    %c38_195 = arith.constant 38 : index
    %c0_196 = arith.constant 0 : index
    %187 = vector.load %arg8[%c38_195, %c0_196] : memref<328x4xbf16, #tpu.memory_space<vmem>>, vector<288x4xbf16>
    %c2_197 = arith.constant 2 : index
    %c2_198 = arith.constant 2 : index
    %c0_199 = arith.constant 0 : index
    %c0_200 = arith.constant 0 : index
    %188 = vector.load %arg3[%c2_197, %c2_198, %c0_199, %c0_200] : memref<3x3x4x4xbf16, #tpu.memory_space<vmem>>, vector<1x1x4x4xbf16>
    %189 = vector.shape_cast %188 : vector<1x1x4x4xbf16> to vector<4x4xbf16>
    %cst_201 = arith.constant dense<0.000000e+00> : vector<288x4xf32>
    %190 = tpu.matmul %187, %189, %cst_201 {dimension_numbers = #tpu.dot_dimension_numbers<[1], [0], [0], [1], [0, 0, 1, 1], [], []>} : vector<288x4xbf16>, vector<4x4xbf16>, vector<288x4xf32> -> vector<288x4xf32>
    %191 = arith.addf %186, %190 : vector<288x4xf32>
    %c0_202 = arith.constant 0 : index
    %c0_203 = arith.constant 0 : index
    %192 = vector.load %arg5[%c0_202, %c0_203] : memref<1x4xf32, #tpu.memory_space<vmem>>, vector<1x4xf32>
    %193 = vector.shape_cast %192 : vector<1x4xf32> to vector<4xf32>
    %194 = vector.shape_cast %193 : vector<4xf32> to vector<1x4xf32>
    %195 = vector.broadcast %194 : vector<1x4xf32> to vector<288x4xf32>
    %196 = arith.addf %191, %195 : vector<288x4xf32>
    %197 = vector.extract_strided_slice %196 {offsets = [0, 0], sizes = [16, 4], strides = [1, 1]} : vector<288x4xf32> to vector<16x4xf32>
    %c0_204 = arith.constant 0 : index
    %c0_205 = arith.constant 0 : index
    %c0_206 = arith.constant 0 : index
    %c0_207 = arith.constant 0 : index
    %198 = vector.load %arg1[%c0_204, %c0_205, %c0_206, %c0_207] : memref<1x16x16x4xf32, #tpu.memory_space<vmem>>, vector<1x1x16x4xf32>
    %199 = vector.shape_cast %198 : vector<1x1x16x4xf32> to vector<16x4xf32>
    %200 = arith.addf %197, %199 : vector<16x4xf32>
    %cst_208 = arith.constant 0.000000e+00 : f32
    %201 = vector.broadcast %cst_208 : f32 to vector<16x4xf32>
    %202 = arith.maximumf %200, %201 : vector<16x4xf32>
    %c0_209 = arith.constant 0 : index
    %c0_210 = arith.constant 0 : index
    %c0_211 = arith.constant 0 : index
    %c0_212 = arith.constant 0 : index
    %203 = vector.load %arg6[%c0_209, %c0_210, %c0_211, %c0_212] : memref<1x16x16x4xf32, #tpu.memory_space<vmem>>, vector<1x1x16x4xf32>
    %204 = vector.shape_cast %203 : vector<1x1x16x4xf32> to vector<16x4xf32>
    %205 = vector.shape_cast %202 : vector<16x4xf32> to vector<1x1x16x4xf32>
    tpu.vector_store %arg6[%c0_209, %c0_210, %c0_211, %c0_212], %205 {strides = array<i32>} : memref<1x16x16x4xf32, #tpu.memory_space<vmem>>, vector<1x1x16x4xf32>,
    %206 = vector.extract_strided_slice %196 {offsets = [18, 0], sizes = [16, 4], strides = [1, 1]} : vector<288x4xf32> to vector<16x4xf32>
    %c0_213 = arith.constant 0 : index
    %c1_214 = arith.constant 1 : index
    %c0_215 = arith.constant 0 : index
    %c0_216 = arith.constant 0 : index
    %207 = vector.load %arg1[%c0_213, %c1_214, %c0_215, %c0_216] : memref<1x16x16x4xf32, #tpu.memory_space<vmem>>, vector<1x1x16x4xf32>
    %208 = vector.shape_cast %207 : vector<1x1x16x4xf32> to vector<16x4xf32>
    %209 = arith.addf %206, %208 : vector<16x4xf32>
    %cst_217 = arith.constant 0.000000e+00 : f32
    %210 = vector.broadcast %cst_217 : f32 to vector<16x4xf32>
    %211 = arith.maximumf %209, %210 : vector<16x4xf32>
    %c0_218 = arith.constant 0 : index
    %c1_219 = arith.constant 1 : index
    %c0_220 = arith.constant 0 : index
    %c0_221 = arith.constant 0 : index
    %212 = vector.load %arg6[%c0_218, %c1_219, %c0_220, %c0_221] : memref<1x16x16x4xf32, #tpu.memory_space<vmem>>, vector<1x1x16x4xf32>
    %213 = vector.shape_cast %212 : vector<1x1x16x4xf32> to vector<16x4xf32>
    %214 = vector.shape_cast %211 : vector<16x4xf32> to vector<1x1x16x4xf32>
    tpu.vector_store %arg6[%c0_218, %c1_219, %c0_220, %c0_221], %214 {strides = array<i32>} : memref<1x16x16x4xf32, #tpu.memory_space<vmem>>, vector<1x1x16x4xf32>,
    %215 = vector.extract_strided_slice %196 {offsets = [36, 0], sizes = [16, 4], strides = [1, 1]} : vector<288x4xf32> to vector<16x4xf32>
    %c0_222 = arith.constant 0 : index
    %c2_223 = arith.constant 2 : index
    %c0_224 = arith.constant 0 : index
    %c0_225 = arith.constant 0 : index
    %216 = vector.load %arg1[%c0_222, %c2_223, %c0_224, %c0_225] : memref<1x16x16x4xf32, #tpu.memory_space<vmem>>, vector<1x1x16x4xf32>
    %217 = vector.shape_cast %216 : vector<1x1x16x4xf32> to vector<16x4xf32>
    %218 = arith.addf %215, %217 : vector<16x4xf32>
    %cst_226 = arith.constant 0.000000e+00 : f32
    %219 = vector.broadcast %cst_226 : f32 to vector<16x4xf32>
    %220 = arith.maximumf %218, %219 : vector<16x4xf32>
    %c0_227 = arith.constant 0 : index
    %c2_228 = arith.constant 2 : index
    %c0_229 = arith.constant 0 : index
    %c0_230 = arith.constant 0 : index
    %221 = vector.load %arg6[%c0_227, %c2_228, %c0_229, %c0_230] : memref<1x16x16x4xf32, #tpu.memory_space<vmem>>, vector<1x1x16x4xf32>
    %222 = vector.shape_cast %221 : vector<1x1x16x4xf32> to vector<16x4xf32>
    %223 = vector.shape_cast %220 : vector<16x4xf32> to vector<1x1x16x4xf32>
    tpu.vector_store %arg6[%c0_227, %c2_228, %c0_229, %c0_230], %223 {strides = array<i32>} : memref<1x16x16x4xf32, #tpu.memory_space<vmem>>, vector<1x1x16x4xf32>,
    %224 = vector.extract_strided_slice %196 {offsets = [54, 0], sizes = [16, 4], strides = [1, 1]} : vector<288x4xf32> to vector<16x4xf32>
    %c0_231 = arith.constant 0 : index
    %c3_232 = arith.constant 3 : index
    %c0_233 = arith.constant 0 : index
    %c0_234 = arith.constant 0 : index
    %225 = vector.load %arg1[%c0_231, %c3_232, %c0_233, %c0_234] : memref<1x16x16x4xf32, #tpu.memory_space<vmem>>, vector<1x1x16x4xf32>
    %226 = vector.shape_cast %225 : vector<1x1x16x4xf32> to vector<16x4xf32>
    %227 = arith.addf %224, %226 : vector<16x4xf32>
    %cst_235 = arith.constant 0.000000e+00 : f32
    %228 = vector.broadcast %cst_235 : f32 to vector<16x4xf32>
    %229 = arith.maximumf %227, %228 : vector<16x4xf32>
    %c0_236 = arith.constant 0 : index
    %c3_237 = arith.constant 3 : index
    %c0_238 = arith.constant 0 : index
    %c0_239 = arith.constant 0 : index
    %230 = vector.load %arg6[%c0_236, %c3_237, %c0_238, %c0_239] : memref<1x16x16x4xf32, #tpu.memory_space<vmem>>, vector<1x1x16x4xf32>
    %231 = vector.shape_cast %230 : vector<1x1x16x4xf32> to vector<16x4xf32>
    %232 = vector.shape_cast %229 : vector<16x4xf32> to vector<1x1x16x4xf32>
    tpu.vector_store %arg6[%c0_236, %c3_237, %c0_238, %c0_239], %232 {strides = array<i32>} : memref<1x16x16x4xf32, #tpu.memory_space<vmem>>, vector<1x1x16x4xf32>,
    %233 = vector.extract_strided_slice %196 {offsets = [72, 0], sizes = [16, 4], strides = [1, 1]} : vector<288x4xf32> to vector<16x4xf32>
    %c0_240 = arith.constant 0 : index
    %c4_241 = arith.constant 4 : index
    %c0_242 = arith.constant 0 : index
    %c0_243 = arith.constant 0 : index
    %234 = vector.load %arg1[%c0_240, %c4_241, %c0_242, %c0_243] : memref<1x16x16x4xf32, #tpu.memory_space<vmem>>, vector<1x1x16x4xf32>
    %235 = vector.shape_cast %234 : vector<1x1x16x4xf32> to vector<16x4xf32>
    %236 = arith.addf %233, %235 : vector<16x4xf32>
    %cst_244 = arith.constant 0.000000e+00 : f32
    %237 = vector.broadcast %cst_244 : f32 to vector<16x4xf32>
    %238 = arith.maximumf %236, %237 : vector<16x4xf32>
    %c0_245 = arith.constant 0 : index
    %c4_246 = arith.constant 4 : index
    %c0_247 = arith.constant 0 : index
    %c0_248 = arith.constant 0 : index
    %239 = vector.load %arg6[%c0_245, %c4_246, %c0_247, %c0_248] : memref<1x16x16x4xf32, #tpu.memory_space<vmem>>, vector<1x1x16x4xf32>
    %240 = vector.shape_cast %239 : vector<1x1x16x4xf32> to vector<16x4xf32>
    %241 = vector.shape_cast %238 : vector<16x4xf32> to vector<1x1x16x4xf32>
    tpu.vector_store %arg6[%c0_245, %c4_246, %c0_247, %c0_248], %241 {strides = array<i32>} : memref<1x16x16x4xf32, #tpu.memory_space<vmem>>, vector<1x1x16x4xf32>,
    %242 = vector.extract_strided_slice %196 {offsets = [90, 0], sizes = [16, 4], strides = [1, 1]} : vector<288x4xf32> to vector<16x4xf32>
    %c0_249 = arith.constant 0 : index
    %c5_250 = arith.constant 5 : index
    %c0_251 = arith.constant 0 : index
    %c0_252 = arith.constant 0 : index
    %243 = vector.load %arg1[%c0_249, %c5_250, %c0_251, %c0_252] : memref<1x16x16x4xf32, #tpu.memory_space<vmem>>, vector<1x1x16x4xf32>
    %244 = vector.shape_cast %243 : vector<1x1x16x4xf32> to vector<16x4xf32>
    %245 = arith.addf %242, %244 : vector<16x4xf32>
    %cst_253 = arith.constant 0.000000e+00 : f32
    %246 = vector.broadcast %cst_253 : f32 to vector<16x4xf32>
    %247 = arith.maximumf %245, %246 : vector<16x4xf32>
    %c0_254 = arith.constant 0 : index
    %c5_255 = arith.constant 5 : index
    %c0_256 = arith.constant 0 : index
    %c0_257 = arith.constant 0 : index
    %248 = vector.load %arg6[%c0_254, %c5_255, %c0_256, %c0_257] : memref<1x16x16x4xf32, #tpu.memory_space<vmem>>, vector<1x1x16x4xf32>
    %249 = vector.shape_cast %248 : vector<1x1x16x4xf32> to vector<16x4xf32>
    %250 = vector.shape_cast %247 : vector<16x4xf32> to vector<1x1x16x4xf32>
    tpu.vector_store %arg6[%c0_254, %c5_255, %c0_256, %c0_257], %250 {strides = array<i32>} : memref<1x16x16x4xf32, #tpu.memory_space<vmem>>, vector<1x1x16x4xf32>,
    %251 = vector.extract_strided_slice %196 {offsets = [108, 0], sizes = [16, 4], strides = [1, 1]} : vector<288x4xf32> to vector<16x4xf32>
    %c0_258 = arith.constant 0 : index
    %c6_259 = arith.constant 6 : index
    %c0_260 = arith.constant 0 : index
    %c0_261 = arith.constant 0 : index
    %252 = vector.load %arg1[%c0_258, %c6_259, %c0_260, %c0_261] : memref<1x16x16x4xf32, #tpu.memory_space<vmem>>, vector<1x1x16x4xf32>
    %253 = vector.shape_cast %252 : vector<1x1x16x4xf32> to vector<16x4xf32>
    %254 = arith.addf %251, %253 : vector<16x4xf32>
    %cst_262 = arith.constant 0.000000e+00 : f32
    %255 = vector.broadcast %cst_262 : f32 to vector<16x4xf32>
    %256 = arith.maximumf %254, %255 : vector<16x4xf32>
    %c0_263 = arith.constant 0 : index
    %c6_264 = arith.constant 6 : index
    %c0_265 = arith.constant 0 : index
    %c0_266 = arith.constant 0 : index
    %257 = vector.load %arg6[%c0_263, %c6_264, %c0_265, %c0_266] : memref<1x16x16x4xf32, #tpu.memory_space<vmem>>, vector<1x1x16x4xf32>
    %258 = vector.shape_cast %257 : vector<1x1x16x4xf32> to vector<16x4xf32>
    %259 = vector.shape_cast %256 : vector<16x4xf32> to vector<1x1x16x4xf32>
    tpu.vector_store %arg6[%c0_263, %c6_264, %c0_265, %c0_266], %259 {strides = array<i32>} : memref<1x16x16x4xf32, #tpu.memory_space<vmem>>, vector<1x1x16x4xf32>,
    %260 = vector.extract_strided_slice %196 {offsets = [126, 0], sizes = [16, 4], strides = [1, 1]} : vector<288x4xf32> to vector<16x4xf32>
    %c0_267 = arith.constant 0 : index
    %c7_268 = arith.constant 7 : index
    %c0_269 = arith.constant 0 : index
    %c0_270 = arith.constant 0 : index
    %261 = vector.load %arg1[%c0_267, %c7_268, %c0_269, %c0_270] : memref<1x16x16x4xf32, #tpu.memory_space<vmem>>, vector<1x1x16x4xf32>
    %262 = vector.shape_cast %261 : vector<1x1x16x4xf32> to vector<16x4xf32>
    %263 = arith.addf %260, %262 : vector<16x4xf32>
    %cst_271 = arith.constant 0.000000e+00 : f32
    %264 = vector.broadcast %cst_271 : f32 to vector<16x4xf32>
    %265 = arith.maximumf %263, %264 : vector<16x4xf32>
    %c0_272 = arith.constant 0 : index
    %c7_273 = arith.constant 7 : index
    %c0_274 = arith.constant 0 : index
    %c0_275 = arith.constant 0 : index
    %266 = vector.load %arg6[%c0_272, %c7_273, %c0_274, %c0_275] : memref<1x16x16x4xf32, #tpu.memory_space<vmem>>, vector<1x1x16x4xf32>
    %267 = vector.shape_cast %266 : vector<1x1x16x4xf32> to vector<16x4xf32>
    %268 = vector.shape_cast %265 : vector<16x4xf32> to vector<1x1x16x4xf32>
    tpu.vector_store %arg6[%c0_272, %c7_273, %c0_274, %c0_275], %268 {strides = array<i32>} : memref<1x16x16x4xf32, #tpu.memory_space<vmem>>, vector<1x1x16x4xf32>,
    %269 = vector.extract_strided_slice %196 {offsets = [144, 0], sizes = [16, 4], strides = [1, 1]} : vector<288x4xf32> to vector<16x4xf32>
    %c0_276 = arith.constant 0 : index
    %c8_277 = arith.constant 8 : index
    %c0_278 = arith.constant 0 : index
    %c0_279 = arith.constant 0 : index
    %270 = vector.load %arg1[%c0_276, %c8_277, %c0_278, %c0_279] : memref<1x16x16x4xf32, #tpu.memory_space<vmem>>, vector<1x1x16x4xf32>
    %271 = vector.shape_cast %270 : vector<1x1x16x4xf32> to vector<16x4xf32>
    %272 = arith.addf %269, %271 : vector<16x4xf32>
    %cst_280 = arith.constant 0.000000e+00 : f32
    %273 = vector.broadcast %cst_280 : f32 to vector<16x4xf32>
    %274 = arith.maximumf %272, %273 : vector<16x4xf32>
    %c0_281 = arith.constant 0 : index
    %c8_282 = arith.constant 8 : index
    %c0_283 = arith.constant 0 : index
    %c0_284 = arith.constant 0 : index
    %275 = vector.load %arg6[%c0_281, %c8_282, %c0_283, %c0_284] : memref<1x16x16x4xf32, #tpu.memory_space<vmem>>, vector<1x1x16x4xf32>
    %276 = vector.shape_cast %275 : vector<1x1x16x4xf32> to vector<16x4xf32>
    %277 = vector.shape_cast %274 : vector<16x4xf32> to vector<1x1x16x4xf32>
    tpu.vector_store %arg6[%c0_281, %c8_282, %c0_283, %c0_284], %277 {strides = array<i32>} : memref<1x16x16x4xf32, #tpu.memory_space<vmem>>, vector<1x1x16x4xf32>,
    %278 = vector.extract_strided_slice %196 {offsets = [162, 0], sizes = [16, 4], strides = [1, 1]} : vector<288x4xf32> to vector<16x4xf32>
    %c0_285 = arith.constant 0 : index
    %c9_286 = arith.constant 9 : index
    %c0_287 = arith.constant 0 : index
    %c0_288 = arith.constant 0 : index
    %279 = vector.load %arg1[%c0_285, %c9_286, %c0_287, %c0_288] : memref<1x16x16x4xf32, #tpu.memory_space<vmem>>, vector<1x1x16x4xf32>
    %280 = vector.shape_cast %279 : vector<1x1x16x4xf32> to vector<16x4xf32>
    %281 = arith.addf %278, %280 : vector<16x4xf32>
    %cst_289 = arith.constant 0.000000e+00 : f32
    %282 = vector.broadcast %cst_289 : f32 to vector<16x4xf32>
    %283 = arith.maximumf %281, %282 : vector<16x4xf32>
    %c0_290 = arith.constant 0 : index
    %c9_291 = arith.constant 9 : index
    %c0_292 = arith.constant 0 : index
    %c0_293 = arith.constant 0 : index
    %284 = vector.load %arg6[%c0_290, %c9_291, %c0_292, %c0_293] : memref<1x16x16x4xf32, #tpu.memory_space<vmem>>, vector<1x1x16x4xf32>
    %285 = vector.shape_cast %284 : vector<1x1x16x4xf32> to vector<16x4xf32>
    %286 = vector.shape_cast %283 : vector<16x4xf32> to vector<1x1x16x4xf32>
    tpu.vector_store %arg6[%c0_290, %c9_291, %c0_292, %c0_293], %286 {strides = array<i32>} : memref<1x16x16x4xf32, #tpu.memory_space<vmem>>, vector<1x1x16x4xf32>,
    %287 = vector.extract_strided_slice %196 {offsets = [180, 0], sizes = [16, 4], strides = [1, 1]} : vector<288x4xf32> to vector<16x4xf32>
    %c0_294 = arith.constant 0 : index
    %c10_295 = arith.constant 10 : index
    %c0_296 = arith.constant 0 : index
    %c0_297 = arith.constant 0 : index
    %288 = vector.load %arg1[%c0_294, %c10_295, %c0_296, %c0_297] : memref<1x16x16x4xf32, #tpu.memory_space<vmem>>, vector<1x1x16x4xf32>
    %289 = vector.shape_cast %288 : vector<1x1x16x4xf32> to vector<16x4xf32>
    %290 = arith.addf %287, %289 : vector<16x4xf32>
    %cst_298 = arith.constant 0.000000e+00 : f32
    %291 = vector.broadcast %cst_298 : f32 to vector<16x4xf32>
    %292 = arith.maximumf %290, %291 : vector<16x4xf32>
    %c0_299 = arith.constant 0 : index
    %c10_300 = arith.constant 10 : index
    %c0_301 = arith.constant 0 : index
    %c0_302 = arith.constant 0 : index
    %293 = vector.load %arg6[%c0_299, %c10_300, %c0_301, %c0_302] : memref<1x16x16x4xf32, #tpu.memory_space<vmem>>, vector<1x1x16x4xf32>
    %294 = vector.shape_cast %293 : vector<1x1x16x4xf32> to vector<16x4xf32>
    %295 = vector.shape_cast %292 : vector<16x4xf32> to vector<1x1x16x4xf32>
    tpu.vector_store %arg6[%c0_299, %c10_300, %c0_301, %c0_302], %295 {strides = array<i32>} : memref<1x16x16x4xf32, #tpu.memory_space<vmem>>, vector<1x1x16x4xf32>,
    %296 = vector.extract_strided_slice %196 {offsets = [198, 0], sizes = [16, 4], strides = [1, 1]} : vector<288x4xf32> to vector<16x4xf32>
    %c0_303 = arith.constant 0 : index
    %c11_304 = arith.constant 11 : index
    %c0_305 = arith.constant 0 : index
    %c0_306 = arith.constant 0 : index
    %297 = vector.load %arg1[%c0_303, %c11_304, %c0_305, %c0_306] : memref<1x16x16x4xf32, #tpu.memory_space<vmem>>, vector<1x1x16x4xf32>
    %298 = vector.shape_cast %297 : vector<1x1x16x4xf32> to vector<16x4xf32>
    %299 = arith.addf %296, %298 : vector<16x4xf32>
    %cst_307 = arith.constant 0.000000e+00 : f32
    %300 = vector.broadcast %cst_307 : f32 to vector<16x4xf32>
    %301 = arith.maximumf %299, %300 : vector<16x4xf32>
    %c0_308 = arith.constant 0 : index
    %c11_309 = arith.constant 11 : index
    %c0_310 = arith.constant 0 : index
    %c0_311 = arith.constant 0 : index
    %302 = vector.load %arg6[%c0_308, %c11_309, %c0_310, %c0_311] : memref<1x16x16x4xf32, #tpu.memory_space<vmem>>, vector<1x1x16x4xf32>
    %303 = vector.shape_cast %302 : vector<1x1x16x4xf32> to vector<16x4xf32>
    %304 = vector.shape_cast %301 : vector<16x4xf32> to vector<1x1x16x4xf32>
    tpu.vector_store %arg6[%c0_308, %c11_309, %c0_310, %c0_311], %304 {strides = array<i32>} : memref<1x16x16x4xf32, #tpu.memory_space<vmem>>, vector<1x1x16x4xf32>,
    %305 = vector.extract_strided_slice %196 {offsets = [216, 0], sizes = [16, 4], strides = [1, 1]} : vector<288x4xf32> to vector<16x4xf32>
    %c0_312 = arith.constant 0 : index
    %c12_313 = arith.constant 12 : index
    %c0_314 = arith.constant 0 : index
    %c0_315 = arith.constant 0 : index
    %306 = vector.load %arg1[%c0_312, %c12_313, %c0_314, %c0_315] : memref<1x16x16x4xf32, #tpu.memory_space<vmem>>, vector<1x1x16x4xf32>
    %307 = vector.shape_cast %306 : vector<1x1x16x4xf32> to vector<16x4xf32>
    %308 = arith.addf %305, %307 : vector<16x4xf32>
    %cst_316 = arith.constant 0.000000e+00 : f32
    %309 = vector.broadcast %cst_316 : f32 to vector<16x4xf32>
    %310 = arith.maximumf %308, %309 : vector<16x4xf32>
    %c0_317 = arith.constant 0 : index
    %c12_318 = arith.constant 12 : index
    %c0_319 = arith.constant 0 : index
    %c0_320 = arith.constant 0 : index
    %311 = vector.load %arg6[%c0_317, %c12_318, %c0_319, %c0_320] : memref<1x16x16x4xf32, #tpu.memory_space<vmem>>, vector<1x1x16x4xf32>
    %312 = vector.shape_cast %311 : vector<1x1x16x4xf32> to vector<16x4xf32>
    %313 = vector.shape_cast %310 : vector<16x4xf32> to vector<1x1x16x4xf32>
    tpu.vector_store %arg6[%c0_317, %c12_318, %c0_319, %c0_320], %313 {strides = array<i32>} : memref<1x16x16x4xf32, #tpu.memory_space<vmem>>, vector<1x1x16x4xf32>,
    %314 = vector.extract_strided_slice %196 {offsets = [234, 0], sizes = [16, 4], strides = [1, 1]} : vector<288x4xf32> to vector<16x4xf32>
    %c0_321 = arith.constant 0 : index
    %c13_322 = arith.constant 13 : index
    %c0_323 = arith.constant 0 : index
    %c0_324 = arith.constant 0 : index
    %315 = vector.load %arg1[%c0_321, %c13_322, %c0_323, %c0_324] : memref<1x16x16x4xf32, #tpu.memory_space<vmem>>, vector<1x1x16x4xf32>
    %316 = vector.shape_cast %315 : vector<1x1x16x4xf32> to vector<16x4xf32>
    %317 = arith.addf %314, %316 : vector<16x4xf32>
    %cst_325 = arith.constant 0.000000e+00 : f32
    %318 = vector.broadcast %cst_325 : f32 to vector<16x4xf32>
    %319 = arith.maximumf %317, %318 : vector<16x4xf32>
    %c0_326 = arith.constant 0 : index
    %c13_327 = arith.constant 13 : index
    %c0_328 = arith.constant 0 : index
    %c0_329 = arith.constant 0 : index
    %320 = vector.load %arg6[%c0_326, %c13_327, %c0_328, %c0_329] : memref<1x16x16x4xf32, #tpu.memory_space<vmem>>, vector<1x1x16x4xf32>
    %321 = vector.shape_cast %320 : vector<1x1x16x4xf32> to vector<16x4xf32>
    %322 = vector.shape_cast %319 : vector<16x4xf32> to vector<1x1x16x4xf32>
    tpu.vector_store %arg6[%c0_326, %c13_327, %c0_328, %c0_329], %322 {strides = array<i32>} : memref<1x16x16x4xf32, #tpu.memory_space<vmem>>, vector<1x1x16x4xf32>,
    %323 = vector.extract_strided_slice %196 {offsets = [252, 0], sizes = [16, 4], strides = [1, 1]} : vector<288x4xf32> to vector<16x4xf32>
    %c0_330 = arith.constant 0 : index
    %c14_331 = arith.constant 14 : index
    %c0_332 = arith.constant 0 : index
    %c0_333 = arith.constant 0 : index
    %324 = vector.load %arg1[%c0_330, %c14_331, %c0_332, %c0_333] : memref<1x16x16x4xf32, #tpu.memory_space<vmem>>, vector<1x1x16x4xf32>
    %325 = vector.shape_cast %324 : vector<1x1x16x4xf32> to vector<16x4xf32>
    %326 = arith.addf %323, %325 : vector<16x4xf32>
    %cst_334 = arith.constant 0.000000e+00 : f32
    %327 = vector.broadcast %cst_334 : f32 to vector<16x4xf32>
    %328 = arith.maximumf %326, %327 : vector<16x4xf32>
    %c0_335 = arith.constant 0 : index
    %c14_336 = arith.constant 14 : index
    %c0_337 = arith.constant 0 : index
    %c0_338 = arith.constant 0 : index
    %329 = vector.load %arg6[%c0_335, %c14_336, %c0_337, %c0_338] : memref<1x16x16x4xf32, #tpu.memory_space<vmem>>, vector<1x1x16x4xf32>
    %330 = vector.shape_cast %329 : vector<1x1x16x4xf32> to vector<16x4xf32>
    %331 = vector.shape_cast %328 : vector<16x4xf32> to vector<1x1x16x4xf32>
    tpu.vector_store %arg6[%c0_335, %c14_336, %c0_337, %c0_338], %331 {strides = array<i32>} : memref<1x16x16x4xf32, #tpu.memory_space<vmem>>, vector<1x1x16x4xf32>,
    %332 = vector.extract_strided_slice %196 {offsets = [270, 0], sizes = [16, 4], strides = [1, 1]} : vector<288x4xf32> to vector<16x4xf32>
    %c0_339 = arith.constant 0 : index
    %c15_340 = arith.constant 15 : index
    %c0_341 = arith.constant 0 : index
    %c0_342 = arith.constant 0 : index
    %333 = vector.load %arg1[%c0_339, %c15_340, %c0_341, %c0_342] : memref<1x16x16x4xf32, #tpu.memory_space<vmem>>, vector<1x1x16x4xf32>
    %334 = vector.shape_cast %333 : vector<1x1x16x4xf32> to vector<16x4xf32>
    %335 = arith.addf %332, %334 : vector<16x4xf32>
    %cst_343 = arith.constant 0.000000e+00 : f32
    %336 = vector.broadcast %cst_343 : f32 to vector<16x4xf32>
    %337 = arith.maximumf %335, %336 : vector<16x4xf32>
    %c0_344 = arith.constant 0 : index
    %c15_345 = arith.constant 15 : index
    %c0_346 = arith.constant 0 : index
    %c0_347 = arith.constant 0 : index
    %338 = vector.load %arg6[%c0_344, %c15_345, %c0_346, %c0_347] : memref<1x16x16x4xf32, #tpu.memory_space<vmem>>, vector<1x1x16x4xf32>
    %339 = vector.shape_cast %338 : vector<1x1x16x4xf32> to vector<16x4xf32>
    %340 = vector.shape_cast %337 : vector<16x4xf32> to vector<1x1x16x4xf32>
    tpu.vector_store %arg6[%c0_344, %c15_345, %c0_346, %c0_347], %340 {strides = array<i32>} : memref<1x16x16x4xf32, #tpu.memory_space<vmem>>, vector<1x1x16x4xf32>,
    return
  }
  func.func @transform_0(%arg0: i32) -> (i32, i32, i32, i32) {
    %c0_i32 = arith.constant 0 : i32
    %c0_i32_0 = arith.constant 0 : i32
    %c0_i32_1 = arith.constant 0 : i32
    %c0_i32_2 = arith.constant 0 : i32
    return %arg0, %c0_i32, %c0_i32_0, %c0_i32_1 : i32, i32, i32, i32
  }
  func.func @transform_1(%arg0: i32) -> (i32, i32, i32, i32) {
    %c0_i32 = arith.constant 0 : i32
    %c0_i32_0 = arith.constant 0 : i32
    %c0_i32_1 = arith.constant 0 : i32
    %c0_i32_2 = arith.constant 0 : i32
    %c0_i32_3 = arith.constant 0 : i32
    return %c0_i32, %c0_i32_0, %c0_i32_1, %c0_i32_2 : i32, i32, i32, i32
  }
  func.func @transform_2(%arg0: i32) -> (i32, i32, i32, i32) {
    %c0_i32 = arith.constant 0 : i32
    %c0_i32_0 = arith.constant 0 : i32
    %c0_i32_1 = arith.constant 0 : i32
    %c0_i32_2 = arith.constant 0 : i32
    %c0_i32_3 = arith.constant 0 : i32
    return %c0_i32, %c0_i32_0, %c0_i32_1, %c0_i32_2 : i32, i32, i32, i32
  }
  func.func @transform_3(%arg0: i32) -> (i32, i32) {
    %c0_i32 = arith.constant 0 : i32
    %c0_i32_0 = arith.constant 0 : i32
    %c0_i32_1 = arith.constant 0 : i32
    return %c0_i32, %c0_i32_0 : i32, i32
  }
  func.func @transform_4(%arg0: i32) -> (i32, i32) {
    %c0_i32 = arith.constant 0 : i32
    %c0_i32_0 = arith.constant 0 : i32
    %c0_i32_1 = arith.constant 0 : i32
    return %c0_i32, %c0_i32_0 : i32, i32
  }
  func.func @transform_5(%arg0: i32) -> (i32, i32, i32, i32) {
    %c0_i32 = arith.constant 0 : i32
    %c0_i32_0 = arith.constant 0 : i32
    %c0_i32_1 = arith.constant 0 : i32
    %c0_i32_2 = arith.constant 0 : i32
    return %arg0, %c0_i32, %c0_i32_0, %c0_i32_1 : i32, i32, i32, i32
  }
}

</mosaic_0001>

<bundles_post_ra>
// kernel: tpu_custom_call.1
= control target key start
LH: loop header
LB: loop body
LE: loop exit
PB: predicated region body
PF: predicated region fallthrough
CT: control target
= control target key end

     0   :  { %s11600_s18 = smov 0   ;;  %s17126_s0 = inlined_call_operand.vmem [shape: f32[2,16,16,4], index: 0, kind: input, shape index: {}]   ;;  %s17127_s1 = inlined_call_operand.vmem [shape: bf16[3,3,4,4], index: 1, kind: input, shape index: {}]   ;;  %s17128_s2 = inlined_call_operand.vmem [shape: bf16[3,3,4,4], index: 2, kind: input, shape index: {}]   ;;  %s17129_s3 = inlined_call_operand.vmem [shape: f32[1,4], index: 3, kind: input, shape index: {}]   ;;  %s17130_s4 = inlined_call_operand.vmem [shape: f32[1,4], index: 4, kind: input, shape index: {}]   ;;  %s17131_s5 = inlined_call_operand.vmem [shape: f32[2,16,16,4], index: 5, kind: output, shape index: {}]  }
   0x1 LB: > { %s9588_s19 = sadd.s32 4294967295, %s11567_s18   ;;  %p9592_p0 = scmp.ge.s32.totalorder %s11567_s18, 1  ;;  %s11567_s18 = sphi %s11600_s18, %s15_s18  }
   0x2   : > { %p187_p1 = scmp.lt.s32.totalorder %s11567_s18, 3 }
   0x4   : > { %p188_p2 = pnand %p9592_p0, %p187_p1 }
   0x6   : > { %191 = sbr.rel (%p188_p2) target bundleno = 1286 (0x506), region = 40 }
   0xb   : > { %v9659_v0 = vld [vmem:[%s17127_s1 + $0x2] sm:$0x3]  ;;  %vm17132_vm0 = vcmask 1041408   ;;  %v1624_v1 = vld [vmem:[%s17127_s1] sm:$0x3]  ;;  %p215_p3 = scmp.lt.s32.totalorder %s9588_s19, 1 }
   0xc   : > { %11331 = vmatprep.subr.msk.bf16.mxu0 %vm17132_vm0, %v9659_v0  ;;  %v1927_v2 = vsel %vm17132_vm0, %v9659_v0, 0  ;;  %11332 = vmatprep.subr.msk.bf16.mxu1 %vm17132_vm0, %v1624_v1  ;;  %v2143_v3 = vsel %vm17132_vm0, %v1624_v1, 0  ;;  %vm17133_vm1 = vcmask 27648   ;;  %v11621_v4 = vld [vmem:[%s17127_s1 + $0x4] sm:$0x3]  ;;  %v11569_v5 = vmov 0  }
   0xd   : > { %10648 = vmatpush3.bf16.msra.mxu0 %v1927_v2  ;;  %10686 = vmatpush3.bf16.msra.mxu1 %v2143_v3  ;;  %s18469_s19 = smov (!%p215_p3, %s9588_s19), 1  ;;  %227 = vst.msk [vmem:[#allocation2] sm:$0xf] %vm17133_vm1, %v11569_v5  ;;  %228 = vst.msk [vmem:[#allocation2 + $0x4] sm:$0xf] %vm17133_vm1, %v11569_v5  ;;  %vm342_vm4 = vcmask 27649  }
   0xe   : > { %229 = vst.msk [vmem:[#allocation2 + $0x8] sm:$0xf] %vm17133_vm1, %v11569_v5  ;;  %230 = vst.msk [vmem:[#allocation2 + $0xc] sm:$0xf] %vm17133_vm1, %v11569_v5  ;;  %11333 = vmatprep.subr.msk.bf16.mxu0 %vm17132_vm0, %v11621_v4  ;;  %s10235_s26 = sshll.u32 %s18469_s19, 8  ;;  %vm17135_vm6 = vcmask 31744  }
   0xf   : > { %231 = vst.msk [vmem:[#allocation2 + $0x10] sm:$0xf] %vm17133_vm1, %v11569_v5  ;;  %232 = vst.msk [vmem:[#allocation2 + $0x14] sm:$0xf] %vm17133_vm1, %v11569_v5  ;;  %vm317_vm2 = vsmask.f32 1280  ;;  %s11797_s29 = scalar_lea.vmem %s17126_s0, %s10235_s26  ;;  %s16843_s27 = scalar_lea.vmem %s17131_s5, %s10235_s26 }
  0x10   : > { %233 = vst.msk [vmem:[#allocation2 + $0x18] sm:$0xf] %vm17133_vm1, %v11569_v5  ;;  %234 = vst.msk [vmem:[#allocation2 + $0x1c] sm:$0xf] %vm17133_vm1, %v11569_v5  ;;  %vm318_vm3 = vsmask.f32 5392 }
  0x11   : > { %235 = vst.msk [vmem:[#allocation2 + $0x20] sm:$0xf] %vm17133_vm1, %v11569_v5  ;;  %236 = vst.msk [vmem:[#allocation2 + $0x24] sm:$0xf] %vm17133_vm1, %v11569_v5  ;;  %vm343_vm5 = vsmask.f32 7942 }
  0x12   : > { %237 = vst.msk [vmem:[#allocation2 + $0x28] sm:$0xf] %vm17133_vm1, %v11569_v5  ;;  %238 = vst.msk [vmem:[#allocation2 + $0x2c] sm:$0xf] %vm17133_vm1, %v11569_v5  ;;  %vm17134_vm7 = vcmask 25600   ;;  %v309_v6 = vld [vmem:[%s11797_s29] sm:$0xff] }
  0x13   : > { %239 = vst.msk [vmem:[#allocation2 + $0x30] sm:$0xf] %vm17133_vm1, %v11569_v5  ;;  %240 = vst.msk [vmem:[#allocation2 + $0x34] sm:$0xf] %vm17133_vm1, %v11569_v5  ;;  %v310_v7 = vld [vmem:[%s11797_s29 + $0x8] sm:$0xff]  ;;  %v9599_v8 = vld [vmem:[%s11797_s29 + $0x10] sm:$0xff]  ;;  %v10237_v9 = vpack.c.bf16 %v309_v6, %v309_v6 }
  0x14   : > { %241 = vst.msk [vmem:[#allocation2 + $0x38] sm:$0xf] %vm17133_vm1, %v11569_v5  ;;  %242 = vst.msk [vmem:[#allocation2 + $0x3c] sm:$0xf] %vm17133_vm1, %v11569_v5  ;;  %vm364_vm9 = vsmask.f32 6416  ;;  %v10238_v10 = vpack.c.bf16 %v310_v7, %v310_v7  ;;  %v10239_v14 = vpack.c.bf16 %v9599_v8, %v9599_v8 }
  0x15   : > { %243 = vst.msk [vmem:[#allocation2 + $0x40] sm:$0xf] %vm17133_vm1, %v11569_v5  ;;  %244 = vst.msk [vmem:[#allocation2 + $0x44] sm:$0xf] %vm17133_vm1, %v11569_v5  ;;  %vm388_vm10 = vcmask 27650   ;;  %v9600_v11 = vld [vmem:[%s11797_s29 + $0x18] sm:$0xff] }
  0x16   : > { %245 = vst.msk [vmem:[#allocation2 + $0x48] sm:$0xf] %vm17133_vm1, %v11569_v5  ;;  %246 = vst.msk [vmem:[#allocation2 + $0x4c] sm:$0xf] %vm17133_vm1, %v11569_v5  ;;  %vm389_vm11 = vsmask.f32 7946  ;;  %v10240_v15 = vpack.c.bf16 %v9600_v11, %v9600_v11 }
  0x17   : > { %247 = vst.msk [vmem:[#allocation2 + $0x50] sm:$0xf] %vm17133_vm1, %v11569_v5  ;;  %248 = vst.msk [vmem:[#allocation2 + $0x54] sm:$0xf] %vm17133_vm1, %v11569_v5  ;;  %v11805_v12 = vsel %vm17132_vm0, %v11621_v4, 0  ;;  %v9603_v13 = vld [vmem:[%s11797_s29 + $0x20] sm:$0xff] }
  0x18   : > { %249 = vst.msk [vmem:[#allocation2 + $0x58] sm:$0xf] %vm17133_vm1, %v11569_v5  ;;  %250 = vst.msk [vmem:[#allocation2 + $0x5c] sm:$0xf] %vm17133_vm1, %v11569_v5  ;;  %v9604_v16 = vld [vmem:[%s11797_s29 + $0x28] sm:$0xff]  ;;  %v11809_v17 = vpack.c.bf16 %v9603_v13, %v9603_v13  ;;  %vm434_vm13 = vcmask 27651  }
  0x19   : > { %251 = vst.msk [vmem:[#allocation2 + $0x60] sm:$0xf] %vm17133_vm1, %v11569_v5  ;;  %252 = vst.msk [vmem:[#allocation2 + $0x64] sm:$0xf] %vm17133_vm1, %v11569_v5  ;;  %v9607_v18 = vld [vmem:[%s11797_s29 + $0x30] sm:$0xff]  ;;  %v321_v19 = vshrl.u32 %v10237_v9, 16  ;;  %v11812_v25 = vpack.c.bf16 %v9604_v16, %v9604_v16 }
  0x1a   : > { %253 = vst.msk [vmem:[#allocation2 + $0x68] sm:$0xf] %vm17133_vm1, %v11569_v5  ;;  %254 = vst.msk [vmem:[#allocation2 + $0x6c] sm:$0xf] %vm17133_vm1, %v11569_v5  ;;  %v324_v20 = vshll.u32 %v10237_v9, 16  ;;  %v330_v21 = vshrl.u32 %v10238_v10, 16  ;;  %v11814_v26 = vpack.c.bf16 %v9607_v18, %v9607_v18 }
  0x1b   : > { %255 = vst.msk [vmem:[#allocation2 + $0x70] sm:$0xf] %vm17133_vm1, %v11569_v5  ;;  %256 = vst.msk [vmem:[#allocation2 + $0x74] sm:$0xf] %vm17133_vm1, %v11569_v5  ;;  %v333_v22 = vshll.u32 %v10238_v10, 16  ;;  %v323_v27 = vrot.slane %v321_v19, 6 }
  0x1c   : > { %257 = vst.msk [vmem:[#allocation2 + $0x78] sm:$0xf] %vm17133_vm1, %v11569_v5  ;;  %258 = vst.msk [vmem:[#allocation2 + $0x7c] sm:$0xf] %vm17133_vm1, %v11569_v5  ;;  %v1588_v23 = vld [vmem:[#allocation2] sm:$0xf] }
  0x1d   : > { %259 = vst.msk [vmem:[#allocation2 + $0x80] sm:$0xf] %vm17133_vm1, %v11569_v5  ;;  %260 = vst.msk [vmem:[#allocation2 + $0x84] sm:$0xf] %vm17133_vm1, %v11569_v5  ;;  %v1589_v24 = vld [vmem:[#allocation2 + $0x4] sm:$0xf] }
  0x1e   : > { %261 = vst.msk [vmem:[#allocation2 + $0x88] sm:$0xf] %vm17133_vm1, %v11569_v5  ;;  %262 = vst.msk [vmem:[#allocation2 + $0x8c] sm:$0xf] %vm17133_vm1, %v11569_v5  ;;  %vm435_vm14 = vsmask.f32 7950  ;;  %v9660_v33 = vcombine.low %v1588_v23, %v1589_v24 }
  0x1f   : > { %263 = vst.msk [vmem:[#allocation2 + $0x90] sm:$0xf] %vm17133_vm1, %v11569_v5  ;;  %264 = vst.msk [vmem:[#allocation2 + $0x94] sm:$0xf] %vm17133_vm1, %v11569_v5  ;;  %v326_v28 = vrot.slane %v324_v20, 7  ;;  %v332_v29 = vrot.slane %v330_v21, 6 }
  0x20   : > { %265 = vst.msk [vmem:[#allocation2 + $0x98] sm:$0xf] %vm17133_vm1, %v11569_v5  ;;  %266 = vst.msk [vmem:[#allocation2 + $0x9c] sm:$0xf] %vm17133_vm1, %v11569_v5  ;;  %v335_v30 = vrot.slane %v333_v22, 7  ;;  %v17280_v31 = vmov 0  ;;  %10687 = vmatprep.mubr.msk.bf16.mxu1 %vm17135_vm6, %v9660_v33 }
  0x21   : > { %267 = vst.msk [vmem:[#allocation2 + $0xa0] sm:$0xf] %vm17133_vm1, %v11569_v5  ;;  %268 = vst.msk [vmem:[#allocation3] sm:$0xf] %vm17133_vm1, %v11569_v5  ;;  %vm409_vm15 = vsmask.f32 3328  ;;  %v327_v38 = vor.u32 %v326_v28, %v323_v27 }
  0x22   : > { %269 = vst.msk [vmem:[#allocation3 + $0x4] sm:$0xf] %vm17133_vm1, %v11569_v5  ;;  %270 = vst.msk [vmem:[#allocation3 + $0x8] sm:$0xf] %vm17133_vm1, %v11569_v5  ;;  %vm410_vm0 = vsmask.f32 7440  ;;  %v336_v39 = vor.u32 %v335_v30, %v332_v29 }
  0x23   : > { %271 = vst.msk [vmem:[#allocation3 + $0xc] sm:$0xf] %vm17133_vm1, %v11569_v5  ;;  %272 = vst.msk [vmem:[#allocation3 + $0x10] sm:$0xf] %vm17133_vm1, %v11569_v5  ;;  %v345_v32 = vld [vmem:[#allocation2 + $0x8] sm:$0xe] }
  0x24   : > { %273 = vst.msk [vmem:[#allocation3 + $0x14] sm:$0xf] %vm17133_vm1, %v11569_v5  ;;  %274 = vst.msk [vmem:[#allocation3 + $0x18] sm:$0xf] %vm17133_vm1, %v11569_v5  ;;  %v367_v34 = vshrl.u32 %v10239_v14, 16  ;;  %v370_v35 = vshll.u32 %v10239_v14, 16 }
  0x25   : > { %275 = vst.msk [vmem:[#allocation3 + $0x1c] sm:$0xf] %vm17133_vm1, %v11569_v5  ;;  %276 = vst.msk [vmem:[#allocation3 + $0x20] sm:$0xf] %vm17133_vm1, %v11569_v5  ;;  %v376_v36 = vshrl.u32 %v10240_v15, 16  ;;  %v17283_v37 = vmov 0 }
  0x26   : > { %277 = vst.msk [vmem:[#allocation3 + $0x24] sm:$0xf] %vm17133_vm1, %v11569_v5  ;;  %278 = vst.msk [vmem:[#allocation3 + $0x28] sm:$0xf] %vm17133_vm1, %v11569_v5  ;;  %v379_v40 = vshll.u32 %v10240_v15, 16  ;;  %v413_v41 = vshll.u32 %v11809_v17, 16 }
  0x27   : > { %279 = vst.msk [vmem:[#allocation3 + $0x2c] sm:$0xf] %vm17133_vm1, %v11569_v5  ;;  %280 = vst.msk [vmem:[#allocation3 + $0x30] sm:$0xf] %vm17133_vm1, %v11569_v5  ;;  %v1723_v42 = vshrl.u32 %v9660_v33, 16  ;;  %v1725_v43 = vshll.u32 %v9660_v33, 16 }
  0x28   : > { %281 = vst.msk [vmem:[#allocation3 + $0x34] sm:$0xf] %vm17133_vm1, %v11569_v5  ;;  %282 = vst.msk [vmem:[#allocation3 + $0x38] sm:$0xf] %vm17133_vm1, %v11569_v5  ;;  %v17286_v44 = vmov 0  ;;  %v369_v46 = vrot.slane %v367_v34, 5 }
  0x29   : > { %283 = vst.msk [vmem:[#allocation3 + $0x3c] sm:$0xf] %vm17133_vm1, %v11569_v5  ;;  %284 = vst.msk [vmem:[#allocation3 + $0x40] sm:$0xf] %vm17133_vm1, %v11569_v5  ;;  %v351_v45 = vld [vmem:[#allocation2 + $0x10] sm:$0x3] }
  0x2a   : > { %285 = vst.msk [vmem:[#allocation3 + $0x44] sm:$0xf] %vm17133_vm1, %v11569_v5  ;;  %286 = vst.msk [vmem:[#allocation3 + $0x48] sm:$0xf] %vm17133_vm1, %v11569_v5  ;;  %v372_v47 = vrot.slane %v370_v35, 6  ;;  %v328_v48 = vrot.slane %v327_v38, 4 }
  0x2b   : > { %287 = vst.msk [vmem:[#allocation3 + $0x4c] sm:$0xf] %vm17133_vm1, %v11569_v5  ;;  %288 = vst.msk [vmem:[#allocation3 + $0x50] sm:$0xf] %vm17133_vm1, %v11569_v5  ;;  %v338_v49 = vrot.slane %v336_v39, 4  ;;  %v378_v51 = vrot.slane %v376_v36, 5 }
  0x2c   : > { %289 = vst.msk [vmem:[#allocation3 + $0x54] sm:$0xf] %vm17133_vm1, %v11569_v5  ;;  %290 = vst.msk [vmem:[#allocation3 + $0x58] sm:$0xf] %vm17133_vm1, %v11569_v5  ;;  %v391_v53 = vld [vmem:[#allocation2 + $0x10] sm:$0xc]  ;;  %v373_v55 = vor.u32 %v372_v47, %v369_v46 }
  0x2d   : > { %291 = vst.msk [vmem:[#allocation3 + $0x5c] sm:$0xf] %vm17133_vm1, %v11569_v5  ;;  %292 = vst.msk [vmem:[#allocation3 + $0x60] sm:$0xf] %vm17133_vm1, %v11569_v5  ;;  %v1727_v54 = vrot.slane %v1725_v43, 1  ;;  %v381_v56 = vrot.slane %v379_v40, 6 }
  0x2e   : > { %293 = vst.msk [vmem:[#allocation3 + $0x64] sm:$0xf] %vm17133_vm1, %v11569_v5  ;;  %294 = vst.msk [vmem:[#allocation3 + $0x68] sm:$0xf] %vm17133_vm1, %v11569_v5  ;;  %v415_v57 = vrot.slane %v413_v41, 5  ;;  %v416_v63 = vshrl.u32 %v11809_v17, 16 }
  0x2f   : > { %295 = vst.msk [vmem:[#allocation3 + $0x6c] sm:$0xf] %vm17133_vm1, %v11569_v5  ;;  %296 = vst.msk [vmem:[#allocation3 + $0x70] sm:$0xf] %vm17133_vm1, %v11569_v5  ;;  %v437_v59 = vld [vmem:[#allocation2 + $0x18] sm:$0x8]  ;;  %v11863_v1 = vor.u32 %v1727_v54, %v1723_v42  ;;  %v382_v3 = vor.u32 %v381_v56, %v378_v51 }
  0x30   : > { %297 = vst.msk [vmem:[#allocation3 + $0x74] sm:$0xf] %vm17133_vm1, %v11569_v5  ;;  %298 = vst.msk [vmem:[#allocation3 + $0x78] sm:$0xf] %vm17133_vm1, %v11569_v5  ;;  %v422_v0 = vshll.u32 %v11812_v25, 16  ;;  %v374_v2 = vrot.slane %v373_v55, 4 }
  0x31   : > { %299 = vst.msk [vmem:[#allocation3 + $0x7c] sm:$0xf] %vm17133_vm1, %v11569_v5  ;;  %300 = vst.msk [vmem:[#allocation3 + $0x80] sm:$0xf] %vm17133_vm1, %v11569_v5  ;;  %v397_v7 = vld [vmem:[#allocation2 + $0x18] sm:$0x7] }
  0x32   : > { %301 = vst.msk [vmem:[#allocation3 + $0x84] sm:$0xf] %vm17133_vm1, %v11569_v5  ;;  %302 = vst.msk [vmem:[#allocation3 + $0x88] sm:$0xf] %vm17133_vm1, %v11569_v5  ;;  %v418_v8 = vrot.slane %v416_v63, 4  ;;  %v424_v9 = vrot.slane %v422_v0, 5 }
  0x33   : > { %303 = vst.msk [vmem:[#allocation3 + $0x8c] sm:$0xf] %vm17133_vm1, %v11569_v5  ;;  %304 = vst.msk [vmem:[#allocation3 + $0x90] sm:$0xf] %vm17133_vm1, %v11569_v5  ;;  %v426_v11 = vshrl.u32 %v11812_v25, 16  ;;  %v9611_v13 = vld [vmem:[%s11797_s29 + $0x40] sm:$0xff] }
  0x34   : > { %305 = vst.msk [vmem:[#allocation3 + $0x94] sm:$0xf] %vm17133_vm1, %v11569_v5  ;;  %306 = vst.msk [vmem:[#allocation3 + $0x98] sm:$0xf] %vm17133_vm1, %v11569_v5  ;;  %v384_v15 = vrot.slane %v382_v3, 4  ;;  %v459_v16 = vshrl.u32 %v11814_v26, 16  ;;  %v419_v18 = vor.u32 %v418_v8, %v415_v57  ;;  %v10245_v25 = vpack.c.bf16 %v9611_v13, %v9611_v13 }
  0x35   : > { %307 = vst.msk [vmem:[#allocation3 + $0x9c] sm:$0xf] %vm17133_vm1, %v11569_v5  ;;  %308 = vst.msk [vmem:[#allocation3 + $0xa0] sm:$0xf] %vm17133_vm1, %v11569_v5  ;;  %vm478_vm1 = vsmask.f32 7938 }
  0x36   : > { %vm11818_vm12 = vmand %vm342_vm4, %vm343_vm5  ;;  %v9608_v5 = vld [vmem:[%s11797_s29 + $0x38] sm:$0xff]  ;;  %v462_v17 = vshll.u32 %v11814_v26, 16  ;;  %v428_v19 = vrot.slane %v426_v11, 4  ;;  %v461_v23 = vrot.slane %v459_v16, 7  ;;  %v480_v24 = vld [vmem:[#allocation2 + $0x24] sm:$0xf] }
  0x37   : > { %v17281_v31 = vsel %vm11818_vm12, 4294967295, %v17280_v31  ;;  %vm11824_vm8 = vmor %vm317_vm2, %vm318_vm3  ;;  %v346_v50 = vsel %vm11818_vm12, %v327_v38, %v345_v32  ;;  %v10244_v20 = vpack.c.bf16 %v9608_v5, %v9608_v5  ;;  %v9612_v26 = vld [vmem:[%s11797_s29 + $0x48] sm:$0xff]  ;;  %v420_v27 = vrot.slane %v419_v18, 4  ;;  %v9615_v33 = vld [vmem:[%s11797_s29 + $0x50] sm:$0xff] }
  0x38   : > { %17282 = vst [vmem:[#allocation4_spill] sm:$0xff] %v17281_v31  ;;  %v17284_v37 = vsel %vm11824_vm8, 4294967295, %v17283_v37  ;;  %vm11832_vm4 = vmand %vm17134_vm7, %vm317_vm2  ;;  %v337_v60 = vsel %vm11824_vm8, %v328_v48, %v336_v39  ;;  %v429_v28 = vor.u32 %v428_v19, %v424_v9  ;;  %v443_v35 = vld [vmem:[#allocation2 + $0x20] sm:$0xf]  ;;  %v464_v36 = vor.u32 %v462_v17, %v461_v23  ;;  %v9620_v16 = vld [vmem:[%s11797_s29 + $0x68] sm:$0xff] }
  0x39   : > { %17285 = vst [vmem:[#allocation5_spill] sm:$0xff] %v17284_v37  ;;  %v17287_v44 = vsel %vm11832_vm4, 4294967295, %v17286_v44  ;;  %vm11840_vm3 = vmand %vm388_vm10, %vm389_vm11  ;;  %v352_v61 = vsel %vm11832_vm4, %v338_v49, %v351_v45  ;;  %vm17293_vm10 = vsmask.f32 2304  ;;  %v467_v30 = vshrl.u32 %v10244_v20, 16  ;;  %v9623_v17 = vld [vmem:[%s11797_s29 + $0x70] sm:$0xff] }
  0x3a   : > { %17288 = vst [vmem:[#allocation6_spill] sm:$0xff] %v17287_v44  ;;  %347 = vst [vmem:[#allocation2 + $0x8] sm:$0xe] %v346_v50  ;;  %v392_v4 = vsel %vm11840_vm3, %v373_v55, %v391_v53  ;;  %v470_v32 = vshll.u32 %v10244_v20, 16  ;;  %v465_v38 = vrot.slane %v461_v23, 4  ;;  %v499_v39 = vshrl.u32 %v10245_v25, 16 }
  0x3b   : > { %vm11846_vm5 = vmand %vm434_vm13, %vm435_vm14  ;;  %vm17296_vm13 = vcmask 27648   ;;  %353 = vst [vmem:[#allocation2 + $0x10] sm:$0x3] %v352_v61  ;;  %vm17298_vm14 = vcmask 26624   ;;  %v502_v40 = vshll.u32 %v10245_v25, 16  ;;  %v430_v43 = vrot.slane %v429_v28, 4 }
  0x3c   : > { %vm11856_vm11 = vmor %vm17293_vm10, %vm364_vm9  ;;  %348 = vst.msk [vmem:[#allocation2 + $0xc] sm:$0xf] %vm17296_vm13, %v337_v60  ;;  %v438_v10 = vsel %vm11846_vm5, %v415_v57, %v437_v59  ;;  %v469_v45 = vrot.slane %v467_v30, 7  ;;  %v10246_v46 = vpack.c.bf16 %v9612_v26, %v9612_v26  ;;  %v501_v49 = vrot.slane %v499_v39, 6  ;;  %v486_v59 = vld [vmem:[#allocation2 + $0x2c] sm:$0x1] }
  0x3d   : > { %393 = vst [vmem:[#allocation2 + $0x10] sm:$0xc] %v392_v4  ;;  %vm17297_vm9 = vmmov %vm17293_vm10  ;;  %v383_v14 = vsel %vm11856_vm11, %v374_v2, %v382_v3  ;;  %v504_v50 = vrot.slane %v502_v40, 7  ;;  %v10247_v51 = vpack.c.bf16 %v9615_v33, %v9615_v33  ;;  %v520_v60 = vld [vmem:[#allocation2 + $0x2c] sm:$0xe] }
  0x3e   : > { %vm11870_vm10 = vmand %vm17298_vm14, %vm17297_vm9  ;;  %439 = vst [vmem:[#allocation2 + $0x18] sm:$0x8] %v438_v10  ;;  %vm456_vm14 = vsmask.f32 4368  ;;  %v472_v56 = vor.u32 %v470_v32, %v469_v45  ;;  %v474_v63 = vrot.slane %v469_v45, 4  ;;  %v508_v2 = vshrl.u32 %v10246_v46, 16 }
  0x3f   : > { %vm17301_vm9 = vmmov %vm17296_vm13  ;;  %v398_v21 = vsel %vm11870_vm10, %v384_v15, %v397_v7  ;;  %vm484_vm13 = vcmask 24576   ;;  %v505_v0 = vor.u32 %v504_v50, %v501_v49  ;;  %v511_v3 = vshll.u32 %v10246_v46, 16  ;;  %v9619_v10 = vld [vmem:[%s11797_s29 + $0x60] sm:$0xff]  ;;  %v558_v30 = vld [vmem:[#allocation2 + $0x34] sm:$0xc] }
  0x40   : > { %394 = vst.msk [vmem:[#allocation2 + $0x14] sm:$0xf] %vm17301_vm9, %v383_v14  ;;  %vm11887_vm7 = vmor %vm409_vm15, %vm410_vm0  ;;  %v537_v7 = vshrl.u32 %v10247_v51, 16  ;;  %v540_v8 = vshll.u32 %v10247_v51, 16  ;;  %v10249_v33 = vpack.c.bf16 %v9619_v10, %v9619_v10  ;;  %v524_v40 = vld [vmem:[#allocation2 + $0x34] sm:$0x3] }
  0x41   : > { %399 = vst [vmem:[#allocation2 + $0x18] sm:$0x7] %v398_v21  ;;  %vm11894_vm6 = vmand %vm17301_vm9, %vm478_vm1  ;;  %v425_v42 = vsel %vm11887_vm7, %v420_v27, %v424_v9  ;;  %v9616_v9 = vld [vmem:[%s11797_s29 + $0x58] sm:$0xff]  ;;  %v521_v15 = vsel %vm11818_vm12, %v505_v0, %v520_v60  ;;  %v506_v20 = vrot.slane %v505_v0, 4  ;;  %v510_v21 = vrot.slane %v508_v2, 6 }
  0x42   : > { %vm17306_vm0 = vmmov %vm17301_vm9  ;;  %v481_v47 = vsel %vm11894_vm6, %v464_v36, %v480_v24  ;;  %522 = vst [vmem:[#allocation2 + $0x2c] sm:$0xe] %v521_v15  ;;  %v513_v24 = vrot.slane %v511_v3, 7  ;;  %v539_v25 = vrot.slane %v537_v7, 5  ;;  %v542_v26 = vrot.slane %v540_v8, 6  ;;  %v9624_v27 = vld [vmem:[%s11797_s29 + $0x78] sm:$0xff] }
  0x43   : > { %vm11901_vm2 = vmand %vm17306_vm0, %vm409_vm15  ;;  %v11905_v41 = vld [vmem:[#allocation2 + $0x8] sm:$0xff]   ;;  %vm17310_vm15 = vsmask.f32 256  ;;  %482 = vst [vmem:[#allocation2 + $0x24] sm:$0xf] %v481_v47  ;;  %v10248_v32 = vpack.c.bf16 %v9616_v9, %v9616_v9  ;;  %v11965_v49 = vpack.c.bf16 %v9624_v27, %v9624_v27  ;;  %v575_v2 = vshll.u32 %v10249_v33, 16 }
  0x44   : > { %vm17309_vm1 = vmmov %vm17306_vm0  ;;  %v1730_v53 = vshll.u32 %v11905_v41, 16  ;;  %v1734_v54 = vshrl.u32 %v11905_v41, 16  ;;  %vm17313_vm0 = vcmask 31744   ;;  %v444_v55 = vsel %vm11901_vm2, %v430_v43, %v443_v35  ;;  %v596_v8 = vld [vmem:[#allocation2 + $0x3c] sm:$0x8] }
  0x45   : > { %440 = vst.msk [vmem:[#allocation2 + $0x1c] sm:$0xf] %vm17309_vm1, %v425_v42  ;;  %vm11914_vm9 = vmor %vm17310_vm15, %vm456_vm14  ;;  %10688 = vmatmul.mubr.msk.bf16.vlgmr.msra.gmra.mxu1 %vm17313_vm0, %v11905_v41  ;;  %v11953_v35 = vpack.c.bf16 %v9620_v16, %v9620_v16  ;;  %v514_v39 = vor.u32 %v513_v24, %v510_v21  ;;  %v543_v42 = vor.u32 %v542_v26, %v539_v25  ;;  %v546_v47 = vshrl.u32 %v10248_v32, 16  ;;  %v562_v21 = vld [vmem:[#allocation2 + $0x3c] sm:$0x7]  ;;  %v9627_v25 = vld [vmem:[%s11797_s29 + $0x80] sm:$0xff] }
  0x46   : > { %vm17314_vm14 = vmmov %vm17310_vm15  ;;  %445 = vst [vmem:[#allocation2 + $0x20] sm:$0xf] %v444_v55  ;;  %v1732_v4 = vrot.slane %v1730_v53, 1  ;;  %v473_v5 = vsel %vm11914_vm9, %v465_v38, %v472_v56  ;;  %vm17318_vm15 = vcmask 27648   ;;  %v549_v0 = vshll.u32 %v10248_v32, 16 }
  0x47   : > { %vm11926_vm1 = vmand %vm484_vm13, %vm17314_vm14  ;;  %v11930_v61 = vld [vmem:[#allocation2 + $0x10] sm:$0xff]   ;;  %483 = vst.msk [vmem:[#allocation2 + $0x28] sm:$0xf] %vm17318_vm15, %v473_v5  ;;  %v515_v50 = vsel %vm11824_vm8, %v506_v20, %v514_v39  ;;  %v516_v51 = vrot.slane %v514_v39, 4  ;;  %v559_v53 = vsel %vm11840_vm3, %v543_v42, %v558_v30  ;;  %v578_v3 = vshrl.u32 %v10249_v33, 16  ;;  %v9628_v33 = vld [vmem:[%s11797_s29 + $0x88] sm:$0xff] }
  0x48   : > { %v1738_v11 = vshll.u32 %v11930_v61, 16  ;;  %v1742_v13 = vshrl.u32 %v11930_v61, 16  ;;  %vm17317_vm13 = vmmov %vm17313_vm0  ;;  %v487_v14 = vsel %vm11926_vm1, %v474_v63, %v486_v59  ;;  %vm17319_vm0 = vsmask.f32 7424  ;;  %560 = vst [vmem:[#allocation2 + $0x34] sm:$0xc] %v559_v53 }
  0x49   : > { %10691 = vmatprep.mubr.msk.bf16.mxu1 %vm17317_vm13, %v11930_v61  ;;  %v1733_v18 = vsel %vm17319_vm0, %v11863_v1, %v1732_v4  ;;  %v1736_v19 = vor.u32 %v1734_v54, %v1732_v4  ;;  %488 = vst [vmem:[#allocation2 + $0x2c] sm:$0x1] %v487_v14  ;;  %vm17320_vm14 = vmmov %vm17317_vm13  ;;  %v11955_v1 = vpack.c.bf16 %v9623_v17, %v9623_v17  ;;  %v544_v54 = vrot.slane %v543_v42, 4  ;;  %v600_v53 = vld [vmem:[#allocation2 + $0x44] sm:$0xf] }
  0x4a   : > { %10649 = vmatprep.mubr.msk.bf16.mxu0 %vm17320_vm14, %v1733_v18  ;;  %v1740_v23 = vrot.slane %v1738_v11, 1  ;;  %vm17321_vm13 = vmmov %vm17319_vm0  ;;  %v525_v63 = vsel %vm11832_vm4, %v516_v51, %v524_v40  ;;  %v584_v9 = vshll.u32 %v11953_v35, 16  ;;  %v577_v14 = vrot.slane %v575_v2, 5 }
  0x4b   : > { %vm17322_vm15 = vmmov %vm17320_vm14  ;;  %526 = vst [vmem:[#allocation2 + $0x34] sm:$0x3] %v525_v63  ;;  %v580_v17 = vrot.slane %v578_v3, 4  ;;  %v588_v24 = vshrl.u32 %v11953_v35, 16  ;;  %v613_v27 = vshrl.u32 %v11955_v1, 16  ;;  %v616_v30 = vshll.u32 %v11955_v1, 16 }
  0x4c   : > { %v11951_v28 = vld [vmem:[#allocation2 + $0x18] sm:$0xff]   ;;  %v1741_v36 = vsel %vm17321_vm13, %v1736_v19, %v1740_v23  ;;  %v1744_v38 = vor.u32 %v1742_v13, %v1740_v23  ;;  %vm17323_vm0 = vmmov %vm17320_vm14  ;;  %vm17325_vm13 = vcmask 27648   ;;  %v551_v13 = vrot.slane %v549_v0, 6  ;;  %v636_v3 = vld [vmem:[#allocation2 + $0x50] sm:$0x1] }
  0x4d   : > { %10650 = vmatmul.mubr.msk.bf16.vlgmr.msra.gmra.mxu0 %vm17322_vm15, %v1741_v36  ;;  %v1746_v43 = vshll.u32 %v11951_v28, 16  ;;  %v11960_v45 = vld [vmem:[#allocation2 + $0x20] sm:$0xff]   ;;  %v1750_v46 = vshrl.u32 %v11951_v28, 16  ;;  %10692 = vmatmul.mubr.msk.bf16.gmra.mxu1 %vm17323_vm0, %v11951_v28  ;;  %vm17324_vm14 = vmmov %vm17323_vm0  ;;  %523 = vst.msk [vmem:[#allocation2 + $0x30] sm:$0xf] %vm17325_vm13, %v515_v50  ;;  %v586_v18 = vrot.slane %v584_v9, 5  ;;  %v597_v23 = vsel %vm11846_vm5, %v577_v14, %v596_v8 }
  0x4e   : > { %10724 = vmatpush3.bf16.msra.mxu0 %v11805_v12  ;;  %v1754_v56 = vshll.u32 %v11960_v45, 16  ;;  %v1758_v59 = vshrl.u32 %v11960_v45, 16  ;;  %10695 = vmatprep.mubr.msk.bf16.mxu1 %vm17324_vm14, %v11960_v45  ;;  %v548_v12 = vrot.slane %v546_v47, 5  ;;  %vm17326_vm15 = vsmask.f32 7424  ;;  %vm17328_vm13 = vmmov %vm17323_vm0  ;;  %v9632_v9 = vld [vmem:[%s11797_s29 + $0x98] sm:$0xff] }
  0x4f   : > { %v1748_v55 = vrot.slane %v1746_v43, 1  ;;  %vm17327_vm14 = vmmov %vm17326_vm15  ;;  %598 = vst [vmem:[#allocation2 + $0x3c] sm:$0x8] %v597_v23  ;;  %v581_v26 = vor.u32 %v580_v17, %v577_v14  ;;  %v621_v32 = vshrl.u32 %v11965_v49, 16  ;;  %v12001_v36 = vld [vmem:[%s17127_s1 + $0x6] sm:$0x3] }
  0x50   : > { %v11977_v60 = vld [vmem:[#allocation2 + $0x28] sm:$0xff]   ;;  %v1756_v7 = vrot.slane %v1754_v56, 1  ;;  %v552_v20 = vor.u32 %v551_v13, %v548_v12  ;;  %v590_v42 = vrot.slane %v588_v24, 4  ;;  %v615_v43 = vrot.slane %v613_v27, 7  ;;  %v9639_v27 = vld [vmem:[%s11797_s29 + $0xb0] sm:$0xff] }
  0x51   : > { %v1749_v4 = vsel %vm17326_vm15, %v1744_v38, %v1748_v55  ;;  %v1752_v5 = vor.u32 %v1750_v46, %v1748_v55  ;;  %v1762_v10 = vshll.u32 %v11977_v60, 16  ;;  %v1766_v11 = vshrl.u32 %v11977_v60, 16  ;;  %vm17329_vm15 = vmmov %vm17323_vm0  ;;  %v12013_v47 = vld [vmem:[%s17127_s1 + $0x8] sm:$0x3] }
  0x52   : > { %10653 = vmatprep.mubr.msk.bf16.mxu0 %vm17323_vm0, %v1749_v4  ;;  %v1760_v16 = vor.u32 %v1758_v59, %v1756_v7  ;;  %vm17330_vm0 = vmmov %vm17327_vm14  ;;  %v553_v39 = vsel %vm11856_vm11, %v544_v54, %v552_v20  ;;  %v554_v40 = vrot.slane %v552_v20, 4  ;;  %v582_v1 = vrot.slane %v581_v26, 4  ;;  %v632_v55 = vld [vmem:[#allocation2 + $0x48] sm:$0xf]  ;;  %v9631_v4 = vld [vmem:[%s11797_s29 + $0x90] sm:$0xff] }
  0x53   : > { %v1757_v15 = vsel %vm17327_vm14, %v1752_v5, %v1756_v7  ;;  %v1764_v19 = vrot.slane %v1762_v10, 1  ;;  %vm17331_vm14 = vcmask 1041408   ;;  %v623_v46 = vrot.slane %v621_v32, 7  ;;  %v9635_v10 = vld [vmem:[%s11797_s29 + $0xa0] sm:$0xff] }
  0x54   : > { %11334 = vmatprep.subr.msk.bf16.mxu1 %vm17331_vm14, %v12001_v36  ;;  %v12015_v50 = vld [vmem:[#allocation2 + $0x30] sm:$0xff]   ;;  %v563_v51 = vsel %vm11870_vm10, %v554_v40, %v562_v21  ;;  %v624_v54 = vshll.u32 %v11965_v49, 16  ;;  %v10253_v56 = vpack.c.bf16 %v9627_v25, %v9627_v25  ;;  %v10254_v59 = vpack.c.bf16 %v9628_v33, %v9628_v33 }
  0x55   : > { %10654 = vmatmul.mubr.msk.bf16.gmra.mxu0 %vm17328_vm13, %v1757_v15  ;;  %10696 = vmatmul.mubr.msk.bf16.gmra.mxu1 %vm17329_vm15, %v11977_v60  ;;  %v1765_v35 = vsel %vm17330_vm0, %v1760_v16, %v1764_v19  ;;  %v1768_v38 = vor.u32 %v1766_v11, %v1764_v19  ;;  %vm17332_vm15 = vcmask 27648   ;;  %vm17333_vm0 = vmmov %vm17331_vm14  ;;  %564 = vst [vmem:[#allocation2 + $0x3c] sm:$0x7] %v563_v51  ;;  %v619_v2 = vrot.slane %v615_v43, 4  ;;  %v9636_v16 = vld [vmem:[%s11797_s29 + $0xa8] sm:$0xff] }
  0x56   : > { %10657 = vmatprep.mubr.msk.bf16.mxu0 %vm17328_vm13, %v1765_v35  ;;  %561 = vst.msk [vmem:[#allocation2 + $0x38] sm:$0xf] %vm17332_vm15, %v553_v39  ;;  %11335 = vmatprep.subr.msk.bf16.mxu0 %vm17333_vm0, %v12013_v47  ;;  %v587_v12 = vsel %vm11887_vm7, %v582_v1, %v586_v18  ;;  %v591_v63 = vor.u32 %v590_v42, %v586_v18  ;;  %v1770_v49 = vshll.u32 %v12015_v50, 16  ;;  %v1774_v5 = vshrl.u32 %v12015_v50, 16  ;;  %vm17334_vm14 = vmmov %vm17328_vm13  ;;  %v670_v21 = vld [vmem:[#allocation2 + $0x50] sm:$0xe] }
  0x57   : > { %v618_v0 = vor.u32 %v616_v30, %v615_v43  ;;  %10699 = vmatprep.mubr.msk.bf16.mxu1 %vm17334_vm14, %v12015_v50  ;;  %vm17335_vm13 = vmmov %vm17332_vm15  ;;  %v626_v7 = vor.u32 %v624_v54, %v623_v46  ;;  %v628_v8 = vrot.slane %v623_v46, 4  ;;  %v649_v14 = vshrl.u32 %v10253_v56, 16  ;;  %v674_v46 = vld [vmem:[#allocation2 + $0x58] sm:$0x3] }
  0x58   : > { %599 = vst.msk [vmem:[#allocation2 + $0x40] sm:$0xf] %vm17335_vm13, %v587_v12  ;;  %v592_v11 = vrot.slane %v591_v63, 4  ;;  %v652_v15 = vshll.u32 %v10253_v56, 16  ;;  %v1772_v17 = vrot.slane %v1770_v49, 1  ;;  %v658_v20 = vshrl.u32 %v10254_v59, 16  ;;  %vm17336_vm15 = vmmov %vm17335_vm13 }
  0x59   : > { %v633_v13 = vsel %vm11894_vm6, %v618_v0, %v632_v55  ;;  %v627_v18 = vsel %vm11914_vm9, %v619_v2, %v626_v7  ;;  %v637_v19 = vsel %vm11926_vm1, %v628_v8, %v636_v3  ;;  %v651_v24 = vrot.slane %v649_v14, 6  ;;  %vm17338_vm13 = vmmov %vm17334_vm14  ;;  %v708_v8 = vld [vmem:[#allocation2 + $0x58] sm:$0xc] }
  0x5a   : > { %634 = vst [vmem:[#allocation2 + $0x48] sm:$0xf] %v633_v13  ;;  %v601_v23 = vsel %vm11901_vm2, %v592_v11, %v600_v53  ;;  %635 = vst.msk [vmem:[#allocation2 + $0x4c] sm:$0xf] %vm17336_vm15, %v627_v18  ;;  %v654_v25 = vrot.slane %v652_v15, 7  ;;  %v661_v26 = vshll.u32 %v10254_v59, 16  ;;  %v1776_v32 = vor.u32 %v1774_v5, %v1772_v17 }
  0x5b   : > { %638 = vst [vmem:[#allocation2 + $0x50] sm:$0x1] %v637_v19  ;;  %vm17337_vm0 = vsmask.f32 7424  ;;  %602 = vst [vmem:[#allocation2 + $0x44] sm:$0xf] %v601_v23  ;;  %v10255_v35 = vpack.c.bf16 %v9631_v4, %v9631_v4  ;;  %v10256_v1 = vpack.c.bf16 %v9632_v9, %v9632_v9  ;;  %v10257_v42 = vpack.c.bf16 %v9635_v10, %v9635_v10 }
  0x5c   : > { %v1773_v30 = vsel %vm17337_vm0, %v1768_v38, %v1772_v17  ;;  %v660_v33 = vrot.slane %v658_v20, 6  ;;  %v655_v39 = vor.u32 %v654_v25, %v651_v24  ;;  %v663_v40 = vrot.slane %v661_v26, 7  ;;  %v746_v19 = vld [vmem:[#allocation2 + $0x60] sm:$0x8]  ;;  %v712_v26 = vld [vmem:[#allocation2 + $0x60] sm:$0x7] }
  0x5d   : > { %10658 = vmatmul.mubr.msk.bf16.gmra.mxu0 %vm17334_vm14, %v1773_v30  ;;  %v12045_v43 = vld [vmem:[#allocation2 + $0x38] sm:$0xff]   ;;  %v687_v51 = vshrl.u32 %v10255_v35, 16  ;;  %v690_v53 = vshll.u32 %v10255_v35, 16  ;;  %v10258_v54 = vpack.c.bf16 %v9636_v16, %v9636_v16  ;;  %v12047_v55 = vpack.c.bf16 %v9639_v27, %v9639_v27  ;;  %vm17339_vm14 = vmmov %vm17338_vm13 }
  0x5e   : > { %v656_v56 = vrot.slane %v655_v39, 4  ;;  %v664_v38 = vor.u32 %v663_v40, %v660_v33  ;;  %v671_v59 = vsel %vm11818_vm12, %v655_v39, %v670_v21  ;;  %v696_v12 = vshrl.u32 %v10256_v1, 16  ;;  %10700 = vmatmul.mubr.msk.bf16.gmra.mxu1 %vm17338_vm13, %v12045_v43 }
  0x5f   : > { %v1778_v63 = vshll.u32 %v12045_v43, 16  ;;  %v1782_v0 = vshrl.u32 %v12045_v43, 16  ;;  %672 = vst [vmem:[#allocation2 + $0x50] sm:$0xe] %v671_v59  ;;  %v689_v2 = vrot.slane %v687_v51, 5  ;;  %v692_v3 = vrot.slane %v690_v53, 6 }
  0x60   : > { %v665_v4 = vsel %vm11824_vm8, %v656_v56, %v664_v38  ;;  %v666_v49 = vrot.slane %v664_v38, 4  ;;  %v698_v5 = vrot.slane %v696_v12, 5  ;;  %v699_v7 = vshll.u32 %v10256_v1, 16 }
  0x61   : > { %v1780_v9 = vrot.slane %v1778_v63, 1  ;;  %v12057_v10 = vld [vmem:[#allocation2 + $0x48] sm:$0xff]   ;;  %673 = vst.msk [vmem:[#allocation2 + $0x54] sm:$0xf] %vm17336_vm15, %v665_v4  ;;  %v693_v11 = vor.u32 %v692_v3, %v689_v2  ;;  %v725_v13 = vshll.u32 %v10257_v42, 16  ;;  %v728_v14 = vshrl.u32 %v10257_v42, 16  ;;  %vm17340_vm15 = vmmov %vm17338_vm13 }
  0x62   : > { %v12060_v15 = vld [vmem:[#allocation2 + $0x40] sm:$0xff]   ;;  %v675_v16 = vsel %vm11832_vm4, %v666_v49, %v674_v46  ;;  %v701_v17 = vrot.slane %v699_v7, 6  ;;  %v734_v18 = vshll.u32 %v10258_v54, 16  ;;  %v738_v20 = vshrl.u32 %v10258_v54, 16  ;;  %v9640_v54 = vld [vmem:[%s11797_s29 + $0xb8] sm:$0xff] }
  0x63   : > { %v1781_v21 = vsel %vm17337_vm0, %v1776_v32, %v1780_v9  ;;  %v1784_v23 = vor.u32 %v1782_v0, %v1780_v9  ;;  %v1794_v24 = vshll.u32 %v12057_v10, 16  ;;  %v1798_v25 = vshrl.u32 %v12057_v10, 16  ;;  %676 = vst [vmem:[#allocation2 + $0x58] sm:$0x3] %v675_v16  ;;  %10703 = vmatprep.mubr.msk.bf16.mxu1 %vm17338_vm13, %v12060_v15  ;;  %v750_v7 = vld [vmem:[#allocation2 + $0x68] sm:$0xf] }
  0x64   : > { %10661 = vmatprep.mubr.msk.bf16.mxu0 %vm17339_vm14, %v1781_v21  ;;  %v1786_v27 = vshll.u32 %v12060_v15, 16  ;;  %v1790_v30 = vshrl.u32 %v12060_v15, 16  ;;  %v694_v33 = vrot.slane %v693_v11, 4  ;;  %v702_v35 = vor.u32 %v701_v17, %v698_v5  ;;  %v782_v21 = vld [vmem:[#allocation2 + $0x6c] sm:$0xf] }
  0x65   : > { %v1796_v32 = vrot.slane %v1794_v24, 1  ;;  %v709_v39 = vsel %vm11840_vm3, %v693_v11, %v708_v8  ;;  %v727_v40 = vrot.slane %v725_v13, 5  ;;  %v730_v1 = vrot.slane %v728_v14, 4  ;;  %v9643_v11 = vld [vmem:[%s11797_s29 + $0xc0] sm:$0xff] }
  0x66   : > { %v1788_v42 = vrot.slane %v1786_v27, 1  ;;  %v703_v46 = vsel %vm11856_vm11, %v694_v33, %v702_v35  ;;  %710 = vst [vmem:[#allocation2 + $0x58] sm:$0xc] %v709_v39  ;;  %v704_v51 = vrot.slane %v702_v35, 4  ;;  %v736_v53 = vrot.slane %v734_v18, 5  ;;  %10704 = vmatmul.mubr.msk.bf16.gmra.mxu1 %vm17340_vm15, %v12057_v10  ;;  %v9644_v18 = vld [vmem:[%s11797_s29 + $0xc8] sm:$0xff] }
  0x67   : > { %v1800_v56 = vor.u32 %v1798_v25, %v1796_v32  ;;  %vm17341_vm0 = vcmask 27648   ;;  %v731_v38 = vor.u32 %v730_v1, %v727_v40  ;;  %v747_v59 = vsel %vm11846_vm5, %v727_v40, %v746_v19  ;;  %v9647_v19 = vld [vmem:[%s11797_s29 + $0xd0] sm:$0xff] }
  0x68   : > { %711 = vst.msk [vmem:[#allocation2 + $0x5c] sm:$0xf] %vm17341_vm0, %v703_v46  ;;  %v740_v12 = vrot.slane %v738_v20, 4  ;;  %vm17342_vm14 = vsmask.f32 7424  ;;  %v1792_v0 = vor.u32 %v1790_v30, %v1788_v42  ;;  %v12083_v2 = vld [vmem:[#allocation2 + $0x50] sm:$0xff]   ;;  %v713_v3 = vsel %vm11870_vm10, %v704_v51, %v712_v26  ;;  %vm17344_vm0 = vmmov %vm17338_vm13 }
  0x69   : > { %v1789_v63 = vsel %vm17342_vm14, %v1784_v23, %v1788_v42  ;;  %748 = vst [vmem:[#allocation2 + $0x60] sm:$0x8] %v747_v59  ;;  %v763_v4 = vshrl.u32 %v12047_v55, 16  ;;  %714 = vst [vmem:[#allocation2 + $0x60] sm:$0x7] %v713_v3  ;;  %v732_v49 = vrot.slane %v731_v38, 4  ;;  %v10260_v9 = vpack.c.bf16 %v9640_v54, %v9640_v54  ;;  %10707 = vmatprep.mubr.msk.bf16.mxu1 %vm17344_vm0, %v12083_v2 }
  0x6a   : > { %10662 = vmatmul.mubr.msk.bf16.gmra.mxu0 %vm17338_vm13, %v1789_v63  ;;  %v741_v5 = vor.u32 %v740_v12, %v736_v53  ;;  %v766_v8 = vshll.u32 %v12047_v55, 16  ;;  %vm17343_vm15 = vmmov %vm17342_vm14  ;;  %v1802_v14 = vshll.u32 %v12083_v2, 16  ;;  %v1806_v16 = vshrl.u32 %v12083_v2, 16  ;;  %v786_v30 = vld [vmem:[#allocation2 + $0x74] sm:$0x1]  ;;  %v9648_v54 = vld [vmem:[%s11797_s29 + $0xd8] sm:$0xff] }
  0x6b   : > { %v1797_v13 = vsel %vm17343_vm15, %v1792_v0, %v1796_v32  ;;  %v765_v17 = vrot.slane %v763_v4, 7  ;;  %vm17345_vm14 = vmmov %vm17344_vm0  ;;  %v737_v20 = vsel %vm11887_vm7, %v732_v49, %v736_v53  ;;  %v771_v23 = vshrl.u32 %v10260_v9, 16  ;;  %v9651_v38 = vld [vmem:[%s11797_s29 + $0xe0] sm:$0xff]  ;;  %v9652_v3 = vld [vmem:[%s11797_s29 + $0xe8] sm:$0xff] }
  0x6c   : > { %10665 = vmatprep.mubr.msk.bf16.mxu0 %vm17345_vm14, %v1797_v13  ;;  %v742_v55 = vrot.slane %v741_v5, 4  ;;  %v774_v24 = vshll.u32 %v10260_v9, 16  ;;  %v1804_v25 = vrot.slane %v1802_v14, 1  ;;  %vm17346_vm13 = vcmask 27648   ;;  %v820_v5 = vld [vmem:[#allocation2 + $0x74] sm:$0xe]  ;;  %vm17347_vm14 = vmmov %vm17344_vm0 }
  0x6d   : > { %749 = vst.msk [vmem:[#allocation2 + $0x64] sm:$0xf] %vm17346_vm13, %v737_v20  ;;  %v768_v26 = vor.u32 %v766_v8, %v765_v17  ;;  %v769_v27 = vrot.slane %v765_v17, 4  ;;  %v10261_v33 = vpack.c.bf16 %v9643_v11, %v9643_v11  ;;  %v773_v32 = vrot.slane %v771_v23, 7  ;;  %v9655_v14 = vld [vmem:[%s11797_s29 + $0xf0] sm:$0xff] }
  0x6e   : > { %v751_v35 = vsel %vm11901_vm2, %v742_v55, %v750_v7  ;;  %v10262_v39 = vpack.c.bf16 %v9644_v18, %v9644_v18  ;;  %v10263_v40 = vpack.c.bf16 %v9647_v19, %v9647_v19  ;;  %v1805_v1 = vsel %vm17343_vm15, %v1800_v56, %v1804_v25 }
  0x6f   : > { %v12105_v42 = vld [vmem:[#allocation2 + $0x58] sm:$0xff]   ;;  %v1808_v46 = vor.u32 %v1806_v16, %v1804_v25  ;;  %752 = vst [vmem:[#allocation2 + $0x68] sm:$0xf] %v751_v35  ;;  %v783_v51 = vsel %vm11894_vm6, %v768_v26, %v782_v21  ;;  %v799_v53 = vshrl.u32 %v10261_v33, 16  ;;  %v776_v59 = vor.u32 %v774_v24, %v773_v32 }
  0x70   : > { %784 = vst [vmem:[#allocation2 + $0x6c] sm:$0xf] %v783_v51  ;;  %v778_v12 = vrot.slane %v773_v32, 4  ;;  %v802_v63 = vshll.u32 %v10261_v33, 16  ;;  %v808_v0 = vshrl.u32 %v10262_v39, 16  ;;  %v1810_v4 = vshll.u32 %v12105_v42, 16  ;;  %10708 = vmatmul.mubr.msk.bf16.gmra.mxu1 %vm17344_vm0, %v12105_v42 }
  0x71   : > { %v1814_v56 = vshrl.u32 %v12105_v42, 16  ;;  %v801_v49 = vrot.slane %v799_v53, 6  ;;  %v811_v7 = vshll.u32 %v10262_v39, 16  ;;  %v777_v8 = vsel %vm11914_vm9, %v769_v27, %v776_v59  ;;  %v824_v21 = vld [vmem:[#allocation2 + $0x7c] sm:$0x3] }
  0x72   : > { %10666 = vmatmul.mubr.msk.bf16.gmra.mxu0 %vm17347_vm14, %v1805_v1  ;;  %v787_v9 = vsel %vm11926_vm1, %v778_v12, %v786_v30  ;;  %v804_v11 = vrot.slane %v802_v63, 7  ;;  %v810_v13 = vrot.slane %v808_v0, 6  ;;  %v1812_v16 = vrot.slane %v1810_v4, 1  ;;  %785 = vst.msk [vmem:[#allocation2 + $0x70] sm:$0xf] %vm17346_vm13, %v777_v8  ;;  %vm17348_vm14 = vmmov %vm17344_vm0 }
  0x73   : > { %788 = vst [vmem:[#allocation2 + $0x74] sm:$0x1] %v787_v9  ;;  %v813_v17 = vrot.slane %v811_v7, 7  ;;  %v837_v18 = vshrl.u32 %v10263_v40, 16  ;;  %v840_v19 = vshll.u32 %v10263_v40, 16  ;;  %v10264_v23 = vpack.c.bf16 %v9648_v54, %v9648_v54  ;;  %vm17349_vm13 = vmmov %vm17344_vm0 }
  0x74   : > { %v12123_v20 = vld [vmem:[#allocation2 + $0x60] sm:$0xff]   ;;  %v805_v55 = vor.u32 %v804_v11, %v801_v49  ;;  %v10265_v24 = vpack.c.bf16 %v9651_v38, %v9651_v38  ;;  %v10266_v25 = vpack.c.bf16 %v9652_v3, %v9652_v3  ;;  %v1813_v26 = vsel %vm17343_vm15, %v1808_v46, %v1812_v16  ;;  %v858_v1 = vld [vmem:[#allocation2 + $0x7c] sm:$0xc] }
  0x75   : > { %v1816_v27 = vor.u32 %v1814_v56, %v1812_v16  ;;  %v814_v30 = vor.u32 %v813_v17, %v810_v13  ;;  %v839_v33 = vrot.slane %v837_v18, 5  ;;  %10669 = vmatprep.mubr.msk.bf16.mxu0 %vm17344_vm0, %v1813_v26  ;;  %v1818_v35 = vshll.u32 %v12123_v20, 16  ;;  %10711 = vmatprep.mubr.msk.bf16.mxu1 %vm17348_vm14, %v12123_v20  ;;  %v896_v3 = vld [vmem:[#allocation2 + $0x84] sm:$0x8]  ;;  %vm17352_vm14 = vmmov %vm17349_vm13  ;;  %v862_v17 = vld [vmem:[#allocation2 + $0x84] sm:$0x7] }
  0x76   : > { %v1822_v32 = vshrl.u32 %v12123_v20, 16  ;;  %v821_v39 = vsel %vm11818_vm12, %v805_v55, %v820_v5  ;;  %v806_v40 = vrot.slane %v805_v55, 4  ;;  %v842_v53 = vrot.slane %v840_v19, 6  ;;  %v12151_v26 = vld [vmem:[%s17127_s1 + $0xa] sm:$0x3] }
  0x77   : > { %v12133_v51 = vld [vmem:[#allocation2 + $0x68] sm:$0xff]   ;;  %822 = vst [vmem:[#allocation2 + $0x74] sm:$0xe] %v821_v39  ;;  %v816_v46 = vrot.slane %v814_v30, 4  ;;  %v846_v54 = vshrl.u32 %v10264_v23, 16  ;;  %v10267_v38 = vpack.c.bf16 %v9655_v14, %v9655_v14  ;;  %v1820_v59 = vrot.slane %v1818_v35, 1 }
  0x78   : > { %v815_v12 = vsel %vm11824_vm8, %v806_v40, %v814_v30  ;;  %v849_v63 = vshll.u32 %v10264_v23, 16  ;;  %v875_v0 = vshll.u32 %v10265_v24, 16  ;;  %v1826_v4 = vshll.u32 %v12133_v51, 16  ;;  %10712 = vmatmul.mubr.msk.bf16.gmra.mxu1 %vm17349_vm13, %v12133_v51 }
  0x79   : > { %v1830_v56 = vshrl.u32 %v12133_v51, 16  ;;  %vm17350_vm15 = vcmask 27648   ;;  %v825_v49 = vsel %vm11832_vm4, %v816_v46, %v824_v21  ;;  %v843_v5 = vor.u32 %v842_v53, %v839_v33 }
  0x7a   : > { %823 = vst.msk [vmem:[#allocation2 + $0x78] sm:$0xf] %vm17350_vm15, %v815_v12  ;;  %vm17351_vm0 = vsmask.f32 7424  ;;  %v1824_v8 = vor.u32 %v1822_v32, %v1820_v59  ;;  %826 = vst [vmem:[#allocation2 + $0x7c] sm:$0x3] %v825_v49 }
  0x7b   : > { %v1821_v7 = vsel %vm17351_vm0, %v1816_v27, %v1820_v59  ;;  %v848_v9 = vrot.slane %v846_v54, 5  ;;  %v851_v11 = vrot.slane %v849_v63, 6  ;;  %v1828_v13 = vrot.slane %v1826_v4, 1  ;;  %vm17353_vm13 = vmmov %vm17351_vm0  ;;  %v900_v59 = vld [vmem:[#allocation2 + $0x8c] sm:$0xf]  ;;  %v12178_v49 = vld [vmem:[#allocation2 + $0x10] sm:$0xff]  }
  0x7c   : > { %10670 = vmatmul.mubr.msk.bf16.gmra.mxu0 %vm17352_vm14, %v1821_v7  ;;  %v859_v14 = vsel %vm11840_vm3, %v843_v5, %v858_v1  ;;  %v844_v16 = vrot.slane %v843_v5, 4  ;;  %v877_v18 = vrot.slane %v875_v0, 5  ;;  %v878_v55 = vshrl.u32 %v10265_v24, 16  ;;  %vm17354_vm3 = vmmov %vm17352_vm14  ;;  %v932_v12 = vld [vmem:[#allocation2 + $0x90] sm:$0xf] }
  0x7d   : > { %860 = vst [vmem:[#allocation2 + $0x7c] sm:$0xc] %v859_v14  ;;  %v852_v19 = vor.u32 %v851_v11, %v848_v9  ;;  %v884_v21 = vshll.u32 %v10266_v25, 16  ;;  %v888_v23 = vshrl.u32 %v10266_v25, 16  ;;  %v1829_v27 = vsel %vm17353_vm13, %v1824_v8, %v1828_v13  ;;  %vm17356_vm0 = vmmov %vm17354_vm3  ;;  %v2322_v14 = vld [vmem:[#allocation2] sm:$0xe] }
  0x7e   : > { %v897_v30 = vsel %vm11846_vm5, %v877_v18, %v896_v3  ;;  %v913_v52 = vshrl.u32 %v10267_v38, 16  ;;  %10673 = vmatprep.mubr.msk.bf16.mxu0 %vm17354_vm3, %v1829_v27  ;;  %v12157_v33 = vld [vmem:[#allocation2 + $0x70] sm:$0xff]   ;;  %v880_v25 = vrot.slane %v878_v55, 4  ;;  %v916_v1 = vshll.u32 %v10267_v38, 16  ;;  %v12173_v3 = vld [vmem:[#allocation2 + $0xc] sm:$0xf]  ;;  %vm17358_vm14 = vmmov %vm17353_vm13 }
  0x7f   : > { %v853_v24 = vsel %vm11856_vm11, %v844_v16, %v852_v19  ;;  %v854_v35 = vrot.slane %v852_v19, 4  ;;  %898 = vst [vmem:[#allocation2 + $0x84] sm:$0x8] %v897_v30  ;;  %v886_v32 = vrot.slane %v884_v21, 5  ;;  %v890_v39 = vrot.slane %v888_v23, 4  ;;  %10715 = vmatprep.mubr.msk.bf16.mxu1 %vm17356_vm0, %v12157_v33  ;;  %vm17359_vm13 = vmmov %vm17356_vm0 }
  0x80   : > { %861 = vst.msk [vmem:[#allocation2 + $0x80] sm:$0xf] %vm17350_vm15, %v853_v24  ;;  %v12162_v40 = vrot.slane %v913_v52, 7  ;;  %vm17355_vm5 = vcmask 1041408   ;;  %v1832_v46 = vor.u32 %v1830_v56, %v1828_v13  ;;  %v1834_v53 = vshll.u32 %v12157_v33, 16  ;;  %vm17360_vm3 = vmmov %vm17356_vm0  ;;  %v12210_v24 = vld [vmem:[#allocation2 + $0x18] sm:$0xff]  }
  0x81   : > { %v2860_v58 = vsel %vm17355_vm5, %v12001_v36, 0  ;;  %v863_v62 = vsel %vm11870_vm10, %v854_v35, %v862_v17  ;;  %v881_v54 = vor.u32 %v880_v25, %v877_v18  ;;  %v1838_v63 = vshrl.u32 %v12157_v33, 16  ;;  %v2636_v36 = vld [vmem:[#allocation2 + $0x8] sm:$0xe]  ;;  %vm17357_vm11 = vmmov %vm17355_vm5  ;;  %v11551_v27 = vld [vmem:[#allocation2 + $0x4] sm:$0xf] }
  0x82   : > { %10762 = vmatpush3.bf16.msra.mxu1 %v2860_v58  ;;  %864 = vst [vmem:[#allocation2 + $0x84] sm:$0x7] %v863_v62  ;;  %v891_v38 = vor.u32 %v890_v39, %v886_v32  ;;  %v918_v0 = vor.u32 %v916_v1, %v12162_v40  ;;  %v1836_v4 = vrot.slane %v1834_v53, 1  ;;  %v2330_v6 = vrot.slane %v11905_v41, 1  ;;  %v12221_v39 = vld [vmem:[#allocation2 + $0x20] sm:$0xff]  }
  0x83   : > { %11336 = vmatprep.subr.msk.bf16.mxu1 %vm17357_vm11, %v12151_v26  ;;  %v882_v56 = vrot.slane %v881_v54, 4  ;;  %vm17164_vm10 = vcmask 1046528   ;;  %v2332_v9 = vrot.slane %v11930_v61, 1  ;;  %v12202_v18 = vcombine.low %v2636_v36, %v12173_v3 }
  0x84   : > { %v12180_v5 = vld [vmem:[#allocation2 + $0x78] sm:$0xff]   ;;  %v892_v7 = vrot.slane %v891_v38, 4  ;;  %v933_v8 = vsel %vm11894_vm6, %v918_v0, %v932_v12  ;;  %v1837_v11 = vsel %vm17358_vm14, %v1832_v46, %v1836_v4  ;;  %v1840_v16 = vor.u32 %v1838_v63, %v1836_v4  ;;  %vm17361_vm6 = vmmov %vm17358_vm14 }
  0x85   : > { %v887_v13 = vsel %vm11887_vm7, %v882_v56, %v886_v32  ;;  %934 = vst [vmem:[#allocation2 + $0x90] sm:$0xf] %v933_v8  ;;  %10674 = vmatmul.mubr.msk.bf16.gmra.mxu0 %vm17359_vm13, %v1837_v11  ;;  %v1842_v17 = vshll.u32 %v12180_v5, 16  ;;  %10716 = vmatmul.mubr.msk.bf16.gmra.mxu1 %vm17360_vm3, %v12180_v5  ;;  %v1846_v61 = vshrl.u32 %v12180_v5, 16  ;;  %v12199_v22 = vsel %vm17164_vm10, %v2330_v6, %v2332_v9  ;;  %vm17362_vm7 = vmmov %vm17356_vm0 }
  0x86   : > { %899 = vst.msk [vmem:[#allocation2 + $0x88] sm:$0xf] %vm17350_vm15, %v887_v13  ;;  %v901_v29 = vsel %vm11901_vm2, %v892_v7, %v900_v59  ;;  %v2334_v55 = vrot.slane %v11951_v28, 1  ;;  %v2336_v21 = vrot.slane %v11960_v45, 1  ;;  %v919_v34 = vrot.slane %v12162_v40, 4  ;;  %vm17363_vm2 = vmmov %vm17356_vm0  ;;  %v12248_v7 = vld [vmem:[#allocation2 + $0x30] sm:$0xff]  }
  0x87   : > { %902 = vst [vmem:[#allocation2 + $0x8c] sm:$0xf] %v901_v29  ;;  %v1844_v19 = vrot.slane %v1842_v17, 1  ;;  %v9716_v30 = vcombine.low %v2322_v14, %v11551_v27  ;;  %v2769_v52 = vrot.slane %v12178_v49, 1  ;;  %v2338_v35 = vrot.slane %v11977_v60, 1  ;;  %v12228_v60 = vld [vmem:[#allocation2 + $0x28] sm:$0xff]   ;;  %vm17364_vm0 = vmmov %vm17361_vm6 }
  0x88   : > { %v2768_v32 = vrot.slane %v12202_v18, 1  ;;  %v12216_v28 = vsel %vm17164_vm10, %v2332_v9, %v2334_v55  ;;  %v12219_v45 = vsel %vm17164_vm10, %v2334_v55, %v2336_v21  ;;  %v2340_v54 = vrot.slane %v12015_v50, 1  ;;  %vm17365_vm11 = vmmov %vm17363_vm2  ;;  %v12259_v14 = vld [vmem:[#allocation2 + $0x38] sm:$0xff]  }
  0x89   : > { %v12206_v23 = vld [vmem:[#allocation2 + $0x80] sm:$0xff]   ;;  %v1845_v25 = vsel %vm17361_vm6, %v1840_v16, %v1844_v19  ;;  %v1848_v1 = vor.u32 %v1846_v61, %v1844_v19  ;;  %v12233_v62 = vsel %vm17164_vm10, %v2336_v21, %v2338_v35  ;;  %v2329_v12 = vrot.slane %v9716_v30, 1  ;;  %vm17366_vm14 = vmmov %vm17363_vm2  ;;  %v12271_v61 = vld [vmem:[#allocation2 + $0x48] sm:$0xff]  }
  0x8a   : > { %10677 = vmatprep.mubr.msk.bf16.mxu0 %vm17362_vm7, %v1845_v25  ;;  %v1850_v58 = vshll.u32 %v12206_v23, 16  ;;  %v1854_v46 = vshrl.u32 %v12206_v23, 16  ;;  %10719 = vmatprep.mubr.msk.bf16.mxu1 %vm17363_vm2, %v12206_v23  ;;  %v12238_v63 = vsel %vm17355_vm5, %v12013_v47, 0  ;;  %v2342_v38 = vrot.slane %v12045_v43, 1  ;;  %v12264_v16 = vld [vmem:[#allocation2 + $0x40] sm:$0xff]   ;;  %vm17367_vm13 = vmmov %vm17363_vm2 }
  0x8b   : > { %v2770_v4 = vsel %vm17164_vm10, %v2768_v32, %v2769_v52  ;;  %v12246_v56 = vsel %vm17164_vm10, %v2338_v35, %v2340_v54  ;;  %v2344_v50 = vrot.slane %v12060_v15, 1  ;;  %v2771_v47 = vrot.slane %v12210_v24, 1  ;;  %v9656_v35 = vld [vmem:[%s11797_s29 + $0xf8] sm:$0xff]  ;;  %vm17368_vm3 = vmmov %vm17364_vm0 }
  0x8c   : > { %v12230_v53 = vld [vmem:[#allocation2 + $0x90] ss:$0 sps:$4 sm:$0x11]   ;;  %v1852_v59 = vrot.slane %v1850_v58, 1  ;;  %v2773_v9 = vrot.slane %v12221_v39, 1  ;;  %v12262_v15 = vsel %vm17164_vm10, %v2340_v54, %v2342_v38  ;;  %v2775_v17 = vrot.slane %v12228_v60, 1  ;;  %vm17369_vm15 = vmmov %vm17363_vm2 }
  0x8d   : > { %v1866_v36 = vshll.u32 %v12230_v53, 16  ;;  %v12269_v29 = vsel %vm17164_vm10, %v2342_v38, %v2344_v50  ;;  %v2346_v19 = vrot.slane %v12057_v10, 1  ;;  %v2777_v27 = vrot.slane %v12248_v7, 1  ;;  %vm17370_vm6 = vmmov %vm17364_vm0 }
  0x8e   : > { %v12241_v0 = vld [vmem:[#allocation2 + $0x88] sm:$0xff]   ;;  %v1853_v8 = vsel %vm17364_vm0, %v1848_v1, %v1852_v59  ;;  %v1856_v43 = vor.u32 %v1854_v46, %v1852_v59  ;;  %v2348_v30 = vrot.slane %v12083_v2, 1  ;;  %v2331_v25 = vsel %vm17164_vm10, %v2329_v12, %v2330_v6  ;;  %v12283_v1 = vld [vmem:[#allocation2 + $0x50] sm:$0xff]   ;;  %vm17371_vm7 = vmmov %vm17363_vm2 }
  0x8f   : > { %10678 = vmatmul.mubr.msk.bf16.gmra.mxu0 %vm17365_vm11, %v1853_v8  ;;  %v1858_v11 = vshll.u32 %v12241_v0, 16  ;;  %v1862_v13 = vshrl.u32 %v12241_v0, 16  ;;  %10720 = vmatmul.mubr.msk.bf16.gmra.mxu1 %vm17366_vm14, %v12241_v0  ;;  %v1868_v21 = vrot.slane %v1866_v36, 1  ;;  %v12281_v32 = vsel %vm17164_vm10, %v2344_v50, %v2346_v19  ;;  %vm17372_vm5 = vmmov %vm17363_vm2 }
  0x90   : > { %10763 = vmatprep.mubr.msk.bf16.mxu1 %vm17367_vm13, %v2770_v4  ;;  %v2350_v58 = vrot.slane %v12105_v42, 1  ;;  %v2352_v10 = vrot.slane %v12123_v20, 1  ;;  %v2772_v59 = vsel %vm17164_vm10, %v2769_v52, %v2771_v47  ;;  %v12290_v2 = vsel %vm17164_vm10, %v2346_v19, %v2348_v30  ;;  %v12303_v52 = vld [vmem:[#allocation2 + $0x58] sm:$0xff]   ;;  %v12315_v19 = vld [vmem:[#allocation2 + $0x68] sm:$0xff]   ;;  %vm17373_vm0 = vmmov %vm17363_vm2 }
  0x91   : > { %v1860_v55 = vrot.slane %v1858_v11, 1  ;;  %v2779_v41 = vrot.slane %v12259_v14, 1  ;;  %v2781_v6 = vrot.slane %v12264_v16, 1  ;;  %v2774_v38 = vsel %vm17164_vm10, %v2771_v47, %v2773_v9  ;;  %vm17375_vm13 = vmmov %vm17373_vm0 }
  0x92   : > { %v12296_v12 = vsel %vm17164_vm10, %v2348_v30, %v2350_v58  ;;  %v12299_v42 = vsel %vm17164_vm10, %v2350_v58, %v2352_v10  ;;  %v2354_v36 = vrot.slane %v12133_v51, 1  ;;  %v2356_v4 = vrot.slane %v12157_v33, 1 }
  0x93   : > { %v1861_v46 = vsel %vm17368_vm3, %v1856_v43, %v1860_v55  ;;  %v1864_v54 = vor.u32 %v1862_v13, %v1860_v55  ;;  %v2776_v50 = vsel %vm17164_vm10, %v2773_v9, %v2775_v17  ;;  %v2783_v8 = vrot.slane %v12271_v61, 1  ;;  %v12309_v43 = vld [vmem:[#allocation2 + $0x60] sm:$0xff]   ;;  %vm17376_vm3 = vmmov %vm17373_vm0 }
  0x94   : > { %10681 = vmatprep.mubr.msk.bf16.mxu0 %vm17369_vm15, %v1861_v46  ;;  %v2358_v11 = vrot.slane %v12180_v5, 1  ;;  %v10268_v13 = vpack.c.bf16 %v9656_v35, %v9656_v35  ;;  %v2778_v47 = vsel %vm17164_vm10, %v2775_v17, %v2777_v27  ;;  %v12318_v51 = vsel %vm17164_vm10, %v2352_v10, %v2354_v36  ;;  %vm17377_vm15 = vmmov %vm17373_vm0 }
  0x95   : > { %v1869_v20 = vsel %vm17370_vm6, %v1864_v54, %v1868_v21  ;;  %v12321_v33 = vsel %vm17164_vm10, %v2354_v36, %v2356_v4  ;;  %v2360_v9 = vrot.slane %v12206_v23, 1  ;;  %v12327_v5 = vsel %vm17164_vm10, %v2777_v27, %v2779_v41 }
  0x96   : > { %v12330_v55 = vsel %vm17164_vm10, %v2779_v41, %v2781_v6  ;;  %v2785_v17 = vrot.slane %v12283_v1, 1  ;;  %v12334_v21 = vsel %vm17164_vm10, %v2356_v4, %v2358_v11  ;;  %v2362_v23 = vrot.slane %v12241_v0, 1 }
  0x97   : > { %10682 = vmatmul.mubr.msk.bf16.gmra.mxu0 %vm17371_vm7, %v1869_v20  ;;  %10764 = vmatmul.mubr.msk.bf16.vlgmr.msra.gmra.mxu1 %vm17363_vm2, %v2772_v59  ;;  %v12338_v35 = vsel %vm17164_vm10, %v2358_v11, %v2360_v9  ;;  %v12345_v27 = vsel %vm17164_vm10, %v2781_v6, %v2783_v8  ;;  %v921_v58 = vshrl.u32 %v10268_v13, 16  ;;  %v924_v10 = vshll.u32 %v10268_v13, 16  ;;  %vm17378_vm7 = vmmov %vm17373_vm0 }
  0x98   : > { %10725 = vmatprep.mubr.msk.bf16.mxu0 %vm17372_vm5, %v2331_v25  ;;  %10767 = vmatprep.mubr.msk.bf16.mxu1 %vm17373_vm0, %v2774_v38  ;;  %v2364_v25 = vrot.slane %v12230_v53, 1  ;;  %vm17374_vm11 = vcmask 1041408   ;;  %v12352_v41 = vsel %vm17164_vm10, %v2360_v9, %v2362_v23  ;;  %v936_v53 = vld [vmem:[#allocation2 + $0x98] sm:$0x1]  ;;  %v3083_v6 = vshrl.u32 %v12202_v18, 16 }
  0x99   : > { %v3621_v46 = vsel %vm17374_vm11, %v12151_v26, 0  ;;  %v923_v20 = vrot.slane %v921_v58, 7  ;;  %v3086_v38 = vshll.u32 %v12202_v18, 16  ;;  %v3091_v36 = vshrl.u32 %v12178_v49, 16  ;;  %v12363_v26 = vld [vmem:[%s17127_s1 + $0xc] sm:$0x3]  ;;  %vm17380_vm5 = vmmov %vm17374_vm11 }
  0x9a   : > { %v12355_v0 = vsel %vm17164_vm10, %v2362_v23, %v2364_v25  ;;  %10838 = vmatpush3.bf16.msra.mxu1 %v3621_v46  ;;  %vm17162_vm14 = vsmask.f32 6400  ;;  %v3094_v4 = vshll.u32 %v12178_v49, 16  ;;  %v3100_v11 = vshrl.u32 %v12210_v24, 16  ;;  %v3522_v46 = vld [vmem:[#allocation2 + $0x8] sm:$0xc]  ;;  %vm17383_vm11 = vmmov %vm17373_vm0 }
  0x9b   : > { %v3103_v13 = vshll.u32 %v12210_v24, 16  ;;  %v926_v9 = vor.u32 %v924_v10, %v923_v20  ;;  %v928_v23 = vrot.slane %v923_v20, 4  ;;  %v3085_v25 = vrot.slane %v3083_v6, 1 }
  0x9c   : > { %v3088_v58 = vrot.slane %v3086_v38, 2  ;;  %v3093_v18 = vrot.slane %v3091_v36, 1  ;;  %v3096_v59 = vrot.slane %v3094_v4, 2  ;;  %v3102_v54 = vrot.slane %v3100_v11, 1 }
  0x9d   : > { %v3105_v30 = vrot.slane %v3103_v13, 2  ;;  %v927_v10 = vsel %vm11914_vm9, %v919_v34, %v926_v9  ;;  %v937_v20 = vsel %vm11926_vm1, %v928_v23, %v936_v53  ;;  %vm17163_vm6 = vcmask 1045504   ;;  %vm17381_vm9 = vmmov %vm17373_vm0 }
  0x9e   : > { %vm17379_vm2 = vcmask 27648   ;;  %938 = vst [vmem:[#allocation2 + $0x98] sm:$0x1] %v937_v20  ;;  %v9794_v40 = vcombine.low %v3522_v46, %v12173_v3  ;;  %v3530_v48 = vrot.slane %v12178_v49, 2  ;;  %v3532_v34 = vrot.slane %v12210_v24, 2  ;;  %v12397_v3 = vld [vmem:[#allocation2 + $0x70] sm:$0xff]   ;;  %vm17382_vm1 = vmmov %vm17373_vm0 }
  0x9f   : > { %10726 = vmatmul.mubr.msk.bf16.vlgmr.msra.gmra.mxu0 %vm17375_vm13, %v12199_v22  ;;  %10768 = vmatmul.mubr.msk.bf16.gmra.mxu1 %vm17376_vm3, %v2776_v50  ;;  %v3089_v22 = vor.u32 %v3088_v58, %v3085_v25  ;;  %935 = vst.msk [vmem:[#allocation2 + $0x94] sm:$0xf] %vm17379_vm2, %v927_v10  ;;  %v3097_v50 = vor.u32 %v3096_v59, %v3093_v18  ;;  %v3109_v57 = vshrl.u32 %v12221_v39, 16  ;;  %v3534_v11 = vrot.slane %v12221_v39, 2  ;;  %v12424_v10 = vld [vmem:[%s17127_s1 + $0xe] sm:$0x3]  ;;  %vm17384_vm13 = vmmov %vm17380_vm5 }
  0xa0   : > { %10800 = vmatpush3.bf16.msra.mxu0 %v12238_v63  ;;  %10729 = vmatprep.mubr.msk.bf16.mxu0 %vm17377_vm15, %v12216_v28  ;;  %v3106_v28 = vor.u32 %v3105_v30, %v3102_v54  ;;  %v3112_v63 = vshll.u32 %v12221_v39, 16  ;;  %v3529_v6 = vrot.slane %v9794_v40, 2  ;;  %v3121_v30 = vshll.u32 %v12228_v60, 16  ;;  %vm17391_vm3 = vmmov %vm17373_vm0 }
  0xa1   : > { %10771 = vmatprep.mubr.msk.bf16.mxu1 %vm17378_vm7, %v2778_v47  ;;  %11337 = vmatprep.subr.msk.bf16.mxu0 %vm17380_vm5, %v12363_v26  ;;  %v3118_v47 = vshrl.u32 %v12228_v60, 16  ;;  %v12391_v53 = vsel %vm17162_vm14, %v3089_v22, %v3097_v50  ;;  %v12400_v49 = vsel %vm17163_vm6, %v3530_v48, %v3532_v34  ;;  %v3111_v24 = vrot.slane %v3109_v57, 1  ;;  %vm17392_vm15 = vmmov %vm17373_vm0 }
  0xa2   : > { %v12394_v59 = vsel %vm17162_vm14, %v3097_v50, %v3106_v28  ;;  %v3114_v54 = vrot.slane %v3112_v63, 2  ;;  %v12403_v36 = vsel %vm17163_vm6, %v3529_v6, %v3530_v48  ;;  %v3123_v4 = vrot.slane %v3121_v30, 2  ;;  %11338 = vmatprep.subr.msk.bf16.mxu1 %vm17384_vm13, %v12424_v10  ;;  %vm17393_vm7 = vmmov %vm17373_vm0 }
  0xa3   : > { %v3120_v38 = vrot.slane %v3118_v47, 1  ;;  %v3536_v13 = vrot.slane %v12228_v60, 2  ;;  %v3127_v23 = vshrl.u32 %v12248_v7, 16  ;;  %v3130_v25 = vshll.u32 %v12248_v7, 16  ;;  %vm17394_vm2 = vmmov %vm17373_vm0 }
  0xa4   : > { %v3115_v9 = vor.u32 %v3114_v54, %v3111_v24  ;;  %v3136_v58 = vshrl.u32 %v12259_v14, 16  ;;  %v12415_v18 = vsel %vm17163_vm6, %v3532_v34, %v3534_v11  ;;  %v3139_v60 = vshll.u32 %v12259_v14, 16  ;;  %vm17395_vm5 = vmmov %vm17373_vm0 }
  0xa5   : > { %v3124_v46 = vor.u32 %v3123_v4, %v3120_v38  ;;  %v12418_v39 = vsel %vm17163_vm6, %v3534_v11, %v3536_v13  ;;  %v3129_v22 = vrot.slane %v3127_v23, 1  ;;  %v3132_v40 = vrot.slane %v3130_v25, 2  ;;  %vm17399_vm13 = vmmov %vm17373_vm0 }
  0xa6   : > { %v12437_v20 = vsel %vm17162_vm14, %v3106_v28, %v3115_v9  ;;  %v3141_v48 = vrot.slane %v3139_v60, 2  ;;  %v3538_v34 = vrot.slane %v12248_v7, 2  ;;  %v3540_v28 = vrot.slane %v12259_v14, 2 }
  0xa7   : > { %10730 = vmatmul.mubr.msk.bf16.gmra.mxu0 %vm17381_vm9, %v12219_v45  ;;  %10772 = vmatmul.mubr.msk.bf16.gmra.mxu1 %vm17382_vm1, %v12327_v5  ;;  %v2786_v45 = vsel %vm17164_vm10, %v2783_v8, %v2785_v17  ;;  %v17136_v5 = vrot.slane %v12397_v3, 1  ;;  %v12440_v50 = vsel %vm17162_vm14, %v3115_v9, %v3124_v46  ;;  %v3145_v57 = vshrl.u32 %v12264_v16, 16  ;;  %vm17396_vm9 = vmmov %vm17373_vm0 }
  0xa8   : > { %10733 = vmatprep.mubr.msk.bf16.mxu0 %vm17373_vm0, %v12233_v62  ;;  %10775 = vmatprep.mubr.msk.bf16.mxu1 %vm17383_vm11, %v12330_v55  ;;  %v3138_v62 = vrot.slane %v3136_v58, 1  ;;  %v17385_v55 = vrot.slane %v12303_v52, 1  ;;  %v17386_v63 = vrot.slane %v12309_v43, 1  ;;  %v3133_v30 = vor.u32 %v3132_v40, %v3129_v22  ;;  %vm17397_vm1 = vmmov %vm17373_vm0 }
  0xa9   : > { %v3148_v54 = vshll.u32 %v12264_v16, 16  ;;  %v17388_v38 = vrot.slane %v12315_v19, 1  ;;  %v12466_v14 = vsel %vm17163_vm6, %v3536_v13, %v3538_v34  ;;  %v12469_v4 = vsel %vm17163_vm6, %v3538_v34, %v3540_v28  ;;  %vm17398_vm11 = vmmov %vm17373_vm0 }
  0xaa   : > { %v2788_v8 = vsel %vm17164_vm10, %v2785_v17, %v17385_v55  ;;  %v17387_v47 = vmov %v17385_v55  ;;  %v3142_v24 = vor.u32 %v3141_v48, %v3138_v62  ;;  %v17389_v17 = vmov %v17386_v63 }
  0xab   : > { %v2790_v6 = vsel %vm17164_vm10, %v17387_v47, %v17386_v63  ;;  %v12463_v7 = vsel %vm17164_vm10, %v17389_v17, %v17388_v38  ;;  %v3147_v11 = vrot.slane %v3145_v57, 1  ;;  %v17390_v9 = vmov %v17388_v38 }
  0xac   : > { %v12476_v23 = vsel %vm17164_vm10, %v17390_v9, %v17136_v5  ;;  %v12479_v25 = vsel %vm17162_vm14, %v3124_v46, %v3133_v30  ;;  %v12482_v58 = vsel %vm17162_vm14, %v3133_v30, %v3142_v24  ;;  %v3150_v60 = vrot.slane %v3148_v54, 2 }
  0xad   : > { %v3154_v13 = vshrl.u32 %v12271_v61, 16  ;;  %v3157_v22 = vshll.u32 %v12271_v61, 16  ;;  %v3542_v40 = vrot.slane %v12264_v16, 2  ;;  %v3544_v62 = vrot.slane %v12271_v61, 2 }
  0xae   : > { %v3151_v46 = vor.u32 %v3150_v60, %v3147_v11  ;;  %v3163_v48 = vshrl.u32 %v12283_v1, 16  ;;  %v3166_v55 = vshll.u32 %v12283_v1, 16  ;;  %v3172_v34 = vshrl.u32 %v12303_v52, 16 }
  0xaf   : > { %10734 = vmatmul.mubr.msk.bf16.gmra.mxu0 %vm17391_vm3, %v12246_v56  ;;  %10776 = vmatmul.mubr.msk.bf16.gmra.mxu1 %vm17392_vm15, %v12345_v27  ;;  %v3156_v16 = vrot.slane %v3154_v13, 1  ;;  %v3159_v61 = vrot.slane %v3157_v22, 2  ;;  %v12499_v57 = vsel %vm17163_vm6, %v3540_v28, %v3542_v40  ;;  %v12502_v56 = vsel %vm17163_vm6, %v3542_v40, %v3544_v62  ;;  %vm17400_vm3 = vmmov %vm17373_vm0 }
  0xb0   : > { %10737 = vmatprep.mubr.msk.bf16.mxu0 %vm17393_vm7, %v12262_v15  ;;  %10779 = vmatprep.mubr.msk.bf16.mxu1 %vm17394_vm2, %v2786_v45  ;;  %v12505_v27 = vsel %vm17162_vm14, %v3142_v24, %v3151_v46  ;;  %v3165_v63 = vrot.slane %v3163_v48, 1  ;;  %v3168_v47 = vrot.slane %v3166_v55, 2  ;;  %v3174_v30 = vrot.slane %v3172_v34, 1  ;;  %vm17401_vm15 = vmmov %vm17373_vm0 }
  0xb1   : > { %v3160_v54 = vor.u32 %v3159_v61, %v3156_v16  ;;  %v3175_v38 = vshll.u32 %v12303_v52, 16  ;;  %v3546_v15 = vrot.slane %v12283_v1, 2  ;;  %v3548_v45 = vrot.slane %v12303_v52, 2  ;;  %v12522_v1 = vld [vmem:[#allocation2 + $0x78] sm:$0xff]   ;;  %vm17403_vm7 = vmmov %vm17373_vm0 }
  0xb2   : > { %v3169_v17 = vor.u32 %v3168_v47, %v3165_v63  ;;  %v3181_v28 = vshrl.u32 %v12309_v43, 16  ;;  %v3184_v11 = vshll.u32 %v12309_v43, 16  ;;  %v3190_v9 = vshrl.u32 %v12315_v19, 16  ;;  %vm17404_vm2 = vmmov %vm17373_vm0 }
  0xb3   : > { %v12514_v24 = vsel %vm17162_vm14, %v3151_v46, %v3160_v54  ;;  %v3177_v60 = vrot.slane %v3175_v38, 2  ;;  %v12517_v13 = vsel %vm17163_vm6, %v3544_v62, %v3546_v15  ;;  %v12520_v22 = vsel %vm17163_vm6, %v3546_v15, %v3548_v45  ;;  %v11465_v38 = vld [vmem:[#allocation2 + $0x88] sm:$0xff]  }
  0xb4   : > { %v12525_v52 = vsel %vm17162_vm14, %v3160_v54, %v3169_v17  ;;  %v3183_v40 = vrot.slane %v3181_v28, 1  ;;  %v3186_v48 = vrot.slane %v3184_v11, 2  ;;  %v3192_v55 = vrot.slane %v3190_v9, 1 }
  0xb5   : > { %v3178_v34 = vor.u32 %v3177_v60, %v3174_v30  ;;  %v3193_v16 = vshll.u32 %v12315_v19, 16  ;;  %v3550_v46 = vrot.slane %v12309_v43, 2  ;;  %v3552_v61 = vrot.slane %v12315_v19, 2  ;;  %v11464_v30 = vld [vmem:[#allocation2 + $0x80] sm:$0xff]  }
  0xb6   : > { %v3187_v62 = vor.u32 %v3186_v48, %v3183_v40  ;;  %v3199_v63 = vshrl.u32 %v12397_v3, 16  ;;  %v3202_v47 = vshll.u32 %v12397_v3, 16  ;;  %v3208_v54 = vshrl.u32 %v12522_v1, 16 }
  0xb7   : > { %10738 = vmatmul.mubr.msk.bf16.gmra.mxu0 %vm17395_vm5, %v12269_v29  ;;  %10780 = vmatmul.mubr.msk.bf16.gmra.mxu1 %vm17396_vm9, %v2788_v8  ;;  %v12540_v43 = vsel %vm17162_vm14, %v3169_v17, %v3178_v34  ;;  %v3195_v19 = vrot.slane %v3193_v16, 2  ;;  %v12543_v29 = vsel %vm17163_vm6, %v3548_v45, %v3550_v46  ;;  %v12546_v8 = vsel %vm17163_vm6, %v3550_v46, %v3552_v61  ;;  %vm17405_vm5 = vmmov %vm17373_vm0 }
  0xb8   : > { %10741 = vmatprep.mubr.msk.bf16.mxu0 %vm17397_vm1, %v12281_v32  ;;  %10783 = vmatprep.mubr.msk.bf16.mxu1 %vm17373_vm0, %v2790_v6  ;;  %v12549_v15 = vsel %vm17162_vm14, %v3178_v34, %v3187_v62  ;;  %v3201_v28 = vrot.slane %v3199_v63, 1  ;;  %v3204_v11 = vrot.slane %v3202_v47, 2  ;;  %v3210_v32 = vrot.slane %v3208_v54, 1  ;;  %vm17406_vm9 = vmmov %vm17373_vm0 }
  0xb9   : > { %v3196_v9 = vor.u32 %v3195_v19, %v3192_v55  ;;  %v3211_v6 = vshll.u32 %v12522_v1, 16  ;;  %v3554_v17 = vrot.slane %v12397_v3, 2  ;;  %v3556_v60 = vrot.slane %v12522_v1, 2  ;;  %v12563_v55 = vld [vmem:[#allocation2 + $0x90] sm:$0xff]   ;;  %vm17407_vm1 = vmmov %vm17373_vm0 }
  0xba   : > { %v3205_v45 = vor.u32 %v3204_v11, %v3201_v28  ;;  %v3217_v40 = vshrl.u32 %v11464_v30, 16  ;;  %v3220_v48 = vshll.u32 %v11464_v30, 16  ;;  %v3226_v16 = vshrl.u32 %v11465_v38, 16 }
  0xbb   : > { %v12555_v46 = vsel %vm17162_vm14, %v3187_v62, %v3196_v9  ;;  %v3213_v5 = vrot.slane %v3211_v6, 2  ;;  %v12558_v34 = vsel %vm17163_vm6, %v3552_v61, %v3554_v17  ;;  %v12561_v63 = vsel %vm17163_vm6, %v3554_v17, %v3556_v60 }
  0xbc   : > { %v12566_v47 = vsel %vm17162_vm14, %v3196_v9, %v3205_v45  ;;  %v3219_v54 = vrot.slane %v3217_v40, 1  ;;  %v3222_v19 = vrot.slane %v3220_v48, 2  ;;  %v3228_v28 = vrot.slane %v3226_v16, 1 }
  0xbd   : > { %v3214_v11 = vor.u32 %v3213_v5, %v3210_v32  ;;  %v3229_v44 = vshll.u32 %v11465_v38, 16  ;;  %v3558_v37 = vrot.slane %v11464_v30, 2  ;;  %v3560_v62 = vrot.slane %v11465_v38, 2 }
  0xbe   : > { %v2795_v61 = vrot.slane %v12522_v1, 1  ;;  %v3223_v6 = vor.u32 %v3222_v19, %v3219_v54  ;;  %v3235_v17 = vshrl.u32 %v12563_v55, 16  ;;  %v3238_v9 = vshll.u32 %v12563_v55, 16 }
  0xbf   : > { %10742 = vmatmul.mubr.msk.bf16.gmra.mxu0 %vm17398_vm11, %v12290_v2  ;;  %10784 = vmatmul.mubr.msk.bf16.gmra.mxu1 %vm17399_vm13, %v12463_v7  ;;  %v12580_v5 = vsel %vm17162_vm14, %v3205_v45, %v3214_v11  ;;  %v3231_v2 = vrot.slane %v3229_v44, 2  ;;  %v12583_v32 = vsel %vm17163_vm6, %v3556_v60, %v3558_v37  ;;  %v12586_v7 = vsel %vm17163_vm6, %v3558_v37, %v3560_v62  ;;  %vm17408_vm11 = vmmov %vm17373_vm0 }
  0xc0   : > { %10745 = vmatprep.mubr.msk.bf16.mxu0 %vm17400_vm3, %v12296_v12  ;;  %10787 = vmatprep.mubr.msk.bf16.mxu1 %vm17401_vm15, %v12476_v23  ;;  %v2797_v1 = vrot.slane %v11464_v30, 1  ;;  %v12589_v40 = vsel %vm17162_vm14, %v3214_v11, %v3223_v6  ;;  %v3237_v48 = vrot.slane %v3235_v17, 1  ;;  %v3240_v16 = vrot.slane %v3238_v9, 2  ;;  %vm17409_vm13 = vmmov %vm17373_vm0 }
  0xc1   : > { %v3232_v12 = vor.u32 %v3231_v2, %v3228_v28  ;;  %v3562_v54 = vrot.slane %v12563_v55, 2  ;;  %v17402_v45 = vrot.slane %v12397_v3, 1  ;;  %v2799_v3 = vrot.slane %v11465_v38, 1  ;;  %vm17410_vm3 = vmmov %vm17373_vm0  ;;  %v12731_v38 = vld [vmem:[#allocation2 + $0x50] sm:$0xff]  }
  0xc2   : > { %v12592_v23 = vor.u32 %v3240_v16, %v3237_v48  ;;  %v2798_v30 = vsel %vm17164_vm10, %v2795_v61, %v2797_v1  ;;  %v2801_v28 = vrot.slane %v12563_v55, 1  ;;  %vm17411_vm15 = vmmov %vm17373_vm0 }
  0xc3   : > { %v2796_v44 = vsel %vm17164_vm10, %v17402_v45, %v2795_v61  ;;  %v12598_v60 = vsel %vm17162_vm14, %v3223_v6, %v3232_v12  ;;  %v12603_v37 = vsel %vm17163_vm6, %v3560_v62, %v3562_v54  ;;  %v2800_v11 = vsel %vm17164_vm10, %v2797_v1, %v2799_v3  ;;  %v11467_v62 = vld [vmem:[#allocation2 + $0x98] ss:$0 sps:$4 sm:$0x11]  }
  0xc4   : > { %v12608_v19 = vsel %vm17162_vm14, %v3232_v12, %v12592_v23  ;;  %v2802_v61 = vsel %vm17164_vm10, %v2799_v3, %v2801_v28 }
  0xc7   : > { %10746 = vmatmul.mubr.msk.bf16.gmra.mxu0 %vm17403_vm7, %v12299_v42  ;;  %10788 = vmatmul.mubr.msk.bf16.gmra.mxu1 %vm17404_vm2, %v2796_v44  ;;  %v2803_v42 = vrot.slane %v11467_v62, 1  ;;  %vm17412_vm7 = vmmov %vm17373_vm0  ;;  %v12762_v62 = vld [vmem:[#allocation2 + $0x58] sm:$0xff]  }
  0xc8   : > { %10749 = vmatprep.mubr.msk.bf16.mxu0 %vm17405_vm5, %v12318_v51  ;;  %10791 = vmatprep.mubr.msk.bf16.mxu1 %vm17406_vm9, %v2798_v30  ;;  %vm17413_vm2 = vmmov %vm17373_vm0  ;;  %vm17414_vm5 = vcmask 1041408  }
  0xc9   : > { %v2804_v51 = vsel %vm17164_vm10, %v2801_v28, %v2803_v42  ;;  %vm17415_vm9 = vmmov %vm17373_vm0  ;;  %vm17596_vm10 = vcmask 31744  }
  0xcf   : > { %10750 = vmatmul.mubr.msk.bf16.gmra.mxu0 %vm17407_vm1, %v12321_v33  ;;  %10792 = vmatmul.mubr.msk.bf16.gmra.mxu1 %vm17373_vm0, %v2800_v11  ;;  %v4507_v33 = vsel %vm17414_vm5, %v12424_v10, 0  ;;  %vm17416_vm1 = vmmov %vm17373_vm0 }
  0xd0   : > { %10753 = vmatprep.mubr.msk.bf16.mxu0 %vm17408_vm11, %v12334_v21  ;;  %10795 = vmatprep.mubr.msk.bf16.mxu1 %vm17409_vm13, %v2802_v61  ;;  %vm17417_vm11 = vmmov %vm17373_vm0 }
  0xd1   : > { %vm17418_vm13 = vmmov %vm17414_vm5 }
  0xd2   : > { %v4060_v21 = vsel %vm17418_vm13, %v12363_v26, 0  ;;  %vm17157_vm13 = vcmask 1044480  }
  0xd7   : > { %10754 = vmatmul.mubr.msk.bf16.gmra.mxu0 %vm17410_vm3, %v12338_v35  ;;  %10796 = vmatmul.mubr.msk.bf16.gmra.mxu1 %vm17411_vm15, %v2804_v51  ;;  %v12648_v35 = vld [vmem:[%s17127_s1 + $0x10] sm:$0x3]  ;;  %vm17419_vm3 = vmmov %vm17373_vm0 }
  0xd8   : > { %10757 = vmatprep.mubr.msk.bf16.mxu0 %vm17412_vm7, %v12352_v41  ;;  %10839 = vmatprep.mubr.msk.bf16.mxu1 %vm17413_vm2, %v12403_v36  ;;  %vm17420_vm15 = vmmov %vm17373_vm0  ;;  %v12668_v41 = vld [vmem:[#allocation2 + $0x18] sm:$0xff]   ;;  %v12689_v36 = vld [vmem:[#allocation2 + $0x30] sm:$0xff]  }
  0xd9   : > { %vm17421_vm7 = vmmov %vm17373_vm0  ;;  %v17141_v26 = vrot.slane %v12668_v41, 3 }
  0xda   : > { %vm17422_vm2 = vmmov %vm17373_vm0 }
  0xdf   : > { %10758 = vmatmul.mubr.msk.bf16.gmra.mxu0 %vm17415_vm9, %v12355_v0  ;;  %10840 = vmatmul.mubr.msk.bf16.vlgmr.msra.gmra.mxu1 %vm17416_vm1, %v12400_v49  ;;  %vm17423_vm9 = vmmov %vm17373_vm0  ;;  %v12670_v0 = vld [vmem:[#allocation2 + $0x20] sm:$0xff]   ;;  %v12687_v49 = vld [vmem:[#allocation2 + $0x28] sm:$0xff]  }
  0xe0   : > { %10801 = vmatprep.mubr.msk.bf16.mxu0 %vm17373_vm0, %v12391_v53  ;;  %10843 = vmatprep.mubr.msk.bf16.mxu1 %vm17417_vm11, %v12415_v18  ;;  %vm17424_vm1 = vmmov %vm17373_vm0  ;;  %v4732_v53 = vrot.slane %v12670_v0, 3  ;;  %v4734_v18 = vrot.slane %v12687_v49, 3 }
  0xe1   : > { %10914 = vmatpush3.bf16.msra.mxu1 %v4507_v33  ;;  %vm17425_vm11 = vmmov %vm17373_vm0  ;;  %v11468_v33 = vld [vmem:[#allocation2 + $0x98] ss:$0 sps:$4 sm:$0x33]  }
  0xe2   : > { %v12694_v10 = vsel %vm17157_vm13, %v4732_v53, %v4734_v18 }
  0xe7   : > { %10802 = vmatmul.mubr.msk.bf16.vlgmr.msra.gmra.mxu0 %vm17419_vm3, %v12394_v59  ;;  %10844 = vmatmul.mubr.msk.bf16.gmra.mxu1 %vm17420_vm15, %v12418_v39  ;;  %v12677_v59 = vsel %vm17157_vm13, %v17141_v26, %v4732_v53  ;;  %vm17426_vm3 = vmmov %vm17373_vm0  ;;  %v4736_v39 = vrot.slane %v12689_v36, 3 }
  0xe8   : > { %10876 = vmatpush3.bf16.msra.mxu0 %v4060_v21  ;;  %10805 = vmatprep.mubr.msk.bf16.mxu0 %vm17421_vm7, %v12437_v20  ;;  %vm17427_vm15 = vmmov %vm17373_vm0 }
  0xe9   : > { %10847 = vmatprep.mubr.msk.bf16.mxu1 %vm17422_vm2, %v12466_v14  ;;  %11339 = vmatprep.subr.msk.bf16.mxu0 %vm17414_vm5, %v12648_v35  ;;  %vm17428_vm7 = vmmov %vm17373_vm0  ;;  %v12697_v20 = vsel %vm17157_vm13, %v4734_v18, %v4736_v39  ;;  %v12709_v14 = vld [vmem:[#allocation2 + $0x40] sm:$0xff]  }
  0xea   : > { %vm17429_vm2 = vmmov %vm17373_vm0 }
  0xeb   : > { %vm17430_vm5 = vmmov %vm17373_vm0 }
  0xef   : > { %10806 = vmatmul.mubr.msk.bf16.gmra.mxu0 %vm17423_vm9, %v12440_v50  ;;  %10848 = vmatmul.mubr.msk.bf16.gmra.mxu1 %vm17424_vm1, %v12469_v4  ;;  %vm17431_vm9 = vmmov %vm17373_vm0  ;;  %v12707_v50 = vld [vmem:[#allocation2 + $0x38] sm:$0xff]  }
  0xf0   : > { %10809 = vmatprep.mubr.msk.bf16.mxu0 %vm17373_vm0, %v12479_v25  ;;  %10851 = vmatprep.mubr.msk.bf16.mxu1 %vm17425_vm11, %v12499_v57  ;;  %vm17432_vm1 = vmmov %vm17373_vm0  ;;  %v4738_v25 = vrot.slane %v12707_v50, 3 }
  0xf1   : > { %vm17433_vm11 = vmmov %vm17373_vm0 }
  0xf7   : > { %10810 = vmatmul.mubr.msk.bf16.gmra.mxu0 %vm17426_vm3, %v12482_v58  ;;  %10852 = vmatmul.mubr.msk.bf16.gmra.mxu1 %vm17427_vm15, %v12502_v56  ;;  %v4740_v58 = vrot.slane %v12709_v14, 3  ;;  %v12714_v56 = vsel %vm17157_vm13, %v4736_v39, %v4738_v25  ;;  %vm17434_vm3 = vmmov %vm17373_vm0 }
  0xf8   : > { %10813 = vmatprep.mubr.msk.bf16.mxu0 %vm17428_vm7, %v12505_v27  ;;  %10855 = vmatprep.mubr.msk.bf16.mxu1 %vm17429_vm2, %v12517_v13  ;;  %vm17435_vm15 = vmmov %vm17373_vm0 }
  0xf9   : > { %v12717_v27 = vsel %vm17157_vm13, %v4738_v25, %v4740_v58  ;;  %vm17436_vm7 = vmmov %vm17373_vm0 }
  0xfa   : > { %vm17438_vm2 = vmmov %vm17373_vm0 }
  0xff   : > { %10814 = vmatmul.mubr.msk.bf16.gmra.mxu0 %vm17430_vm5, %v12514_v24  ;;  %10856 = vmatmul.mubr.msk.bf16.gmra.mxu1 %vm17431_vm9, %v12520_v22  ;;  %v3836_v22 = vld [vmem:[#allocation2 + $0x10] sm:$0xc]  ;;  %vm17439_vm5 = vmmov %vm17373_vm0 }
 0x100   : > { %10817 = vmatprep.mubr.msk.bf16.mxu0 %vm17432_vm1, %v12525_v52  ;;  %10859 = vmatprep.mubr.msk.bf16.mxu1 %vm17373_vm0, %v12543_v29  ;;  %v12727_v52 = vld [vmem:[#allocation2 + $0x14] sm:$0xf]  ;;  %v12729_v29 = vld [vmem:[#allocation2 + $0x48] sm:$0xff]   ;;  %vm17440_vm9 = vmmov %vm17373_vm0 }
 0x101   : > { %v4742_v17 = vrot.slane %v12729_v29, 3  ;;  %v12737_v9 = vcombine.low %v3836_v22, %v12727_v52  ;;  %vm17441_vm1 = vmmov %vm17373_vm0 }
 0x103   : > { %v12741_v1 = vsel %vm17157_vm13, %v4740_v58, %v4742_v17  ;;  %v4283_v30 = vshrl.u32 %v12737_v9, 16  ;;  %v4286_v11 = vshll.u32 %v12737_v9, 16 }
 0x105   : > { %v10689_v4 = vpop.f32.mrf.mxu1  ;;  %v4285_v53 = vrot.slane %v4283_v30, 2  ;;  %v4288_v25 = vrot.slane %v4286_v11, 3  ;;  %v4309_v11 = vshrl.u32 %v12687_v49, 16 }
 0x107   : > { %v2179_v57 = vpop.f32.mrf.mxu1  ;;  %10818 = vmatmul.mubr.msk.bf16.gmra.mxu0 %vm17433_vm11, %v12540_v43  ;;  %10860 = vmatmul.mubr.msk.bf16.gmra.mxu1 %vm17434_vm3, %v12546_v8  ;;  %vm17445_vm11 = vmmov %vm17373_vm0 }
 0x108   : > { %10821 = vmatprep.mubr.msk.bf16.mxu0 %vm17435_vm15, %v12549_v15  ;;  %10863 = vmatprep.mubr.msk.bf16.mxu1 %vm17436_vm7, %v12558_v34  ;;  %v4744_v15 = vrot.slane %v12731_v38, 3  ;;  %vm17446_vm3 = vmmov %vm17373_vm0  ;;  %vm17156_vm7 = vsmask.f32 5376 }
 0x109   : > { %v10690_v24 = vpop.f32.mrf.mxu1  ;;  %vm17447_vm15 = vmmov %vm17373_vm0 }
 0x10a   : > { %v12746_v16 = vsel %vm17157_vm13, %v4742_v17, %v4744_v15  ;;  %v3247_v17 = vshll.u32 %v11468_v33, 16 }
 0x10b   : > { %v2182_v13 = vpop.f32.mrf.mxu1  ;;  %17437 = vst [vmem:[#allocation7_spill] sm:$0xff] %v12746_v16  ;;  %v12917_v16 = vld [vmem:[#allocation2 + $0x88] sm:$0xff]  }
 0x10d   : > { %v10651_v6 = vpop.f32.mrf.mxu0  ;;  %v10693_v43 = vpop.f32.mrf.mxu1 }
 0x10e   : > { %v12734_v8 = vadd.f32 %v10689_v4, %v10651_v6 }
 0x10f   : > { %v1963_v34 = vpop.f32.mrf.mxu0  ;;  %v2195_v2 = vpop.f32.mrf.mxu1  ;;  %10822 = vmatmul.mubr.msk.bf16.gmra.mxu0 %vm17438_vm2, %v12555_v46  ;;  %10864 = vmatmul.mubr.msk.bf16.gmra.mxu1 %vm17439_vm5, %v12561_v63  ;;  %v4291_v46 = vshrl.u32 %v12668_v41, 16  ;;  %v4294_v63 = vshll.u32 %v12668_v41, 16  ;;  %vm17448_vm2 = vmmov %vm17373_vm0 }
 0x110   : > { %v12743_v48 = vadd.f32 %v2179_v57, %v1963_v34  ;;  %10825 = vmatprep.mubr.msk.bf16.mxu0 %vm17440_vm9, %v12566_v47  ;;  %10867 = vmatprep.mubr.msk.bf16.mxu1 %vm17441_vm1, %v12583_v32  ;;  %v12766_v47 = vld [vmem:[#allocation2 + $0x60] sm:$0xff]   ;;  %v4746_v32 = vrot.slane %v12762_v62, 3  ;;  %v3564_v34 = vrot.slane %v11468_v33, 2  ;;  %vm17449_vm5 = vmmov %vm17373_vm0 }
 0x111   : > { %v10652_v12 = vpop.f32.mrf.mxu0  ;;  %v10694_v45 = vpop.f32.mrf.mxu1  ;;  %17442 = vst [vmem:[#allocation8_spill] sm:$0xff] %v12766_v47  ;;  %v17140_v18 = vrot.slane %v12766_v47, 3  ;;  %v4293_v58 = vrot.slane %v4291_v46, 2  ;;  %v4296_v57 = vrot.slane %v4294_v63, 3  ;;  %v4312_v46 = vshll.u32 %v12687_v49, 16  ;;  %vm17450_vm9 = vmmov %vm17373_vm0 }
 0x112   : > { %v12754_v44 = vadd.f32 %v10690_v24, %v10652_v12  ;;  %v12773_v24 = vsel %vm17157_vm13, %v4744_v15, %v4746_v32  ;;  %v4300_v12 = vshrl.u32 %v12670_v0, 16  ;;  %vm17451_vm1 = vmmov %vm17373_vm0 }
 0x113   : > { %v1966_v3 = vpop.f32.mrf.mxu0  ;;  %v2198_v28 = vpop.f32.mrf.mxu1  ;;  %17443 = vst [vmem:[#allocation9_spill] sm:$0xff] %v12773_v24  ;;  %v12780_v22 = vsel %vm17157_vm13, %v4746_v32, %v17140_v18 }
 0x114   : > { %v12764_v61 = vadd.f32 %v2182_v13, %v1966_v3  ;;  %17444 = vst [vmem:[#allocation10_spill] sm:$0xff] %v12780_v22  ;;  %v4289_v3 = vor.u32 %v4288_v25, %v4285_v53  ;;  %v4311_v25 = vrot.slane %v4309_v11, 2  ;;  %v12893_v22 = vld [vmem:[#allocation2 + $0x78] sm:$0xff]  }
 0x115   : > { %v10655_v42 = vpop.f32.mrf.mxu0  ;;  %v10697_v51 = vpop.f32.mrf.mxu1  ;;  %17465 = vst [vmem:[#allocation13_spill] sm:$0xff] %v12893_v22 }
 0x116   : > { %v12769_v21 = vadd.f32 %v10693_v43, %v10655_v42  ;;  %v3244_v43 = vshrl.u32 %v11468_v33, 16  ;;  %v4302_v33 = vrot.slane %v4300_v12, 2  ;;  %v3969_v12 = vrot.slane %v12668_v41, 2 }
 0x117   : > { %v1979_v39 = vpop.f32.mrf.mxu0  ;;  %v2211_v4 = vpop.f32.mrf.mxu1  ;;  %10826 = vmatmul.mubr.msk.bf16.gmra.mxu0 %vm17373_vm0, %v12580_v5  ;;  %10868 = vmatmul.mubr.msk.bf16.gmra.mxu1 %vm17445_vm11, %v12586_v7  ;;  %v4303_v5 = vshll.u32 %v12670_v0, 16  ;;  %v4297_v7 = vor.u32 %v4296_v57, %v4293_v58  ;;  %v4314_v58 = vrot.slane %v4312_v46, 3  ;;  %vm17452_vm11 = vmmov %vm17373_vm0 }
 0x118   : > { %v12775_v13 = vadd.f32 %v2195_v2, %v1979_v39  ;;  %10829 = vmatprep.mubr.msk.bf16.mxu0 %vm17446_vm3, %v12589_v40  ;;  %10871 = vmatprep.mubr.msk.bf16.mxu1 %vm17447_vm15, %v12603_v37  ;;  %v3246_v40 = vrot.slane %v3244_v43, 1  ;;  %v3565_v37 = vsel %vm17163_vm6, %v3562_v54, %v3564_v34  ;;  %vm17453_vm3 = vmmov %vm17373_vm0 }
 0x119   : > { %v10656_v6 = vpop.f32.mrf.mxu0  ;;  %v10698_v2 = vpop.f32.mrf.mxu1  ;;  %v4305_v32 = vrot.slane %v4303_v5, 3  ;;  %v4298_v53 = vsel %vm17156_vm7, %v4289_v3, %v4297_v7  ;;  %v4315_v5 = vor.u32 %v4314_v58, %v4311_v25  ;;  %vm17454_vm15 = vmmov %vm17373_vm0  ;;  %v4336_v58 = vshrl.u32 %v12709_v14, 16 }
 0x11a   : > { %v12788_v15 = vadd.f32 %v10694_v45, %v10656_v6  ;;  %v3249_v45 = vrot.slane %v3247_v17, 2  ;;  %v4318_v17 = vshrl.u32 %v12689_v36, 16 }
 0x11b   : > { %v1982_v30 = vpop.f32.mrf.mxu0  ;;  %v2214_v42 = vpop.f32.mrf.mxu1  ;;  %v4306_v43 = vor.u32 %v4305_v32, %v4302_v33 }
 0x11c   : > { %v12796_v63 = vadd.f32 %v2198_v28, %v1982_v30  ;;  %v3250_v28 = vor.u32 %v3249_v45, %v3246_v40 }
 0x11d   : > { %v10659_v39 = vpop.f32.mrf.mxu0  ;;  %v4307_v45 = vsel %vm17156_vm7, %v4297_v7, %v4306_v43 }
 0x11e   : > { %v12802_v57 = vadd.f32 %v10697_v51, %v10659_v39  ;;  %v10701_v54 = vpop.f32.mrf.mxu1  ;;  %v4321_v51 = vshll.u32 %v12689_v36, 16  ;;  %v3251_v11 = vsel %vm17162_vm14, %v12592_v23, %v3250_v28  ;;  %v3971_v23 = vrot.slane %v12670_v0, 2 }
 0x11f   : > { %10830 = vmatmul.mubr.msk.bf16.gmra.mxu0 %vm17448_vm2, %v12598_v60  ;;  %v1995_v6 = vpop.f32.mrf.mxu0  ;;  %10872 = vmatmul.mubr.msk.bf16.gmra.mxu1 %vm17449_vm5, %v3565_v37  ;;  %v3968_v60 = vrot.slane %v12737_v9, 2  ;;  %v4320_v9 = vrot.slane %v4318_v17, 2  ;;  %v4339_v28 = vshll.u32 %v12709_v14, 16  ;;  %v4348_v17 = vshll.u32 %v12729_v29, 16  ;;  %vm17456_vm5 = vmmov %vm17373_vm0 }
 0x120   : > { %10833 = vmatprep.mubr.msk.bf16.mxu0 %vm17450_vm9, %v12608_v19  ;;  %v12809_v55 = vadd.f32 %v2211_v4, %v1995_v6  ;;  %10915 = vmatprep.mubr.msk.bf16.mxu1 %vm17451_vm1, %v4298_v53  ;;  %v2227_v3 = vpop.f32.mrf.mxu1  ;;  %v4327_v19 = vshrl.u32 %v12707_v50, 16  ;;  %v4330_v4 = vshll.u32 %v12707_v50, 16  ;;  %v4323_v33 = vrot.slane %v4321_v51, 3  ;;  %vm17457_vm9 = vmmov %vm17373_vm0 }
 0x121   : > { %v10660_v34 = vpop.f32.mrf.mxu0  ;;  %v3970_v32 = vsel %vm17163_vm6, %v3968_v60, %v3969_v12  ;;  %v3973_v6 = vrot.slane %v12687_v49, 2  ;;  %vm17455_vm2 = vcmask 1041408   ;;  %v4341_v49 = vrot.slane %v4339_v28, 3  ;;  %vm17458_vm1 = vmmov %vm17373_vm0 }
 0x122   : > { %v12816_v30 = vadd.f32 %v10698_v2, %v10660_v34  ;;  %v10702_v37 = vpop.f32.mrf.mxu1  ;;  %v4316_v2 = vsel %vm17156_vm7, %v4306_v43, %v4315_v5  ;;  %v4329_v53 = vrot.slane %v4327_v19, 2  ;;  %v4332_v25 = vrot.slane %v4330_v4, 3 }
 0x123   : > { %v1998_v46 = vpop.f32.mrf.mxu0  ;;  %v4324_v7 = vor.u32 %v4323_v33, %v4320_v9  ;;  %v4345_v43 = vshrl.u32 %v12729_v29, 16  ;;  %v4821_v0 = vsel %vm17455_vm2, %v12648_v35, 0  ;;  %v3972_v4 = vsel %vm17163_vm6, %v3969_v12, %v3971_v23  ;;  %vm17463_vm2 = vmmov %vm17373_vm0 }
 0x124   : > { %v12822_v40 = vadd.f32 %v2214_v42, %v1998_v46  ;;  %v2230_v39 = vpop.f32.mrf.mxu1  ;;  %v4333_v60 = vor.u32 %v4332_v25, %v4329_v53  ;;  %v4338_v9 = vrot.slane %v4336_v58, 2  ;;  %v4350_v18 = vrot.slane %v4348_v17, 3 }
 0x125   : > { %v4325_v46 = vsel %vm17156_vm7, %v4315_v5, %v4324_v7  ;;  %v3975_v12 = vrot.slane %v12689_v36, 2  ;;  %v4354_v58 = vshrl.u32 %v12731_v38, 16  ;;  %v4357_v28 = vshll.u32 %v12731_v38, 16 }
 0x126   : > { %v10705_v42 = vpop.f32.mrf.mxu1  ;;  %v4334_v25 = vsel %vm17156_vm7, %v4324_v7, %v4333_v60  ;;  %v4363_v36 = vshrl.u32 %v12762_v62, 16  ;;  %v4366_v17 = vshll.u32 %v12762_v62, 16 }
 0x127   : > { %10834 = vmatmul.mubr.msk.bf16.gmra.mxu0 %vm17373_vm0, %v3251_v11  ;;  %10916 = vmatmul.mubr.msk.bf16.vlgmr.msra.gmra.mxu1 %vm17452_vm11, %v4307_v45  ;;  %vm17460_vm11 = vmmov %vm17373_vm0 }
 0x128   : > { %10877 = vmatprep.mubr.msk.bf16.mxu0 %vm17453_vm3, %v3970_v32  ;;  %10919 = vmatprep.mubr.msk.bf16.mxu1 %vm17454_vm15, %v4316_v2  ;;  %v2243_v34 = vpop.f32.mrf.mxu1  ;;  %v3974_v32 = vsel %vm17163_vm6, %v3971_v23, %v3973_v6  ;;  %v4347_v2 = vrot.slane %v4345_v43, 2  ;;  %v4342_v23 = vor.u32 %v4341_v49, %v4338_v9  ;;  %v4356_v9 = vrot.slane %v4354_v58, 2  ;;  %vm17461_vm3 = vmmov %vm17373_vm0 }
 0x129   : > { %v4359_v49 = vrot.slane %v4357_v28, 3  ;;  %vm17462_vm15 = vmmov %vm17373_vm0  ;;  %v4372_v28 = vshrl.u32 %v12766_v47, 16 }
 0x12a   : > { %v10663_v51 = vpop.f32.mrf.mxu0  ;;  %v10706_v45 = vpop.f32.mrf.mxu1 }
 0x12b   : > { %v12837_v19 = vadd.f32 %v10701_v54, %v10663_v51 }
 0x12c   : > { %v2011_v11 = vpop.f32.mrf.mxu0  ;;  %v2246_v54 = vpop.f32.mrf.mxu1 }
 0x12d   : > { %v12843_v33 = vadd.f32 %v2227_v3, %v2011_v11  ;;  %v3977_v3 = vrot.slane %v12707_v50, 2  ;;  %v3976_v50 = vsel %vm17163_vm6, %v3973_v6, %v3975_v12 }
 0x12e   : > { %v10664_v53 = vpop.f32.mrf.mxu0 }
 0x12f   : > { %10878 = vmatmul.mubr.msk.bf16.vlgmr.msra.gmra.mxu0 %vm17456_vm5, %v3972_v4  ;;  %v12848_v35 = vadd.f32 %v10702_v37, %v10664_v53  ;;  %10920 = vmatmul.mubr.msk.bf16.gmra.mxu1 %vm17457_vm9, %v4325_v46  ;;  %v4351_v37 = vor.u32 %v4350_v18, %v4347_v2  ;;  %v3978_v46 = vsel %vm17163_vm6, %v3975_v12, %v3977_v3  ;;  %v4365_v53 = vrot.slane %v4363_v36, 2  ;;  %vm17466_vm5 = vmmov %vm17373_vm0 }
 0x130   : > { %10952 = vmatpush3.bf16.msra.mxu0 %v4821_v0  ;;  %v2014_v5 = vpop.f32.mrf.mxu0  ;;  %10881 = vmatprep.mubr.msk.bf16.mxu0 %vm17458_vm1, %v3974_v32  ;;  %v10709_v43 = vpop.f32.mrf.mxu1  ;;  %v3979_v12 = vrot.slane %v12709_v14, 2  ;;  %v4375_v36 = vshll.u32 %v12766_v47, 16  ;;  %vm17467_vm9 = vmmov %vm17373_vm0 }
 0x131   : > { %v12856_v7 = vadd.f32 %v2230_v39, %v2014_v5  ;;  %10923 = vmatprep.mubr.msk.bf16.mxu1 %vm17373_vm0, %v4334_v25  ;;  %v4343_v39 = vsel %vm17156_vm7, %v4333_v60, %v4342_v23  ;;  %v4352_v2 = vsel %vm17156_vm7, %v4342_v23, %v4351_v37  ;;  %v4368_v25 = vrot.slane %v4366_v17, 3  ;;  %v12869_v5 = vld [vmem:[#allocation2 + $0x68] sm:$0xff]   ;;  %vm17468_vm1 = vmmov %vm17373_vm0 }
 0x132   : > { %v10667_v51 = vpop.f32.mrf.mxu0  ;;  %v2259_v4 = vpop.f32.mrf.mxu1  ;;  %17459 = vst [vmem:[#allocation11_spill] sm:$0xff] %v12869_v5  ;;  %v4360_v23 = vor.u32 %v4359_v49, %v4356_v9  ;;  %v4381_v14 = vshrl.u32 %v12869_v5, 16  ;;  %v4374_v49 = vrot.slane %v4372_v28, 2 }
 0x133   : > { %v12861_v0 = vadd.f32 %v10705_v42, %v10667_v51  ;;  %v4369_v51 = vor.u32 %v4368_v25, %v4365_v53 }
 0x134   : > { %v2027_v11 = vpop.f32.mrf.mxu0  ;;  %v10710_v18 = vpop.f32.mrf.mxu1  ;;  %v4361_v9 = vsel %vm17156_vm7, %v4351_v37, %v4360_v23  ;;  %v4383_v26 = vrot.slane %v4381_v14, 2  ;;  %v3983_v37 = vrot.slane %v12731_v38, 2  ;;  %v4399_v38 = vshrl.u32 %v12893_v22, 16 }
 0x135   : > { %v12866_v32 = vadd.f32 %v2243_v34, %v2027_v11  ;;  %v3981_v34 = vrot.slane %v12729_v29, 2  ;;  %v4370_v25 = vsel %vm17156_vm7, %v4360_v23, %v4369_v51 }
 0x136   : > { %v10668_v42 = vpop.f32.mrf.mxu0  ;;  %v2262_v60 = vpop.f32.mrf.mxu1 }
 0x137   : > { %10882 = vmatmul.mubr.msk.bf16.gmra.mxu0 %vm17460_vm11, %v3976_v50  ;;  %v12872_v6 = vadd.f32 %v10706_v45, %v10668_v42  ;;  %10924 = vmatmul.mubr.msk.bf16.gmra.mxu1 %vm17461_vm3, %v4343_v39  ;;  %v4384_v50 = vshll.u32 %v12869_v5, 16  ;;  %v12889_v42 = vld [vmem:[#allocation2 + $0x70] sm:$0xff]   ;;  %vm17471_vm11 = vmmov %vm17373_vm0 }
 0x138   : > { %v2030_v58 = vpop.f32.mrf.mxu0  ;;  %10885 = vmatprep.mubr.msk.bf16.mxu0 %vm17462_vm15, %v3978_v46  ;;  %10927 = vmatprep.mubr.msk.bf16.mxu1 %vm17463_vm2, %v4352_v2  ;;  %v10713_v45 = vpop.f32.mrf.mxu1  ;;  %v3980_v46 = vsel %vm17163_vm6, %v3977_v3, %v3979_v12  ;;  %v4377_v2 = vrot.slane %v4375_v36, 3  ;;  %17464 = vst [vmem:[#allocation12_spill] sm:$0xff] %v12889_v42  ;;  %v4390_v23 = vshrl.u32 %v12889_v42, 16  ;;  %v4393_v36 = vshll.u32 %v12889_v42, 16  ;;  %vm17472_vm3 = vmmov %vm17373_vm0 }
 0x139   : > { %v12881_v17 = vadd.f32 %v2246_v54, %v2030_v58  ;;  %v3982_v58 = vsel %vm17163_vm6, %v3979_v12, %v3981_v34  ;;  %v4386_v31 = vrot.slane %v4384_v50, 3  ;;  %v3985_v50 = vrot.slane %v12762_v62, 2  ;;  %vm17474_vm15 = vmmov %vm17373_vm0 }
 0x13a   : > { %v2275_v39 = vpop.f32.mrf.mxu1  ;;  %v4378_v12 = vor.u32 %v4377_v2, %v4374_v49  ;;  %v4392_v49 = vrot.slane %v4390_v23, 2  ;;  %v4395_v2 = vrot.slane %v4393_v36, 3  ;;  %vm17475_vm2 = vmmov %vm17373_vm0 }
 0x13c   : > { %v10671_v11 = vpop.f32.mrf.mxu0  ;;  %v10714_v53 = vpop.f32.mrf.mxu1 }
 0x13d   : > { %v12886_v29 = vadd.f32 %v10709_v43, %v10671_v11  ;;  %v4387_v11 = vor.u32 %v4386_v31, %v4383_v26  ;;  %v4401_v26 = vrot.slane %v4399_v38, 2 }
 0x13e   : > { %v2043_v54 = vpop.f32.mrf.mxu0  ;;  %v2278_v14 = vpop.f32.mrf.mxu1 }
 0x13f   : > { %v12895_v3 = vadd.f32 %v2259_v4, %v2043_v54  ;;  %10886 = vmatmul.mubr.msk.bf16.gmra.mxu0 %vm17466_vm5, %v3980_v46  ;;  %10928 = vmatmul.mubr.msk.bf16.gmra.mxu1 %vm17467_vm9, %v4361_v9  ;;  %v4402_v46 = vshll.u32 %v12893_v22, 16  ;;  %v3984_v9 = vsel %vm17163_vm6, %v3981_v34, %v3983_v37  ;;  %v4379_v54 = vsel %vm17156_vm7, %v4369_v51, %v4378_v12  ;;  %vm17478_vm5 = vmmov %vm17373_vm0 }
 0x140   : > { %v10672_v43 = vpop.f32.mrf.mxu0  ;;  %10889 = vmatprep.mubr.msk.bf16.mxu0 %vm17468_vm1, %v3982_v58  ;;  %10931 = vmatprep.mubr.msk.bf16.mxu1 %vm17373_vm0, %v4370_v25  ;;  %v12913_v58 = vld [vmem:[#allocation2 + $0x80] sm:$0xff]   ;;  %v4388_v31 = vsel %vm17156_vm7, %v4378_v12, %v4387_v11  ;;  %v3987_v51 = vrot.slane %v12766_v47, 2  ;;  %vm17479_vm9 = vmmov %vm17373_vm0 }
 0x141   : > { %v12900_v28 = vadd.f32 %v10710_v18, %v10672_v43  ;;  %v3986_v43 = vsel %vm17163_vm6, %v3983_v37, %v3985_v50  ;;  %v4404_v62 = vrot.slane %v4402_v46, 3  ;;  %v4396_v37 = vor.u32 %v4395_v2, %v4392_v49  ;;  %vm17481_vm1 = vmmov %vm17373_vm0 }
 0x142   : > { %v2046_v4 = vpop.f32.mrf.mxu0  ;;  %v4408_v12 = vshrl.u32 %v12913_v58, 16  ;;  %v3989_v46 = vrot.slane %v12869_v5, 2 }
 0x143   : > { %v12909_v18 = vadd.f32 %v2262_v60, %v2046_v4  ;;  %v4397_v2 = vsel %vm17156_vm7, %v4387_v11, %v4396_v37 }
 0x144   : > { %v4410_v47 = vrot.slane %v4408_v12, 2 }
 0x145   : > { %17469 = vst [vmem:[#allocation14_spill] sm:$0xff] %v12909_v18  ;;  %v10675_v25 = vpop.f32.mrf.mxu0  ;;  %v10717_v24 = vpop.f32.mrf.mxu1 }
 0x146   : > { %v12919_v60 = vadd.f32 %v10713_v45, %v10675_v25  ;;  %v4411_v45 = vshll.u32 %v12913_v58, 16  ;;  %v4417_v25 = vshrl.u32 %v12917_v16, 16 }
 0x147   : > { %10890 = vmatmul.mubr.msk.bf16.gmra.mxu0 %vm17471_vm11, %v3984_v9  ;;  %v2059_v34 = vpop.f32.mrf.mxu0  ;;  %v2291_v23 = vpop.f32.mrf.mxu1  ;;  %10932 = vmatmul.mubr.msk.bf16.gmra.mxu1 %vm17472_vm3, %v4379_v54  ;;  %v4405_v9 = vor.u32 %v4404_v62, %v4401_v26  ;;  %v4420_v54 = vshll.u32 %v12917_v16, 16  ;;  %v3990_v26 = vsel %vm17163_vm6, %v3987_v51, %v3989_v46  ;;  %vm17485_vm11 = vmmov %vm17373_vm0 }
 0x148   : > { %17470 = vst [vmem:[#allocation15_spill] sm:$0xff] %v12919_v60  ;;  %v12924_v36 = vadd.f32 %v2275_v39, %v2059_v34  ;;  %10893 = vmatprep.mubr.msk.bf16.mxu0 %vm17474_vm15, %v3986_v43  ;;  %10935 = vmatprep.mubr.msk.bf16.mxu1 %vm17475_vm2, %v4388_v31  ;;  %v3988_v43 = vsel %vm17163_vm6, %v3985_v50, %v3987_v51  ;;  %v12939_v60 = vld [vmem:[#allocation2 + $0x90] sm:$0xff]   ;;  %v4419_v5 = vrot.slane %v4417_v25, 2  ;;  %vm17486_vm3 = vmmov %vm17373_vm0 }
 0x149   : > { %v10676_v4 = vpop.f32.mrf.mxu0  ;;  %v10718_v38 = vpop.f32.mrf.mxu1  ;;  %v4406_v62 = vsel %vm17156_vm7, %v4396_v37, %v4405_v9  ;;  %v4422_v18 = vrot.slane %v4420_v54, 3  ;;  %v4426_v37 = vshrl.u32 %v12939_v60, 16  ;;  %v4429_v12 = vshll.u32 %v12939_v60, 16  ;;  %vm17487_vm15 = vmmov %vm17373_vm0 }
 0x14a   : > { %17473 = vst [vmem:[#allocation16_spill] sm:$0xff] %v12924_v36  ;;  %v12933_v39 = vadd.f32 %v10714_v53, %v10676_v4  ;;  %v4413_v36 = vrot.slane %v4411_v45, 3  ;;  %v12943_v53 = vld [vmem:[#allocation2 + $0x98] sm:$0xff]   ;;  %v3993_v54 = vrot.slane %v12893_v22, 2  ;;  %vm17488_vm2 = vmmov %vm17373_vm0 }
 0x14b   : > { %v2062_v34 = vpop.f32.mrf.mxu0  ;;  %v2294_v31 = vpop.f32.mrf.mxu1 }
 0x14c   : > { %17476 = vst [vmem:[#allocation17_spill] sm:$0xff] %v12933_v39  ;;  %v12936_v49 = vadd.f32 %v2278_v14, %v2062_v34  ;;  %v3991_v14 = vrot.slane %v12889_v42, 2  ;;  %v4414_v51 = vor.u32 %v4413_v36, %v4410_v47  ;;  %v4423_v34 = vor.u32 %v4422_v18, %v4419_v5 }
 0x14d   : > { %v4428_v42 = vrot.slane %v4426_v37, 2 }
 0x14e   : > { %17477 = vst [vmem:[#allocation18_spill] sm:$0xff] %v12936_v49  ;;  %v4415_v36 = vsel %vm17156_vm7, %v4405_v9, %v4414_v51  ;;  %v12963_v49 = vld [vmem:[#allocation2 + $0xa0] ss:$0 sps:$4 sm:$0x77]   ;;  %v3994_v18 = vsel %vm17163_vm6, %v3991_v14, %v3993_v54 }
 0x14f   : > { %v10679_v4 = vpop.f32.mrf.mxu0  ;;  %10894 = vmatmul.mubr.msk.bf16.gmra.mxu0 %vm17478_vm5, %v3988_v43  ;;  %v10721_v50 = vpop.f32.mrf.mxu1  ;;  %10936 = vmatmul.mubr.msk.bf16.gmra.mxu1 %vm17479_vm9, %v4397_v2  ;;  %v4435_v43 = vshrl.u32 %v12943_v53, 16  ;;  %v4438_v2 = vshll.u32 %v12943_v53, 16  ;;  %17483 = vst [vmem:[#allocation21_spill] sm:$0xff] %v12963_v49  ;;  %vm17491_vm5 = vmmov %vm17373_vm0 }
 0x150   : > { %v12948_v11 = vadd.f32 %v10717_v24, %v10679_v4  ;;  %10897 = vmatprep.mubr.msk.bf16.mxu0 %vm17481_vm1, %v3990_v26  ;;  %10939 = vmatprep.mubr.msk.bf16.mxu1 %vm17373_vm0, %v4406_v62  ;;  %v3992_v26 = vsel %vm17163_vm6, %v3989_v46, %v3991_v14  ;;  %vm17492_vm9 = vmmov %vm17373_vm0 }
 0x151   : > { %v2075_v45 = vpop.f32.mrf.mxu0  ;;  %v2307_v25 = vpop.f32.mrf.mxu1  ;;  %vm17493_vm1 = vmmov %vm17373_vm0 }
 0x152   : > { %17480 = vst [vmem:[#allocation19_spill] sm:$0xff] %v12948_v11  ;;  %v12957_v24 = vadd.f32 %v2291_v23, %v2075_v45  ;;  %v4431_v11 = vrot.slane %v4429_v12, 3  ;;  %v4424_v23 = vsel %vm17156_vm7, %v4414_v51, %v4423_v34  ;;  %v4437_v45 = vrot.slane %v4435_v43, 2 }
 0x153   : > { %v10680_v4 = vpop.f32.mrf.mxu0  ;;  %v10722_v62 = vpop.f32.mrf.mxu1  ;;  %v4444_v51 = vshrl.u32 %v12963_v49, 16  ;;  %v3997_v43 = vrot.slane %v12917_v16, 2 }
 0x154   : > { %17482 = vst [vmem:[#allocation20_spill] sm:$0xff] %v12957_v24  ;;  %v12960_v47 = vadd.f32 %v10718_v38, %v10680_v4  ;;  %v4440_v24 = vrot.slane %v4438_v2, 3  ;;  %v3995_v38 = vrot.slane %v12913_v58, 2  ;;  %v4432_v14 = vor.u32 %v4431_v11, %v4428_v42 }
 0x155   : > { %v2078_v22 = vpop.f32.mrf.mxu0  ;;  %v12965_v5 = vpop.f32.mrf.mxu1  ;;  %v4446_v42 = vrot.slane %v4444_v51, 2 }
 0x156   : > { %17484 = vst [vmem:[#allocation22_spill] sm:$0xff] %v12965_v5  ;;  %v12969_v39 = vadd.f32 %v2294_v31, %v2078_v22  ;;  %v4447_v22 = vshll.u32 %v12963_v49, 16  ;;  %v4441_v2 = vor.u32 %v4440_v24, %v4437_v45  ;;  %v3998_v5 = vsel %vm17163_vm6, %v3995_v38, %v3997_v43 }
 0x157   : > { %v10683_v46 = vpop.f32.mrf.mxu0  ;;  %10898 = vmatmul.mubr.msk.bf16.gmra.mxu0 %vm17485_vm11, %v3992_v26  ;;  %v10765_v9 = vpop.f32.mrf.mxu1  ;;  %10940 = vmatmul.mubr.msk.bf16.gmra.mxu1 %vm17486_vm3, %v4415_v36  ;;  %vm17494_vm11 = vmmov %vm17373_vm0 }
 0x158   : > { %v12974_v37 = vadd.f32 %v10721_v50, %v10683_v46  ;;  %10901 = vmatprep.mubr.msk.bf16.mxu0 %vm17487_vm15, %v3994_v18  ;;  %10943 = vmatprep.mubr.msk.bf16.mxu1 %vm17488_vm2, %v4424_v23  ;;  %v3996_v50 = vsel %vm17163_vm6, %v3993_v54, %v3995_v38  ;;  %v4433_v18 = vsel %vm17156_vm7, %v4423_v34, %v4432_v14  ;;  %v4449_v11 = vrot.slane %v4447_v22, 3  ;;  %vm17495_vm3 = vmmov %vm17373_vm0 }
 0x159   : > { %v2091_v31 = vpop.f32.mrf.mxu0  ;;  %v2896_v12 = vpop.f32.mrf.mxu1  ;;  %v4442_v24 = vsel %vm17156_vm7, %v4432_v14, %v4441_v2  ;;  %v3999_v34 = vrot.slane %v12939_v60, 2  ;;  %v4001_v22 = vrot.slane %v12943_v53, 2  ;;  %vm17496_vm15 = vmmov %vm17373_vm0 }
 0x15a   : > { %v12981_v4 = vadd.f32 %v2307_v25, %v2091_v31  ;;  %vm17498_vm2 = vmmov %vm17373_vm0 }
 0x15b   : > { %v10684_v26 = vpop.f32.mrf.mxu0  ;;  %v10766_v36 = vpop.f32.mrf.mxu1 }
 0x15c   : > { %v12984_v46 = vadd.f32 %v10722_v62, %v10684_v26  ;;  %v4450_v62 = vor.u32 %v4449_v11, %v4446_v42  ;;  %v4722_v26 = vld [vmem:[#allocation2 + $0x10] sm:$0x8] }
 0x15d   : > { %v12987_v23 = vpop.f32.mrf.mxu0  ;;  %v12990_v49 = vpop.f32.mrf.mxu1 }
 0x15e   : > { %17489 = vst [vmem:[#allocation23_spill] sm:$0xff] %v12987_v23  ;;  %17490 = vst [vmem:[#allocation24_spill] sm:$0xff] %v12990_v49  ;;  %v11487_v49 = vld [vmem:[#allocation2 + $0xa0] ss:$0 sps:$4 sm:$0x33]   ;;  %v4451_v42 = vsel %vm17156_vm7, %v4441_v2, %v4450_v62 }
 0x15f   : > { %v10727_v25 = vpop.f32.mrf.mxu0  ;;  %10902 = vmatmul.mubr.msk.bf16.gmra.mxu0 %vm17491_vm5, %v3996_v50  ;;  %v10769_v45 = vpop.f32.mrf.mxu1  ;;  %10944 = vmatmul.mubr.msk.bf16.gmra.mxu1 %vm17492_vm9, %v4433_v18  ;;  %v4003_v2 = vrot.slane %v11487_v49, 2  ;;  %vm17499_vm5 = vmmov %vm17373_vm0 }
 0x160   : > { %v2602_v54 = vadd.f32 %v10727_v25, %v12734_v8  ;;  %10905 = vmatprep.mubr.msk.bf16.mxu0 %vm17493_vm1, %v3998_v5  ;;  %10947 = vmatprep.mubr.msk.bf16.mxu1 %vm17373_vm0, %v4442_v24  ;;  %v4000_v5 = vsel %vm17163_vm6, %v3997_v43, %v3999_v34  ;;  %v4002_v24 = vsel %vm17163_vm6, %v3999_v34, %v4001_v22  ;;  %vm17500_vm9 = vmmov %vm17373_vm0 }
 0x161   : > { %v2457_v38 = vpop.f32.mrf.mxu0  ;;  %v2912_v51 = vpop.f32.mrf.mxu1  ;;  %vm17501_vm1 = vmmov %vm17373_vm0 }
 0x162   : > { %v2600_v14 = vadd.f32 %v2457_v38, %v12743_v48  ;;  %v13001_v31 = vadd.f32 %v10765_v9, %v2602_v54  ;;  %v9872_v48 = vcombine.low %v4722_v26, %v12727_v52 }
 0x163   : > { %v10728_v50 = vpop.f32.mrf.mxu0  ;;  %v10770_v18 = vpop.f32.mrf.mxu1 }
 0x164   : > { %v2603_v8 = vadd.f32 %v10728_v50, %v12754_v44  ;;  %v13004_v25 = vadd.f32 %v2896_v12, %v2600_v14  ;;  %v4729_v38 = vrot.slane %v9872_v48, 3 }
 0x165   : > { %v2460_v11 = vpop.f32.mrf.mxu0  ;;  %v13009_v23 = vpop.f32.mrf.mxu1 }
 0x166   : > { %v13013_v9 = vadd.f32 %v2460_v11, %v12764_v61  ;;  %v13015_v54 = vadd.f32 %v10766_v36, %v2603_v8  ;;  %v4004_v8 = vsel %vm17163_vm6, %v4001_v22, %v4003_v2 }
 0x167   : > { %v10731_v44 = vpop.f32.mrf.mxu0  ;;  %10906 = vmatmul.mubr.msk.bf16.gmra.mxu0 %vm17494_vm11, %v4000_v5  ;;  %v10773_v12 = vpop.f32.mrf.mxu1  ;;  %10948 = vmatmul.mubr.msk.bf16.gmra.mxu1 %vm17495_vm3, %v4451_v42  ;;  %vm17502_vm11 = vmmov %vm17373_vm0 }
 0x168   : > { %v2606_v43 = vadd.f32 %v10731_v44, %v12769_v21  ;;  %10909 = vmatprep.mubr.msk.bf16.mxu0 %vm17496_vm15, %v4002_v24  ;;  %v17497_v21 = vrot.slane %v12668_v41, 3  ;;  %vm17503_vm3 = vmmov %vm17373_vm0 }
 0x169   : > { %v2473_v34 = vpop.f32.mrf.mxu0  ;;  %v2928_v62 = vpop.f32.mrf.mxu1  ;;  %vm17504_vm15 = vmmov %vm17373_vm0 }
 0x16a   : > { %v2604_v52 = vadd.f32 %v2473_v34, %v12775_v13  ;;  %v13022_v61 = vadd.f32 %v10769_v45, %v2606_v43  ;;  %v4731_v49 = vsel %vm17157_vm13, %v4729_v38, %v17497_v21 }
 0x16b   : > { %v10732_v36 = vpop.f32.mrf.mxu0  ;;  %v10774_v14 = vpop.f32.mrf.mxu1 }
 0x16c   : > { %v2607_v26 = vadd.f32 %v10732_v36, %v12788_v15  ;;  %v13025_v50 = vadd.f32 %v2912_v51, %v2604_v52 }
 0x16d   : > { %v2476_v5 = vpop.f32.mrf.mxu0  ;;  %v13031_v42 = vpop.f32.mrf.mxu1 }
 0x16e   : > { %v13034_v11 = vadd.f32 %v2476_v5, %v12796_v63  ;;  %v13036_v13 = vadd.f32 %v10770_v18, %v2607_v26 }
 0x16f   : > { %v10735_v45 = vpop.f32.mrf.mxu0  ;;  %10910 = vmatmul.mubr.msk.bf16.gmra.mxu0 %vm17498_vm2, %v4004_v8  ;;  %v10777_v15 = vpop.f32.mrf.mxu1  ;;  %vm17507_vm2 = vmmov %vm17373_vm0 }
 0x170   : > { %v2610_v51 = vadd.f32 %v10735_v45, %v12802_v57  ;;  %10953 = vmatprep.mubr.msk.bf16.mxu0 %vm17499_vm5, %v4731_v49  ;;  %vm17510_vm5 = vmmov %vm17373_vm0 }
 0x171   : > { %v2489_v22 = vpop.f32.mrf.mxu0  ;;  %v2944_v24 = vpop.f32.mrf.mxu1 }
 0x172   : > { %v2608_v41 = vadd.f32 %v2489_v22, %v12809_v55  ;;  %v13042_v48 = vadd.f32 %v10773_v12, %v2610_v51 }
 0x173   : > { %v10736_v44 = vpop.f32.mrf.mxu0  ;;  %v10778_v43 = vpop.f32.mrf.mxu1 }
 0x174   : > { %v2611_v63 = vadd.f32 %v10736_v44, %v12816_v30  ;;  %v13045_v18 = vadd.f32 %v2928_v62, %v2608_v41 }
 0x175   : > { %v2492_v2 = vpop.f32.mrf.mxu0  ;;  %v13047_v34 = vpop.f32.mrf.mxu1 }
 0x176   : > { %v13050_v38 = vadd.f32 %v2492_v2, %v12822_v40  ;;  %v13052_v57 = vadd.f32 %v10774_v14, %v2611_v63 }
 0x177   : > { %v10739_v52 = vpop.f32.mrf.mxu0  ;;  %10954 = vmatmul.mubr.msk.bf16.vlgmr.msra.gmra.mxu0 %vm17500_vm9, %v12677_v59  ;;  %v10781_v55 = vpop.f32.mrf.mxu1  ;;  %vm17521_vm9 = vmmov %vm17373_vm0 }
 0x178   : > { %v2614_v12 = vadd.f32 %v10739_v52, %v12837_v19  ;;  %10957 = vmatprep.mubr.msk.bf16.mxu0 %vm17501_vm1, %v12694_v10  ;;  %vm17522_vm1 = vcmask 1041408  }
 0x179   : > { %v2505_v30 = vpop.f32.mrf.mxu0  ;;  %v2960_v62 = vpop.f32.mrf.mxu1 }
 0x17a   : > { %v2612_v36 = vadd.f32 %v2505_v30, %v12843_v33  ;;  %v13060_v26 = vadd.f32 %v10777_v15, %v2614_v12 }
 0x17b   : > { %v10740_v40 = vpop.f32.mrf.mxu0  ;;  %v10782_v8 = vpop.f32.mrf.mxu1 }
 0x17c   : > { %v2615_v14 = vadd.f32 %v10740_v40, %v12848_v35  ;;  %v13063_v5 = vadd.f32 %v2944_v24, %v2612_v36 }
 0x17d   : > { %v2508_v21 = vpop.f32.mrf.mxu0  ;;  %v13065_v59 = vpop.f32.mrf.mxu1 }
 0x17e   : > { %v13068_v19 = vadd.f32 %v2508_v21, %v12856_v7  ;;  %v13070_v49 = vadd.f32 %v10778_v43, %v2615_v14  ;;  %v17506_v21 = vld [vmem:[#allocation7_spill] sm:$0xff] }
 0x17f   : > { %v10743_v10 = vpop.f32.mrf.mxu0  ;;  %10958 = vmatmul.mubr.msk.bf16.gmra.mxu0 %vm17373_vm0, %v12697_v20  ;;  %v10785_v33 = vpop.f32.mrf.mxu1 }
 0x180   : > { %v2618_v45 = vadd.f32 %v10743_v10, %v12861_v0  ;;  %10961 = vmatprep.mubr.msk.bf16.mxu0 %vm17502_vm11, %v12714_v56  ;;  %v17508_v10 = vld [vmem:[#allocation15_spill] sm:$0xff]  ;;  %vm17525_vm11 = vmmov %vm17522_vm1 }
 0x181   : > { %v2521_v35 = vpop.f32.mrf.mxu0  ;;  %v2976_v15 = vpop.f32.mrf.mxu1 }
 0x182   : > { %v2616_v51 = vadd.f32 %v2521_v35, %v12866_v32  ;;  %v13078_v22 = vadd.f32 %v10781_v55, %v2618_v45  ;;  %v17509_v45 = vld [vmem:[#allocation9_spill] sm:$0xff] }
 0x183   : > { %v10744_v7 = vpop.f32.mrf.mxu0  ;;  %v10786_v24 = vpop.f32.mrf.mxu1 }
 0x184   : > { %v2619_v41 = vadd.f32 %v10744_v7, %v12872_v6  ;;  %v13081_v44 = vadd.f32 %v2960_v62, %v2616_v51  ;;  %v17512_v7 = vld [vmem:[#allocation16_spill] sm:$0xff] }
 0x185   : > { %v2524_v43 = vpop.f32.mrf.mxu0  ;;  %v13083_v20 = vpop.f32.mrf.mxu1 }
 0x186   : > { %v13086_v0 = vadd.f32 %v2524_v43, %v12881_v17  ;;  %v13088_v63 = vadd.f32 %v10782_v8, %v2619_v41  ;;  %v17505_v8 = vld [vmem:[#allocation14_spill] sm:$0xff] }
 0x187   : > { %v10747_v56 = vpop.f32.mrf.mxu0  ;;  %10962 = vmatmul.mubr.msk.bf16.gmra.mxu0 %vm17503_vm3, %v12717_v27  ;;  %v10789_v32 = vpop.f32.mrf.mxu1  ;;  %vm17528_vm3 = vmmov %vm17373_vm0 }
 0x188   : > { %v2622_v2 = vadd.f32 %v10747_v56, %v12886_v29  ;;  %10965 = vmatprep.mubr.msk.bf16.mxu0 %vm17504_vm15, %v12741_v1  ;;  %vm17529_vm15 = vmmov %vm17373_vm0 }
 0x189   : > { %v2537_v6 = vpop.f32.mrf.mxu0  ;;  %v2992_v52 = vpop.f32.mrf.mxu1 }
 0x18a   : > { %v2620_v55 = vadd.f32 %v2537_v6, %v12895_v3  ;;  %v13096_v12 = vadd.f32 %v10785_v33, %v2622_v2  ;;  %v17514_v2 = vld [vmem:[#allocation17_spill] sm:$0xff] }
 0x18b   : > { %v10748_v17 = vpop.f32.mrf.mxu0  ;;  %v10790_v30 = vpop.f32.mrf.mxu1 }
 0x18c   : > { %v2623_v62 = vadd.f32 %v10748_v17, %v12900_v28  ;;  %v13099_v36 = vadd.f32 %v2976_v15, %v2620_v55  ;;  %v17511_v15 = vld [vmem:[#allocation11_spill] sm:$0xff] }
 0x18d   : > { %v2540_v40 = vpop.f32.mrf.mxu0  ;;  %v13101_v27 = vpop.f32.mrf.mxu1  ;;  %v4750_v51 = vrot.slane %v17511_v15, 3  ;;  %v17523_v15 = vld [vmem:[#allocation19_spill] sm:$0xff] }
 0x18e   : > { %v13104_v29 = vadd.f32 %v2540_v40, %v17505_v8  ;;  %v13106_v14 = vadd.f32 %v10786_v24, %v2623_v62  ;;  %v17516_v62 = vld [vmem:[#allocation8_spill] sm:$0xff] }
 0x18f   : > { %v10751_v1 = vpop.f32.mrf.mxu0  ;;  %10966 = vmatmul.mubr.msk.bf16.gmra.mxu0 %vm17507_vm2, %v17506_v21  ;;  %v10793_v3 = vpop.f32.mrf.mxu1  ;;  %v17517_v40 = vrot.slane %v17516_v62, 3  ;;  %v17518_v21 = vld [vmem:[#allocation18_spill] sm:$0xff]  ;;  %vm17532_vm2 = vmmov %vm17373_vm0 }
 0x190   : > { %v2626_v33 = vadd.f32 %v10751_v1, %v17508_v10  ;;  %10969 = vmatprep.mubr.msk.bf16.mxu0 %vm17510_vm5, %v17509_v45  ;;  %vm17533_vm5 = vmmov %vm17373_vm0 }
 0x191   : > { %v2553_v28 = vpop.f32.mrf.mxu0  ;;  %v3008_v35 = vpop.f32.mrf.mxu1  ;;  %v4751_v8 = vsel %vm17157_vm13, %v17517_v40, %v4750_v51  ;;  %v17527_v40 = vld [vmem:[#allocation20_spill] sm:$0xff] }
 0x192   : > { %v2624_v41 = vadd.f32 %v2553_v28, %v17512_v7  ;;  %v13115_v43 = vadd.f32 %v10789_v32, %v2626_v33  ;;  %v9928_v32 = vld [vmem:[%s17128_s2 + $0x2] sm:$0x3]  ;;  %v17520_v28 = vld [vmem:[#allocation10_spill] sm:$0xff] }
 0x193   : > { %v10752_v24 = vpop.f32.mrf.mxu0  ;;  %v10794_v56 = vpop.f32.mrf.mxu1  ;;  %11340 = vmatprep.subr.msk.bf16.mxu1 %vm17522_vm1, %v9928_v32  ;;  %vm17538_vm1 = vmmov %vm17373_vm0 }
 0x194   : > { %17513 = vst [vmem:[#allocation14_spill] sm:$0xff] %v13115_v43  ;;  %v2627_v6 = vadd.f32 %v10752_v24, %v17514_v2  ;;  %v13118_v55 = vadd.f32 %v2992_v52, %v2624_v41  ;;  %v17524_v41 = vld [vmem:[#allocation12_spill] sm:$0xff] }
 0x195   : > { %v2556_v17 = vpop.f32.mrf.mxu0  ;;  %v13123_v1 = vpop.f32.mrf.mxu1  ;;  %v4752_v24 = vrot.slane %v17524_v41, 3 }
 0x196   : > { %17515 = vst [vmem:[#allocation7_spill] sm:$0xff] %v13118_v55  ;;  %v13126_v10 = vadd.f32 %v2556_v17, %v17518_v21  ;;  %v13128_v45 = vadd.f32 %v10790_v30, %v2627_v6  ;;  %v6104_v30 = vsel %vm17525_vm11, %v9928_v32, 0  ;;  %v17526_v17 = vld [vmem:[#allocation13_spill] sm:$0xff] }
 0x197   : > { %v10755_v33 = vpop.f32.mrf.mxu0  ;;  %10970 = vmatmul.mubr.msk.bf16.gmra.mxu0 %vm17521_vm9, %v17520_v28  ;;  %v10797_v52 = vpop.f32.mrf.mxu1  ;;  %v4754_v62 = vrot.slane %v17526_v17, 3  ;;  %10990 = vmatpush3.bf16.msra.mxu1 %v6104_v30  ;;  %vm17537_vm9 = vmmov %vm17373_vm0 }
 0x198   : > { %17519 = vst [vmem:[#allocation15_spill] sm:$0xff] %v13128_v45  ;;  %v2630_v7 = vadd.f32 %v10755_v33, %v17523_v15  ;;  %10973 = vmatprep.mubr.msk.bf16.mxu0 %vm17373_vm0, %v4751_v8  ;;  %v4753_v8 = vsel %vm17157_vm13, %v4750_v51, %v4752_v24 }
 0x199   : > { %v2569_v2 = vpop.f32.mrf.mxu0  ;;  %v3024_v6 = vpop.f32.mrf.mxu1  ;;  %v4755_v32 = vsel %vm17157_vm13, %v4752_v24, %v4754_v62  ;;  %v4758_v24 = vrot.slane %v12917_v16, 3 }
 0x19a   : > { %v2628_v21 = vadd.f32 %v2569_v2, %v17527_v40  ;;  %v13142_v45 = vadd.f32 %v10793_v3, %v2630_v7 }
 0x19b   : > { %v10756_v28 = vpop.f32.mrf.mxu0  ;;  %v10798_v55 = vpop.f32.mrf.mxu1 }
 0x19c   : > { %v2631_v43 = vadd.f32 %v10756_v28, %v12960_v47  ;;  %v13145_v33 = vadd.f32 %v3008_v35, %v2628_v21  ;;  %v4756_v35 = vrot.slane %v12913_v58, 3 }
 0x19d   : > { %v2572_v15 = vpop.f32.mrf.mxu0  ;;  %v13149_v41 = vpop.f32.mrf.mxu1 }
 0x19e   : > { %v13152_v17 = vadd.f32 %v2572_v15, %v12969_v39  ;;  %v13154_v30 = vadd.f32 %v10794_v56, %v2631_v43  ;;  %v4759_v58 = vsel %vm17157_vm13, %v4756_v35, %v4758_v24 }
 0x19f   : > { %v10759_v3 = vpop.f32.mrf.mxu0  ;;  %10974 = vmatmul.mubr.msk.bf16.gmra.mxu0 %vm17528_vm3, %v4753_v8  ;;  %v10841_v7 = vpop.f32.mrf.mxu1 }
 0x1a0   : > { %v2634_v47 = vadd.f32 %v10759_v3, %v12974_v37  ;;  %10977 = vmatprep.mubr.msk.bf16.mxu0 %vm17529_vm15, %v4755_v32  ;;  %v4757_v37 = vsel %vm17157_vm13, %v4754_v62, %v4756_v35  ;;  %v4762_v3 = vrot.slane %v12943_v53, 3 }
 0x1a1   : > { %v2585_v51 = vpop.f32.mrf.mxu0  ;;  %v3657_v2 = vpop.f32.mrf.mxu1 }
 0x1a2   : > { %v2632_v40 = vadd.f32 %v2585_v51, %v12981_v4  ;;  %v13162_v39 = vadd.f32 %v10797_v52, %v2634_v47 }
 0x1a3   : > { %v10760_v43 = vpop.f32.mrf.mxu0  ;;  %v10842_v56 = vpop.f32.mrf.mxu1 }
 0x1a4   : > { %v2635_v21 = vadd.f32 %v10760_v43, %v12984_v46  ;;  %v13165_v28 = vadd.f32 %v3024_v6, %v2632_v40  ;;  %v4760_v46 = vrot.slane %v12939_v60, 3 }
 0x1a5   : > { %v13168_v8 = vpop.f32.mrf.mxu0  ;;  %v13171_v15 = vpop.f32.mrf.mxu1 }
 0x1a6   : > { %17530 = vst [vmem:[#allocation9_spill] sm:$0xff] %v13165_v28  ;;  %v13173_v32 = vadd.f32 %v10798_v55, %v2635_v21  ;;  %v4763_v60 = vsel %vm17157_vm13, %v4760_v46, %v4762_v3 }
 0x1a7   : > { %v10803_v16 = vpop.f32.mrf.mxu0  ;;  %10978 = vmatmul.mubr.msk.bf16.gmra.mxu0 %vm17532_vm2, %v4757_v37  ;;  %v10845_v4 = vpop.f32.mrf.mxu1 }
 0x1a8   : > { %17531 = vst [vmem:[#allocation11_spill] sm:$0xff] %v13173_v32  ;;  %v3488_v52 = vadd.f32 %v10803_v16, %v13001_v31  ;;  %10981 = vmatprep.mubr.msk.bf16.mxu0 %vm17533_vm5, %v4759_v58  ;;  %v4761_v31 = vsel %vm17157_vm13, %v4758_v24, %v4760_v46 }
 0x1a9   : > { %v3343_v6 = vpop.f32.mrf.mxu0  ;;  %v3673_v62 = vpop.f32.mrf.mxu1 }
 0x1aa   : > { %v3486_v47 = vadd.f32 %v3343_v6, %v13004_v25  ;;  %v13181_v35 = vadd.f32 %v10841_v7, %v3488_v52  ;;  %v939_v7 = vlaneseq }
 0x1ab   : > { %v10804_v55 = vpop.f32.mrf.mxu0  ;;  %v10846_v51 = vpop.f32.mrf.mxu1 }
 0x1ac   : > { %17534 = vst [vmem:[#allocation16_spill] sm:$0xff] %v13181_v35  ;;  %v3489_v40 = vadd.f32 %v10804_v55, %v13015_v54  ;;  %v13184_v43 = vadd.f32 %v3657_v2, %v3486_v47  ;;  %v17539_v54 = vld [vmem:[#allocation21_spill] sm:$0xff]  ;;  %v13201_v55 = vshrl.u32 %v939_v7, 7 }
 0x1ad   : > { %v13187_v21 = vpop.f32.mrf.mxu0  ;;  %v13190_v37 = vpop.f32.mrf.mxu1  ;;  %v4764_v2 = vrot.slane %v17539_v54, 3 }
 0x1ae   : > { %17535 = vst [vmem:[#allocation17_spill] sm:$0xff] %v13184_v43  ;;  %v13192_v58 = vadd.f32 %v10842_v56, %v3489_v40 }
 0x1af   : > { %v10807_v53 = vpop.f32.mrf.mxu0  ;;  %10982 = vmatmul.mubr.msk.bf16.gmra.mxu0 %vm17537_vm9, %v4761_v31  ;;  %v10849_v25 = vpop.f32.mrf.mxu1 }
 0x1b0   : > { %17536 = vst [vmem:[#allocation8_spill] sm:$0xff] %v13192_v58  ;;  %v3492_v16 = vadd.f32 %v10807_v53, %v13022_v61  ;;  %10985 = vmatprep.mubr.msk.bf16.mxu0 %vm17538_vm1, %v4763_v60  ;;  %v4765_v61 = vsel %vm17157_vm13, %v4762_v3, %v4764_v2  ;;  %vm17588_vm13 = vcmask 1041408  }
 0x1b1   : > { %v3359_v24 = vpop.f32.mrf.mxu0  ;;  %v3689_v52 = vpop.f32.mrf.mxu1 }
 0x1b2   : > { %v3490_v6 = vadd.f32 %v3359_v24, %v13025_v50  ;;  %v13199_v46 = vadd.f32 %v10845_v4, %v3492_v16  ;;  %v13215_v4 = vadd.s32 16, %v13201_v55 }
 0x1b3   : > { %v10808_v47 = vpop.f32.mrf.mxu0  ;;  %v10850_v56 = vpop.f32.mrf.mxu1 }
 0x1b4   : > { %17540 = vst [vmem:[#allocation18_spill] sm:$0xff] %v13199_v46  ;;  %v3493_v40 = vadd.f32 %v10808_v47, %v13036_v13  ;;  %v13204_v31 = vadd.f32 %v3673_v62, %v3490_v6  ;;  %v13226_v47 = vadd.s32 24, %v13201_v55 }
 0x1b5   : > { %v13207_v53 = vpop.f32.mrf.mxu0  ;;  %v13209_v60 = vpop.f32.mrf.mxu1 }
 0x1b6   : > { %17541 = vst [vmem:[#allocation10_spill] sm:$0xff] %v13204_v31  ;;  %v13211_v54 = vadd.f32 %v10846_v51, %v3493_v40  ;;  %v13222_v51 = vmul.u32.u64.low 3817748708, %v13215_v4  ;;  %v13223_v6 = vmul.u32.u64.high 3817748708, %v13215_v4, %v13222_v51 }
 0x1b7   : > { %v10811_v58 = vpop.f32.mrf.mxu0  ;;  %10986 = vmatmul.mubr.msk.bf16.gmra.mxu0 %vm17373_vm0, %v4765_v61  ;;  %v10853_v50 = vpop.f32.mrf.mxu1 }
 0x1b8   : > { %17542 = vst [vmem:[#allocation19_spill] sm:$0xff] %v13211_v54  ;;  %v3496_v7 = vadd.f32 %v10811_v58, %v13042_v48  ;;  %v13232_v48 = vmul.u32.u64.low 3817748708, %v13201_v55  ;;  %v13233_v58 = vmul.u32.u64.high 3817748708, %v13201_v55, %v13232_v48 }
 0x1b9   : > { %v3375_v13 = vpop.f32.mrf.mxu0  ;;  %v3705_v62 = vpop.f32.mrf.mxu1 }
 0x1ba   : > { %v3494_v16 = vadd.f32 %v3375_v13, %v13045_v18  ;;  %v13219_v3 = vadd.f32 %v10849_v25, %v3496_v7  ;;  %v13240_v7 = vadd.s32 8, %v13201_v55 }
 0x1bb   : > { %v10812_v2 = vpop.f32.mrf.mxu0  ;;  %v10854_v24 = vpop.f32.mrf.mxu1 }
 0x1bc   : > { %17543 = vst [vmem:[#allocation12_spill] sm:$0xff] %v13219_v3  ;;  %v3497_v40 = vadd.f32 %v10812_v2, %v13052_v57  ;;  %v13229_v61 = vadd.f32 %v3689_v52, %v3494_v16  ;;  %v13245_v54 = vmul.u32.u64.low 3817748708, %v13226_v47  ;;  %v13246_v57 = vmul.u32.u64.high 3817748708, %v13226_v47, %v13245_v54 }
 0x1bd   : > { %v13235_v18 = vpop.f32.mrf.mxu0  ;;  %v13237_v25 = vpop.f32.mrf.mxu1  ;;  %v17546_v54 = vld [vmem:[#allocation23_spill] sm:$0xff] }
 0x1be   : > { %17544 = vst [vmem:[#allocation13_spill] sm:$0xff] %v13229_v61  ;;  %v13242_v13 = vadd.f32 %v10850_v56, %v3497_v40  ;;  %v13250_v48 = vmul.u32.u64.low 3817748708, %v13240_v7  ;;  %v13251_v61 = vmul.u32.u64.high 3817748708, %v13240_v7, %v13250_v48 }
 0x1bf   : > { %v10815_v51 = vpop.f32.mrf.mxu0  ;;  %v10857_v3 = vpop.f32.mrf.mxu1 }
 0x1c0   : > { %17545 = vst [vmem:[#allocation20_spill] sm:$0xff] %v13242_v13  ;;  %v3500_v52 = vadd.f32 %v10815_v51, %v13060_v26  ;;  %v1004_v13 = vshrl.u32 %v13223_v6, 4  ;;  %v982_v26 = vshrl.u32 %v13233_v58, 4  ;;  %v17547_v51 = vld [vmem:[#allocation22_spill] sm:$0xff]  ;;  %v3048_v6 = vadd.f32 %v13031_v42, %v13050_v38 }
 0x1c1   : > { %v3391_v16 = vpop.f32.mrf.mxu0  ;;  %v3721_v2 = vpop.f32.mrf.mxu1  ;;  %v2311_v32 = vadd.f32 %v17547_v51, %v17546_v54  ;;  %v13283_v58 = vadd.f32 %v13047_v34, %v13068_v19  ;;  %v993_v38 = vshrl.u32 %v13251_v61, 4 }
 0x1c2   : > { %v3498_v31 = vadd.f32 %v3391_v16, %v13063_v5  ;;  %v13254_v46 = vadd.f32 %v10853_v50, %v3500_v52  ;;  %v13268_v5 = vadd.s32 48, %v13201_v55  ;;  %v17548_v50 = vld [vmem:[#allocation24_spill] sm:$0xff]  ;;  %v1005_v54 = vmul.u32 18, %v1004_v13 }
 0x1c3   : > { %v10816_v56 = vpop.f32.mrf.mxu0  ;;  %v10858_v40 = vpop.f32.mrf.mxu1  ;;  %v3040_v52 = vadd.f32 %v17548_v50, %v13013_v9  ;;  %v1015_v9 = vshrl.u32 %v13246_v57, 4  ;;  %v13298_v13 = vadd.s32 56, %v13201_v55 }
 0x1c4   : > { %v3501_v43 = vadd.f32 %v10816_v56, %v13070_v49  ;;  %v13258_v35 = vadd.f32 %v3705_v62, %v3498_v31  ;;  %v3044_v49 = vadd.f32 %v13009_v23, %v13034_v11  ;;  %v13277_v62 = vadd.s32 32, %v13201_v55 }
 0x1c5   : > { %v13263_v28 = vpop.f32.mrf.mxu0  ;;  %v13265_v48 = vpop.f32.mrf.mxu1  ;;  %v13288_v23 = vadd.f32 %v13065_v59, %v13086_v0  ;;  %v2633_v11 = vadd.f32 %v13168_v8, %v2311_v32  ;;  %v13294_v34 = vmul.u32.u64.low 3817748708, %v13268_v5  ;;  %v13295_v19 = vmul.u32.u64.high 3817748708, %v13268_v5, %v13294_v34 }
 0x1c6   : > { %v13274_v31 = vadd.f32 %v10854_v24, %v3501_v43  ;;  %v983_v24 = vmul.u32 18, %v982_v26  ;;  %v13304_v0 = vmul.u32.u64.low 3817748708, %v13277_v62  ;;  %v13305_v8 = vmul.u32.u64.high 3817748708, %v13277_v62, %v13304_v0 }
 0x1c7   : > { %v10819_v16 = vpop.f32.mrf.mxu0  ;;  %v10861_v56 = vpop.f32.mrf.mxu1  ;;  %v13313_v32 = vadd.f32 %v13101_v27, %v13126_v10  ;;  %v13316_v50 = vsub.s32 %v13215_v4, %v1005_v54  ;;  %v13329_v27 = vadd.f32 %v13149_v41, %v2633_v11 }
 0x1c8   : > { %v3504_v43 = vadd.f32 %v10819_v16, %v13078_v22  ;;  %v13309_v22 = vadd.f32 %v13083_v20, %v13104_v29  ;;  %v13326_v20 = vsub.s32 %v13201_v55, %v983_v24 }
 0x1c9   : > { %v3407_v51 = vpop.f32.mrf.mxu0  ;;  %v3737_v42 = vpop.f32.mrf.mxu1  ;;  %17549 = vst [vmem:[#allocation21_spill] sm:$0xff] %v13316_v50  ;;  %v13336_v4 = vmul.u32.u64.low 3817748708, %v13298_v13  ;;  %v13337_v54 = vmul.u32.u64.high 3817748708, %v13298_v13, %v13336_v4  ;;  %vm1374_vm11 = vcmp.ne.s32.totalorder %v13316_v50, 0  ;;  %vm1410_vm3 = vcmp.lt.s32.totalorder %v13316_v50, 0 }
 0x1ca   : > { %v3502_v57 = vadd.f32 %v3407_v51, %v13081_v44  ;;  %v13301_v59 = vadd.f32 %v10857_v3, %v3504_v43  ;;  %v1016_v44 = vmul.u32 18, %v1015_v9  ;;  %v13320_v3 = vadd.f32 %v13123_v1, %v13152_v17  ;;  %17551 = vst [vmem:[#allocation22_spill] sm:$0xff] %v13326_v20  ;;  %vm13388_vm1 = vmand %vm1410_vm3, %vm1374_vm11 }
 0x1cb   : > { %v10820_v61 = vpop.f32.mrf.mxu0  ;;  %v10862_v26 = vpop.f32.mrf.mxu1  ;;  %v13340_v1 = vadd.s32 40, %v13201_v55  ;;  %v3491_v17 = vadd.f32 %v13207_v53, %v3044_v49  ;;  %v994_v9 = vmul.u32 18, %v993_v38  ;;  %v13349_v24 = vadd.s32 18, %v13316_v50 }
 0x1cc   : > { %v3505_v16 = vadd.f32 %v10820_v61, %v13088_v63  ;;  %v13323_v43 = vadd.f32 %v3721_v2, %v3502_v57  ;;  %v3487_v63 = vadd.f32 %v13187_v21, %v3040_v52  ;;  %v13352_v51 = vsub.s32 %v13226_v47, %v1016_v44 }
 0x1cd   : > { %v13331_v29 = vpop.f32.mrf.mxu0  ;;  %v13333_v10 = vpop.f32.mrf.mxu1  ;;  %17553 = vst [vmem:[#allocation25_spill] sm:$0xff] %v13349_v24  ;;  %vm1372_vm15 = vcmp.ne.s32.totalorder %v13326_v20, 0  ;;  %vm1408_vm2 = vcmp.lt.s32.totalorder %v13326_v20, 0  ;;  %v13358_v21 = vadd.s32 80, %v13201_v55  ;;  %v1048_v52 = vshrl.u32 %v13295_v19, 4 }
 0x1ce   : > { %17550 = vst [vmem:[#allocation23_spill] sm:$0xff] %v13323_v43  ;;  %v13344_v2 = vadd.f32 %v10858_v40, %v3505_v16  ;;  %17554 = vst [vmem:[#allocation26_spill] sm:$0xff] %v13352_v51  ;;  %v13362_v49 = vmul.u32.u64.low 3817748708, %v13340_v1  ;;  %v13363_v38 = vmul.u32.u64.high 3817748708, %v13340_v1, %v13362_v49  ;;  %v13366_v47 = vadd.s32 64, %v13201_v55 }
 0x1cf   : > { %v10823_v41 = vpop.f32.mrf.mxu0  ;;  %v10865_v11 = vpop.f32.mrf.mxu1  ;;  %v13372_v0 = vsub.s32 %v13240_v7, %v994_v9  ;;  %v1026_v61 = vshrl.u32 %v13305_v8, 4  ;;  %v3495_v44 = vadd.f32 %v13235_v18, %v3048_v6  ;;  %v13377_v4 = vadd.s32 18, %v13326_v20  ;;  %vm13404_vm0 = vmand %vm1408_vm2, %vm1372_vm15 }
 0x1d0   : > { %17552 = vst [vmem:[#allocation24_spill] sm:$0xff] %v13344_v2  ;;  %v3508_v34 = vadd.f32 %v10823_v41, %v13096_v12  ;;  %vm1375_vm5 = vcmp.ne.s32.totalorder %v13352_v51, 0  ;;  %vm1411_vm9 = vcmp.lt.s32.totalorder %v13352_v51, 0  ;;  %v17559_v7 = vmov 0 }
 0x1d1   : > { %v3423_v53 = vpop.f32.mrf.mxu0  ;;  %v3753_v40 = vpop.f32.mrf.mxu1  ;;  %17556 = vst [vmem:[#allocation28_spill] sm:$0xff] %v13372_v0  ;;  %17557 = vst [vmem:[#allocation29_spill] sm:$0xff] %v13377_v4  ;;  %v17560_v7 = vsel %vm13388_vm1, 4294967295, %v17559_v7  ;;  %v13393_v18 = vmul.u32.u64.low 3817748708, %v13358_v21  ;;  %v13394_v6 = vmul.u32.u64.high 3817748708, %v13358_v21, %v13393_v18  ;;  %v1059_v41 = vshrl.u32 %v13337_v54, 4 }
 0x1d2   : > { %v3506_v12 = vadd.f32 %v3423_v53, %v13099_v36  ;;  %v13369_v57 = vadd.f32 %v10861_v56, %v3508_v34  ;;  %17561 = vst [vmem:[#allocation31_spill] sm:$0xff] %v17560_v7  ;;  %v13410_v34 = vmul.u32.u64.low 3817748708, %v13366_v47  ;;  %v13411_v53 = vmul.u32.u64.high 3817748708, %v13366_v47, %v13410_v34  ;;  %vm13442_vm15 = vmand %vm1411_vm9, %vm1375_vm5 }
 0x1d3   : > { %v10824_v16 = vpop.f32.mrf.mxu0  ;;  %v10866_v19 = vpop.f32.mrf.mxu1  ;;  %vm1373_vm11 = vcmp.ne.s32.totalorder %v13372_v0, 0  ;;  %vm1409_vm3 = vcmp.lt.s32.totalorder %v13372_v0, 0  ;;  %v13421_v18 = vadd.f32 %v13190_v37, %v3491_v17  ;;  %v13424_v54 = vadd.s32 18, %v13352_v51  ;;  %v5768_v51 = vld [vmem:[#allocation3] sm:$0xf] }
 0x1d4   : > { %17555 = vst [vmem:[#allocation27_spill] sm:$0xff] %v13369_v57  ;;  %v3509_v36 = vadd.f32 %v10824_v16, %v13106_v14  ;;  %v13382_v56 = vadd.f32 %v3737_v42, %v3506_v12  ;;  %v17562_v14 = vmov 0  ;;  %v1049_v42 = vmul.u32 18, %v1048_v52  ;;  %vm13456_vm2 = vmand %vm1409_vm3, %vm1373_vm11 }
 0x1d5   : > { %v13396_v8 = vpop.f32.mrf.mxu0  ;;  %v13398_v9 = vpop.f32.mrf.mxu1  ;;  %v17563_v14 = vsel %vm13404_vm0, 4294967295, %v17562_v14  ;;  %v1027_v12 = vmul.u32 18, %v1026_v61  ;;  %v13418_v16 = vadd.f32 %v13171_v15, %v3487_v63  ;;  %17566 = vst [vmem:[#allocation34_spill] sm:$0xff] %v13424_v54  ;;  %v13427_v34 = vadd.s32 88, %v13201_v55  ;;  %v5769_v54 = vld [vmem:[#allocation3 + $0x4] sm:$0xf] }
 0x1d6   : > { %17558 = vst [vmem:[#allocation30_spill] sm:$0xff] %v13382_v56  ;;  %17564 = vst [vmem:[#allocation32_spill] sm:$0xff] %v17563_v14  ;;  %v13413_v49 = vadd.f32 %v10862_v26, %v3509_v36  ;;  %v17567_v26 = vld [vmem:[#allocation14_spill] sm:$0xff]  ;;  %v17568_v37 = vmov 0  ;;  %v13447_v63 = vadd.s32 18, %v13372_v0  ;;  %v13450_v17 = vadd.f32 %v13209_v60, %v3495_v44  ;;  %v17577_v44 = vld [vmem:[#allocation7_spill] sm:$0xff] }
 0x1d7   : > { %v10827_v52 = vpop.f32.mrf.mxu0  ;;  %v10869_v56 = vpop.f32.mrf.mxu1  ;;  %v17569_v37 = vsel %vm13442_vm15, 4294967295, %v17568_v37  ;;  %v17573_v15 = vmov 0  ;;  %v13461_v61 = vsub.s32 %v13268_v5, %v1049_v42  ;;  %v1060_v20 = vmul.u32 18, %v1059_v41 }
 0x1d8   : > { %17565 = vst [vmem:[#allocation33_spill] sm:$0xff] %v13413_v49  ;;  %v3512_v36 = vadd.f32 %v10827_v52, %v17567_v26  ;;  %17570 = vst [vmem:[#allocation14_spill] sm:$0xff] %v17569_v37  ;;  %v17574_v15 = vsel %vm13456_vm2, 4294967295, %v17573_v15  ;;  %v1037_v4 = vshrl.u32 %v13363_v38, 4  ;;  %v3499_v60 = vadd.f32 %v13263_v28, %v13283_v58  ;;  %v17580_v58 = vld [vmem:[#allocation15_spill] sm:$0xff] }
 0x1d9   : > { %17571 = vst [vmem:[#allocation35_spill] sm:$0xff] %v13447_v63  ;;  %17572 = vst [vmem:[#allocation36_spill] sm:$0xff] %v13450_v17  ;;  %v3439_v52 = vpop.f32.mrf.mxu0  ;;  %v3769_v26 = vpop.f32.mrf.mxu1  ;;  %v13470_v24 = vsub.s32 %v13277_v62, %v1027_v12  ;;  %v13477_v42 = vmul.u32.u64.low 3817748708, %v13427_v34  ;;  %v13478_v38 = vmul.u32.u64.high 3817748708, %v13427_v34, %v13477_v42  ;;  %v13481_v28 = vadd.s32 72, %v13201_v55 }
 0x1da   : > { %17575 = vst [vmem:[#allocation37_spill] sm:$0xff] %v17574_v15  ;;  %17576 = vst [vmem:[#allocation38_spill] sm:$0xff] %v13461_v61  ;;  %v3510_v14 = vadd.f32 %v3439_v52, %v17577_v44  ;;  %v13467_v50 = vadd.f32 %v10865_v11, %v3512_v36  ;;  %v1092_v12 = vshrl.u32 %v13394_v6, 4  ;;  %vm1378_vm5 = vcmp.ne.s32.totalorder %v13461_v61, 0 }
 0x1db   : > { %17579 = vst [vmem:[#allocation39_spill] sm:$0xff] %v13470_v24  ;;  %v10828_v7 = vpop.f32.mrf.mxu0  ;;  %v10870_v49 = vpop.f32.mrf.mxu1  ;;  %vm1414_vm9 = vcmp.lt.s32.totalorder %v13461_v61, 0  ;;  %v13498_v44 = vadd.s32 18, %v13461_v61  ;;  %v13505_v42 = vadd.f32 %v13237_v25, %v3499_v60  ;;  %vm1376_vm11 = vcmp.ne.s32.totalorder %v13470_v24, 0 }
 0x1dc   : > { %17578 = vst [vmem:[#allocation7_spill] sm:$0xff] %v13467_v50  ;;  %v3513_v11 = vadd.f32 %v10828_v7, %v17580_v58  ;;  %v13484_v41 = vadd.f32 %v3753_v40, %v3510_v14  ;;  %v13501_v40 = vsub.s32 %v13298_v13, %v1060_v20  ;;  %v1038_v7 = vmul.u32 18, %v1037_v4 }
 0x1dd   : > { %v13491_v36 = vpop.f32.mrf.mxu0  ;;  %v13493_v52 = vpop.f32.mrf.mxu1  ;;  %17582 = vst [vmem:[#allocation40_spill] sm:$0xff] %v13498_v44  ;;  %v1070_v14 = vshrl.u32 %v13411_v53, 4  ;;  %17584 = vst [vmem:[#allocation42_spill] sm:$0xff] %v13505_v42  ;;  %v13511_v58 = vadd.s32 112, %v13201_v55  ;;  %vm1412_vm3 = vcmp.lt.s32.totalorder %v13470_v24, 0  ;;  %v13521_v4 = vadd.s32 96, %v13201_v55 }
 0x1de   : > { %17581 = vst [vmem:[#allocation15_spill] sm:$0xff] %v13484_v41  ;;  %17583 = vst [vmem:[#allocation41_spill] sm:$0xff] %v13501_v40  ;;  %v13507_v6 = vadd.f32 %v10866_v19, %v3513_v11  ;;  %v13517_v13 = vmul.u32.u64.low 3817748708, %v13481_v28  ;;  %v13518_v20 = vmul.u32.u64.high 3817748708, %v13481_v28, %v13517_v13  ;;  %v13525_v25 = vadd.f32 %v13331_v29, %v13288_v23  ;;  %v5804_v11 = vld [vmem:[%s17128_s2] sm:$0x3] }
 0x1df   : > { %v10831_v62 = vpop.f32.mrf.mxu0  ;;  %v13513_v5 = vpop.f32.mrf.mxu1  ;;  %v13529_v53 = vadd.s32 18, %v13470_v24  ;;  %v1093_v60 = vmul.u32 18, %v1092_v12  ;;  %vm1379_vm7 = vcmp.ne.s32.totalorder %v13501_v40, 0  ;;  %v13538_v13 = vsub.s32 %v13340_v1, %v1038_v7  ;;  %11341 = vmatprep.subr.msk.bf16.mxu0 %vm17588_vm13, %v5804_v11 }
 0x1e0   : > { %17585 = vst [vmem:[#allocation43_spill] sm:$0xff] %v13507_v6  ;;  %v3516_v19 = vadd.f32 %v10831_v62, %v13142_v45  ;;  %v1071_v23 = vmul.u32 18, %v1070_v14  ;;  %v13541_v29 = vadd.s32 120, %v13201_v55  ;;  %vm1415_vm14 = vcmp.lt.s32.totalorder %v13501_v40, 0 }
 0x1e1   : > { %17586 = vst [vmem:[#allocation44_spill] sm:$0xff] %v13529_v53  ;;  %v3455_v0 = vpop.f32.mrf.mxu0  ;;  %v13534_v63 = vpop.f32.mrf.mxu1  ;;  %17587 = vst [vmem:[#allocation45_spill] sm:$0xff] %v13538_v13  ;;  %v13548_v12 = vmul.u32.u64.low 3817748708, %v13511_v58  ;;  %v13549_v15 = vmul.u32.u64.high 3817748708, %v13511_v58, %v13548_v12  ;;  %v13555_v1 = vmul.u32.u64.low 3817748708, %v13521_v4  ;;  %v13556_v7 = vmul.u32.u64.high 3817748708, %v13521_v4, %v13555_v1 }
 0x1e2   : > { %v3514_v45 = vadd.f32 %v3455_v0, %v13145_v33  ;;  %v13545_v62 = vadd.f32 %v10869_v56, %v3516_v19  ;;  %v6320_v14 = vsel %vm17588_vm13, %v5804_v11, 0  ;;  %v13563_v56 = vsub.s32 %v13358_v21, %v1093_v60  ;;  %vm13604_vm13 = vmand %vm1414_vm9, %vm1378_vm5 }
 0x1e3   : > { %v10832_v37 = vpop.f32.mrf.mxu0  ;;  %v13551_v6 = vpop.f32.mrf.mxu1  ;;  %v1103_v19 = vshrl.u32 %v13478_v38, 4  ;;  %11028 = vmatpush3.bf16.msra.mxu0 %v6320_v14  ;;  %v13571_v41 = vmul.u32.u64.low 3817748708, %v13541_v29  ;;  %v13572_v50 = vmul.u32.u64.high 3817748708, %v13541_v29, %v13571_v41  ;;  %v13575_v11 = vadd.s32 104, %v13201_v55  ;;  %vm13638_vm9 = vmand %vm1415_vm14, %vm1379_vm7 }
 0x1e4   : > { %17589 = vst [vmem:[#allocation46_spill] sm:$0xff] %v13545_v62  ;;  %v3517_v33 = vadd.f32 %v10832_v37, %v13154_v30  ;;  %v13560_v0 = vadd.f32 %v3769_v26, %v3514_v45  ;;  %17591 = vst [vmem:[#allocation48_spill] sm:$0xff] %v13563_v56  ;;  %v13577_v30 = vcombine.low %v5768_v51, %v5769_v54  ;;  %v13582_v21 = vadd.s32 18, %v13501_v40 }
 0x1e5   : > { %v13566_v12 = vpop.f32.mrf.mxu0  ;;  %v13568_v62 = vpop.f32.mrf.mxu1  ;;  %v13586_v26 = vsub.s32 %v13366_v47, %v1071_v23  ;;  %v3507_v38 = vadd.f32 %v13396_v8, %v13309_v22  ;;  %v13594_v51 = vadd.s32 18, %v13538_v13  ;;  %v17597_v22 = vmov 0 }
 0x1e6   : > { %17590 = vst [vmem:[#allocation47_spill] sm:$0xff] %v13560_v0  ;;  %v13579_v37 = vadd.f32 %v10870_v49, %v3517_v33  ;;  %17593 = vst [vmem:[#allocation50_spill] sm:$0xff] %v13582_v21  ;;  %v1081_v49 = vshrl.u32 %v13518_v20, 4  ;;  %11029 = vmatprep.mubr.msk.bf16.mxu0 %vm17596_vm10, %v13577_v30  ;;  %v17598_v22 = vsel %vm13604_vm13, 4294967295, %v17597_v22  ;;  %v1104_v47 = vmul.u32 18, %v1103_v19  ;;  %v17604_v33 = vld [vmem:[#allocation9_spill] sm:$0xff] }
 0x1e7   : > { %17594 = vst [vmem:[#allocation51_spill] sm:$0xff] %v13586_v26  ;;  %v10835_v60 = vpop.f32.mrf.mxu0  ;;  %v13590_v41 = vpop.f32.mrf.mxu1  ;;  %17595 = vst [vmem:[#allocation52_spill] sm:$0xff] %v13594_v51  ;;  %v13610_v8 = vadd.s32 144, %v13201_v55  ;;  %v13624_v45 = vadd.s32 18, %v13563_v56  ;;  %v13627_v1 = vmul.u32.u64.low 3817748708, %v13575_v11  ;;  %v13628_v14 = vmul.u32.u64.high 3817748708, %v13575_v11, %v13627_v1 }
 0x1e8   : > { %17592 = vst [vmem:[#allocation49_spill] sm:$0xff] %v13579_v37  ;;  %v3520_v54 = vadd.f32 %v10835_v60, %v13162_v39  ;;  %17599 = vst [vmem:[#allocation53_spill] sm:$0xff] %v17598_v22  ;;  %v17600_v39 = vmov 0  ;;  %v17606_v37 = vmov 0  ;;  %vm17609_vm5 = vcmp.ne.s32.totalorder %v13538_v13, 0 }
 0x1e9   : > { %v3471_v20 = vpop.f32.mrf.mxu0  ;;  %v13612_v23 = vpop.f32.mrf.mxu1  ;;  %vm13618_vm10 = vmand %vm1412_vm3, %vm1376_vm11  ;;  %17603 = vst [vmem:[#allocation55_spill] sm:$0xff] %v13624_v45  ;;  %v17607_v37 = vsel %vm13638_vm9, 4294967295, %v17606_v37  ;;  %vm1380_vm11 = vcmp.ne.s32.totalorder %v13586_v26, 0  ;;  %vm1416_vm3 = vcmp.lt.s32.totalorder %v13586_v26, 0  ;;  %vm17610_vm6 = vcmp.lt.s32.totalorder %v13538_v13, 0 }
 0x1ea   : > { %v17601_v39 = vsel %vm13618_vm10, 4294967295, %v17600_v39  ;;  %v3518_v19 = vadd.f32 %v3471_v20, %v17604_v33  ;;  %v13632_v60 = vadd.f32 %v13513_v5, %v3520_v54  ;;  %17608 = vst [vmem:[#allocation56_spill] sm:$0xff] %v17607_v37  ;;  %vm13650_vm4 = vmand %vm17610_vm6, %vm17609_vm5  ;;  %v17611_v5 = vmov 0 }
 0x1eb   : > { %17602 = vst [vmem:[#allocation54_spill] sm:$0xff] %v17601_v39  ;;  %v10836_v0 = vpop.f32.mrf.mxu0  ;;  %v13644_v42 = vpop.f32.mrf.mxu1  ;;  %v17612_v5 = vsel %vm13650_vm4, 4294967295, %v17611_v5  ;;  %v13655_v54 = vadd.s32 18, %v13586_v26  ;;  %v1082_v20 = vmul.u32 18, %v1081_v49  ;;  %v1136_v1 = vshrl.u32 %v13549_v15, 4  ;;  %vm13691_vm5 = vmand %vm1416_vm3, %vm1380_vm11 }
 0x1ec   : > { %17605 = vst [vmem:[#allocation9_spill] sm:$0xff] %v13632_v60  ;;  %17613 = vst [vmem:[#allocation57_spill] sm:$0xff] %v17612_v5  ;;  %v1114_v33 = vshrl.u32 %v13556_v7, 4  ;;  %v17615_v60 = vld [vmem:[#allocation11_spill] sm:$0xff]  ;;  %v13661_v17 = vadd.f32 %v13534_v63, %v3518_v19  ;;  %vm17617_vm14 = vcmp.ne.s32.totalorder %v13563_v56, 0  ;;  %vm17618_vm6 = vcmp.lt.s32.totalorder %v13563_v56, 0 }
 0x1ed   : > { %17614 = vst [vmem:[#allocation58_spill] sm:$0xff] %v13655_v54  ;;  %v3521_v57 = vadd.f32 %v10836_v0, %v17615_v60  ;;  %vm13667_vm7 = vmand %vm17618_vm6, %vm17617_vm14  ;;  %v17619_v2 = vmov 0  ;;  %v13672_v43 = vmul.u32.u64.low 3817748708, %v13610_v8  ;;  %v13673_v49 = vmul.u32.u64.high 3817748708, %v13610_v8, %v13672_v43  ;;  %v13675_v15 = vpop.f32.mrf.mxu0  ;;  %v13677_v7 = vpop.f32.mrf.mxu1 }
 0x1ee   : > { %17616 = vst [vmem:[#allocation11_spill] sm:$0xff] %v13661_v17  ;;  %v17620_v2 = vsel %vm13667_vm7, 4294967295, %v17619_v2  ;;  %v17622_v43 = vmov 0  ;;  %v13696_v19 = vsub.s32 %v13427_v34, %v1104_v47  ;;  %v1147_v60 = vshrl.u32 %v13572_v50, 4  ;;  %v17629_v34 = vld [vmem:[#allocation17_spill] sm:$0xff] }
 0x1ef   : > { %17621 = vst [vmem:[#allocation59_spill] sm:$0xff] %v17620_v2  ;;  %v17623_v43 = vsel %vm13691_vm5, 4294967295, %v17622_v43  ;;  %v13701_v63 = vadd.f32 %v13265_v48, %v13525_v25  ;;  %v13704_v39 = vadd.f32 %v13551_v6, %v3521_v57  ;;  %v13715_v47 = vadd.f32 %v13333_v10, %v3507_v38  ;;  %v10879_v50 = vpop.f32.mrf.mxu0  ;;  %v13717_v24 = vpop.f32.mrf.mxu1  ;;  %v17627_v6 = vld [vmem:[#allocation16_spill] sm:$0xff] }
 0x1f0   : > { %17624 = vst [vmem:[#allocation60_spill] sm:$0xff] %v17623_v43  ;;  %17625 = vst [vmem:[#allocation61_spill] sm:$0xff] %v13696_v19  ;;  %v1137_v48 = vmul.u32 18, %v1136_v1  ;;  %v1115_v25 = vmul.u32 18, %v1114_v33  ;;  %v13720_v57 = vadd.s32 128, %v13201_v55  ;;  %v13723_v53 = vadd.f32 %v10879_v50, %v17627_v6 }
 0x1f1   : > { %17626 = vst [vmem:[#allocation62_spill] sm:$0xff] %v13704_v39  ;;  %v13734_v38 = vsub.s32 %v13481_v28, %v1082_v20  ;;  %v4096_v1 = vpop.f32.mrf.mxu0  ;;  %v13736_v33 = vpop.f32.mrf.mxu1  ;;  %v1148_v50 = vmul.u32 18, %v1147_v60  ;;  %v1125_v6 = vshrl.u32 %v13628_v14, 4  ;;  %v3511_v0 = vadd.f32 %v13491_v36, %v13313_v32  ;;  %v17633_v60 = vld [vmem:[#allocation8_spill] sm:$0xff] }
 0x1f2   : > { %v13744_v56 = vadd.f32 %v4096_v1, %v17629_v34  ;;  %v13747_v10 = vadd.s32 18, %v13696_v19  ;;  %v13750_v28 = vadd.s32 152, %v13201_v55  ;;  %v13755_v54 = vsub.s32 %v13511_v58, %v1137_v48 }
 0x1f3   : > { %17628 = vst [vmem:[#allocation16_spill] sm:$0xff] %v13734_v38  ;;  %v10880_v20 = vpop.f32.mrf.mxu0  ;;  %v13752_v26 = vpop.f32.mrf.mxu1  ;;  %v13758_v14 = vsub.s32 %v13521_v4, %v1115_v25  ;;  %v13761_v32 = vmul.u32.u64.low 3817748708, %v13720_v57  ;;  %v13762_v36 = vmul.u32.u64.high 3817748708, %v13720_v57, %v13761_v32  ;;  %v1180_v1 = vshrl.u32 %v13673_v49, 4 }
 0x1f4   : > { %17630 = vst [vmem:[#allocation17_spill] sm:$0xff] %v13747_v10  ;;  %17631 = vst [vmem:[#allocation63_spill] sm:$0xff] %v13755_v54  ;;  %v13765_v34 = vadd.f32 %v10880_v20, %v17633_v60  ;;  %v13770_v43 = vadd.s32 136, %v13201_v55  ;;  %v13778_v4 = vadd.s32 18, %v13734_v38  ;;  %v13781_v48 = vsub.s32 %v13541_v29, %v1148_v50  ;;  %v17636_v29 = vld [vmem:[#allocation18_spill] sm:$0xff] }
 0x1f5   : > { %17632 = vst [vmem:[#allocation64_spill] sm:$0xff] %v13758_v14  ;;  %v13772_v45 = vpop.f32.mrf.mxu0  ;;  %v13774_v58 = vpop.f32.mrf.mxu1  ;;  %v1126_v25 = vmul.u32 18, %v1125_v6  ;;  %v3515_v20 = vadd.f32 %v13566_v12, %v13320_v3  ;;  %v13786_v49 = vmul.u32.u64.low 3817748708, %v13750_v28  ;;  %v13787_v32 = vmul.u32.u64.high 3817748708, %v13750_v28, %v13786_v49 }
 0x1f6   : > { %17634 = vst [vmem:[#allocation8_spill] sm:$0xff] %v13778_v4  ;;  %17635 = vst [vmem:[#allocation65_spill] sm:$0xff] %v13781_v48  ;;  %v13790_v60 = vadd.s32 176, %v13201_v55  ;;  %vm1386_vm6 = vcmp.ne.s32.totalorder %v13755_v54, 0  ;;  %vm17637_vm8 = vcmp.ne.s32.totalorder %v13696_v19, 0  ;;  %vm17638_vm5 = vcmp.lt.s32.totalorder %v13696_v19, 0 }
 0x1f7   : > { %v10883_v2 = vpop.f32.mrf.mxu0  ;;  %v13792_v13 = vpop.f32.mrf.mxu1  ;;  %vm13805_vm12 = vmand %vm17638_vm5, %vm17637_vm8  ;;  %v17639_v12 = vmov 0  ;;  %v1181_v50 = vmul.u32 18, %v1180_v1  ;;  %v13810_v6 = vmul.u32.u64.low 3817748708, %v13770_v43  ;;  %v13811_v49 = vmul.u32.u64.high 3817748708, %v13770_v43, %v13810_v6 }
 0x1f8   : > { %v13799_v3 = vadd.f32 %v10883_v2, %v17636_v29  ;;  %v17640_v12 = vsel %vm13805_vm12, 4294967295, %v17639_v12  ;;  %vm17642_vm11 = vcmp.ne.s32.totalorder %v13734_v38, 0  ;;  %vm17643_vm3 = vcmp.lt.s32.totalorder %v13734_v38, 0  ;;  %v17649_v6 = vld [vmem:[#allocation10_spill] sm:$0xff] }
 0x1f9   : > { %17641 = vst [vmem:[#allocation18_spill] sm:$0xff] %v17640_v12  ;;  %v4112_v51 = vpop.f32.mrf.mxu0  ;;  %v13813_v5 = vpop.f32.mrf.mxu1  ;;  %vm13819_vm14 = vmand %vm17643_vm3, %vm17642_vm11  ;;  %v17644_v2 = vmov 0  ;;  %v13824_v29 = vadd.s32 18, %v13755_v54  ;;  %vm1387_vm8 = vcmp.ne.s32.totalorder %v13781_v48, 0  ;;  %v13829_v1 = vsub.s32 %v13575_v11, %v1126_v25 }
 0x1fa   : > { %v17645_v2 = vsel %vm13819_vm14, 4294967295, %v17644_v2  ;;  %v13832_v40 = vadd.f32 %v4112_v51, %v17649_v6  ;;  %vm17650_vm11 = vcmp.lt.s32.totalorder %v13755_v54, 0  ;;  %v17651_v21 = vmov 0  ;;  %v17661_v51 = vld [vmem:[#allocation19_spill] sm:$0xff] }
 0x1fb   : > { %17646 = vst [vmem:[#allocation66_spill] sm:$0xff] %v17645_v2  ;;  %17647 = vst [vmem:[#allocation67_spill] sm:$0xff] %v13824_v29  ;;  %v13843_v37 = vadd.s32 18, %v13758_v14  ;;  %v13846_v61 = vmul.u32.u64.low 3817748708, %v13790_v60  ;;  %v13847_v44 = vmul.u32.u64.high 3817748708, %v13790_v60, %v13846_v61  ;;  %v10884_v11 = vpop.f32.mrf.mxu0  ;;  %v13849_v25 = vpop.f32.mrf.mxu1  ;;  %v17657_v6 = vmov 0 }
 0x1fc   : > { %17648 = vst [vmem:[#allocation68_spill] sm:$0xff] %v13829_v1  ;;  %vm13838_vm3 = vmand %vm17650_vm11, %vm1386_vm6  ;;  %vm17655_vm6 = vcmp.ne.s32.totalorder %v13758_v14, 0  ;;  %vm17656_vm11 = vcmp.lt.s32.totalorder %v13758_v14, 0  ;;  %v13864_v22 = vadd.s32 18, %v13781_v48  ;;  %v1158_v61 = vshrl.u32 %v13762_v36, 4 }
 0x1fd   : > { %v17652_v21 = vsel %vm13838_vm3, 4294967295, %v17651_v21  ;;  %17654 = vst [vmem:[#allocation69_spill] sm:$0xff] %v13843_v37  ;;  %vm13859_vm5 = vmand %vm17656_vm11, %vm17655_vm6  ;;  %v13868_v39 = vadd.s32 160, %v13201_v55  ;;  %v13871_v17 = vadd.f32 %v13398_v9, %v3511_v0  ;;  %v13874_v19 = vadd.f32 %v10884_v11, %v17661_v51  ;;  %v13896_v11 = vpop.f32.mrf.mxu0  ;;  %v13898_v51 = vpop.f32.mrf.mxu1 }
 0x1fe   : > { %17653 = vst [vmem:[#allocation10_spill] sm:$0xff] %v17652_v21  ;;  %v17658_v6 = vsel %vm13859_vm5, 4294967295, %v17657_v6  ;;  %17660 = vst [vmem:[#allocation71_spill] sm:$0xff] %v13864_v22  ;;  %vm17662_vm6 = vcmp.lt.s32.totalorder %v13781_v48, 0  ;;  %v17663_v36 = vmov 0  ;;  %v13889_v12 = vsub.s32 %v13610_v8, %v1181_v50 }
 0x1ff   : > { %17659 = vst [vmem:[#allocation70_spill] sm:$0xff] %v17658_v6  ;;  %vm13884_vm11 = vmand %vm17662_vm6, %vm1387_vm8  ;;  %v13892_v9 = vadd.f32 %v13493_v52, %v3515_v20  ;;  %v3519_v0 = vadd.f32 %v13675_v15, %v13329_v27  ;;  %vm1385_vm14 = vcmp.ne.s32.totalorder %v13829_v1, 0  ;;  %vm1421_vm8 = vcmp.lt.s32.totalorder %v13829_v1, 0  ;;  %v10887_v20 = vpop.f32.mrf.mxu0  ;;  %v13914_v50 = vpop.f32.mrf.mxu1  ;;  %v17668_v6 = vld [vmem:[#allocation12_spill] sm:$0xff] }
 0x200   : > { %v17664_v36 = vsel %vm13884_vm11, 4294967295, %v17663_v36  ;;  %17666 = vst [vmem:[#allocation72_spill] sm:$0xff] %v13889_v12  ;;  %v13911_v27 = vadd.s32 18, %v13829_v1  ;;  %v1191_v15 = vshrl.u32 %v13787_v32, 4  ;;  %v1159_v21 = vmul.u32 18, %v1158_v61  ;;  %vm13927_vm6 = vmand %vm1421_vm8, %vm1385_vm14 }
 0x201   : > { %17665 = vst [vmem:[#allocation19_spill] sm:$0xff] %v17664_v36  ;;  %v13921_v8 = vmul.u32.u64.low 3817748708, %v13868_v39  ;;  %v13922_v54 = vmul.u32.u64.high 3817748708, %v13868_v39, %v13921_v8  ;;  %v13925_v52 = vadd.f32 %v10887_v20, %v17668_v6  ;;  %v17669_v14 = vmov 0  ;;  %v4128_v61 = vpop.f32.mrf.mxu0  ;;  %v13937_v48 = vpop.f32.mrf.mxu1  ;;  %v17673_v36 = vld [vmem:[#allocation13_spill] sm:$0xff] }
 0x202   : > { %17667 = vst [vmem:[#allocation73_spill] sm:$0xff] %v13911_v27  ;;  %v17670_v14 = vsel %vm13927_vm6, 4294967295, %v17669_v14  ;;  %vm1390_vm5 = vcmp.ne.s32.totalorder %v13889_v12, 0  ;;  %vm1426_vm3 = vcmp.lt.s32.totalorder %v13889_v12, 0  ;;  %v1169_v32 = vshrl.u32 %v13811_v49, 4 }
 0x203   : > { %17671 = vst [vmem:[#allocation12_spill] sm:$0xff] %v17670_v14  ;;  %v13935_v10 = vadd.f32 %v13568_v62, %v3519_v0  ;;  %v13940_v8 = vadd.s32 18, %v13889_v12  ;;  %v5904_v6 = vshll.u32 %v13577_v30, 16  ;;  %v13944_v20 = vadd.s32 184, %v13201_v55  ;;  %v10888_v29 = vpop.f32.mrf.mxu0  ;;  %v13956_v38 = vpop.f32.mrf.mxu1  ;;  %vm13966_vm14 = vmand %vm1426_vm3, %vm1390_vm5 }
 0x204   : > { %v4240_v22 = vadd.f32 %v13772_v45, %v13418_v16  ;;  %v13949_v37 = vadd.f32 %v4128_v61, %v17673_v36  ;;  %v1192_v49 = vmul.u32 18, %v1191_v15  ;;  %v1224_v62 = vshrl.u32 %v13847_v44, 4  ;;  %v13982_v15 = vld [vmem:[%s17128_s2 + $0x4] sm:$0x3] }
 0x205   : > { %17672 = vst [vmem:[#allocation74_spill] sm:$0xff] %v13940_v8  ;;  %v13954_v0 = vadd.f32 %v13590_v41, %v13723_v53  ;;  %v17674_v16 = vmov 0  ;;  %v13971_v44 = vsub.s32 %v13720_v57, %v1159_v21  ;;  %v13974_v53 = vadd.s32 168, %v13201_v55  ;;  %v17678_v41 = vld [vmem:[#allocation20_spill] sm:$0xff] }
 0x206   : > { %v17675_v16 = vsel %vm13966_vm14, 4294967295, %v17674_v16  ;;  %v13977_v45 = vadd.f32 %v10888_v29, %v17678_v41  ;;  %v1170_v36 = vmul.u32 18, %v1169_v32  ;;  %v13990_v21 = vadd.f32 %v13612_v23, %v13744_v56  ;;  %v13996_v29 = vpop.f32.mrf.mxu0  ;;  %v13998_v32 = vpop.f32.mrf.mxu1 }
 0x207   : > { %17676 = vst [vmem:[#allocation13_spill] sm:$0xff] %v17675_v16  ;;  %17677 = vst [vmem:[#allocation75_spill] sm:$0xff] %v13971_v44  ;;  %v13985_v61 = vmul.u32.u64.low 3817748708, %v13944_v20  ;;  %v13986_v4 = vmul.u32.u64.high 3817748708, %v13944_v20, %v13985_v61  ;;  %v13994_v57 = vadd.f32 %v13644_v42, %v13765_v34  ;;  %v5902_v41 = vshrl.u32 %v13577_v30, 16 }
 0x208   : > { %v5906_v1 = vrot.slane %v5904_v6, 1  ;;  %vm17679_vm5 = vcmask 1041408   ;;  %v14004_v61 = vadd.f32 %v13677_v7, %v4240_v22  ;;  %v14011_v42 = vsub.s32 %v13750_v28, %v1192_v49  ;;  %v10891_v34 = vpop.f32.mrf.mxu0  ;;  %v14013_v27 = vpop.f32.mrf.mxu1 }
 0x209   : > { %11342 = vmatprep.subr.msk.bf16.mxu1 %vm17679_vm5, %v13982_v15  ;;  %v1225_v23 = vmul.u32 18, %v1224_v62  ;;  %v1202_v30 = vshrl.u32 %v13922_v54, 4  ;;  %v14017_v6 = vmul.u32.u64.low 3817748708, %v13974_v53  ;;  %v14018_v14 = vmul.u32.u64.high 3817748708, %v13974_v53, %v14017_v6 }
 0x20a   : > { %17680 = vst [vmem:[#allocation20_spill] sm:$0xff] %v14011_v42  ;;  %v14021_v22 = vadd.s32 208, %v13201_v55  ;;  %v14024_v7 = vadd.f32 %v10891_v34, %v13254_v46  ;;  %vm1424_vm8 = vcmp.lt.s32.totalorder %v13971_v44, 0  ;;  %v14029_v28 = vsub.s32 %v13770_v43, %v1170_v36  ;;  %v4144_v49 = vpop.f32.mrf.mxu0  ;;  %v14035_v62 = vpop.f32.mrf.mxu1 }
 0x20b   : > { %v14033_v54 = vadd.f32 %v13717_v24, %v13799_v3  ;;  %v14038_v6 = vadd.s32 18, %v13971_v44  ;;  %v14040_v56 = vor.u32 %v5906_v1, %v5902_v41  ;;  %v14043_v46 = vadd.s32 192, %v13201_v55 }
 0x20c   : > { %17681 = vst [vmem:[#allocation76_spill] sm:$0xff] %v14029_v28  ;;  %v14046_v34 = vadd.f32 %v4144_v49, %v13258_v35  ;;  %vm1391_vm5 = vcmp.ne.s32.totalorder %v14011_v42, 0  ;;  %v1235_v24 = vshrl.u32 %v13986_v4, 4  ;;  %v10892_v43 = vpop.f32.mrf.mxu0  ;;  %v14051_v3 = vpop.f32.mrf.mxu1  ;;  %vm17685_vm14 = vcmp.ne.s32.totalorder %v13971_v44, 0  ;;  %v17701_v44 = vld [vmem:[#allocation23_spill] sm:$0xff] }
 0x20d   : > { %17682 = vst [vmem:[#allocation77_spill] sm:$0xff] %v14033_v54  ;;  %17683 = vst [vmem:[#allocation78_spill] sm:$0xff] %v14038_v6  ;;  %v17686_v1 = vmov 0  ;;  %v14060_v36 = vsub.s32 %v13790_v60, %v1225_v23  ;;  %v1203_v35 = vmul.u32 18, %v1202_v30  ;;  %v14070_v4 = vadd.s32 18, %v14011_v42 }
 0x20e   : > { %17684 = vst [vmem:[#allocation79_spill] sm:$0xff] %v14040_v56  ;;  %vm14055_vm6 = vmand %vm1424_vm8, %vm17685_vm14  ;;  %v14063_v41 = vmul.u32.u64.low 3817748708, %v14021_v22  ;;  %v14064_v49 = vmul.u32.u64.high 3817748708, %v14021_v22, %v14063_v41  ;;  %v14067_v56 = vadd.f32 %v10892_v43, %v13274_v31  ;;  %vm1389_vm3 = vcmp.ne.s32.totalorder %v14029_v28, 0  ;;  %v14076_v60 = vpop.f32.mrf.mxu0  ;;  %v14078_v23 = vpop.f32.mrf.mxu1 }
 0x20f   : > { %v17687_v1 = vsel %vm14055_vm6, 4294967295, %v17686_v1  ;;  %17689 = vst [vmem:[#allocation81_spill] sm:$0xff] %v14060_v36  ;;  %17690 = vst [vmem:[#allocation82_spill] sm:$0xff] %v14070_v4  ;;  %vm1425_vm14 = vcmp.lt.s32.totalorder %v14029_v28, 0  ;;  %v4244_v12 = vadd.f32 %v13896_v11, %v13421_v18  ;;  %vm17691_vm8 = vcmp.lt.s32.totalorder %v14011_v42, 0 }
 0x210   : > { %17688 = vst [vmem:[#allocation80_spill] sm:$0xff] %v17687_v1  ;;  %vm14084_vm11 = vmand %vm17691_vm8, %vm1391_vm5  ;;  %v17692_v31 = vmov 0  ;;  %v14089_v30 = vmul.u32.u64.low 3817748708, %v14043_v46  ;;  %v14090_v43 = vmul.u32.u64.high 3817748708, %v14043_v46, %v14089_v30  ;;  %v14093_v41 = vadd.s32 216, %v13201_v55  ;;  %v10895_v2 = vpop.f32.mrf.mxu0  ;;  %v14106_v54 = vpop.f32.mrf.mxu1 }
 0x211   : > { %v17693_v31 = vsel %vm14084_vm11, 4294967295, %v17692_v31  ;;  %v14097_v18 = vadd.f32 %v13736_v33, %v13832_v40  ;;  %v14104_v8 = vadd.s32 18, %v14029_v28  ;;  %v1236_v16 = vmul.u32 18, %v1235_v24  ;;  %vm14108_vm5 = vmand %vm1425_vm14, %vm1389_vm3 }
 0x212   : > { %17694 = vst [vmem:[#allocation83_spill] sm:$0xff] %v17693_v31  ;;  %v17696_v30 = vmov 0  ;;  %vm1394_vm8 = vcmp.ne.s32.totalorder %v14060_v36, 0  ;;  %vm1430_vm12 = vcmp.lt.s32.totalorder %v14060_v36, 0  ;;  %v14115_v40 = vsub.s32 %v13868_v39, %v1203_v35  ;;  %v4160_v35 = vpop.f32.mrf.mxu0 }
 0x213   : > { %17695 = vst [vmem:[#allocation84_spill] sm:$0xff] %v14104_v8  ;;  %v17697_v30 = vsel %vm14108_vm5, 4294967295, %v17696_v30  ;;  %v1213_v33 = vshrl.u32 %v14018_v14, 4  ;;  %v14120_v11 = vadd.f32 %v13752_v26, %v13874_v19  ;;  %v14123_v24 = vadd.f32 %v10895_v2, %v13301_v59  ;;  %v14135_v14 = vpop.f32.mrf.mxu1  ;;  %vm14159_vm3 = vmand %vm1430_vm12, %vm1394_vm8 }
 0x214   : > { %17698 = vst [vmem:[#allocation85_spill] sm:$0xff] %v17697_v30  ;;  %17699 = vst [vmem:[#allocation86_spill] sm:$0xff] %v14115_v40  ;;  %v14130_v6 = vadd.s32 200, %v13201_v55  ;;  %v14133_v39 = vadd.f32 %v13774_v58, %v4244_v12  ;;  %v14138_v26 = vadd.s32 18, %v14060_v36  ;;  %v14146_v2 = vadd.f32 %v13792_v13, %v13925_v52  ;;  %v10896_v13 = vpop.f32.mrf.mxu0  ;;  %v17706_v58 = vld [vmem:[#allocation24_spill] sm:$0xff] }
 0x215   : > { %v14141_v59 = vmul.u32.u64.low 3817748708, %v14093_v41  ;;  %v14142_v19 = vmul.u32.u64.high 3817748708, %v14093_v41, %v14141_v59  ;;  %v14149_v42 = vadd.f32 %v4160_v35, %v17701_v44  ;;  %v17702_v12 = vmov 0  ;;  %v14166_v52 = vpop.f32.mrf.mxu1 }
 0x216   : > { %17700 = vst [vmem:[#allocation87_spill] sm:$0xff] %v14138_v26  ;;  %v17703_v12 = vsel %vm14159_vm3, 4294967295, %v17702_v12  ;;  %v14164_v59 = vsub.s32 %v13944_v20, %v1236_v16  ;;  %vm1392_vm14 = vcmp.ne.s32.totalorder %v14115_v40, 0  ;;  %vm1428_vm11 = vcmp.lt.s32.totalorder %v14115_v40, 0  ;;  %v17708_v16 = vld [vmem:[#allocation36_spill] sm:$0xff]  ;;  %v4163_v1 = vpop.f32.mrf.mxu0 }
 0x217   : > { %17704 = vst [vmem:[#allocation23_spill] sm:$0xff] %v17703_v12  ;;  %v1214_v44 = vmul.u32 18, %v1213_v33  ;;  %v1268_v35 = vshrl.u32 %v14064_v49, 4  ;;  %v14172_v28 = vadd.f32 %v10896_v13, %v17706_v58  ;;  %v1246_v8 = vshrl.u32 %v14090_v43, 4  ;;  %v14185_v33 = vpop.f32.mrf.mxu1  ;;  %vm14212_vm3 = vmand %vm1428_vm11, %vm1392_vm14 }
 0x218   : > { %17705 = vst [vmem:[#allocation88_spill] sm:$0xff] %v14164_v59  ;;  %v14176_v30 = vmul.u32.u64.low 3817748708, %v14130_v6  ;;  %v14177_v4 = vmul.u32.u64.high 3817748708, %v14130_v6, %v14176_v30  ;;  %v14181_v20 = vadd.f32 %v13813_v5, %v13949_v37  ;;  %v4248_v31 = vadd.f32 %v13996_v29, %v17708_v16  ;;  %v10899_v29 = vpop.f32.mrf.mxu0  ;;  %v17717_v16 = vld [vmem:[#allocation27_spill] sm:$0xff] }
 0x219   : > { %v14192_v43 = vadd.s32 240, %v13201_v55  ;;  %v14196_v30 = vadd.f32 %v13849_v25, %v13977_v45  ;;  %vm17710_vm12 = vcmask 1041408   ;;  %v14203_v5 = vadd.s32 18, %v14115_v40  ;;  %v14206_v58 = vpop.f32.mrf.mxu1 }
 0x21a   : > { %17707 = vst [vmem:[#allocation24_spill] sm:$0xff] %v14181_v20  ;;  %v14200_v37 = vsel %vm17710_vm12, %v13982_v15, 0  ;;  %vm1395_vm8 = vcmp.ne.s32.totalorder %v14164_v59, 0  ;;  %v17713_v13 = vmov 0  ;;  %vm1431_vm5 = vcmp.lt.s32.totalorder %v14164_v59, 0 }
 0x21b   : > { %17709 = vst [vmem:[#allocation36_spill] sm:$0xff] %v14196_v30  ;;  %17711 = vst [vmem:[#allocation89_spill] sm:$0xff] %v14200_v37  ;;  %v17714_v13 = vsel %vm14212_vm3, 4294967295, %v17713_v13  ;;  %v14218_v25 = vsub.s32 %v13974_v53, %v1214_v44  ;;  %v1269_v45 = vmul.u32 18, %v1268_v35  ;;  %v14221_v15 = vadd.s32 224, %v13201_v55  ;;  %v17718_v30 = vld [vmem:[#allocation42_spill] sm:$0xff]  ;;  %v4176_v53 = vpop.f32.mrf.mxu0  ;;  %v14235_v44 = vpop.f32.mrf.mxu1 }
 0x21c   : > { %17712 = vst [vmem:[#allocation90_spill] sm:$0xff] %v14203_v5  ;;  %17715 = vst [vmem:[#allocation91_spill] sm:$0xff] %v17714_v13  ;;  %v14224_v49 = vadd.f32 %v10899_v29, %v17717_v16  ;;  %v1247_v37 = vmul.u32 18, %v1246_v8  ;;  %v14227_v36 = vmul.u32.u64.low 3817748708, %v14192_v43  ;;  %v14228_v26 = vmul.u32.u64.high 3817748708, %v14192_v43, %v14227_v36  ;;  %v17725_v16 = vld [vmem:[#allocation33_spill] sm:$0xff] }
 0x21d   : > { %17716 = vst [vmem:[#allocation92_spill] sm:$0xff] %v14218_v25  ;;  %v14231_v12 = vadd.f32 %v13898_v51, %v4248_v31  ;;  %v4252_v20 = vadd.f32 %v14076_v60, %v17718_v30  ;;  %v14238_v35 = vadd.s32 18, %v14164_v59  ;;  %v1279_v29 = vshrl.u32 %v14142_v19, 4  ;;  %v17720_v51 = vld [vmem:[#allocation30_spill] sm:$0xff]  ;;  %vm14260_vm11 = vmand %vm1431_vm5, %vm1395_vm8 }
 0x21e   : > { %v14243_v8 = vadd.f32 %v13914_v50, %v14024_v7  ;;  %v14247_v36 = vadd.f32 %v13937_v48, %v14046_v34  ;;  %v14250_v31 = vadd.f32 %v4176_v53, %v17720_v51  ;;  %v17721_v19 = vmov 0  ;;  %v10900_v50 = vpop.f32.mrf.mxu0  ;;  %v14264_v7 = vpop.f32.mrf.mxu1 }
 0x21f   : > { %17719 = vst [vmem:[#allocation27_spill] sm:$0xff] %v14238_v35  ;;  %v17722_v19 = vsel %vm14260_vm11, 4294967295, %v17721_v19  ;;  %vm1393_vm14 = vcmp.ne.s32.totalorder %v14218_v25, 0  ;;  %v14268_v48 = vsub.s32 %v14021_v22, %v1269_v45  ;;  %v14275_v53 = vadd.f32 %v10900_v50, %v17725_v16 }
 0x220   : > { %17723 = vst [vmem:[#allocation42_spill] sm:$0xff] %v17722_v19  ;;  %v14271_v34 = vmul.u32.u64.low 3817748708, %v14221_v15  ;;  %v14272_v30 = vmul.u32.u64.high 3817748708, %v14221_v15, %v14271_v34  ;;  %vm1429_vm5 = vcmp.lt.s32.totalorder %v14218_v25, 0  ;;  %v14279_v51 = vsub.s32 %v14043_v46, %v1247_v37  ;;  %v14289_v45 = vpop.f32.mrf.mxu0 }
 0x221   : > { %17724 = vst [vmem:[#allocation30_spill] sm:$0xff] %v14268_v48  ;;  %v1257_v60 = vshrl.u32 %v14177_v4, 4  ;;  %v14284_v40 = vadd.f32 %v13956_v38, %v14067_v56  ;;  %v14287_v22 = vadd.f32 %v13998_v32, %v4252_v20  ;;  %v14291_v34 = vpop.f32.mrf.mxu1  ;;  %v1280_v46 = vmul.u32 18, %v1279_v29  ;;  %vm14312_vm12 = vmand %vm1429_vm5, %vm1393_vm14 }
 0x222   : > { %17726 = vst [vmem:[#allocation33_spill] sm:$0xff] %v14279_v51  ;;  %v14299_v4 = vadd.f32 %v14013_v27, %v14123_v24  ;;  %v4256_v38 = vadd.f32 %v4163_v1, %v13701_v63  ;;  %v14303_v56 = vadd.s32 18, %v14218_v25  ;;  %v14306_v32 = vadd.s32 248, %v13201_v55  ;;  %v10903_v20 = vpop.f32.mrf.mxu0  ;;  %v17732_v1 = vld [vmem:[#allocation7_spill] sm:$0xff] }
 0x223   : > { %v17728_v37 = vmov 0  ;;  %vm1398_vm8 = vcmp.ne.s32.totalorder %v14268_v48, 0  ;;  %vm1434_vm11 = vcmp.lt.s32.totalorder %v14268_v48, 0  ;;  %v14319_v63 = vadd.s32 18, %v14268_v48  ;;  %v14327_v29 = vpop.f32.mrf.mxu1  ;;  %v17748_v48 = vld [vmem:[#allocation46_spill] sm:$0xff] }
 0x224   : > { %17727 = vst [vmem:[#allocation93_spill] sm:$0xff] %v14303_v56  ;;  %v17729_v37 = vsel %vm14312_vm12, 4294967295, %v17728_v37  ;;  %v14322_v27 = vadd.s32 232, %v13201_v55  ;;  %v14325_v24 = vadd.f32 %v10903_v20, %v17732_v1  ;;  %vm1396_vm14 = vcmp.ne.s32.totalorder %v14279_v51, 0  ;;  %v4192_v59 = vpop.f32.mrf.mxu0  ;;  %v17734_v1 = vld [vmem:[#allocation15_spill] sm:$0xff]  ;;  %vm14354_vm5 = vmand %vm1434_vm11, %vm1398_vm8 }
 0x225   : > { %17730 = vst [vmem:[#allocation94_spill] sm:$0xff] %v17729_v37  ;;  %17731 = vst [vmem:[#allocation95_spill] sm:$0xff] %v14319_v63  ;;  %v1258_v16 = vmul.u32 18, %v1257_v60  ;;  %v1312_v50 = vshrl.u32 %v14228_v26, 4  ;;  %v14333_v35 = vsub.s32 %v14093_v41, %v1280_v46  ;;  %v14341_v20 = vadd.f32 %v14035_v62, %v14149_v42  ;;  %v17740_v26 = vld [vmem:[#allocation43_spill] sm:$0xff]  ;;  %v14376_v56 = vpop.f32.mrf.mxu1 }
 0x226   : > { %v14336_v19 = vmul.u32.u64.low 3817748708, %v14306_v32  ;;  %v14337_v5 = vmul.u32.u64.high 3817748708, %v14306_v32, %v14336_v19  ;;  %v14344_v13 = vadd.f32 %v4192_v59, %v17734_v1  ;;  %v17735_v41 = vmov 0  ;;  %v10904_v42 = vpop.f32.mrf.mxu0 }
 0x227   : > { %17733 = vst [vmem:[#allocation7_spill] sm:$0xff] %v14333_v35  ;;  %v17736_v41 = vsel %vm14354_vm5, 4294967295, %v17735_v41  ;;  %v1290_v60 = vshrl.u32 %v14272_v30, 4  ;;  %v14360_v62 = vadd.s32 18, %v14279_v51  ;;  %v14367_v46 = vadd.s32 272, %v13201_v55 }
 0x228   : > { %17737 = vst [vmem:[#allocation15_spill] sm:$0xff] %v17736_v41  ;;  %v14363_v59 = vmul.u32.u64.low 3817748708, %v14322_v27  ;;  %v14364_v19 = vmul.u32.u64.high 3817748708, %v14322_v27, %v14363_v59  ;;  %v14371_v1 = vadd.f32 %v14051_v3, %v14172_v28  ;;  %v14374_v25 = vadd.f32 %v10904_v42, %v17740_v26  ;;  %v4195_v3 = vpop.f32.mrf.mxu0  ;;  %v17753_v26 = vld [vmem:[#allocation47_spill] sm:$0xff] }
 0x229   : > { %17738 = vst [vmem:[#allocation96_spill] sm:$0xff] %v14360_v62  ;;  %vm17741_vm11 = vcmp.lt.s32.totalorder %v14279_v51, 0  ;;  %v17742_v30 = vmov 0  ;;  %v14387_v59 = vsub.s32 %v14130_v6, %v1258_v16  ;;  %v1313_v37 = vmul.u32 18, %v1312_v50 }
 0x22a   : > { %17739 = vst [vmem:[#allocation97_spill] sm:$0xff] %v14371_v1  ;;  %vm14382_vm8 = vmand %vm17741_vm11, %vm1396_vm14  ;;  %v14390_v28 = vadd.f32 %v14078_v23, %v4256_v38  ;;  %vm1399_vm12 = vcmp.ne.s32.totalorder %v14333_v35, 0  ;;  %v14398_v42 = vadd.s32 256, %v13201_v55  ;;  %vm1435_vm14 = vcmp.lt.s32.totalorder %v14333_v35, 0  ;;  %v10907_v16 = vpop.f32.mrf.mxu0 }
 0x22b   : > { %v17743_v30 = vsel %vm14382_vm8, 4294967295, %v17742_v30  ;;  %17745 = vst [vmem:[#allocation98_spill] sm:$0xff] %v14387_v59  ;;  %v1291_v1 = vmul.u32 18, %v1290_v60  ;;  %v14402_v6 = vmul.u32.u64.low 3817748708, %v14367_v46  ;;  %v14403_v50 = vmul.u32.u64.high 3817748708, %v14367_v46, %v14402_v6  ;;  %vm14434_vm8 = vmand %vm1435_vm14, %vm1399_vm12 }
 0x22c   : > { %17744 = vst [vmem:[#allocation43_spill] sm:$0xff] %v17743_v30  ;;  %v14407_v23 = vadd.f32 %v14106_v54, %v14224_v49  ;;  %v14411_v38 = vadd.f32 %v14135_v14, %v14250_v31  ;;  %v1323_v60 = vshrl.u32 %v14337_v5, 4  ;;  %v14419_v63 = vadd.f32 %v10907_v16, %v17748_v48  ;;  %v14421_v6 = vpop.f32.mrf.mxu1  ;;  %v4208_v49 = vpop.f32.mrf.mxu0 }
 0x22d   : > { %v14424_v54 = vadd.s32 18, %v14333_v35  ;;  %vm1397_vm11 = vcmp.ne.s32.totalorder %v14387_v59, 0  ;;  %v14428_v14 = vsub.s32 %v14192_v43, %v1313_v37  ;;  %v17750_v5 = vmov 0 }
 0x22e   : > { %17746 = vst [vmem:[#allocation99_spill] sm:$0xff] %v14407_v23  ;;  %17747 = vst [vmem:[#allocation100_spill] sm:$0xff] %v14411_v38  ;;  %v17751_v5 = vsel %vm14434_vm8, 4294967295, %v17750_v5  ;;  %vm1433_vm5 = vcmp.lt.s32.totalorder %v14387_v59, 0  ;;  %v1301_v31 = vshrl.u32 %v14364_v19, 4  ;;  %v4260_v43 = vadd.f32 %v14289_v45, %v13715_v47  ;;  %v10908_v30 = vpop.f32.mrf.mxu0  ;;  %v17755_v47 = vld [vmem:[#allocation49_spill] sm:$0xff]  ;;  %v14462_v23 = vpop.f32.mrf.mxu1 }
 0x22f   : > { %17749 = vst [vmem:[#allocation46_spill] sm:$0xff] %v14424_v54  ;;  %17752 = vst [vmem:[#allocation101_spill] sm:$0xff] %v17751_v5  ;;  %v14441_v48 = vmul.u32.u64.low 3817748708, %v14398_v42  ;;  %v14442_v16 = vmul.u32.u64.high 3817748708, %v14398_v42, %v14441_v48  ;;  %v14448_v37 = vadd.f32 %v14166_v52, %v14275_v53  ;;  %v4267_v51 = vadd.f32 %v4208_v49, %v17753_v26 }
 0x230   : > { %v14452_v62 = vsub.s32 %v14221_v15, %v1291_v1  ;;  %v14455_v41 = vadd.s32 18, %v14387_v59  ;;  %v1324_v19 = vmul.u32 18, %v1323_v60  ;;  %v1356_v38 = vshrl.u32 %v14403_v50, 4  ;;  %vm14472_vm12 = vmand %vm1433_vm5, %vm1397_vm11  ;;  %v4211_v53 = vpop.f32.mrf.mxu0  ;;  %v14513_v5 = vpop.f32.mrf.mxu1 }
 0x231   : > { %v14459_v48 = vadd.s32 280, %v13201_v55  ;;  %v4270_v45 = vadd.f32 %v10908_v30, %v17755_v47  ;;  %v17756_v15 = vmov 0  ;;  %vm1402_vm14 = vcmp.ne.s32.totalorder %v14428_v14, 0 }
 0x232   : > { %17754 = vst [vmem:[#allocation47_spill] sm:$0xff] %v14455_v41  ;;  %v17757_v15 = vsel %vm14472_vm12, 4294967295, %v17756_v15  ;;  %vm1438_vm3 = vcmp.lt.s32.totalorder %v14428_v14, 0  ;;  %v14479_v1 = vadd.s32 18, %v14428_v14  ;;  %v1302_v30 = vmul.u32 18, %v1301_v31  ;;  %v10911_v52 = vpop.f32.mrf.mxu0 }
 0x233   : > { %v1334_v26 = vshrl.u32 %v14442_v16, 4  ;;  %v14483_v50 = vadd.s32 264, %v13201_v55  ;;  %vm1400_vm8 = vcmp.ne.s32.totalorder %v14452_v62, 0  ;;  %vm1436_vm5 = vcmp.lt.s32.totalorder %v14452_v62, 0  ;;  %vm14498_vm11 = vmand %vm1438_vm3, %vm1402_vm14 }
 0x234   : > { %v14488_v60 = vmul.u32.u64.low 3817748708, %v14459_v48  ;;  %v14489_v49 = vmul.u32.u64.high 3817748708, %v14459_v48, %v14488_v60  ;;  %v14492_v47 = vadd.f32 %v14185_v33, %v4260_v43  ;;  %v17758_v55 = vmov 0  ;;  %v17762_v43 = vld [vmem:[#allocation9_spill] sm:$0xff]  ;;  %v4224_v59 = vpop.f32.mrf.mxu0  ;;  %vm14522_vm3 = vmand %vm1436_vm5, %vm1400_vm8 }
 0x235   : > { %v17759_v55 = vsel %vm14498_vm11, 4294967295, %v17758_v55  ;;  %v14503_v16 = vsub.s32 %v14306_v32, %v1324_v19  ;;  %v1357_v35 = vmul.u32 18, %v1356_v38  ;;  %v14507_v60 = vadd.f32 %v14206_v58, %v14325_v24 }
 0x236   : > { %v4264_v33 = vadd.f32 %v4195_v3, %v13871_v17  ;;  %v14511_v54 = vadd.f32 %v10911_v52, %v17762_v43  ;;  %v14516_v31 = vadd.s32 18, %v14452_v62  ;;  %v17763_v32 = vmov 0  ;;  %v17766_v52 = vld [vmem:[#allocation11_spill] sm:$0xff] }
 0x237   : > { %17760 = vst [vmem:[#allocation49_spill] sm:$0xff] %v14503_v16  ;;  %17761 = vst [vmem:[#allocation102_spill] sm:$0xff] %v14507_v60  ;;  %v17764_v32 = vsel %vm14522_vm3, 4294967295, %v17763_v32  ;;  %v14527_v58 = vsub.s32 %v14322_v27, %v1302_v30  ;;  %v1335_v17 = vmul.u32 18, %v1334_v26  ;;  %v14535_v38 = vadd.f32 %v14235_v44, %v14344_v13  ;;  %v10912_v30 = vpop.f32.mrf.mxu0  ;;  %v17768_v60 = vld [vmem:[#allocation25_spill] sm:$0xff]  ;;  %v4671_v26 = vpop.f32.mrf.mxu1  ;;  %v17777_v27 = vld [vmem:[#allocation22_spill] sm:$0xff] }
 0x238   : > { %v14530_v24 = vmul.u32.u64.low 3817748708, %v14483_v50  ;;  %v14531_v3 = vmul.u32.u64.high 3817748708, %v14483_v50, %v14530_v24  ;;  %v14539_v19 = vadd.f32 %v14264_v7, %v14374_v25  ;;  %v4271_v43 = vadd.f32 %v4224_v59, %v17766_v52  ;;  %v17773_v59 = vld [vmem:[#allocation62_spill] sm:$0xff] }
 0x239   : > { %17765 = vst [vmem:[#allocation9_spill] sm:$0xff] %v14527_v58  ;;  %v17769_v24 = vld [vmem:[#allocation21_spill] sm:$0xff]  ;;  %v14558_v25 = vsub.s32 %v14367_v46, %v1357_v35  ;;  %v1367_v44 = vshrl.u32 %v14489_v49, 4  ;;  %v14562_v7 = vadd.f32 %v14291_v34, %v4264_v33  ;;  %v4274_v52 = vadd.f32 %v10912_v30, %v17773_v59  ;;  %v4227_v35 = vpop.f32.mrf.mxu0 }
 0x23a   : > { %v17770_v41 = vsel %vm13388_vm1, %v17768_v60, %v17769_v24  ;;  %v14570_v60 = vsub.s32 %v14398_v42, %v1335_v17  ;;  %v4268_v24 = vadd.f32 %v4211_v53, %v13892_v9  ;;  %v17776_v49 = vld [vmem:[#allocation29_spill] sm:$0xff]  ;;  %v14583_v30 = vadd.s32 18, %v14503_v16 }
 0x23b   : > { %vm14551_vm8 = vcmp.lt.s32.totalorder %v17770_v41, 16  ;;  %v17778_v34 = vsel %vm13404_vm0, %v17776_v49, %v17777_v27  ;;  %vm1401_vm5 = vcmp.ne.s32.totalorder %v14527_v58, 0  ;;  %v14589_v9 = vadd.f32 %v14327_v29, %v14419_v63  ;;  %v10955_v59 = vpop.f32.mrf.mxu0  ;;  %v14608_v63 = vld [vmem:[%s17129_s3] ss:$0 sm:$0xff]  ;;  %v17791_v29 = vld [vmem:[#allocation26_spill] sm:$0xff]  ;;  %v10950_v49 = vpop.f32.mrf.mxu1 }
 0x23c   : > { %17774 = vst [vmem:[#allocation11_spill] sm:$0xff] %v14570_v60  ;;  %vm14578_vm1 = vcmp.lt.s32.totalorder %v17778_v34, 16  ;;  %17781 = vst [vmem:[#allocation31_spill] sm:$0xff] %v14583_v30  ;;  %v14592_v42 = vadd.f32 %v14376_v56, %v4267_v51  ;;  %v14595_v53 = vadd.f32 %v14421_v6, %v4270_v45  ;;  %vm17784_vm0 = vcmp.ne.s32.totalorder %v14503_v16, 0  ;;  %v17790_v56 = vld [vmem:[#allocation34_spill] sm:$0xff] }
 0x23d   : > { %vm17785_vm3 = vcmp.lt.s32.totalorder %v14503_v16, 0  ;;  %v17786_v17 = vmov 0  ;;  %v1368_v27 = vmul.u32 18, %v1367_v44  ;;  %v17792_v6 = vsel %vm13442_vm15, %v17790_v56, %v17791_v29  ;;  %v4857_v29 = vpop.f32.mrf.mxu0 }
 0x23e   : > { %17782 = vst [vmem:[#allocation25_spill] sm:$0xff] %v14592_v42  ;;  %17783 = vst [vmem:[#allocation21_spill] sm:$0xff] %v14595_v53  ;;  %vm14615_vm14 = vcmp.lt.s32.totalorder %v17792_v6, 16  ;;  %v14620_v46 = vadd.s32 18, %v14527_v58  ;;  %v1345_v44 = vshrl.u32 %v14531_v3, 4  ;;  %v5002_v34 = vadd.f32 %v10955_v59, %v13954_v0  ;;  %v17803_v59 = vld [vmem:[#allocation35_spill] sm:$0xff] }
 0x23f   : > { %vm14601_vm11 = vmand %vm17785_vm3, %vm17784_vm0  ;;  %vm1406_vm3 = vcmp.ne.s32.totalorder %v14558_v25, 0  ;;  %vm1442_vm0 = vcmp.lt.s32.totalorder %v14558_v25, 0  ;;  %vm17796_vm15 = vcmp.lt.s32.totalorder %v14527_v58, 0  ;;  %v17797_v51 = vmov 0  ;;  %v17804_v6 = vld [vmem:[#allocation28_spill] sm:$0xff] }
 0x240   : > { %v17787_v17 = vsel %vm14601_vm11, 4294967295, %v17786_v17  ;;  %17795 = vst [vmem:[#allocation32_spill] sm:$0xff] %v14620_v46  ;;  %vm14630_vm12 = vmand %vm17796_vm15, %vm1401_vm5  ;;  %v14637_v56 = vsub.s32 %v14459_v48, %v1368_v27  ;;  %v14640_v3 = vadd.f32 %v14462_v23, %v4268_v24  ;;  %v17805_v41 = vsel %vm13456_vm2, %v17803_v59, %v17804_v6  ;;  %v10956_v59 = vpop.f32.mrf.mxu0  ;;  %v17812_v6 = vld [vmem:[#allocation38_spill] sm:$0xff] }
 0x241   : > { %17788 = vst [vmem:[#allocation62_spill] sm:$0xff] %v17787_v17  ;;  %v17798_v51 = vsel %vm14630_vm12, 4294967295, %v17797_v51  ;;  %vm14647_vm5 = vcmp.lt.s32.totalorder %v17805_v41, 16  ;;  %v14656_v48 = vadd.s32 18, %v14558_v25  ;;  %v1346_v23 = vmul.u32 18, %v1345_v44  ;;  %vm14664_vm2 = vmand %vm1442_vm0, %vm1406_vm3  ;;  %v17828_v17 = vld [vmem:[#allocation44_spill] sm:$0xff] }
 0x242   : > { %17799 = vst [vmem:[#allocation29_spill] sm:$0xff] %v17798_v51  ;;  %17800 = vst [vmem:[#allocation22_spill] sm:$0xff] %v14637_v56  ;;  %v5045_v24 = vadd.f32 %v14608_v63, %v5002_v34  ;;  %v5000_v27 = vadd.f32 %v4857_v29, %v13990_v21  ;;  %vm1407_vm15 = vcmp.ne.s32.totalorder %v14637_v56, 0  ;;  %vm1443_vm7 = vcmp.lt.s32.totalorder %v14637_v56, 0  ;;  %v17811_v34 = vld [vmem:[#allocation40_spill] sm:$0xff]  ;;  %v4860_v16 = vpop.f32.mrf.mxu0 }
 0x243   : > { %17801 = vst [vmem:[#allocation14_spill] sm:$0xff] %v14640_v3  ;;  %v4272_v0 = vadd.f32 %v4227_v35, %v13935_v10  ;;  %v17813_v21 = vsel %vm13604_vm13, %v17811_v34, %v17812_v6  ;;  %vm17816_vm3 = vcmp.ne.s32.totalorder %v14570_v60, 0  ;;  %vm17817_vm0 = vcmp.lt.s32.totalorder %v14570_v60, 0  ;;  %v4674_v6 = vpop.f32.mrf.mxu1  ;;  %vm14704_vm13 = vmand %vm1443_vm7, %vm1407_vm15 }
 0x244   : > { %vm14676_vm6 = vcmp.lt.s32.totalorder %v17813_v21, 16  ;;  %vm14688_vm11 = vmand %vm17817_vm0, %vm17816_vm3  ;;  %v14693_v35 = vadd.s32 18, %v14570_v60  ;;  %v14696_v44 = vadd.s32 18, %v14637_v56  ;;  %v14700_v34 = vadd.f32 %v14513_v5, %v14511_v54  ;;  %v17829_v54 = vld [vmem:[#allocation39_spill] sm:$0xff] }
 0x245   : > { %v5081_v21 = vmax.f32 %v5045_v24, 0.0  ;;  %v5043_v42 = vadd.f32 %v14608_v63, %v5000_v27  ;;  %v5003_v3 = vadd.f32 %v10956_v59, %v13994_v57  ;;  %v17822_v58 = vmov 0  ;;  %v10959_v59 = vpop.f32.mrf.mxu0 }
 0x246   : > { %17820 = vst [vmem:[#allocation34_spill] sm:$0xff] %v14693_v35  ;;  %17821 = vst [vmem:[#allocation26_spill] sm:$0xff] %v14696_v44  ;;  %v17823_v58 = vsel %vm14704_vm13, 4294967295, %v17822_v58  ;;  %v14708_v46 = vadd.f32 %v4671_v26, %v4271_v43  ;;  %v14710_v51 = vadd.f32 %v10950_v49, %v4274_v52  ;;  %v17830_v5 = vsel %vm13618_vm10, %v17828_v17, %v17829_v54 }
 0x247   : > { %17824 = vst [vmem:[#allocation37_spill] sm:$0xff] %v17823_v58  ;;  %vm14717_vm3 = vcmp.lt.s32.totalorder %v17830_v5, 16  ;;  %v14726_v43 = vsub.s32 %v14483_v50, %v1346_v23  ;;  %v5189_v52 = vsel %vm14551_vm8, %v5081_v21, 0.0  ;;  %v5079_v26 = vmax.f32 %v5043_v42, 0.0  ;;  %v4873_v21 = vpop.f32.mrf.mxu0 }
 0x248   : > { %17825 = vst [vmem:[#allocation35_spill] sm:$0xff] %v14708_v46  ;;  %17826 = vst [vmem:[#allocation28_spill] sm:$0xff] %v14710_v51  ;;  %v5046_v30 = vadd.f32 %v14608_v63, %v5003_v3  ;;  %v5001_v17 = vadd.f32 %v4860_v16, %v14004_v61  ;;  %v14732_v49 = vadd.f32 %v4674_v6, %v4272_v0  ;;  %v17834_v16 = vld [vmem:[#allocation77_spill] sm:$0xff]  ;;  %vm17865_vm0 = vcmask 1041408  }
 0x249   : > { %v10271_v27 = vpack.c.bf16 %v5189_v52, %v5189_v52  ;;  %v5187_v13 = vsel %vm14578_vm1, %v5079_v26, 0.0  ;;  %v5006_v3 = vadd.f32 %v10959_v59, %v17834_v16  ;;  %v14747_v5 = vadd.s32 18, %v14726_v43  ;;  %v10960_v59 = vpop.f32.mrf.mxu0 }
 0x24a   : > { %17833 = vst [vmem:[#allocation53_spill] sm:$0xff] %v14732_v49  ;;  %v5082_v42 = vmax.f32 %v5046_v30, 0.0  ;;  %v5044_v61 = vadd.f32 %v14608_v63, %v5001_v17  ;;  %v10269_v6 = vpack.c.bf16 %v5187_v13, %v5187_v13  ;;  %v5004_v33 = vadd.f32 %v4873_v21, %v14097_v18 }
 0x24b   : > { %v5351_v23 = vshrl.u32 %v10271_v27, 16  ;;  %v5354_v0 = vshll.u32 %v10271_v27, 16  ;;  %v5049_v50 = vadd.f32 %v14608_v63, %v5006_v3  ;;  %v4876_v46 = vpop.f32.mrf.mxu0  ;;  %v5727_v3 = vld [vmem:[#allocation3 + $0x8] sm:$0xe]  ;;  %vm1441_vm15 = vcmp.lt.s32.totalorder %v14726_v43, 0 }
 0x24c   : > { %v5190_v52 = vsel %vm14615_vm14, %v5082_v42, 0.0  ;;  %v5080_v54 = vmax.f32 %v5044_v61, 0.0  ;;  %v5332_v17 = vshrl.u32 %v10269_v6, 16  ;;  %v5335_v57 = vshll.u32 %v10269_v6, 16 }
 0x24d   : > { %v5353_v26 = vrot.slane %v5351_v23, 6  ;;  %v5356_v30 = vrot.slane %v5354_v0, 7  ;;  %v10272_v16 = vpack.c.bf16 %v5190_v52, %v5190_v52  ;;  %v5085_v13 = vmax.f32 %v5049_v50, 0.0  ;;  %v17836_v50 = vld [vmem:[#allocation50_spill] sm:$0xff] }
 0x24e   : > { %v5188_v27 = vsel %vm14647_vm5, %v5080_v54, 0.0  ;;  %v5047_v49 = vadd.f32 %v14608_v63, %v5004_v33  ;;  %v5334_v45 = vrot.slane %v5332_v17, 6  ;;  %v5337_v42 = vrot.slane %v5335_v57, 7  ;;  %v17837_v33 = vld [vmem:[#allocation41_spill] sm:$0xff]  ;;  %v17842_v17 = vld [vmem:[#allocation52_spill] sm:$0xff]  ;;  %v10963_v54 = vpop.f32.mrf.mxu0  ;;  %v18084_v10 = vld [vmem:[#allocation26_spill] sm:$0xff] }
 0x24f   : > { %v5357_v51 = vor.u32 %v5356_v30, %v5353_v26  ;;  %v10270_v61 = vpack.c.bf16 %v5188_v27, %v5188_v27  ;;  %v5361_v56 = vshrl.u32 %v10272_v16, 16  ;;  %v5364_v18 = vshll.u32 %v10272_v16, 16  ;;  %v17843_v16 = vld [vmem:[#allocation45_spill] sm:$0xff]  ;;  %v17847_v27 = vld [vmem:[#allocation59_spill] sm:$0xff] }
 0x250   : > { %v5193_v23 = vsel %vm14676_vm6, %v5085_v13, 0.0  ;;  %v5083_v0 = vmax.f32 %v5047_v49, 0.0  ;;  %v5338_v21 = vor.u32 %v5337_v42, %v5334_v45  ;;  %v17838_v26 = vsel %vm13638_vm9, %v17836_v50, %v17837_v33  ;;  %v17849_v13 = vld [vmem:[#allocation55_spill] sm:$0xff]  ;;  %v17850_v45 = vld [vmem:[#allocation48_spill] sm:$0xff]  ;;  %v4889_v58 = vpop.f32.mrf.mxu0 }
 0x251   : > { %v5359_v6 = vrot.slane %v5357_v51, 4  ;;  %v5341_v52 = vshrl.u32 %v10270_v61, 16  ;;  %v5344_v53 = vshll.u32 %v10270_v61, 16  ;;  %vm14763_vm10 = vcmp.lt.s32.totalorder %v17838_v26, 16 }
 0x252   : > { %v17844_v29 = vsel %vm13650_vm4, %v17842_v17, %v17843_v16  ;;  %vm17848_vm6 = vnez %v17847_v27  ;;  %v5363_v50 = vrot.slane %v5361_v56, 6  ;;  %v5366_v33 = vrot.slane %v5364_v18, 7  ;;  %v17854_v16 = vld [vmem:[#allocation4_spill] sm:$0xff] }
 0x253   : > { %vm14772_vm7 = vcmp.lt.s32.totalorder %v17844_v29, 16  ;;  %v17851_v42 = vsel %vm17848_vm6, %v17849_v13, %v17850_v45  ;;  %v10275_v26 = vpack.c.bf16 %v5193_v23, %v5193_v23  ;;  %v5191_v30 = vsel %vm14717_vm3, %v5083_v0, 0.0  ;;  %v17856_v23 = vld [vmem:[#allocation60_spill] sm:$0xff]  ;;  %v17858_v0 = vld [vmem:[#allocation58_spill] sm:$0xff] }
 0x254   : > { %vm14781_vm8 = vcmp.lt.s32.totalorder %v17851_v42, 16  ;;  %v5339_v17 = vrot.slane %v5338_v21, 4  ;;  %vm17855_vm4 = vnez %v17854_v16  ;;  %v5343_v44 = vrot.slane %v5341_v52, 6  ;;  %v17859_v16 = vld [vmem:[#allocation51_spill] sm:$0xff]  ;;  %v10964_v52 = vpop.f32.mrf.mxu0 }
 0x255   : > { %v5728_v29 = vsel %vm17855_vm4, %v5338_v21, %v5727_v3  ;;  %v5346_v27 = vrot.slane %v5344_v53, 7  ;;  %v5367_v13 = vor.u32 %v5366_v33, %v5363_v50  ;;  %v5391_v45 = vshrl.u32 %v10275_v26, 16  ;;  %v17863_v53 = vld [vmem:[#allocation5_spill] sm:$0xff] }
 0x256   : > { %5729 = vst [vmem:[#allocation3 + $0x8] sm:$0xe] %v5728_v29  ;;  %v5394_v42 = vshll.u32 %v10275_v26, 16  ;;  %v10273_v60 = vpack.c.bf16 %v5191_v30, %v5191_v30  ;;  %v5007_v56 = vadd.f32 %v10960_v59, %v14120_v11  ;;  %v5005_v18 = vadd.f32 %v4876_v46, %v14133_v39  ;;  %v17867_v26 = vld [vmem:[#allocation18_spill] sm:$0xff]  ;;  %v17870_v30 = vld [vmem:[#allocation61_spill] sm:$0xff] }
 0x257   : > { %v5347_v35 = vor.u32 %v5346_v27, %v5343_v44  ;;  %v5010_v24 = vadd.f32 %v10963_v54, %v14146_v2  ;;  %vm17857_vm9 = vnez %v17856_v23  ;;  %v10004_v44 = vld [vmem:[%s17128_s2 + $0x6] sm:$0x3]  ;;  %vm17864_vm1 = vnez %v17863_v53 }
 0x258   : > { %v17860_v3 = vsel %vm17857_vm9, %v17858_v0, %v17859_v16  ;;  %v5368_v11 = vsel %vm17864_vm1, %v5359_v6, %v5367_v13  ;;  %v5369_v39 = vrot.slane %v5367_v13, 4  ;;  %v5393_v46 = vrot.slane %v5391_v45, 6  ;;  %11343 = vmatprep.subr.msk.bf16.mxu0 %vm17865_vm0, %v10004_v44  ;;  %v17869_v6 = vld [vmem:[#allocation17_spill] sm:$0xff]  ;;  %v4892_v13 = vpop.f32.mrf.mxu0  ;;  %v17875_v16 = vld [vmem:[#allocation24_spill] sm:$0xff] }
 0x259   : > { %vm14797_vm14 = vcmp.lt.s32.totalorder %v17860_v3, 16  ;;  %v5396_v2 = vrot.slane %v5394_v42, 7  ;;  %vm1405_vm5 = vcmp.ne.s32.totalorder %v14726_v43, 0  ;;  %vm17866_vm3 = vcmask 27648  }
 0x25a   : > { %5732 = vst.msk [vmem:[#allocation3 + $0x14] sm:$0xf] %vm17866_vm3, %v5368_v11  ;;  %v5348_v59 = vsel %vm17864_vm1, %v5339_v17, %v5347_v35  ;;  %v5349_v54 = vrot.slane %v5347_v35, 4  ;;  %v5371_v50 = vshrl.u32 %v10273_v60, 16  ;;  %v5374_v33 = vshll.u32 %v10273_v60, 16  ;;  %vm17874_vm9 = vmmov %vm17866_vm3  ;;  %v10967_v44 = vpop.f32.mrf.mxu0 }
 0x25b   : > { %vm17868_vm6 = vnez %v17867_v26  ;;  %5730 = vst.msk [vmem:[#allocation3 + $0xc] sm:$0xf] %vm17874_vm9, %v5348_v59  ;;  %v14822_v45 = vor.u32 %v5396_v2, %v5393_v46  ;;  %v5050_v42 = vadd.f32 %v14608_v63, %v5007_v56  ;;  %v5048_v35 = vadd.f32 %v14608_v63, %v5005_v18  ;;  %vm17876_vm0 = vmmov %vm17866_vm3  ;;  %v17877_v26 = vld [vmem:[#allocation36_spill] sm:$0xff] }
 0x25c   : > { %v17871_v29 = vsel %vm17868_vm6, %v17869_v6, %v17870_v30  ;;  %v5053_v60 = vadd.f32 %v14608_v63, %v5010_v24  ;;  %v5358_v17 = vsel %vm17864_vm1, %v5349_v54, %v5357_v51  ;;  %v5373_v23 = vrot.slane %v5371_v50, 6  ;;  %v14835_v51 = vpop.f32.mrf.mxu0  ;;  %v17880_v30 = vld [vmem:[#allocation8_spill] sm:$0xff]  ;;  %vm14877_vm9 = vmand %vm1441_vm15, %vm1405_vm5 }
 0x25d   : > { %vm14817_vm4 = vcmp.lt.s32.totalorder %v17871_v29, 16  ;;  %v5376_v0 = vrot.slane %v5374_v33, 7  ;;  %v5008_v3 = vadd.f32 %v4889_v58, %v17875_v16  ;;  %5731 = vst.msk [vmem:[#allocation3 + $0x10] sm:$0xf] %vm17876_vm0, %v5358_v17  ;;  %v5399_v11 = vrot.slane %v14822_v45, 4  ;;  %v17878_v33 = vld [vmem:[#allocation66_spill] sm:$0xff] }
 0x25e   : > { %v5086_v46 = vmax.f32 %v5050_v42, 0.0  ;;  %v5084_v2 = vmax.f32 %v5048_v35, 0.0  ;;  %v5089_v59 = vmax.f32 %v5053_v60, 0.0  ;;  %v5011_v24 = vadd.f32 %v10964_v52, %v17877_v26  ;;  %v17881_v29 = vld [vmem:[#allocation16_spill] sm:$0xff]  ;;  %v14855_v60 = vpop.f32.mrf.mxu0  ;;  %v17886_v16 = vld [vmem:[#allocation10_spill] sm:$0xff]  ;;  %v17920_v52 = vld [vmem:[#allocation13_spill] sm:$0xff] }
 0x25f   : > { %v5377_v56 = vor.u32 %v5376_v0, %v5373_v23  ;;  %v5051_v18 = vadd.f32 %v14608_v63, %v5008_v3  ;;  %v5009_v6 = vadd.f32 %v4892_v13, %v14231_v12  ;;  %vm17879_vm3 = vnez %v17878_v33  ;;  %v17888_v3 = vld [vmem:[#allocation67_spill] sm:$0xff] }
 0x260   : > { %v5194_v58 = vsel %vm14763_vm10, %v5086_v46, 0.0  ;;  %v5192_v54 = vsel %vm14772_vm7, %v5084_v2, 0.0  ;;  %v5197_v50 = vsel %vm14781_vm8, %v5089_v59, 0.0  ;;  %v17882_v42 = vsel %vm17879_vm3, %v17880_v30, %v17881_v29  ;;  %vm17885_vm10 = vmmov %vm17876_vm0  ;;  %v4908_v26 = vpop.f32.mrf.mxu0 }
 0x261   : > { %vm14848_vm6 = vcmp.lt.s32.totalorder %v17882_v42, 16  ;;  %v5014_v12 = vadd.f32 %v10967_v44, %v14243_v8  ;;  %v5378_v57 = vsel %vm17864_vm1, %v5369_v39, %v5377_v56  ;;  %v5379_v13 = vrot.slane %v5377_v56, 4  ;;  %v17889_v8 = vld [vmem:[#allocation63_spill] sm:$0xff] }
 0x262   : > { %v10276_v49 = vpack.c.bf16 %v5194_v58, %v5194_v58  ;;  %v10274_v35 = vpack.c.bf16 %v5192_v54, %v5192_v54  ;;  %5733 = vst.msk [vmem:[#allocation3 + $0x18] sm:$0xf] %vm17885_vm10, %v5378_v57  ;;  %v10279_v61 = vpack.c.bf16 %v5197_v50, %v5197_v50  ;;  %v5087_v17 = vmax.f32 %v5051_v18, 0.0  ;;  %v14871_v54 = vld [vmem:[#allocation3 + $0x8] sm:$0xff]   ;;  %v10971_v42 = vpop.f32.mrf.mxu0 }
 0x263   : > { %v5054_v23 = vadd.f32 %v14608_v63, %v5011_v24  ;;  %v5052_v0 = vadd.f32 %v14608_v63, %v5009_v6  ;;  %vm17887_vm7 = vnez %v17886_v16  ;;  %v1549_v27 = vsel %vm14877_vm9, %v14747_v5, %v14726_v43 }
 0x264   : > { %v17890_v44 = vsel %vm17887_vm7, %v17888_v3, %v17889_v8  ;;  %v5401_v46 = vshrl.u32 %v10276_v49, 16  ;;  %v5404_v2 = vshll.u32 %v10276_v49, 16  ;;  %v5381_v59 = vshrl.u32 %v10274_v35, 16  ;;  %vm17911_vm7 = vmmov %vm17885_vm10 }
 0x265   : > { %vm14865_vm8 = vcmp.lt.s32.totalorder %v17890_v44, 16  ;;  %v5384_v56 = vshll.u32 %v10274_v35, 16  ;;  %v5431_v58 = vshrl.u32 %v10279_v61, 16  ;;  %v5434_v18 = vshll.u32 %v10279_v61, 16 }
 0x266   : > { %v5195_v24 = vsel %vm14797_vm14, %v5087_v17, 0.0  ;;  %v5090_v6 = vmax.f32 %v5054_v23, 0.0  ;;  %v5403_v50 = vrot.slane %v5401_v46, 6  ;;  %v5406_v33 = vrot.slane %v5404_v2, 7  ;;  %v14885_v17 = vld [vmem:[#allocation3 + $0x10] sm:$0xff]  }
 0x267   : > { %v5383_v30 = vrot.slane %v5381_v59, 6  ;;  %v5386_v29 = vrot.slane %v5384_v56, 7  ;;  %v5433_v49 = vrot.slane %v5431_v58, 6  ;;  %v5436_v35 = vrot.slane %v5434_v18, 7  ;;  %v17897_v18 = vld [vmem:[#allocation70_spill] sm:$0xff] }
 0x268   : > { %v10277_v21 = vpack.c.bf16 %v5195_v24, %v5195_v24  ;;  %v5198_v61 = vsel %vm14817_vm4, %v5090_v6, 0.0  ;;  %vm17895_vm14 = vcmask 31744   ;;  %v5407_v23 = vor.u32 %v5406_v33, %v5403_v50  ;;  %v17900_v24 = vld [vmem:[#allocation64_spill] sm:$0xff]  ;;  %v17904_v33 = vld [vmem:[#allocation19_spill] sm:$0xff] }
 0x269   : > { %11030 = vmatmul.mubr.msk.bf16.vlgmr.msra.gmra.mxu0 %vm17895_vm14, %v14871_v54  ;;  %v5387_v16 = vor.u32 %v5386_v29, %v5383_v30  ;;  %v10280_v3 = vpack.c.bf16 %v5198_v61, %v5198_v61  ;;  %v5088_v8 = vmax.f32 %v5052_v0, 0.0  ;;  %v5057_v2 = vadd.f32 %v14608_v63, %v5014_v12  ;;  %vm17896_vm5 = vmmov %vm17895_vm14  ;;  %v17899_v12 = vld [vmem:[#allocation69_spill] sm:$0xff]  ;;  %v17906_v30 = vld [vmem:[#allocation71_spill] sm:$0xff] }
 0x26a   : > { %v5411_v44 = vshrl.u32 %v10277_v21, 16  ;;  %v5414_v46 = vshll.u32 %v10277_v21, 16  ;;  %11033 = vmatprep.mubr.msk.bf16.mxu0 %vm17896_vm5, %v14885_v17  ;;  %v5408_v59 = vsel %vm17864_vm1, %v5399_v11, %v5407_v23  ;;  %v14898_v0 = vor.u32 %v5436_v35, %v5433_v49  ;;  %v17907_v29 = vld [vmem:[#allocation65_spill] sm:$0xff] }
 0x26b   : > { %v5388_v56 = vsel %vm17864_vm1, %v5379_v13, %v5387_v16  ;;  %v5389_v58 = vrot.slane %v5387_v16, 4  ;;  %vm17898_vm15 = vnez %v17897_v18  ;;  %vm17905_vm0 = vnez %v17904_v33  ;;  %v4921_v13 = vpop.f32.mrf.mxu0  ;;  %5736 = vst.msk [vmem:[#allocation3 + $0x24] sm:$0xf] %vm17885_vm10, %v5408_v59  ;;  %v17912_v18 = vld [vmem:[#allocation12_spill] sm:$0xff] }
 0x26c   : > { %v17901_v6 = vsel %vm17898_vm15, %v17899_v12, %v17900_v24  ;;  %v17908_v11 = vsel %vm17905_vm0, %v17906_v30, %v17907_v29  ;;  %v5409_v49 = vrot.slane %v5407_v23, 4  ;;  %5734 = vst.msk [vmem:[#allocation3 + $0x1c] sm:$0xf] %vm17911_vm7, %v5388_v56  ;;  %v5413_v35 = vrot.slane %v5411_v44, 6  ;;  %v17914_v12 = vld [vmem:[#allocation73_spill] sm:$0xff]  ;;  %v17915_v24 = vld [vmem:[#allocation68_spill] sm:$0xff]  ;;  %vm17919_vm15 = vmmov %vm17911_vm7 }
 0x26d   : > { %vm14905_vm4 = vcmp.lt.s32.totalorder %v17901_v6, 16  ;;  %vm14914_vm3 = vcmp.lt.s32.totalorder %v17908_v11, 16  ;;  %v5416_v61 = vrot.slane %v5414_v46, 7  ;;  %v5441_v16 = vshrl.u32 %v10280_v3, 16 }
 0x26e   : > { %vm17913_vm14 = vnez %v17912_v18  ;;  %v5398_v23 = vsel %vm17864_vm1, %v5389_v58, %v14822_v45  ;;  %v5444_v30 = vshll.u32 %v10280_v3, 16  ;;  %v5196_v59 = vsel %vm14848_vm6, %v5088_v8, 0.0  ;;  %v17922_v8 = vld [vmem:[#allocation74_spill] sm:$0xff] }
 0x26f   : > { %v17916_v6 = vsel %vm17913_vm14, %v17914_v12, %v17915_v24  ;;  %v5093_v44 = vmax.f32 %v5057_v2, 0.0  ;;  %5735 = vst.msk [vmem:[#allocation3 + $0x20] sm:$0xf] %vm17919_vm15, %v5398_v23  ;;  %v5417_v46 = vor.u32 %v5416_v61, %v5413_v35  ;;  %v5443_v56 = vrot.slane %v5441_v16, 6  ;;  %v17923_v2 = vld [vmem:[#allocation72_spill] sm:$0xff]  ;;  %v14951_v61 = vpop.f32.mrf.mxu0 }
 0x270   : > { %vm14925_vm5 = vcmp.lt.s32.totalorder %v17916_v6, 16  ;;  %v10278_v29 = vpack.c.bf16 %v5196_v59, %v5196_v59  ;;  %v5012_v11 = vadd.f32 %v14835_v51, %v14247_v36  ;;  %v5446_v18 = vrot.slane %v5444_v30, 7 }
 0x271   : > { %v5201_v12 = vsel %vm14865_vm8, %v5093_v44, 0.0  ;;  %v5015_v45 = vadd.f32 %v14855_v60, %v14284_v40  ;;  %v5013_v3 = vadd.f32 %v4908_v26, %v14287_v22  ;;  %vm17921_vm6 = vnez %v17920_v52  ;;  %vm17927_vm8 = vmmov %vm17911_vm7  ;;  %v14975_v52 = vpop.f32.mrf.mxu0 }
 0x272   : > { %v17924_v58 = vsel %vm17921_vm6, %v17922_v8, %v17923_v2  ;;  %v5439_v36 = vrot.slane %v14898_v0, 4  ;;  %v5418_v51 = vsel %vm17864_vm1, %v5409_v49, %v5417_v46  ;;  %v5421_v39 = vshrl.u32 %v10278_v29, 16  ;;  %vm17935_vm14 = vmmov %vm17927_vm8 }
 0x273   : > { %vm14947_vm0 = vcmp.lt.s32.totalorder %v17924_v58, 16  ;;  %v5424_v40 = vshll.u32 %v10278_v29, 16  ;;  %5737 = vst.msk [vmem:[#allocation3 + $0x28] sm:$0xf] %vm17927_vm8, %v5418_v51  ;;  %v14957_v22 = vor.u32 %v5446_v18, %v5443_v56  ;;  %v10283_v60 = vpack.c.bf16 %v5201_v12, %v5201_v12  ;;  %v17928_v56 = vld [vmem:[#allocation80_spill] sm:$0xff]  ;;  %v17930_v18 = vld [vmem:[#allocation78_spill] sm:$0xff]  ;;  %vm17937_vm6 = vmmov %vm17927_vm8 }
 0x274   : > { %v5055_v26 = vadd.f32 %v14608_v63, %v5012_v11  ;;  %v5058_v16 = vadd.f32 %v14608_v63, %v5015_v45  ;;  %v5423_v24 = vrot.slane %v5421_v39, 6  ;;  %v5056_v23 = vadd.f32 %v14608_v63, %v5013_v3  ;;  %v17931_v12 = vld [vmem:[#allocation75_spill] sm:$0xff] }
 0x275   : > { %v5426_v6 = vrot.slane %v5424_v40, 7  ;;  %v5018_v30 = vadd.f32 %v10971_v42, %v14299_v4  ;;  %v5419_v59 = vrot.slane %v5417_v46, 4  ;;  %v5448_v49 = vsel %vm17864_vm1, %v5439_v36, %v14957_v22  ;;  %v14977_v3 = vld [vmem:[#allocation3 + $0x18] sm:$0xff]  }
 0x276   : > { %v5471_v44 = vshrl.u32 %v10283_v60, 16  ;;  %v5474_v29 = vshll.u32 %v10283_v60, 16  ;;  %vm17929_vm10 = vnez %v17928_v56  ;;  %5740 = vst.msk [vmem:[#allocation3 + $0x34] sm:$0xf] %vm17935_vm14, %v5448_v49  ;;  %v5091_v42 = vmax.f32 %v5055_v26, 0.0  ;;  %v14984_v39 = vld [vmem:[#allocation3 + $0x20] sm:$0xff]  }
 0x277   : > { %v17932_v11 = vsel %vm17929_vm10, %v17930_v18, %v17931_v12  ;;  %v5427_v4 = vor.u32 %v5426_v6, %v5423_v24  ;;  %v5094_v46 = vmax.f32 %v5058_v16, 0.0  ;;  %v5092_v8 = vmax.f32 %v5056_v23, 0.0  ;;  %v14996_v23 = vpop.f32.mrf.mxu0  ;;  %v17957_v45 = vld [vmem:[#allocation87_spill] sm:$0xff] }
 0x278   : > { %vm14971_vm7 = vcmp.lt.s32.totalorder %v17932_v11, 16  ;;  %v5473_v2 = vrot.slane %v5471_v44, 6  ;;  %v5476_v58 = vrot.slane %v5474_v29, 7  ;;  %v5061_v36 = vadd.f32 %v14608_v63, %v5018_v30  ;;  %v15477_v53 = vld [vmem:[#allocation3 + $0x18] sm:$0xff]  }
 0x279   : > { %v5016_v51 = vadd.f32 %v4921_v13, %v14341_v20  ;;  %vm17936_vm15 = vcmask 31744   ;;  %v5428_v40 = vsel %vm17864_vm1, %v5419_v59, %v5427_v4  ;;  %v5429_v60 = vrot.slane %v5427_v4, 4 }
 0x27a   : > { %11034 = vmatmul.mubr.msk.bf16.gmra.mxu0 %vm17936_vm15, %v14977_v3  ;;  %v5199_v26 = vsel %vm14905_vm4, %v5091_v42, 0.0  ;;  %v5202_v16 = vsel %vm14914_vm3, %v5094_v46, 0.0  ;;  %v5449_v24 = vrot.slane %v14957_v22, 4  ;;  %5738 = vst.msk [vmem:[#allocation3 + $0x2c] sm:$0xf] %vm17937_vm6, %v5428_v40  ;;  %v5200_v6 = vsel %vm14925_vm5, %v5092_v8, 0.0  ;;  %vm17938_vm8 = vmmov %vm17936_vm15  ;;  %v4937_v46 = vpop.f32.mrf.mxu0 }
 0x27b   : > { %v10281_v20 = vpack.c.bf16 %v5199_v26, %v5199_v26  ;;  %v10284_v13 = vpack.c.bf16 %v5202_v16, %v5202_v16  ;;  %11037 = vmatprep.mubr.msk.bf16.mxu0 %vm17938_vm8, %v14984_v39  ;;  %v5438_v50 = vsel %vm17864_vm1, %v5429_v60, %v14898_v0  ;;  %v10282_v21 = vpack.c.bf16 %v5200_v6, %v5200_v6  ;;  %vm17939_vm4 = vmmov %vm17937_vm6  ;;  %v17940_v60 = vld [vmem:[#allocation83_spill] sm:$0xff] }
 0x27c   : > { %v5097_v30 = vmax.f32 %v5061_v36, 0.0  ;;  %v5059_v22 = vadd.f32 %v14608_v63, %v5016_v51  ;;  %5739 = vst.msk [vmem:[#allocation3 + $0x30] sm:$0xf] %vm17939_vm4, %v5438_v50  ;;  %v5477_v59 = vor.u32 %v5476_v58, %v5473_v2  ;;  %vm17941_vm3 = vnez %v17940_v60  ;;  %v17942_v2 = vld [vmem:[#allocation82_spill] sm:$0xff]  ;;  %v17943_v58 = vld [vmem:[#allocation20_spill] sm:$0xff]  ;;  %v17947_v50 = vld [vmem:[#allocation85_spill] sm:$0xff]  ;;  %v10976_v60 = vpop.f32.mrf.mxu0 }
 0x27d   : > { %v5451_v49 = vshrl.u32 %v10281_v20, 16  ;;  %v5454_v44 = vshll.u32 %v10281_v20, 16  ;;  %v5481_v33 = vshrl.u32 %v10284_v13, 16  ;;  %v5484_v29 = vshll.u32 %v10284_v13, 16  ;;  %vm17954_vm14 = vmmov %vm17939_vm4 }
 0x27e   : > { %v5461_v56 = vshrl.u32 %v10282_v21, 16  ;;  %v5464_v18 = vshll.u32 %v10282_v21, 16  ;;  %v5205_v12 = vsel %vm14947_vm0, %v5097_v30, 0.0  ;;  %v5095_v40 = vmax.f32 %v5059_v22, 0.0  ;;  %v17949_v21 = vld [vmem:[#allocation84_spill] sm:$0xff] }
 0x27f   : > { %v5453_v11 = vrot.slane %v5451_v49, 6  ;;  %v5456_v4 = vrot.slane %v5454_v44, 7  ;;  %v5483_v42 = vrot.slane %v5481_v33, 6  ;;  %v10287_v0 = vpack.c.bf16 %v5205_v12, %v5205_v12  ;;  %v17950_v30 = vld [vmem:[#allocation76_spill] sm:$0xff] }
 0x280   : > { %v5486_v8 = vrot.slane %v5484_v29, 7  ;;  %v5463_v36 = vrot.slane %v5461_v56, 6  ;;  %v5466_v51 = vrot.slane %v5464_v18, 7  ;;  %v17944_v26 = vsel %vm17941_vm3, %v17942_v2, %v17943_v58  ;;  %vm17970_vm3 = vmmov %vm17954_vm14 }
 0x281   : > { %vm15012_vm5 = vcmp.lt.s32.totalorder %v17944_v26, 16  ;;  %v5457_v35 = vor.u32 %v5456_v4, %v5453_v11  ;;  %v5511_v20 = vshrl.u32 %v10287_v0, 16  ;;  %v5514_v13 = vshll.u32 %v10287_v0, 16  ;;  %v15028_v18 = vld [vmem:[#allocation3 + $0x28] sm:$0xff]  }
 0x282   : > { %v5917_v6 = vshll.u32 %v14885_v17, 16  ;;  %vm17948_vm0 = vnez %v17947_v50  ;;  %v5479_v44 = vrot.slane %v5477_v59, 4  ;;  %v5487_v33 = vor.u32 %v5486_v8, %v5483_v42 }
 0x283   : > { %v17951_v49 = vsel %vm17948_vm0, %v17949_v21, %v17950_v30  ;;  %v5467_v29 = vor.u32 %v5466_v51, %v5463_v36  ;;  %v5203_v56 = vsel %vm14971_vm7, %v5095_v40, 0.0  ;;  %v5458_v12 = vsel %vm17864_vm1, %v5449_v24, %v5457_v35  ;;  %v17955_v36 = vld [vmem:[#allocation23_spill] sm:$0xff]  ;;  %v17958_v51 = vld [vmem:[#allocation81_spill] sm:$0xff]  ;;  %vm17972_vm0 = vmmov %vm17970_vm3 }
 0x284   : > { %vm15022_vm10 = vcmp.lt.s32.totalorder %v17951_v49, 16  ;;  %v5459_v11 = vrot.slane %v5457_v35, 4  ;;  %v5513_v4 = vrot.slane %v5511_v20, 6  ;;  %v5516_v0 = vrot.slane %v5514_v13, 7  ;;  %5741 = vst.msk [vmem:[#allocation3 + $0x38] sm:$0xf] %vm17954_vm14, %v5458_v12 }
 0x285   : > { %v5488_v2 = vsel %vm17864_vm1, %v5479_v44, %v5487_v33  ;;  %v5489_v58 = vrot.slane %v5487_v33, 4  ;;  %v5469_v42 = vrot.slane %v5467_v29, 4  ;;  %v10285_v8 = vpack.c.bf16 %v5203_v56, %v5203_v56  ;;  %v17962_v24 = vld [vmem:[#allocation91_spill] sm:$0xff]  ;;  %v17964_v35 = vld [vmem:[#allocation90_spill] sm:$0xff]  ;;  %v17971_v33 = vld [vmem:[#allocation97_spill] sm:$0xff] }
 0x286   : > { %vm17956_vm15 = vnez %v17955_v36  ;;  %vm17963_vm6 = vnez %v17962_v24  ;;  %v17965_v20 = vld [vmem:[#allocation86_spill] sm:$0xff]  ;;  %vm17969_vm4 = vcmask 31744   ;;  %5744 = vst.msk [vmem:[#allocation3 + $0x44] sm:$0xf] %vm17970_vm3, %v5488_v2  ;;  %v5468_v30 = vsel %vm17864_vm1, %v5459_v11, %v5467_v29  ;;  %v4940_v11 = vpop.f32.mrf.mxu0 }
 0x287   : > { %v17959_v40 = vsel %vm17956_vm15, %v17957_v45, %v17958_v51  ;;  %v17966_v13 = vsel %vm17963_vm6, %v17964_v35, %v17965_v20  ;;  %11038 = vmatmul.mubr.msk.bf16.gmra.mxu0 %vm17969_vm4, %v15028_v18  ;;  %v15055_v21 = vld [vmem:[#allocation3 + $0x30] sm:$0xff]   ;;  %v15060_v49 = vor.u32 %v5516_v0, %v5513_v4  ;;  %v15062_v44 = vrot.slane %v5917_v6, 1  ;;  %5742 = vst.msk [vmem:[#allocation3 + $0x3c] sm:$0xf] %vm17972_vm0, %v5468_v30  ;;  %vm17973_vm14 = vmmov %vm17969_vm4  ;;  %v17978_v51 = vld [vmem:[#allocation27_spill] sm:$0xff] }
 0x288   : > { %vm15040_vm7 = vcmp.lt.s32.totalorder %v17959_v40, 16  ;;  %vm15049_vm8 = vcmp.lt.s32.totalorder %v17966_v13, 16  ;;  %v5019_v56 = vadd.f32 %v14951_v61, %v17971_v33  ;;  %v5478_v12 = vsel %vm17864_vm1, %v5469_v42, %v5477_v59  ;;  %11041 = vmatprep.mubr.msk.bf16.mxu0 %vm17973_vm14, %v15055_v21  ;;  %vm17974_vm15 = vmmov %vm17972_vm0  ;;  %v17979_v40 = vld [vmem:[#allocation88_spill] sm:$0xff]  ;;  %v17983_v20 = vld [vmem:[#allocation94_spill] sm:$0xff] }
 0x289   : > { %v5491_v36 = vshrl.u32 %v10285_v8, 16  ;;  %v5494_v45 = vshll.u32 %v10285_v8, 16  ;;  %v5017_v2 = vadd.f32 %v14975_v52, %v14390_v28  ;;  %5743 = vst.msk [vmem:[#allocation3 + $0x40] sm:$0xf] %vm17974_vm15, %v5478_v12  ;;  %v5519_v6 = vrot.slane %v15060_v49, 4  ;;  %v17975_v8 = vld [vmem:[#allocation99_spill] sm:$0xff] }
 0x28a   : > { %v5062_v29 = vadd.f32 %v14608_v63, %v5019_v56  ;;  %v5909_v61 = vshll.u32 %v14871_v54, 16  ;;  %v5913_v59 = vshrl.u32 %v14871_v54, 16  ;;  %v5022_v28 = vadd.f32 %v14996_v23, %v17975_v8  ;;  %v17976_v52 = vld [vmem:[#allocation42_spill] sm:$0xff]  ;;  %v17985_v54 = vld [vmem:[#allocation93_spill] sm:$0xff]  ;;  %v17986_v13 = vld [vmem:[#allocation92_spill] sm:$0xff] }
 0x28b   : > { %v5493_v4 = vrot.slane %v5491_v36, 6  ;;  %v5496_v0 = vrot.slane %v5494_v45, 7  ;;  %v5060_v42 = vadd.f32 %v14608_v63, %v5017_v2  ;;  %vm17977_vm6 = vnez %v17976_v52  ;;  %v17990_v12 = vld [vmem:[#allocation100_spill] sm:$0xff] }
 0x28c   : > { %v17980_v24 = vsel %vm17977_vm6, %v17978_v51, %v17979_v40  ;;  %vm17984_vm3 = vnez %v17983_v20  ;;  %v5098_v56 = vmax.f32 %v5062_v29, 0.0  ;;  %v5911_v23 = vrot.slane %v5909_v61, 1 }
 0x28d   : > { %vm15086_vm4 = vcmp.lt.s32.totalorder %v17980_v24, 16  ;;  %v17987_v30 = vsel %vm17984_vm3, %v17985_v54, %v17986_v13  ;;  %v5020_v36 = vadd.f32 %v4937_v46, %v17990_v12  ;;  %v5023_v45 = vadd.f32 %v10976_v60, %v14448_v37  ;;  %v17991_v24 = vld [vmem:[#allocation79_spill] sm:$0xff]  ;;  %v15111_v46 = vld [vmem:[%s17128_s2 + $0x8] sm:$0x3] }
 0x28e   : > { %vm15095_vm0 = vcmp.lt.s32.totalorder %v17987_v30, 16  ;;  %v5497_v2 = vor.u32 %v5496_v0, %v5493_v4  ;;  %v5096_v8 = vmax.f32 %v5060_v42, 0.0  ;;  %v5065_v52 = vadd.f32 %v14608_v63, %v5022_v28  ;;  %v15121_v0 = vpop.f32.mrf.mxu0  ;;  %v15123_v42 = vld [vmem:[#allocation3 + $0x38] sm:$0xff]  }
 0x28f   : > { %v5021_v51 = vadd.f32 %v4940_v11, %v14492_v47  ;;  %v5206_v40 = vsel %vm15012_vm5, %v5098_v56, 0.0  ;;  %vm17992_vm14 = vsmask.f32 7424  ;;  %v5915_v54 = vor.u32 %v5913_v59, %v5911_v23 }
 0x290   : > { %v5912_v20 = vsel %vm17992_vm14, %v17991_v24, %v5911_v23  ;;  %v5063_v29 = vadd.f32 %v14608_v63, %v5020_v36  ;;  %v5498_v37 = vsel %vm17864_vm1, %v5489_v58, %v5497_v2  ;;  %v5499_v60 = vrot.slane %v5497_v2, 4  ;;  %vm17994_vm6 = vmmov %vm17992_vm14  ;;  %v15128_v30 = vld [vmem:[#allocation3 + $0x40] sm:$0xff]   ;;  %v17996_v36 = vld [vmem:[#allocation89_spill] sm:$0xff] }
 0x291   : > { %v10288_v61 = vpack.c.bf16 %v5206_v40, %v5206_v40  ;;  %v5204_v47 = vsel %vm15022_vm10, %v5096_v8, 0.0  ;;  %vm17993_vm5 = vcmask 31744   ;;  %5745 = vst.msk [vmem:[#allocation3 + $0x48] sm:$0xf] %vm17974_vm15, %v5498_v37  ;;  %v5101_v59 = vmax.f32 %v5065_v52, 0.0 }
 0x292   : > { %10991 = vmatprep.mubr.msk.bf16.mxu1 %vm17993_vm5, %v5912_v20  ;;  %v10286_v16 = vpack.c.bf16 %v5204_v47, %v5204_v47  ;;  %v5920_v11 = vsel %vm17994_vm6, %v5915_v54, %v15062_v44  ;;  %v5099_v4 = vmax.f32 %v5063_v29, 0.0  ;;  %vm17995_vm3 = vmmov %vm17993_vm5  ;;  %v5066_v22 = vadd.f32 %v14608_v63, %v5023_v45  ;;  %v4953_v54 = vpop.f32.mrf.mxu0 }
 0x293   : > { %v5521_v58 = vshrl.u32 %v10288_v61, 16  ;;  %v5524_v28 = vshll.u32 %v10288_v61, 16  ;;  %10992 = vmatmul.mubr.msk.bf16.vlgmr.msra.gmra.mxu1 %vm17995_vm3, %v5920_v11  ;;  %v5064_v13 = vadd.f32 %v14608_v63, %v5021_v51  ;;  %v5209_v12 = vsel %vm15040_vm7, %v5101_v59, 0.0  ;;  %vm17997_vm10 = vmmov %vm17995_vm3 }
 0x294   : > { %v5501_v56 = vshrl.u32 %v10286_v16, 16  ;;  %v5504_v23 = vshll.u32 %v10286_v16, 16  ;;  %11066 = vmatpush3.bf16.msra.mxu1 %v17996_v36  ;;  %v5207_v2 = vsel %vm15049_vm8, %v5099_v4, 0.0  ;;  %11042 = vmatmul.mubr.msk.bf16.gmra.mxu0 %vm17997_vm10, %v15123_v42  ;;  %v10291_v45 = vpack.c.bf16 %v5209_v12, %v5209_v12  ;;  %vm17998_vm14 = vmmov %vm17995_vm3  ;;  %v10980_v12 = vpop.f32.mrf.mxu0 }
 0x295   : > { %v5523_v8 = vrot.slane %v5521_v58, 6  ;;  %v5526_v52 = vrot.slane %v5524_v28, 7  ;;  %v10289_v40 = vpack.c.bf16 %v5207_v2, %v5207_v2  ;;  %11045 = vmatprep.mubr.msk.bf16.mxu0 %vm17998_vm14, %v15128_v30  ;;  %vm17999_vm5 = vcmask 1041408   ;;  %vm18000_vm7 = vmmov %vm17974_vm15 }
 0x296   : > { %11344 = vmatprep.subr.msk.bf16.mxu1 %vm17999_vm5, %v15111_v46  ;;  %v5503_v26 = vrot.slane %v5501_v56, 6  ;;  %v5506_v51 = vrot.slane %v5504_v23, 7  ;;  %v5102_v24 = vmax.f32 %v5066_v22, 0.0  ;;  %v5100_v20 = vmax.f32 %v5064_v13, 0.0  ;;  %vm18001_vm8 = vmmov %vm18000_vm7 }
 0x297   : > { %v5527_v50 = vor.u32 %v5526_v52, %v5523_v8  ;;  %v5551_v29 = vshrl.u32 %v10291_v45, 16  ;;  %v5554_v37 = vshll.u32 %v10291_v45, 16  ;;  %v5531_v61 = vshrl.u32 %v10289_v40, 16  ;;  %v18004_v52 = vld [vmem:[#allocation95_spill] sm:$0xff]  ;;  %v18005_v45 = vld [vmem:[#allocation30_spill] sm:$0xff]  ;;  %vm18023_vm14 = vmmov %vm18000_vm7 }
 0x298   : > { %v5507_v47 = vor.u32 %v5506_v51, %v5503_v26  ;;  %v5534_v16 = vshll.u32 %v10289_v40, 16  ;;  %v5210_v59 = vsel %vm15086_vm4, %v5102_v24, 0.0  ;;  %v5208_v11 = vsel %vm15095_vm0, %v5100_v20, 0.0 }
 0x299   : > { %v5528_v4 = vsel %vm17864_vm1, %v5519_v6, %v5527_v50  ;;  %v5529_v58 = vrot.slane %v5527_v50, 4  ;;  %v5553_v28 = vrot.slane %v5551_v29, 6  ;;  %v5556_v22 = vrot.slane %v5554_v37, 7  ;;  %v18002_v6 = vld [vmem:[#allocation15_spill] sm:$0xff]  ;;  %v18012_v29 = vld [vmem:[#allocation33_spill] sm:$0xff] }
 0x29a   : > { %5748 = vst.msk [vmem:[#allocation3 + $0x54] sm:$0xf] %vm18000_vm7, %v5528_v4  ;;  %v5508_v13 = vsel %vm17864_vm1, %v5499_v60, %v5507_v47  ;;  %v5509_v56 = vrot.slane %v5507_v47, 4  ;;  %v5533_v23 = vrot.slane %v5531_v61, 6  ;;  %v5536_v35 = vrot.slane %v5534_v16, 7  ;;  %v18009_v50 = vld [vmem:[#allocation43_spill] sm:$0xff] }
 0x29b   : > { %5746 = vst.msk [vmem:[#allocation3 + $0x4c] sm:$0xf] %vm18001_vm8, %v5508_v13  ;;  %v5557_v33 = vor.u32 %v5556_v22, %v5553_v28  ;;  %v10292_v36 = vpack.c.bf16 %v5210_v59, %v5210_v59  ;;  %v10290_v2 = vpack.c.bf16 %v5208_v11, %v5208_v11  ;;  %v5921_v8 = vshrl.u32 %v14885_v17, 16  ;;  %v18011_v17 = vld [vmem:[#allocation96_spill] sm:$0xff]  ;;  %v18016_v47 = vld [vmem:[#allocation101_spill] sm:$0xff]  ;;  %v18018_v16 = vld [vmem:[#allocation46_spill] sm:$0xff] }
 0x29c   : > { %vm18003_vm4 = vnez %v18002_v6  ;;  %v5518_v60 = vsel %vm17864_vm1, %v5509_v56, %v15060_v49  ;;  %v5537_v51 = vor.u32 %v5536_v35, %v5533_v23  ;;  %v5925_v24 = vshll.u32 %v14977_v3, 16  ;;  %v18019_v59 = vld [vmem:[#allocation7_spill] sm:$0xff] }
 0x29d   : > { %v18006_v40 = vsel %vm18003_vm4, %v18004_v52, %v18005_v45  ;;  %v5929_v20 = vshrl.u32 %v14977_v3, 16  ;;  %vm18010_vm15 = vnez %v18009_v50  ;;  %vm18017_vm3 = vnez %v18016_v47  ;;  %5747 = vst.msk [vmem:[#allocation3 + $0x50] sm:$0xf] %vm18023_vm14, %v5518_v60  ;;  %v18025_v6 = vld [vmem:[#allocation47_spill] sm:$0xff]  ;;  %v18026_v52 = vld [vmem:[#allocation98_spill] sm:$0xff]  ;;  %v4956_v60 = vpop.f32.mrf.mxu0 }
 0x29e   : > { %vm15159_vm0 = vcmp.lt.s32.totalorder %v18006_v40, 16  ;;  %v18013_v37 = vsel %vm18010_vm15, %v18011_v17, %v18012_v29  ;;  %v18020_v11 = vsel %vm18017_vm3, %v18018_v16, %v18019_v59  ;;  %v5559_v3 = vrot.slane %v5557_v33, 4  ;;  %vm18033_vm3 = vmmov %vm18001_vm8 }
 0x29f   : > { %vm15173_vm6 = vcmp.lt.s32.totalorder %v18013_v37, 16  ;;  %vm15182_vm10 = vcmp.lt.s32.totalorder %v18020_v11, 16  ;;  %v5561_v4 = vshrl.u32 %v10292_v36, 16  ;;  %v5564_v28 = vshll.u32 %v10292_v36, 16 }
 0x2a0   : > { %v5541_v22 = vshrl.u32 %v10290_v2, 16  ;;  %v5538_v13 = vsel %vm17864_vm1, %v5529_v58, %v5537_v51  ;;  %v5539_v56 = vrot.slane %v5537_v51, 4  ;;  %v5544_v23 = vshll.u32 %v10290_v2, 16  ;;  %v18030_v2 = vld [vmem:[#allocation102_spill] sm:$0xff] }
 0x2a1   : > { %v5923_v35 = vor.u32 %v5921_v8, %v15062_v44  ;;  %vm18024_vm5 = vnez %v17757_v15  ;;  %5749 = vst.msk [vmem:[#allocation3 + $0x58] sm:$0xf] %vm18001_vm8, %v5538_v13  ;;  %v5563_v36 = vrot.slane %v5561_v4, 6  ;;  %v5566_v50 = vrot.slane %v5564_v28, 7  ;;  %vm18036_vm8 = vmmov %vm18033_vm3 }
 0x2a2   : > { %v18027_v45 = vsel %vm18024_vm5, %v18025_v6, %v18026_v52  ;;  %v5543_v17 = vrot.slane %v5541_v22, 6  ;;  %v5927_v58 = vrot.slane %v5925_v24, 1  ;;  %v5546_v51 = vrot.slane %v5544_v23, 7  ;;  %v15211_v28 = vld [vmem:[#allocation3 + $0x48] sm:$0xff]  }
 0x2a3   : > { %vm15195_vm7 = vcmp.lt.s32.totalorder %v18027_v45, 16  ;;  %v5026_v44 = vadd.f32 %v15121_v0, %v18030_v2  ;;  %v5933_v15 = vshll.u32 %v14984_v39, 16  ;;  %v5024_v8 = vadd.f32 %v4953_v54, %v14535_v38  ;;  %v10983_v0 = vpop.f32.mrf.mxu0 }
 0x2a4   : > { %v15204_v29 = vor.u32 %v5566_v50, %v5563_v36  ;;  %vm18031_vm4 = vsmask.f32 7424  ;;  %v5931_v47 = vor.u32 %v5929_v20, %v5927_v58  ;;  %v5027_v16 = vadd.f32 %v10980_v12, %v14539_v19 }
 0x2a5   : > { %v5928_v37 = vsel %vm18031_vm4, %v5923_v35, %v5927_v58  ;;  %v5547_v59 = vor.u32 %v5546_v51, %v5543_v17  ;;  %vm18032_vm15 = vcmask 31744   ;;  %v5069_v24 = vadd.f32 %v14608_v63, %v5026_v44  ;;  %vm18034_vm14 = vmmov %vm18031_vm4  ;;  %v15225_v35 = vld [vmem:[#allocation3 + $0x50] sm:$0xff]   ;;  %v4969_v50 = vpop.f32.mrf.mxu0 }
 0x2a6   : > { %10995 = vmatprep.mubr.msk.bf16.mxu1 %vm18032_vm15, %v5928_v37  ;;  %v5935_v11 = vrot.slane %v5933_v15, 1  ;;  %v5067_v4 = vadd.f32 %v14608_v63, %v5024_v8  ;;  %v5568_v38 = vsel %vm17864_vm1, %v5559_v3, %v15204_v29  ;;  %v5569_v54 = vrot.slane %v15204_v29, 4  ;;  %vm18035_vm5 = vmmov %vm18032_vm15 }
 0x2a7   : > { %v5070_v20 = vadd.f32 %v14608_v63, %v5027_v16  ;;  %v5025_v19 = vadd.f32 %v4956_v60, %v14562_v7  ;;  %5752 = vst.msk [vmem:[#allocation3 + $0x64] sm:$0xf] %vm18033_vm3, %v5568_v38  ;;  %v5548_v12 = vsel %vm17864_vm1, %v5539_v56, %v5547_v59  ;;  %v5549_v22 = vrot.slane %v5547_v59, 4  ;;  %11046 = vmatmul.mubr.msk.bf16.gmra.mxu0 %vm18035_vm5, %v15211_v28  ;;  %vm18037_vm4 = vmmov %vm18035_vm5 }
 0x2a8   : > { %v5105_v13 = vmax.f32 %v5069_v24, 0.0  ;;  %v5936_v23 = vsel %vm18034_vm14, %v5931_v47, %v5935_v11  ;;  %5750 = vst.msk [vmem:[#allocation3 + $0x5c] sm:$0xf] %vm18036_vm8, %v5548_v12  ;;  %v5103_v3 = vmax.f32 %v5067_v4, 0.0  ;;  %v5937_v52 = vshrl.u32 %v14984_v39, 16  ;;  %vm18038_vm15 = vmmov %vm18037_vm4 }
 0x2a9   : > { %10996 = vmatmul.mubr.msk.bf16.gmra.mxu1 %vm18037_vm4, %v5936_v23  ;;  %v5106_v7 = vmax.f32 %v5070_v20, 0.0  ;;  %v5068_v6 = vadd.f32 %v14608_v63, %v5025_v19  ;;  %v5558_v56 = vsel %vm17864_vm1, %v5549_v22, %v5557_v33  ;;  %v5941_v60 = vshll.u32 %v15028_v18, 16  ;;  %11049 = vmatprep.mubr.msk.bf16.mxu0 %vm18038_vm15, %v15225_v35  ;;  %v18049_v23 = vld [vmem:[#allocation62_spill] sm:$0xff] }
 0x2aa   : > { %v5213_v45 = vsel %vm15159_vm0, %v5105_v13, 0.0  ;;  %v5945_v36 = vshrl.u32 %v15028_v18, 16  ;;  %5751 = vst.msk [vmem:[#allocation3 + $0x60] sm:$0xf] %vm18033_vm3, %v5558_v56  ;;  %v5211_v63 = vsel %vm15173_vm6, %v5103_v3, 0.0  ;;  %vm18039_vm0 = vnez %v17759_v55  ;;  %v18052_v3 = vld [vmem:[#allocation49_spill] sm:$0xff] }
 0x2ab   : > { %v10295_v17 = vpack.c.bf16 %v5213_v45, %v5213_v45  ;;  %v5214_v39 = vsel %vm15182_vm10, %v5106_v7, 0.0  ;;  %v5104_v33 = vmax.f32 %v5068_v6, 0.0  ;;  %v18040_v26 = vsel %vm18039_vm0, %v14479_v1, %v14428_v14  ;;  %v10984_v14 = vpop.f32.mrf.mxu0  ;;  %v18057_v6 = vld [vmem:[#allocation32_spill] sm:$0xff] }
 0x2ac   : > { %vm15249_vm14 = vcmp.lt.s32.totalorder %v18040_v26, 16  ;;  %v10293_v58 = vpack.c.bf16 %v5211_v63, %v5211_v63  ;;  %v10296_v51 = vpack.c.bf16 %v5214_v39, %v5214_v39  ;;  %v5939_v2 = vor.u32 %v5937_v52, %v5935_v11  ;;  %v18058_v52 = vld [vmem:[#allocation9_spill] sm:$0xff]  ;;  %v15292_v63 = vld [vmem:[%s17129_s3] ss:$0 sm:$0xff] }
 0x2ad   : > { %v5943_v44 = vrot.slane %v5941_v60, 1  ;;  %v5591_v15 = vshrl.u32 %v10295_v17, 16  ;;  %v5594_v61 = vshll.u32 %v10295_v17, 16  ;;  %v5212_v49 = vsel %vm15195_vm7, %v5104_v33, 0.0  ;;  %vm18048_vm7 = vmmov %vm18037_vm4  ;;  %v4972_v26 = vpop.f32.mrf.mxu0 }
 0x2ae   : > { %v5030_v8 = vadd.f32 %v10983_v0, %v14589_v9  ;;  %v5571_v37 = vshrl.u32 %v10293_v58, 16  ;;  %v5574_v55 = vshll.u32 %v10293_v58, 16  ;;  %v5601_v47 = vshrl.u32 %v10296_v51, 16  ;;  %vm18064_vm3 = vmmov %vm18048_vm7 }
 0x2af   : > { %v5604_v16 = vshll.u32 %v10296_v51, 16  ;;  %v5593_v1 = vrot.slane %v5591_v15, 6  ;;  %v5596_v59 = vrot.slane %v5594_v61, 7  ;;  %v10294_v24 = vpack.c.bf16 %v5212_v49, %v5212_v49  ;;  %v15285_v60 = vld [vmem:[#allocation3 + $0x58] sm:$0xff]   ;;  %v18062_v15 = vld [vmem:[#allocation25_spill] sm:$0xff] }
 0x2b0   : > { %vm18043_vm6 = vsmask.f32 7424  ;;  %vm18044_vm10 = vnez %v17764_v32  ;;  %v5573_v9 = vrot.slane %v5571_v37, 6  ;;  %v5576_v0 = vrot.slane %v5574_v55, 7  ;;  %v18051_v32 = vld [vmem:[#allocation31_spill] sm:$0xff] }
 0x2b1   : > { %v5944_v4 = vsel %vm18043_vm6, %v5939_v2, %v5943_v44  ;;  %v18045_v11 = vsel %vm18044_vm10, %v14516_v31, %v14452_v62  ;;  %v5603_v38 = vrot.slane %v5601_v47, 6  ;;  %v5606_v20 = vrot.slane %v5604_v16, 7  ;;  %v15296_v58 = vld [vmem:[#allocation3 + $0x60] sm:$0xff]   ;;  %v18077_v62 = vld [vmem:[#allocation34_spill] sm:$0xff] }
 0x2b2   : > { %vm15262_vm5 = vcmp.lt.s32.totalorder %v18045_v11, 16  ;;  %10999 = vmatprep.mubr.msk.bf16.mxu1 %vm18048_vm7, %v5944_v4  ;;  %v5597_v19 = vor.u32 %v5596_v59, %v5593_v1  ;;  %v5581_v12 = vshrl.u32 %v10294_v24, 16  ;;  %v5584_v22 = vshll.u32 %v10294_v24, 16  ;;  %v18067_v1 = vld [vmem:[#allocation21_spill] sm:$0xff]  ;;  %v18068_v24 = vld [vmem:[#allocation14_spill] sm:$0xff] }
 0x2b3   : > { %v5947_v13 = vor.u32 %v5945_v36, %v5943_v44  ;;  %vm18050_vm8 = vnez %v18049_v23  ;;  %v18059_v56 = vsel %vm14630_vm12, %v18057_v6, %v18058_v52  ;;  %v5577_v36 = vor.u32 %v5576_v0, %v5573_v9  ;;  %vm18063_vm12 = vmmov %vm18048_vm7  ;;  %v10987_v9 = vpop.f32.mrf.mxu0 }
 0x2b4   : > { %v18053_v7 = vsel %vm18050_vm8, %v18051_v32, %v18052_v3  ;;  %vm15281_vm15 = vcmp.lt.s32.totalorder %v18059_v56, 16  ;;  %v15287_v17 = vor.u32 %v5606_v20, %v5603_v38  ;;  %v5073_v39 = vadd.f32 %v15292_v63, %v5030_v8  ;;  %11050 = vmatmul.mubr.msk.bf16.gmra.mxu0 %vm18063_vm12, %v15285_v60  ;;  %vm18074_vm8 = vmmov %vm18064_vm3 }
 0x2b5   : > { %vm15272_vm4 = vcmp.lt.s32.totalorder %v18053_v7, 16  ;;  %v5949_v33 = vshll.u32 %v15055_v21, 16  ;;  %v5599_v51 = vrot.slane %v5597_v19, 4  ;;  %v5583_v2 = vrot.slane %v5581_v12, 6  ;;  %11053 = vmatprep.mubr.msk.bf16.mxu0 %vm18064_vm3, %v15296_v58  ;;  %v4985_v52 = vpop.f32.mrf.mxu0 }
 0x2b6   : > { %v5586_v44 = vrot.slane %v5584_v22, 7  ;;  %v5028_v61 = vadd.f32 %v4969_v50, %v18062_v15  ;;  %v5578_v49 = vsel %vm17864_vm1, %v5569_v54, %v5577_v36  ;;  %v5579_v37 = vrot.slane %v5577_v36, 4 }
 0x2b7   : > { %v5609_v8 = vrot.slane %v15287_v17, 4  ;;  %v5109_v55 = vmax.f32 %v5073_v39, 0.0  ;;  %vm18065_vm0 = vcmask 27648   ;;  %v5608_v50 = vsel %vm17864_vm1, %v5599_v51, %v15287_v17  ;;  %v18093_v17 = vld [vmem:[#allocation28_spill] sm:$0xff] }
 0x2b8   : > { %5753 = vst.msk [vmem:[#allocation3 + $0x68] sm:$0xf] %vm18065_vm0, %v5578_v49  ;;  %v5587_v47 = vor.u32 %v5586_v44, %v5583_v2  ;;  %v5951_v16 = vrot.slane %v5949_v33, 1  ;;  %v5071_v29 = vadd.f32 %v15292_v63, %v5028_v61  ;;  %vm18066_vm6 = vmmov %vm18065_vm0  ;;  %v5031_v59 = vadd.f32 %v10984_v14, %v18067_v1 }
 0x2b9   : > { %5756 = vst.msk [vmem:[#allocation3 + $0x74] sm:$0xf] %vm18066_vm6, %v5608_v50  ;;  %v5217_v54 = vsel %vm15249_vm14, %v5109_v55, 0.0  ;;  %v5029_v4 = vadd.f32 %v4972_v26, %v18068_v24  ;;  %v5953_v11 = vshrl.u32 %v15055_v21, 16  ;;  %vm18069_vm10 = vsmask.f32 7424  ;;  %vm18073_vm7 = vmmov %vm18065_vm0 }
 0x2ba   : > { %v5588_v0 = vsel %vm17864_vm1, %v5579_v37, %v5587_v47  ;;  %v5589_v38 = vrot.slane %v5587_v47, 4  ;;  %v10299_v20 = vpack.c.bf16 %v5217_v54, %v5217_v54  ;;  %v5952_v12 = vsel %vm18069_vm10, %v5947_v13, %v5951_v16  ;;  %v18078_v47 = vld [vmem:[#allocation11_spill] sm:$0xff]  ;;  %vm18092_vm6 = vmmov %vm18064_vm3 }
 0x2bb   : > { %v18070_v18 = vsel %vm14664_vm2, %v14656_v48, %v14558_v25  ;;  %5754 = vst.msk [vmem:[#allocation3 + $0x6c] sm:$0xf] %vm18073_vm7, %v5588_v0  ;;  %11000 = vmatmul.mubr.msk.bf16.gmra.mxu1 %vm18074_vm8, %v5952_v12  ;;  %v5107_v21 = vmax.f32 %v5071_v29, 0.0  ;;  %v5074_v14 = vadd.f32 %v15292_v63, %v5031_v59  ;;  %v5072_v23 = vadd.f32 %v15292_v63, %v5029_v4  ;;  %vm18075_vm2 = vmmov %vm18065_vm0 }
 0x2bc   : > { %vm15327_vm14 = vcmp.lt.s32.totalorder %v18070_v18, 16  ;;  %v5955_v32 = vor.u32 %v5953_v11, %v5951_v16  ;;  %v5598_v41 = vsel %vm17864_vm1, %v5589_v38, %v5597_v19  ;;  %v5631_v13 = vshrl.u32 %v10299_v20, 16  ;;  %v18085_v38 = vld [vmem:[#allocation22_spill] sm:$0xff]  ;;  %vm18098_vm7 = vmmov %vm18065_vm0 }
 0x2bd   : > { %v5634_v3 = vshll.u32 %v10299_v20, 16  ;;  %v5957_v25 = vshll.u32 %v15123_v42, 16  ;;  %5755 = vst.msk [vmem:[#allocation3 + $0x70] sm:$0xf] %vm18075_vm2, %v5598_v41  ;;  %v5215_v48 = vsel %vm15262_vm5, %v5107_v21, 0.0  ;;  %v5110_v7 = vmax.f32 %v5074_v14, 0.0  ;;  %vm18076_vm5 = vmmov %vm18069_vm10 }
 0x2be   : > { %v5108_v31 = vmax.f32 %v5072_v23, 0.0  ;;  %v5961_v6 = vshrl.u32 %v15123_v42, 16  ;;  %v5633_v56 = vrot.slane %v5631_v13, 6  ;;  %v10297_v39 = vpack.c.bf16 %v5215_v48, %v5215_v48  ;;  %vm18091_vm12 = vmmov %vm18076_vm5 }
 0x2bf   : > { %v5636_v36 = vrot.slane %v5634_v3, 7  ;;  %v5959_v33 = vrot.slane %v5957_v25, 1  ;;  %v5218_v19 = vsel %vm15272_vm4, %v5110_v7, 0.0  ;;  %v5034_v51 = vadd.f32 %v10987_v9, %v14700_v34  ;;  %v10988_v34 = vpop.f32.mrf.mxu0  ;;  %vm18099_vm9 = vmmov %vm18065_vm0 }
 0x2c0   : > { %v5216_v26 = vsel %vm15281_vm15, %v5108_v31, 0.0  ;;  %v5965_v40 = vshll.u32 %v15128_v30, 16  ;;  %v5611_v44 = vshrl.u32 %v10297_v39, 16  ;;  %v5614_v15 = vshll.u32 %v10297_v39, 16  ;;  %vm18082_vm15 = vmmov %vm18064_vm3 }
 0x2c1   : > { %v5637_v2 = vor.u32 %v5636_v36, %v5633_v56  ;;  %v10300_v61 = vpack.c.bf16 %v5218_v19, %v5218_v19  ;;  %v10298_v49 = vpack.c.bf16 %v5216_v26, %v5216_v26  ;;  %v5960_v37 = vsel %vm18076_vm5, %v5955_v32, %v5959_v33  ;;  %v18089_v32 = vld [vmem:[#allocation35_spill] sm:$0xff]  ;;  %v4988_v31 = vpop.f32.mrf.mxu0  ;;  %vm18100_vm8 = vmmov %vm18076_vm5 }
 0x2c2   : > { %v5963_v55 = vor.u32 %v5961_v6, %v5959_v33  ;;  %v5077_v50 = vadd.f32 %v15292_v63, %v5034_v51  ;;  %v18079_v45 = vsel %vm14688_vm11, %v18077_v62, %v18078_v47  ;;  %v5613_v54 = vrot.slane %v5611_v44, 6  ;;  %11003 = vmatprep.mubr.msk.bf16.mxu1 %vm18082_vm15, %v5960_v37  ;;  %v15369_v18 = vld [vmem:[#allocation3 + $0x68] sm:$0xff]   ;;  %vm18101_vm2 = vmmov %vm18064_vm3 }
 0x2c3   : > { %vm15355_vm4 = vcmp.lt.s32.totalorder %v18079_v45, 16  ;;  %v5639_v29 = vrot.slane %v5637_v2, 4  ;;  %v5616_v1 = vrot.slane %v5614_v15, 7  ;;  %v5641_v59 = vshrl.u32 %v10300_v61, 16  ;;  %vm18103_vm15 = vmmov %vm18101_vm2 }
 0x2c4   : > { %v5644_v24 = vshll.u32 %v10300_v61, 16  ;;  %v5621_v4 = vshrl.u32 %v10298_v49, 16  ;;  %v5624_v11 = vshll.u32 %v10298_v49, 16  ;;  %v5113_v9 = vmax.f32 %v5077_v50, 0.0  ;;  %v15372_v13 = vld [vmem:[#allocation3 + $0x70] sm:$0xff]  }
 0x2c5   : > { %v18086_v20 = vsel %vm14704_vm13, %v18084_v10, %v18085_v38  ;;  %v5617_v21 = vor.u32 %v5616_v1, %v5613_v54  ;;  %v5643_v14 = vrot.slane %v5641_v59, 6  ;;  %v5967_v23 = vrot.slane %v5965_v40, 1  ;;  %vm18090_vm13 = vmmov %vm18064_vm3  ;;  %v18096_v40 = vld [vmem:[#allocation53_spill] sm:$0xff] }
 0x2c6   : > { %vm15365_vm11 = vcmp.lt.s32.totalorder %v18086_v20, 16  ;;  %v5032_v41 = vadd.f32 %v4985_v52, %v18089_v32  ;;  %v5646_v3 = vrot.slane %v5644_v24, 7  ;;  %v5623_v25 = vrot.slane %v5621_v4, 6  ;;  %11054 = vmatmul.mubr.msk.bf16.gmra.mxu0 %vm18090_vm13, %v15369_v18  ;;  %vm18105_vm13 = vmmov %vm18101_vm2 }
 0x2c7   : > { %v5626_v48 = vrot.slane %v5624_v11, 7  ;;  %v5221_v7 = vsel %vm15327_vm14, %v5113_v9, 0.0  ;;  %v5618_v6 = vsel %vm17864_vm1, %v5609_v8, %v5617_v21  ;;  %v5619_v56 = vrot.slane %v5617_v21, 4  ;;  %11057 = vmatprep.mubr.msk.bf16.mxu0 %vm18064_vm3, %v15372_v13  ;;  %vm18097_vm14 = vmmov %vm18065_vm0 }
 0x2c8   : > { %v10303_v36 = vpack.c.bf16 %v5221_v7, %v5221_v7  ;;  %v5968_v52 = vsel %vm18091_vm12, %v5963_v55, %v5967_v23  ;;  %5757 = vst.msk [vmem:[#allocation3 + $0x78] sm:$0xf] %vm18065_vm0, %v5618_v6  ;;  %v15386_v22 = vor.u32 %v5646_v3, %v5643_v14  ;;  %v5075_v33 = vadd.f32 %v15292_v63, %v5032_v41  ;;  %vm18106_vm12 = vmmov %vm18065_vm0 }
 0x2c9   : > { %v5627_v39 = vor.u32 %v5626_v48, %v5623_v25  ;;  %11004 = vmatmul.mubr.msk.bf16.gmra.mxu1 %vm18092_vm6, %v5968_v52  ;;  %v5035_v19 = vadd.f32 %v10988_v34, %v18093_v17  ;;  %vm15396_vm10 = vcmp.lt.s32.totalorder %v1549_v27, 16  ;;  %v5033_v44 = vadd.f32 %v4988_v31, %v18096_v40  ;;  %vm18107_vm3 = vmmov %vm18101_vm2 }
 0x2ca   : > { %v5671_v26 = vshrl.u32 %v10303_v36, 16  ;;  %v5674_v8 = vshll.u32 %v10303_v36, 16  ;;  %v5648_v15 = vsel %vm17864_vm1, %v5639_v29, %v15386_v22  ;;  %v5969_v37 = vshrl.u32 %v15128_v30, 16  ;;  %vm18108_vm6 = vmmov %vm18076_vm5 }
 0x2cb   : > { %v5628_v61 = vsel %vm17864_vm1, %v5619_v56, %v5627_v39  ;;  %v5629_v49 = vrot.slane %v5627_v39, 4  ;;  %5760 = vst.msk [vmem:[#allocation3 + $0x84] sm:$0xf] %vm18097_vm14, %v5648_v15  ;;  %v5111_v57 = vmax.f32 %v5075_v33, 0.0  ;;  %v5078_v27 = vadd.f32 %v15292_v63, %v5035_v19  ;;  %v6499_v33 = vld [vmem:[#allocation3] sm:$0xe]  ;;  %vm18111_vm14 = vmmov %vm18065_vm0 }
 0x2cc   : > { %5758 = vst.msk [vmem:[#allocation3 + $0x7c] sm:$0xf] %vm18098_vm7, %v5628_v61  ;;  %v5673_v43 = vrot.slane %v5671_v26, 6  ;;  %v5676_v5 = vrot.slane %v5674_v8, 7  ;;  %v5649_v55 = vrot.slane %v15386_v22, 4  ;;  %v5076_v62 = vadd.f32 %v15292_v63, %v5033_v44  ;;  %vm18112_vm7 = vmmov %vm18065_vm0 }
 0x2cd   : > { %v5638_v50 = vsel %vm17864_vm1, %v5629_v49, %v5637_v2  ;;  %v5973_v47 = vshll.u32 %v15211_v28, 16  ;;  %v5219_v34 = vsel %vm15355_vm4, %v5111_v57, 0.0  ;;  %v5114_v29 = vmax.f32 %v5078_v27, 0.0  ;;  %vm18102_vm4 = vmmov %vm18101_vm2  ;;  %v5765_v49 = vld [vmem:[#allocation3 + $0x98] sm:$0x3] }
 0x2ce   : > { %5759 = vst.msk [vmem:[#allocation3 + $0x80] sm:$0xf] %vm18099_vm9, %v5638_v50  ;;  %v15416_v45 = vor.u32 %v5676_v5, %v5673_v43  ;;  %v5971_v54 = vor.u32 %v5969_v37, %v5967_v23  ;;  %v10301_v1 = vpack.c.bf16 %v5219_v34, %v5219_v34  ;;  %v5112_v59 = vmax.f32 %v5076_v62, 0.0  ;;  %vm18113_vm9 = vmmov %vm18101_vm2 }
 0x2cf   : > { %v5975_v24 = vrot.slane %v5973_v47, 1  ;;  %v5981_v4 = vshll.u32 %v15225_v35, 16  ;;  %v5222_v2 = vsel %vm15365_vm11, %v5114_v29, 0.0  ;;  %v5977_v63 = vshrl.u32 %v15211_v28, 16  ;;  %vm18104_vm11 = vmmov %vm18076_vm5  ;;  %v15456_v29 = vld [vmem:[#allocation3 + $0xc] sm:$0xf] }
 0x2d0   : > { %v5985_v11 = vshrl.u32 %v15225_v35, 16  ;;  %v5989_v9 = vshll.u32 %v15285_v60, 16  ;;  %v5651_v0 = vshrl.u32 %v10301_v1, 16  ;;  %v5654_v10 = vshll.u32 %v10301_v1, 16  ;;  %v11553_v1 = vld [vmem:[#allocation3 + $0x4] sm:$0xf] }
 0x2d1   : > { %v10304_v16 = vpack.c.bf16 %v5222_v2, %v5222_v2  ;;  %v5220_v38 = vsel %vm15396_vm10, %v5112_v59, 0.0  ;;  %v5976_v21 = vsel %vm18100_vm8, %v5971_v54, %v5975_v24  ;;  %v5979_v14 = vor.u32 %v5977_v63, %v5975_v24  ;;  %v15458_v54 = vld [vmem:[#allocation3 + $0x10] sm:$0xff]   ;;  %vm18114_vm8 = vmmov %vm18076_vm5 }
 0x2d2   : > { %v10302_v20 = vpack.c.bf16 %v5220_v38, %v5220_v38  ;;  %v5983_v23 = vrot.slane %v5981_v4, 1  ;;  %v5653_v32 = vrot.slane %v5651_v0, 6  ;;  %v5656_v12 = vrot.slane %v5654_v10, 7  ;;  %11007 = vmatprep.mubr.msk.bf16.mxu1 %vm18101_vm2, %v5976_v21  ;;  %v18109_v24 = vld [vmem:[#allocation6_spill] sm:$0xff]  ;;  %v6812_v38 = vld [vmem:[#allocation3 + $0x8] sm:$0xe] }
 0x2d3   : > { %v5681_v41 = vshrl.u32 %v10304_v16, 16  ;;  %v5684_v3 = vshll.u32 %v10304_v16, 16  ;;  %v15431_v6 = vld [vmem:[#allocation3 + $0x78] sm:$0xff]   ;;  %v5991_v22 = vrot.slane %v5989_v9, 1  ;;  %v5993_v26 = vshrl.u32 %v15285_v60, 16 }
 0x2d4   : > { %v5661_v25 = vshrl.u32 %v10302_v20, 16  ;;  %v5664_v48 = vshll.u32 %v10302_v20, 16  ;;  %v5984_v7 = vsel %vm18076_vm5, %v5979_v14, %v5983_v23  ;;  %v5987_v31 = vor.u32 %v5985_v11, %v5983_v23  ;;  %11058 = vmatmul.mubr.msk.bf16.gmra.mxu0 %vm18103_vm15, %v15431_v6 }
 0x2d5   : > { %v5657_v56 = vor.u32 %v5656_v12, %v5653_v32  ;;  %v5683_v36 = vrot.slane %v5681_v41, 6  ;;  %v5686_v52 = vrot.slane %v5684_v3, 7  ;;  %11008 = vmatmul.mubr.msk.bf16.gmra.mxu1 %vm18102_vm4, %v5984_v7  ;;  %v15434_v39 = vld [vmem:[#allocation3 + $0x80] sm:$0xff]   ;;  %v5997_v8 = vshll.u32 %v15296_v58, 16  ;;  %vm18118_vm4 = vmmov %vm18108_vm6 }
 0x2d6   : > { %v5663_v17 = vrot.slane %v5661_v25, 6  ;;  %v5666_v19 = vrot.slane %v5664_v48, 7  ;;  %v5679_v51 = vrot.slane %v15416_v45, 4  ;;  %v5992_v15 = vsel %vm18104_vm11, %v5987_v31, %v5991_v22  ;;  %11061 = vmatprep.mubr.msk.bf16.mxu0 %vm18105_vm13, %v15434_v39  ;;  %v15482_v3 = vld [vmem:[#allocation3 + $0x20] sm:$0xff]   ;;  %vm18119_vm15 = vmmov %vm18118_vm4 }
 0x2d7   : > { %v5658_v40 = vsel %vm17864_vm1, %v5649_v55, %v5657_v56  ;;  %v5687_v44 = vor.u32 %v5686_v52, %v5683_v36  ;;  %v5659_v61 = vrot.slane %v5657_v56, 4  ;;  %v5995_v43 = vor.u32 %v5993_v26, %v5991_v22  ;;  %11011 = vmatprep.mubr.msk.bf16.mxu1 %vm18107_vm3, %v5992_v15  ;;  %v15487_v25 = vld [vmem:[%s17128_s2 + $0xa] sm:$0x3]  ;;  %v11554_v7 = vld [vmem:[%s17128_s2 + $0x6] sm:$0x3]  ;;  %v11555_v56 = vld [vmem:[#allocation3 + $0x10] sm:$0xff]  }
 0x2d8   : > { %5761 = vst.msk [vmem:[#allocation3 + $0x88] sm:$0xf] %vm18106_vm12, %v5658_v40  ;;  %v5667_v37 = vor.u32 %v5666_v19, %v5663_v17  ;;  %v5999_v5 = vrot.slane %v5997_v8, 1  ;;  %v6001_v55 = vshrl.u32 %v15296_v58, 16  ;;  %v6005_v50 = vshll.u32 %v15369_v18, 16  ;;  %v15494_v22 = vld [vmem:[#allocation3 + $0x28] sm:$0xff]  }
 0x2d9   : > { %v5688_v57 = vsel %vm17864_vm1, %v5679_v51, %v5687_v44  ;;  %v5689_v27 = vrot.slane %v5687_v44, 4  ;;  %v9985_v59 = vcombine.low %v6499_v33, %v11553_v1  ;;  %vm18110_vm10 = vnez %v18109_v24  ;;  %v15496_v33 = vld [vmem:[#allocation3 + $0x30] sm:$0xff]   ;;  %v11556_v44 = vld [vmem:[#allocation3 + $0x8] sm:$0xff]  }
 0x2da   : > { %5764 = vst.msk [vmem:[#allocation3 + $0x94] sm:$0xf] %vm18065_vm0, %v5688_v57  ;;  %v5668_v62 = vsel %vm17864_vm1, %v5659_v61, %v5667_v37  ;;  %v5669_v47 = vrot.slane %v5667_v37, 4  ;;  %v6000_v34 = vsel %vm18108_vm6, %v5995_v43, %v5999_v5  ;;  %v6003_v2 = vor.u32 %v6001_v55, %v5999_v5  ;;  %v15508_v5 = vld [vmem:[#allocation3 + $0x38] sm:$0xff]   ;;  %v15510_v57 = vld [vmem:[#allocation3 + $0x40] sm:$0xff]   ;;  %vm18124_vm0 = vmmov %vm18118_vm4 }
 0x2db   : > { %v5766_v4 = vsel %vm18110_vm10, %v5689_v27, %v5765_v49  ;;  %5762 = vst.msk [vmem:[#allocation3 + $0x8c] sm:$0xf] %vm18111_vm14, %v5668_v62  ;;  %v6007_v63 = vrot.slane %v6005_v50, 1  ;;  %v6013_v11 = vshll.u32 %v15372_v13, 16  ;;  %v6009_v0 = vshrl.u32 %v15369_v18, 16  ;;  %v11557_v50 = vld [vmem:[#allocation3 + $0x18] sm:$0xff]  }
 0x2dc   : > { %5767 = vst [vmem:[#allocation3 + $0x98] sm:$0x3] %v5766_v4  ;;  %v5678_v9 = vsel %vm17864_vm1, %v5669_v47, %v15416_v45  ;;  %v6017_v10 = vshrl.u32 %v15372_v13, 16  ;;  %v6021_v16 = vshll.u32 %v15431_v6, 16  ;;  %v6029_v14 = vshll.u32 %v15434_v39, 16  ;;  %vm18115_vm1 = vmmov %vm18101_vm2 }
 0x2dd   : > { %5763 = vst.msk [vmem:[#allocation3 + $0x90] sm:$0xf] %vm18112_vm7, %v5678_v9  ;;  %11012 = vmatmul.mubr.msk.bf16.gmra.mxu1 %vm18113_vm9, %v6000_v34  ;;  %v6008_v20 = vsel %vm18114_vm8, %v6003_v2, %v6007_v63  ;;  %v6015_v21 = vrot.slane %v6013_v11, 1  ;;  %v15475_v23 = vcombine.low %v6812_v38, %v15456_v29  ;;  %v6011_v45 = vor.u32 %v6009_v0, %v6007_v63  ;;  %vm18121_vm13 = vmmov %vm18115_vm1  ;;  %v11558_v2 = vld [vmem:[#allocation3 + $0x20] sm:$0xff]   ;;  %v11559_v11 = vld [vmem:[#allocation3 + $0x28] sm:$0xff]  }
 0x2de   : > { %11015 = vmatprep.mubr.msk.bf16.mxu1 %vm18115_vm1, %v6008_v20  ;;  %v6023_v32 = vrot.slane %v6021_v16, 1  ;;  %v6025_v12 = vshrl.u32 %v15431_v6, 16  ;;  %v6945_v41 = vrot.slane %v15458_v54, 1  ;;  %vm18116_vm2 = vcmask 1041408   ;;  %vm18123_vm3 = vmmov %vm18115_vm1  ;;  %v15536_v20 = vld [vmem:[#allocation3 + $0x48] sm:$0xff]  }
 0x2df   : > { %v6944_v48 = vrot.slane %v15475_v23, 1  ;;  %v7036_v31 = vsel %vm18116_vm2, %v11554_v7, 0  ;;  %v6508_v36 = vrot.slane %v11555_v56, 1  ;;  %v6505_v52 = vrot.slane %v9985_v59, 1  ;;  %vm18117_vm5 = vmmov %vm18116_vm2  ;;  %v15547_v56 = vld [vmem:[#allocation3 + $0x50] sm:$0xff]  }
 0x2e0   : > { %11104 = vmatpush3.bf16.msra.mxu0 %v7036_v31  ;;  %v6019_v17 = vor.u32 %v6017_v10, %v6015_v21  ;;  %v6027_v19 = vor.u32 %v6025_v12, %v6023_v32  ;;  %v6031_v26 = vrot.slane %v6029_v14, 1  ;;  %v6033_v8 = vshrl.u32 %v15434_v39, 16  ;;  %vm18122_vm12 = vmmov %vm18116_vm2 }
 0x2e1   : > { %11345 = vmatprep.subr.msk.bf16.mxu0 %vm18117_vm5, %v15487_v25  ;;  %v6016_v51 = vsel %vm18118_vm4, %v6011_v45, %v6015_v21  ;;  %v6506_v15 = vrot.slane %v11556_v44, 1  ;;  %vm18120_vm11 = vcmask 1046528   ;;  %v6947_v37 = vrot.slane %v15477_v53, 1  ;;  %vm18125_vm6 = vmmov %vm18115_vm1 }
 0x2e2   : > { %v15502_v40 = vld [vmem:[#allocation3 + $0x88] sm:$0xff]   ;;  %v6024_v61 = vsel %vm18119_vm15, %v6019_v17, %v6023_v32  ;;  %v6946_v49 = vsel %vm18120_vm11, %v6944_v48, %v6945_v41  ;;  %v6949_v43 = vrot.slane %v15482_v3, 1  ;;  %v15517_v55 = vsel %vm18122_vm12, %v15111_v46, 0  ;;  %vm18126_vm10 = vmmov %vm18115_vm1  ;;  %v11560_v32 = vld [vmem:[#allocation3 + $0x30] sm:$0xff]  }
 0x2e3   : > { %11062 = vmatmul.mubr.msk.bf16.gmra.mxu0 %vm18121_vm13, %v15502_v40  ;;  %v6037_v27 = vshll.u32 %v15502_v40, 16  ;;  %v6510_v62 = vrot.slane %v11557_v50, 1  ;;  %v6951_v47 = vrot.slane %v15494_v22, 1  ;;  %v6032_v34 = vsel %vm18124_vm0, %v6027_v19, %v6031_v26  ;;  %vm18127_vm14 = vmmov %vm18120_vm11 }
 0x2e4   : > { %11105 = vmatprep.mubr.msk.bf16.mxu0 %vm18125_vm6, %v6946_v49  ;;  %v6035_v1 = vor.u32 %v6033_v8, %v6031_v26  ;;  %v15523_v59 = vld [vmem:[#allocation3 + $0x90] ss:$0 sps:$4 sm:$0x11]   ;;  %v6953_v24 = vrot.slane %v15496_v33, 1  ;;  %v15528_v46 = vsel %vm18127_vm14, %v6505_v52, %v6506_v15  ;;  %v6512_v63 = vrot.slane %v11558_v2, 1  ;;  %vm18128_vm7 = vmmov %vm18120_vm11  ;;  %v15556_v8 = vld [vmem:[#allocation3 + $0x58] sm:$0xff]  }
 0x2e5   : > { %11016 = vmatmul.mubr.msk.bf16.gmra.mxu1 %vm18123_vm3, %v6016_v51  ;;  %v6039_v4 = vrot.slane %v6037_v27, 1  ;;  %v6514_v9 = vrot.slane %v11559_v11, 1  ;;  %v6045_v0 = vshll.u32 %v15523_v59, 16  ;;  %v6948_v10 = vsel %vm18128_vm7, %v6945_v41, %v6947_v37  ;;  %vm18129_vm9 = vmmov %vm18128_vm7  ;;  %v15574_v27 = vld [vmem:[#allocation3 + $0x68] sm:$0xff]   ;;  %v15598_v2 = vld [vmem:[#allocation3 + $0x70] sm:$0xff]  }
 0x2e6   : > { %11019 = vmatprep.mubr.msk.bf16.mxu1 %vm18126_vm10, %v6024_v61  ;;  %v6950_v16 = vsel %vm18129_vm9, %v6947_v37, %v6949_v43  ;;  %vm18130_vm8 = vmmov %vm18128_vm7  ;;  %v6041_v21 = vshrl.u32 %v15502_v40, 16  ;;  %v6955_v14 = vrot.slane %v15508_v5, 1  ;;  %v6957_v45 = vrot.slane %v15510_v57, 1 }
 0x2e7   : > { %v15534_v38 = vsel %vm18130_vm8, %v6506_v15, %v6508_v36  ;;  %v6516_v12 = vrot.slane %v11560_v32, 1  ;;  %vm18131_vm1 = vmmov %vm18128_vm7  ;;  %v6518_v31 = vrot.slane %v15123_v42, 1  ;;  %v6959_v51 = vrot.slane %v15536_v20, 1  ;;  %v15560_v15 = vld [vmem:[#allocation3 + $0x60] sm:$0xff]   ;;  %v7697_v32 = vld [vmem:[#allocation3 + $0x8] sm:$0xc] }
 0x2e8   : > { %v15542_v48 = vsel %vm18131_vm1, %v6508_v36, %v6510_v62  ;;  %vm18132_vm2 = vmmov %vm18131_vm1  ;;  %v6043_v17 = vor.u32 %v6041_v21, %v6039_v4  ;;  %v6047_v36 = vrot.slane %v6045_v0, 1  ;;  %v6522_v44 = vrot.slane %v15211_v28, 1 }
 0x2e9   : > { %v6952_v41 = vsel %vm18132_vm2, %v6949_v43, %v6951_v47  ;;  %vm18133_vm5 = vmmov %vm18131_vm1  ;;  %v6524_v42 = vrot.slane %v15225_v35, 1  ;;  %v6526_v43 = vrot.slane %v15285_v60, 1  ;;  %v6961_v35 = vrot.slane %v15547_v56, 1 }
 0x2ea   : > { %v6954_v7 = vsel %vm18133_vm5, %v6951_v47, %v6953_v24  ;;  %vm18134_vm4 = vmmov %vm18124_vm0  ;;  %v6520_v50 = vrot.slane %v15128_v30, 1  ;;  %v6963_v60 = vrot.slane %v15556_v8, 1  ;;  %v6965_v30 = vrot.slane %v15560_v15, 1 }
 0x2eb   : > { %v6040_v52 = vsel %vm18134_vm4, %v6035_v1, %v6039_v4  ;;  %vm18135_vm15 = vmmov %vm18131_vm1  ;;  %v6530_v1 = vrot.slane %v15369_v18, 1  ;;  %v6967_v11 = vrot.slane %v15574_v27, 1  ;;  %v6534_v18 = vrot.slane %v15431_v6, 1 }
 0x2ec   : > { %v15551_v19 = vsel %vm18135_vm15, %v6510_v62, %v6512_v63  ;;  %vm18136_vm11 = vmmov %vm18131_vm1  ;;  %v6536_v6 = vrot.slane %v15434_v39, 1 }
 0x2ed   : > { %v15554_v26 = vsel %vm18136_vm11, %v6512_v63, %v6514_v9  ;;  %vm18137_vm13 = vmmov %vm18123_vm3  ;;  %11020 = vmatmul.mubr.msk.bf16.gmra.mxu1 %vm18125_vm6, %v6032_v34  ;;  %v6528_v34 = vrot.slane %v15296_v58, 1  ;;  %v6532_v63 = vrot.slane %v15372_v13, 1 }
 0x2ee   : > { %11106 = vmatmul.mubr.msk.bf16.vlgmr.msra.gmra.mxu0 %vm18137_vm13, %v6948_v10  ;;  %vm18138_vm12 = vmmov %vm18131_vm1 }
 0x2ef   : > { %v15565_v61 = vsel %vm18138_vm12, %v6953_v24, %v6955_v14  ;;  %vm18139_vm3 = vmmov %vm18131_vm1 }
 0x2f0   : > { %v15568_v49 = vsel %vm18139_vm3, %v6955_v14, %v6957_v45  ;;  %vm18140_vm0 = vmmov %vm18131_vm1 }
 0x2f1   : > { %v15571_v37 = vsel %vm18140_vm0, %v6514_v9, %v6516_v12  ;;  %vm18141_vm10 = vmmov %vm18125_vm6  ;;  %v15625_v14 = vsel %vm18140_vm0, %v6532_v63, %v6534_v18 }
 0x2f2   : > { %11109 = vmatprep.mubr.msk.bf16.mxu0 %vm18141_vm10, %v6950_v16  ;;  %vm18142_vm14 = vmmov %vm18140_vm0 }
 0x2f3   : > { %v15579_v28 = vsel %vm18142_vm14, %v6516_v12, %v6518_v31  ;;  %vm18143_vm7 = vmmov %vm18140_vm0 }
 0x2f4   : > { %v15584_v62 = vsel %vm18143_vm7, %v6522_v44, %v6524_v42  ;;  %vm18144_vm9 = vmmov %vm18125_vm6 }
 0x2f5   : > { %11023 = vmatprep.mubr.msk.bf16.mxu1 %vm18144_vm9, %v6040_v52  ;;  %vm18145_vm8 = vmmov %vm18140_vm0  ;;  %v10063_v52 = vcombine.low %v7697_v32, %v15456_v29  ;;  %v7287_v32 = vshll.u32 %v15482_v3, 16 }
 0x2f6   : > { %v15589_v47 = vsel %vm18145_vm8, %v6524_v42, %v6526_v43  ;;  %vm18146_vm1 = vmmov %vm18134_vm4  ;;  %vm18160_vm8 = vcmask 1041408   ;;  %v7261_v42 = vshll.u32 %v15475_v23, 16 }
 0x2f7   : > { %v6048_v24 = vsel %vm18146_vm1, %v6043_v17, %v6047_v36  ;;  %vm18147_vm2 = vmmov %vm18140_vm0  ;;  %v7704_v17 = vrot.slane %v15458_v54, 2  ;;  %v7703_v29 = vrot.slane %v10063_v52, 2  ;;  %v7710_v52 = vrot.slane %v15494_v22, 2 }
 0x2f8   : > { %v15595_v4 = vsel %vm18147_vm2, %v6957_v45, %v6959_v51  ;;  %vm18148_vm5 = vmmov %vm18140_vm0  ;;  %v6538_v45 = vrot.slane %v15502_v40, 1  ;;  %v7795_v40 = vsel %vm18160_vm8, %v15487_v25, 0  ;;  %v7706_v25 = vrot.slane %v15477_v53, 2 }
 0x2f9   : > { %v15603_v9 = vsel %vm18148_vm5, %v6526_v43, %v6528_v34  ;;  %vm18149_vm4 = vmmov %vm18140_vm0  ;;  %11180 = vmatpush3.bf16.msra.mxu0 %v7795_v40  ;;  %v7266_v43 = vshrl.u32 %v15458_v54, 16 }
 0x2fa   : > { %v15606_v58 = vsel %vm18149_vm4, %v6528_v34, %v6530_v1  ;;  %vm18150_vm15 = vmmov %vm18140_vm0  ;;  %vm18164_vm4 = vcmask 1045504  }
 0x2fb   : > { %v15610_v0 = vsel %vm18150_vm15, %v6959_v51, %v6961_v35  ;;  %vm18151_vm11 = vmmov %vm18140_vm0  ;;  %v7268_v34 = vrot.slane %v7266_v43, 1 }
 0x2fc   : > { %v15613_v10 = vsel %vm18151_vm11, %v6518_v31, %v6520_v50  ;;  %vm18152_vm13 = vmmov %vm18140_vm0  ;;  %v17274_v31 = vrot.slane %v15598_v2, 1 }
 0x2fd   : > { %v15616_v16 = vsel %vm18152_vm13, %v6520_v50, %v6522_v44  ;;  %vm18153_vm12 = vmmov %vm18140_vm0  ;;  %v6540_v44 = vrot.slane %v15523_v59, 1  ;;  %v7708_v50 = vrot.slane %v15482_v3, 2 }
 0x2fe   : > { %v15619_v13 = vsel %vm18153_vm12, %v6530_v1, %v6532_v63  ;;  %vm18154_vm3 = vmmov %vm18140_vm0  ;;  %v7275_v63 = vshrl.u32 %v15477_v53, 16 }
 0x2ff   : > { %v15622_v21 = vsel %vm18154_vm3, %v6961_v35, %v6963_v60  ;;  %vm18155_vm6 = vmmov %vm18140_vm0  ;;  %v7269_v35 = vshll.u32 %v15458_v54, 16 }
 0x300   : > { %v15630_v12 = vsel %vm18155_vm6, %v6963_v60, %v6965_v30  ;;  %vm18156_vm10 = vmmov %vm18144_vm9 }
 0x301   : > { %11110 = vmatmul.mubr.msk.bf16.gmra.mxu0 %vm18156_vm10, %v6952_v41  ;;  %vm18157_vm14 = vmmov %vm18140_vm0  ;;  %v7258_v41 = vshrl.u32 %v15475_v23, 16  ;;  %v7263_v23 = vrot.slane %v7261_v42, 2  ;;  %v7271_v1 = vrot.slane %v7269_v35, 2 }
 0x302   : > { %v15637_v36 = vsel %vm18157_vm14, %v6965_v30, %v6967_v11  ;;  %vm18158_vm7 = vmmov %vm18140_vm0 }
 0x303   : > { %v15640_v51 = vsel %vm18158_vm7, %v6534_v18, %v6536_v6  ;;  %vm18159_vm9 = vmmov %vm18140_vm0  ;;  %v7260_v60 = vrot.slane %v7258_v41, 1  ;;  %v7278_v18 = vshll.u32 %v15477_v53, 16  ;;  %v15690_v53 = vld [vmem:[%s17128_s2 + $0xc] sm:$0x3]  ;;  %v7289_v41 = vrot.slane %v7287_v32, 2 }
 0x304   : > { %v15643_v39 = vsel %vm18159_vm9, %v6536_v6, %v6538_v45  ;;  %vm18161_vm1 = vmmov %vm18156_vm10  ;;  %v7272_v6 = vor.u32 %v7271_v1, %v7268_v34  ;;  %v7311_v34 = vshrl.u32 %v15508_v5, 16  ;;  %v7314_v32 = vshll.u32 %v15508_v5, 16 }
 0x305   : > { %11024 = vmatmul.mubr.msk.bf16.gmra.mxu1 %vm18161_vm1, %v6048_v24  ;;  %vm18162_vm2 = vmmov %vm18161_vm1  ;;  %v7264_v30 = vor.u32 %v7263_v23, %v7260_v60  ;;  %v7280_v40 = vrot.slane %v7278_v18, 2  ;;  %v7302_v60 = vshrl.u32 %v15496_v33, 16  ;;  %v7714_v23 = vrot.slane %v15508_v5, 2 }
 0x306   : > { %11113 = vmatprep.mubr.msk.bf16.mxu0 %vm18162_vm2, %v6954_v7  ;;  %vm18163_vm5 = vmmov %vm18161_vm1  ;;  %v15659_v7 = vsel %vm18164_vm4, %v7703_v29, %v7704_v17  ;;  %v7712_v29 = vrot.slane %v15496_v33, 2 }
 0x307   : > { %11067 = vmatprep.mubr.msk.bf16.mxu1 %vm18163_vm5, %v15528_v46  ;;  %vm18165_vm15 = vmmov %vm18140_vm0  ;;  %v7304_v1 = vrot.slane %v7302_v60, 1 }
 0x308   : > { %v15662_v59 = vsel %vm18165_vm15, %v6538_v45, %v6540_v44  ;;  %vm18166_vm11 = vmmov %vm18164_vm4  ;;  %v7284_v45 = vshrl.u32 %v15482_v3, 16  ;;  %v7293_v44 = vshrl.u32 %v15494_v22, 16 }
 0x309   : > { %v15665_v46 = vsel %vm18166_vm11, %v7704_v17, %v7706_v25  ;;  %vm18167_vm13 = vmmov %vm18164_vm4  ;;  %v7277_v17 = vrot.slane %v7275_v63, 1  ;;  %v15727_v63 = vsel %vm18164_vm4, %v7712_v29, %v7714_v23 }
 0x30a   : > { %v15668_v24 = vsel %vm18167_vm13, %v7706_v25, %v7708_v50  ;;  %vm18168_vm12 = vmmov %vm18140_vm0  ;;  %vm18170_vm0 = vsmask.f32 6400  ;;  %v7286_v3 = vrot.slane %v7284_v45, 1  ;;  %v7295_v35 = vrot.slane %v7293_v44, 1 }
 0x30b   : > { %v15673_v54 = vsel %vm18168_vm12, %v6967_v11, %v17274_v31  ;;  %vm18169_vm3 = vmmov %vm18161_vm1  ;;  %v15685_v11 = vsel %vm18170_vm0, %v7264_v30, %v7272_v6  ;;  %v7296_v25 = vshll.u32 %v15494_v22, 16  ;;  %v7313_v45 = vrot.slane %v7311_v34, 1 }
 0x30c   : > { %11114 = vmatmul.mubr.msk.bf16.gmra.mxu0 %vm18169_vm3, %v15565_v61  ;;  %vm18171_vm6 = vmmov %vm18164_vm4  ;;  %v7281_v61 = vor.u32 %v7280_v40, %v7277_v17  ;;  %v7320_v17 = vshrl.u32 %v15510_v57, 16  ;;  %v7323_v40 = vshll.u32 %v15510_v57, 16  ;;  %v7718_v44 = vrot.slane %v15536_v20, 2 }
 0x30d   : > { %v15693_v42 = vsel %vm18171_vm6, %v7708_v50, %v7710_v52  ;;  %vm18172_vm10 = vmmov %vm18161_vm1  ;;  %v7290_v50 = vor.u32 %v7289_v41, %v7286_v3  ;;  %v7316_v41 = vrot.slane %v7314_v32, 2 }
 0x30e   : > { %11068 = vmatmul.mubr.msk.bf16.vlgmr.msra.gmra.mxu1 %vm18172_vm10, %v15534_v38  ;;  %vm18173_vm14 = vmmov %vm18161_vm1  ;;  %v7305_v38 = vshll.u32 %v15496_v33, 16 }
 0x30f   : > { %11117 = vmatprep.mubr.msk.bf16.mxu0 %vm18173_vm14, %v15568_v49  ;;  %vm18174_vm7 = vmmov %vm18164_vm4  ;;  %11142 = vmatpush3.bf16.msra.mxu1 %v15517_v55  ;;  %v15712_v49 = vld [vmem:[%s17128_s2 + $0xe] sm:$0x3]  ;;  %v7298_v55 = vrot.slane %v7296_v25, 2  ;;  %v7325_v25 = vrot.slane %v7323_v40, 2  ;;  %v15777_v40 = vld [vmem:[#allocation3 + $0x78] sm:$0xff]  }
 0x310   : > { %v15700_v43 = vsel %vm18174_vm7, %v7710_v52, %v7712_v29  ;;  %vm18175_vm9 = vmmov %vm18161_vm1  ;;  %11346 = vmatprep.subr.msk.bf16.mxu1 %vm18160_vm8, %v15690_v53  ;;  %v7307_v30 = vrot.slane %v7305_v38, 2  ;;  %v7720_v29 = vrot.slane %v15547_v56, 2 }
 0x311   : > { %11071 = vmatprep.mubr.msk.bf16.mxu1 %vm18175_vm9, %v15542_v48  ;;  %vm18176_vm1 = vmmov %vm18170_vm0  ;;  %v7716_v48 = vrot.slane %v15510_v57, 2  ;;  %v7299_v18 = vor.u32 %v7298_v55, %v7295_v35  ;;  %v7322_v35 = vrot.slane %v7320_v17, 1  ;;  %v7338_v55 = vshrl.u32 %v15547_v56, 16 }
 0x312   : > { %v15717_v22 = vsel %vm18176_vm1, %v7272_v6, %v7281_v61  ;;  %vm18177_vm2 = vmmov %vm18160_vm8  ;;  %v7308_v52 = vor.u32 %v7307_v30, %v7304_v1  ;;  %v7724_v1 = vrot.slane %v15560_v15, 2  ;;  %v7347_v30 = vshrl.u32 %v15556_v8, 16 }
 0x313   : > { %11347 = vmatprep.subr.msk.bf16.mxu0 %vm18177_vm2, %v15712_v49  ;;  %vm18178_vm5 = vmmov %vm18170_vm0 }
 0x314   : > { %v15724_v33 = vsel %vm18178_vm5, %v7281_v61, %v7290_v50  ;;  %vm18179_vm15 = vmmov %vm18164_vm4  ;;  %v7329_v61 = vshrl.u32 %v15536_v20, 16  ;;  %v7349_v17 = vrot.slane %v7347_v30, 1  ;;  %v15807_v30 = vld [vmem:[#allocation3 + $0x88] sm:$0xff]  }
 0x315   : > { %v15730_v6 = vsel %vm18179_vm15, %v7714_v23, %v7716_v48  ;;  %vm18180_vm11 = vmmov %vm18170_vm0  ;;  %v7326_v23 = vor.u32 %v7325_v25, %v7322_v35  ;;  %v7726_v35 = vrot.slane %v15574_v27, 2  ;;  %v15782_v25 = vld [vmem:[#allocation3 + $0x80] sm:$0xff]  }
 0x316   : > { %v15737_v3 = vsel %vm18180_vm11, %v7290_v50, %v7299_v18  ;;  %vm18181_vm13 = vmmov %vm18169_vm3  ;;  %v7317_v50 = vor.u32 %v7316_v41, %v7313_v45  ;;  %v7331_v38 = vrot.slane %v7329_v61, 1  ;;  %v7356_v41 = vshrl.u32 %v15560_v15, 16 }
 0x317   : > { %11118 = vmatmul.mubr.msk.bf16.gmra.mxu0 %vm18181_vm13, %v15595_v4  ;;  %vm18182_vm12 = vmmov %vm18170_vm0  ;;  %v7332_v4 = vshll.u32 %v15536_v20, 16  ;;  %v7359_v61 = vshll.u32 %v15560_v15, 16  ;;  %v7395_v31 = vshll.u32 %v15782_v25, 16 }
 0x318   : > { %v15744_v5 = vsel %vm18182_vm12, %v7299_v18, %v7308_v52  ;;  %vm18183_vm3 = vmmov %vm18164_vm4  ;;  %v7340_v18 = vrot.slane %v7338_v55, 1  ;;  %v7358_v55 = vrot.slane %v7356_v41, 1 }
 0x319   : > { %v15747_v57 = vsel %vm18183_vm3, %v7716_v48, %v7718_v44  ;;  %vm18184_vm0 = vmmov %vm18175_vm9  ;;  %v7341_v48 = vshll.u32 %v15547_v56, 16  ;;  %v7361_v15 = vrot.slane %v7359_v61, 2 }
 0x31a   : > { %11072 = vmatmul.mubr.msk.bf16.gmra.mxu1 %vm18184_vm0, %v15551_v19  ;;  %vm18185_vm6 = vmmov %vm18184_vm0  ;;  %v7722_v19 = vrot.slane %v15556_v8, 2 }
 0x31b   : > { %11121 = vmatprep.mubr.msk.bf16.mxu0 %vm18185_vm6, %v15610_v0  ;;  %vm18186_vm10 = vmmov %vm18183_vm3  ;;  %v7334_v0 = vrot.slane %v7332_v4, 2  ;;  %v7365_v4 = vshrl.u32 %v15574_v27, 16 }
 0x31c   : > { %v15754_v60 = vsel %vm18186_vm10, %v7718_v44, %v7720_v29  ;;  %vm18187_vm14 = vmmov %vm18184_vm0 }
 0x31d   : > { %11075 = vmatprep.mubr.msk.bf16.mxu1 %vm18187_vm14, %v15554_v26  ;;  %vm18188_vm7 = vmmov %vm18176_vm1  ;;  %v7343_v26 = vrot.slane %v7341_v48, 2  ;;  %v7335_v32 = vor.u32 %v7334_v0, %v7331_v38  ;;  %v7728_v38 = vrot.slane %v15598_v2, 2  ;;  %v7367_v0 = vrot.slane %v7365_v4, 1 }
 0x31e   : > { %v15763_v34 = vsel %vm18188_vm7, %v7308_v52, %v7317_v50  ;;  %vm18189_vm9 = vmmov %vm18176_vm1  ;;  %v7350_v52 = vshll.u32 %v15556_v8, 16 }
 0x31f   : > { %v15768_v20 = vsel %vm18189_vm9, %v7317_v50, %v7326_v23  ;;  %vm18190_vm8 = vmmov %vm18183_vm3  ;;  %v7344_v44 = vor.u32 %v7343_v26, %v7340_v18  ;;  %v7374_v18 = vshrl.u32 %v15598_v2, 16  ;;  %v7730_v26 = vrot.slane %v15777_v40, 2 }
 0x320   : > { %v15771_v45 = vsel %vm18190_vm8, %v7720_v29, %v7722_v19  ;;  %vm18191_vm1 = vmmov %vm18183_vm3  ;;  %v7352_v50 = vrot.slane %v7350_v52, 2  ;;  %v7383_v52 = vshrl.u32 %v15777_v40, 16 }
 0x321   : > { %v15774_v56 = vsel %vm18191_vm1, %v7722_v19, %v7724_v1  ;;  %vm18192_vm2 = vmmov %vm18178_vm5  ;;  %v7376_v41 = vrot.slane %v7374_v18, 1 }
 0x322   : > { %v15785_v29 = vsel %vm18192_vm2, %v7326_v23, %v7335_v32  ;;  %vm18193_vm5 = vmmov %vm18184_vm0  ;;  %v7353_v23 = vor.u32 %v7352_v50, %v7349_v17 }
 0x323   : > { %11122 = vmatmul.mubr.msk.bf16.gmra.mxu0 %vm18193_vm5, %v15622_v21  ;;  %vm18194_vm4 = vmmov %vm18192_vm2  ;;  %v7368_v21 = vshll.u32 %v15574_v27, 16  ;;  %v7732_v27 = vrot.slane %v15782_v25, 2 }
 0x324   : > { %v15792_v8 = vsel %vm18194_vm4, %v7335_v32, %v7344_v44  ;;  %vm18195_vm15 = vmmov %vm18191_vm1 }
 0x325   : > { %v15795_v48 = vsel %vm18195_vm15, %v7724_v1, %v7726_v35  ;;  %vm18196_vm11 = vmmov %vm18184_vm0  ;;  %v7362_v1 = vor.u32 %v7361_v15, %v7358_v55  ;;  %v7370_v17 = vrot.slane %v7368_v21, 2  ;;  %v7385_v55 = vrot.slane %v7383_v52, 1 }
 0x326   : > { %11076 = vmatmul.mubr.msk.bf16.gmra.mxu1 %vm18196_vm11, %v15571_v37  ;;  %vm18197_vm13 = vmmov %vm18184_vm0  ;;  %v7377_v37 = vshll.u32 %v15598_v2, 16  ;;  %v7392_v21 = vshrl.u32 %v15782_v25, 16  ;;  %v7397_v52 = vrot.slane %v7395_v31, 2 }
 0x327   : > { %11125 = vmatprep.mubr.msk.bf16.mxu0 %vm18197_vm13, %v15630_v12  ;;  %vm18198_vm12 = vmmov %vm18191_vm1  ;;  %v15812_v12 = vld [vmem:[#allocation3 + $0x90] sm:$0xff]   ;;  %v7371_v50 = vor.u32 %v7370_v17, %v7367_v0  ;;  %v7401_v0 = vshrl.u32 %v15807_v30, 16 }
 0x328   : > { %v15802_v19 = vsel %vm18198_vm12, %v7726_v35, %v7728_v38  ;;  %vm18199_vm3 = vmmov %vm18184_vm0  ;;  %v7379_v61 = vrot.slane %v7377_v37, 2  ;;  %v7394_v17 = vrot.slane %v7392_v21, 1  ;;  %v6973_v21 = vrot.slane %v15782_v25, 1 }
 0x329   : > { %11079 = vmatprep.mubr.msk.bf16.mxu1 %vm18199_vm3, %v15579_v28  ;;  %vm18200_vm0 = vmmov %vm18192_vm2  ;;  %vm18214_vm12 = vcmask 1046528  }
 0x32a   : > { %v15815_v32 = vsel %vm18200_vm0, %v7344_v44, %v7353_v23  ;;  %vm18201_vm6 = vmmov %vm18200_vm0  ;;  %v7386_v44 = vshll.u32 %v15777_v40, 16  ;;  %v7380_v15 = vor.u32 %v7379_v61, %v7376_v41  ;;  %v7398_v31 = vor.u32 %v7397_v52, %v7394_v17 }
 0x32b   : > { %v15820_v28 = vsel %vm18201_vm6, %v7353_v23, %v7362_v1  ;;  %vm18202_vm10 = vmmov %vm18191_vm1  ;;  %v7734_v23 = vrot.slane %v15807_v30, 2  ;;  %v18213_v17 = vrot.slane %v15598_v2, 1  ;;  %v6975_v2 = vrot.slane %v15807_v30, 1 }
 0x32c   : > { %v15823_v35 = vsel %vm18202_vm10, %v7728_v38, %v7730_v26  ;;  %vm18203_vm14 = vmmov %vm18191_vm1  ;;  %v7388_v37 = vrot.slane %v7386_v44, 2  ;;  %v17275_v38 = vrot.slane %v15812_v12, 2  ;;  %v6971_v44 = vrot.slane %v15777_v40, 1 }
 0x32d   : > { %v15826_v4 = vsel %vm18203_vm14, %v7730_v26, %v7732_v27  ;;  %vm18204_vm7 = vmmov %vm18200_vm0  ;;  %v15843_v41 = vsel %vm18191_vm1, %v7732_v27, %v7734_v23  ;;  %v7410_v27 = vshrl.u32 %v15812_v12, 16 }
 0x32e   : > { %v15833_v18 = vsel %vm18204_vm7, %v7362_v1, %v7371_v50  ;;  %vm18205_vm9 = vmmov %vm18199_vm3  ;;  %v7389_v1 = vor.u32 %v7388_v37, %v7385_v55  ;;  %v6972_v52 = vsel %vm18214_vm12, %v18213_v17, %v6971_v44 }
 0x32f   : > { %11126 = vmatmul.mubr.msk.bf16.gmra.mxu0 %vm18205_vm9, %v15637_v36  ;;  %vm18206_vm8 = vmmov %vm18200_vm0  ;;  %v7403_v36 = vrot.slane %v7401_v0, 1  ;;  %v7412_v37 = vrot.slane %v7410_v27, 1  ;;  %v15946_v27 = vld [vmem:[#allocation3 + $0x50] sm:$0xff]  }
 0x330   : > { %v15840_v26 = vsel %vm18206_vm8, %v7371_v50, %v7380_v15  ;;  %vm18207_vm2 = vmmov %vm18199_vm3  ;;  %v7404_v50 = vshll.u32 %v15807_v30, 16 }
 0x331   : > { %11080 = vmatmul.mubr.msk.bf16.gmra.mxu1 %vm18207_vm2, %v15613_v10  ;;  %vm18208_vm5 = vmmov %vm18207_vm2  ;;  %v7413_v10 = vshll.u32 %v15812_v12, 16 }
 0x332   : > { %11129 = vmatprep.mubr.msk.bf16.mxu0 %vm18208_vm5, %v15673_v54  ;;  %vm18209_vm4 = vmmov %vm18191_vm1  ;;  %v7406_v55 = vrot.slane %v7404_v50, 2 }
 0x333   : > { %v15852_v61 = vsel %vm18209_vm4, %v7734_v23, %v17275_v38  ;;  %vm18210_vm15 = vmmov %vm18207_vm2  ;;  %v7415_v0 = vrot.slane %v7413_v10, 2  ;;  %v15948_v10 = vld [vmem:[#allocation3 + $0x58] sm:$0xff]  }
 0x334   : > { %11083 = vmatprep.mubr.msk.bf16.mxu1 %vm18210_vm15, %v15616_v16  ;;  %vm18211_vm11 = vmmov %vm18200_vm0  ;;  %v7407_v38 = vor.u32 %v7406_v55, %v7403_v36  ;;  %v15954_v55 = vld [vmem:[#allocation3 + $0x70] sm:$0xff]  }
 0x335   : > { %v15861_v54 = vsel %vm18211_vm11, %v7380_v15, %v7389_v1  ;;  %vm18212_vm13 = vmmov %vm18200_vm0  ;;  %v15867_v16 = vor.u32 %v7415_v0, %v7412_v37 }
 0x336   : > { %v15865_v23 = vsel %vm18212_vm13, %v7389_v1, %v7398_v31  ;;  %vm18215_vm3 = vmmov %vm18200_vm0  ;;  %v6977_v1 = vrot.slane %v15812_v12, 1 }
 0x337   : > { %v15873_v40 = vsel %vm18215_vm3, %v7398_v31, %v7407_v38  ;;  %vm18216_vm0 = vmmov %vm18207_vm2 }
 0x338   : > { %11130 = vmatmul.mubr.msk.bf16.gmra.mxu0 %vm18216_vm0, %v6972_v52  ;;  %vm18217_vm6 = vmmov %vm18214_vm12  ;;  %v15960_v52 = vld [vmem:[#allocation3 + $0x78] sm:$0xff]  }
 0x339   : > { %v6974_v15 = vsel %vm18217_vm6, %v6971_v44, %v6973_v21  ;;  %vm18218_vm10 = vmmov %vm18215_vm3  ;;  %v15950_v44 = vld [vmem:[#allocation3 + $0x60] sm:$0xff]   ;;  %18242 = vst [vmem:[#allocation40_spill] sm:$0xff] %v15960_v52 }
 0x33a   : > { %v15879_v25 = vsel %vm18218_vm10, %v7407_v38, %v15867_v16  ;;  %vm18219_vm14 = vmmov %vm18216_vm0 }
 0x33b   : > { %11084 = vmatmul.mubr.msk.bf16.gmra.mxu1 %vm18219_vm14, %v15584_v62  ;;  %vm18220_vm7 = vmmov %vm18216_vm0  ;;  %v11527_v62 = vld [vmem:[#allocation3 + $0x98] ss:$0 sps:$4 sm:$0x11]  }
 0x33c   : > { %11133 = vmatprep.mubr.msk.bf16.mxu0 %vm18220_vm7, %v6974_v15  ;;  %vm18221_vm9 = vmmov %vm18216_vm0  ;;  %v15962_v15 = vld [vmem:[#allocation3 + $0x80] sm:$0xff]  }
 0x33d   : > { %11087 = vmatprep.mubr.msk.bf16.mxu1 %vm18221_vm9, %v15589_v47  ;;  %vm18222_vm8 = vmmov %vm18217_vm6  ;;  %v6979_v47 = vrot.slane %v11527_v62, 1  ;;  %18243 = vst [vmem:[#allocation38_spill] sm:$0xff] %v15962_v15  ;;  %v15969_v62 = vld [vmem:[#allocation3 + $0x88] sm:$0xff]  }
 0x33e   : > { %v6976_v36 = vsel %vm18222_vm8, %v6973_v21, %v6975_v2  ;;  %vm18223_vm1 = vmmov %vm18216_vm0 }
 0x33f   : > { %vm18224_vm2 = vmmov %vm18217_vm6  ;;  %vm18232_vm6 = vcmask 1041408  }
 0x340   : > { %11134 = vmatmul.mubr.msk.bf16.gmra.mxu0 %vm18223_vm1, %v6976_v36  ;;  %v6978_v50 = vsel %vm18224_vm2, %v6975_v2, %v6977_v1  ;;  %vm18225_vm5 = vmmov %vm18216_vm0 }
 0x341   : > { %vm18226_vm4 = vmmov %vm18216_vm0 }
 0x342   : > { %11137 = vmatprep.mubr.msk.bf16.mxu0 %vm18226_vm4, %v6978_v50  ;;  %vm18227_vm15 = vmmov %vm18216_vm0 }
 0x343   : > { %11088 = vmatmul.mubr.msk.bf16.gmra.mxu1 %vm18225_vm5, %v15603_v9  ;;  %vm18228_vm11 = vmmov %vm18224_vm2  ;;  %v8680_v9 = vsel %vm18232_vm6, %v15712_v49, 0  ;;  %v15938_v49 = vld [vmem:[#allocation3 + $0x40] sm:$0xff]  }
 0x344   : > { %11091 = vmatprep.mubr.msk.bf16.mxu1 %vm18227_vm15, %v15606_v58  ;;  %v6980_v30 = vsel %vm18228_vm11, %v6977_v1, %v6979_v47  ;;  %vm18229_vm13 = vmmov %vm18216_vm0  ;;  %v15914_v58 = vpop.f32.mrf.mxu0  ;;  %v8912_v36 = vrot.slane %v15938_v49, 3  ;;  %vm18244_vm15 = vcmask 1044480  }
 0x345   : > { %vm18230_vm12 = vmmov %vm18216_vm0 }
 0x346   : > { %vm18231_vm3 = vmmov %vm18216_vm0 }
 0x347   : > { %vm18233_vm10 = vmmov %vm18216_vm0 }
 0x348   : > { %11138 = vmatmul.mubr.msk.bf16.gmra.mxu0 %vm18229_vm13, %v6980_v30  ;;  %vm18234_vm14 = vmmov %vm18216_vm0 }
 0x349   : > { %11181 = vmatprep.mubr.msk.bf16.mxu0 %vm18231_vm3, %v15659_v7  ;;  %vm18235_vm7 = vmmov %vm18216_vm0  ;;  %v8895_v7 = vld [vmem:[#allocation3 + $0x10] sm:$0x8] }
 0x34a   : > { %vm18236_vm9 = vmmov %vm18216_vm0 }
 0x34b   : > { %11092 = vmatmul.mubr.msk.bf16.gmra.mxu1 %vm18230_vm12, %v15619_v13  ;;  %v15916_v13 = vld [vmem:[#allocation3 + $0x18] sm:$0xff]   ;;  %vm18237_vm8 = vmmov %vm18216_vm0 }
 0x34c   : > { %11095 = vmatprep.mubr.msk.bf16.mxu1 %vm18216_vm0, %v15625_v14  ;;  %v15920_v14 = vpop.f32.mrf.mxu0  ;;  %vm18238_vm1 = vmmov %vm18216_vm0  ;;  %v8902_v31 = vrot.slane %v15916_v13, 3 }
 0x34d   : > { %vm18239_vm2 = vmmov %vm18216_vm0 }
 0x34e   : > { %vm18240_vm5 = vmmov %vm18216_vm0  ;;  %v15940_v38 = vpop.f32.mrf.mxu0 }
 0x34f   : > { %vm18241_vm4 = vmmov %vm18232_vm6 }
 0x350   : > { %11182 = vmatmul.mubr.msk.bf16.vlgmr.msra.gmra.mxu0 %vm18233_vm10, %v15665_v46  ;;  %v15930_v46 = vld [vmem:[#allocation3 + $0x28] sm:$0xff]   ;;  %v8234_v17 = vsel %vm18241_vm4, %v15690_v53, 0  ;;  %v15967_v50 = vpop.f32.mrf.mxu0  ;;  %vm18246_vm11 = vmmov %vm18244_vm15 }
 0x351   : > { %11185 = vmatprep.mubr.msk.bf16.mxu0 %vm18235_vm7, %v15668_v24  ;;  %11256 = vmatpush3.bf16.msra.mxu0 %v8680_v9  ;;  %v15934_v24 = vld [vmem:[#allocation3 + $0x30] sm:$0xff]   ;;  %v8906_v0 = vrot.slane %v15930_v46, 3  ;;  %vm18248_vm13 = vmmov %vm18246_vm11 }
 0x352   : > { %v8908_v2 = vrot.slane %v15934_v24, 3  ;;  %vm18250_vm12 = vmmov %vm18216_vm0 }
 0x353   : > { %11096 = vmatmul.mubr.msk.bf16.gmra.mxu1 %vm18234_vm14, %v15640_v51  ;;  %v15926_v51 = vld [vmem:[#allocation3 + $0x14] sm:$0xf]  ;;  %vm18251_vm3 = vmmov %vm18246_vm11 }
 0x354   : > { %11099 = vmatprep.mubr.msk.bf16.mxu1 %vm18236_vm9, %v15643_v39  ;;  %v15928_v39 = vld [vmem:[#allocation3 + $0x20] sm:$0xff]   ;;  %vm18253_vm0 = vmmov %vm18251_vm3 }
 0x355   : > { %v8904_v37 = vrot.slane %v15928_v39, 3  ;;  %vm18255_vm6 = vmmov %vm18253_vm0 }
 0x356   : > { %vm18257_vm10 = vmmov %vm18238_vm1 }
 0x357   : > { %v15975_v30 = vsel %vm18246_vm11, %v8902_v31, %v8904_v37  ;;  %v15978_v53 = vsel %vm18248_vm13, %v8904_v37, %v8906_v0  ;;  %vm18258_vm14 = vmmov %vm18238_vm1 }
 0x358   : > { %11186 = vmatmul.mubr.msk.bf16.gmra.mxu0 %vm18237_vm8, %v15693_v42  ;;  %v15936_v42 = vld [vmem:[#allocation3 + $0x38] sm:$0xff]   ;;  %18247 = vst [vmem:[#allocation44_spill] sm:$0xff] %v15975_v30  ;;  %18249 = vst [vmem:[#allocation39_spill] sm:$0xff] %v15978_v53 }
 0x359   : > { %11189 = vmatprep.mubr.msk.bf16.mxu0 %vm18239_vm2, %v15700_v43  ;;  %v10141_v43 = vcombine.low %v8895_v7, %v15926_v51  ;;  %v8910_v1 = vrot.slane %v15936_v42, 3  ;;  %v15986_v7 = vld [vmem:[%s17128_s2 + $0x10] sm:$0x3]  ;;  %v16005_v53 = vld [vmem:[#allocation3 + $0x98] sm:$0xff]   ;;  %vm18259_vm7 = vmmov %vm18253_vm0 }
 0x35a   : > { %vm18261_vm9 = vmmov %vm18238_vm1 }
 0x35b   : > { %11100 = vmatmul.mubr.msk.bf16.gmra.mxu1 %vm18238_vm1, %v15662_v59  ;;  %v15942_v59 = vld [vmem:[#allocation3 + $0x48] sm:$0xff]   ;;  %v8901_v21 = vrot.slane %v10141_v43, 3  ;;  %v15988_v43 = vld [vmem:[#allocation3 + $0xa0] ss:$0 sps:$4 sm:$0x77]   ;;  %v15997_v37 = vsel %vm18255_vm6, %v8910_v1, %v8912_v36  ;;  %vm18262_vm8 = vmmov %vm18241_vm4 }
 0x35c   : > { %11143 = vmatprep.mubr.msk.bf16.mxu1 %vm18240_vm5, %v15685_v11  ;;  %v15952_v11 = vld [vmem:[#allocation3 + $0x68] sm:$0xff]   ;;  %v8914_v9 = vrot.slane %v15942_v59, 3  ;;  %18256 = vst [vmem:[#allocation50_spill] sm:$0xff] %v15997_v37  ;;  %v8926_v37 = vrot.slane %v15960_v52, 3  ;;  %vm18263_vm1 = vmmov %vm18253_vm0 }
 0x35d   : > { %v15972_v47 = vsel %vm18244_vm15, %v8901_v21, %v8902_v31  ;;  %v15991_v21 = vsel %vm18251_vm3, %v8906_v0, %v8908_v2  ;;  %v15994_v31 = vsel %vm18253_vm0, %v8908_v2, %v8910_v1  ;;  %v8916_v0 = vrot.slane %v15946_v27, 3  ;;  %vm18265_vm2 = vmmov %vm18253_vm0 }
 0x35e   : > { %18245 = vst [vmem:[#allocation54_spill] sm:$0xff] %v15972_v47  ;;  %18252 = vst [vmem:[#allocation77_spill] sm:$0xff] %v15991_v21  ;;  %v16008_v30 = vsel %vm18259_vm7, %v8912_v36, %v8914_v9  ;;  %v8918_v2 = vrot.slane %v15948_v10, 3  ;;  %v8920_v1 = vrot.slane %v15950_v44, 3  ;;  %v16019_v36 = vpop.f32.mrf.mxu0  ;;  %v8930_v21 = vrot.slane %v15969_v62, 3 }
 0x35f   : > { %18254 = vst [vmem:[#allocation56_spill] sm:$0xff] %v15994_v31  ;;  %18260 = vst [vmem:[#allocation41_spill] sm:$0xff] %v16008_v30  ;;  %v8928_v31 = vrot.slane %v15962_v15, 3  ;;  %v16024_v30 = vsel %vm18263_vm1, %v8914_v9, %v8916_v0 }
 0x360   : > { %11190 = vmatmul.mubr.msk.bf16.gmra.mxu0 %vm18250_vm12, %v15727_v63  ;;  %v16003_v63 = vld [vmem:[#allocation3 + $0x90] sm:$0xff]   ;;  %18264 = vst [vmem:[#allocation57_spill] sm:$0xff] %v16024_v30  ;;  %vm18267_vm5 = vmmov %vm18253_vm0  ;;  %v16045_v30 = vpop.f32.mrf.mxu0 }
 0x361   : > { %11193 = vmatprep.mubr.msk.bf16.mxu0 %vm18258_vm14, %v15730_v6  ;;  %v8924_v6 = vrot.slane %v15954_v55, 3  ;;  %vm18269_vm4 = vmmov %vm18253_vm0 }
 0x362   : > { %vm18271_vm15 = vmmov %vm18253_vm0 }
 0x363   : > { %11144 = vmatmul.mubr.msk.bf16.vlgmr.msra.gmra.mxu1 %vm18257_vm10, %v15717_v22  ;;  %v8922_v22 = vrot.slane %v15952_v11, 3  ;;  %vm18273_vm11 = vmmov %vm18253_vm0 }
 0x364   : > { %11218 = vmatpush3.bf16.msra.mxu1 %v8234_v17  ;;  %11147 = vmatprep.mubr.msk.bf16.mxu1 %vm18261_vm9, %v15724_v33  ;;  %v16027_v17 = vsel %vm18265_vm2, %v8916_v0, %v8918_v2  ;;  %v16030_v33 = vsel %vm18267_vm5, %v8918_v2, %v8920_v1  ;;  %v16040_v52 = vsel %vm18273_vm11, %v8924_v6, %v8926_v37  ;;  %vm18275_vm13 = vmmov %vm18253_vm0  ;;  %v8932_v2 = vrot.slane %v16003_v63, 3 }
 0x365   : > { %11348 = vmatprep.subr.msk.bf16.mxu1 %vm18262_vm8, %v15986_v7  ;;  %18266 = vst [vmem:[#allocation52_spill] sm:$0xff] %v16027_v17  ;;  %18268 = vst [vmem:[#allocation45_spill] sm:$0xff] %v16030_v33  ;;  %v16034_v47 = vsel %vm18269_vm4, %v8920_v1, %v8922_v22  ;;  %v16037_v15 = vsel %vm18271_vm15, %v8922_v22, %v8924_v6  ;;  %v16043_v9 = vsel %vm18275_vm13, %v8926_v37, %v8928_v31 }
 0x366   : > { %18270 = vst [vmem:[#allocation59_spill] sm:$0xff] %v16034_v47  ;;  %18272 = vst [vmem:[#allocation55_spill] sm:$0xff] %v16037_v15  ;;  %v8934_v33 = vrot.slane %v16005_v53, 3  ;;  %v8936_v1 = vrot.slane %v15988_v43, 3  ;;  %v16053_v47 = vpop.f32.mrf.mxu0 }
 0x367   : > { %18274 = vst [vmem:[#allocation48_spill] sm:$0xff] %v16040_v52  ;;  %18276 = vst [vmem:[#allocation4_spill] sm:$0xff] %v16043_v9 }
 0x368   : > { %vm18277_vm12 = vmmov %vm18253_vm0  ;;  %v16059_v6 = vsel %vm18253_vm0, %v8932_v2, %v8934_v33 }
 0x369   : > { %v16048_v0 = vsel %vm18277_vm12, %v8928_v31, %v8930_v21  ;;  %vm18279_vm3 = vmmov %vm18253_vm0  ;;  %18281 = vst [vmem:[#allocation51_spill] sm:$0xff] %v16059_v6  ;;  %v8485_v6 = vshll.u32 %v15930_v46, 16 }
 0x36a   : > { %18278 = vst [vmem:[#allocation60_spill] sm:$0xff] %v16048_v0  ;;  %v16056_v22 = vsel %vm18279_vm3, %v8930_v21, %v8932_v2  ;;  %vm18282_vm6 = vmmov %vm18253_vm0  ;;  %v16072_v21 = vpop.f32.mrf.mxu0 }
 0x36b   : > { %18280 = vst [vmem:[#allocation58_spill] sm:$0xff] %v16056_v22  ;;  %v16062_v37 = vsel %vm18282_vm6, %v8934_v33, %v8936_v1  ;;  %vm18284_vm10 = vmmov %vm18261_vm9 }
 0x36c   : > { %18283 = vst [vmem:[#allocation5_spill] sm:$0xff] %v16062_v37  ;;  %11194 = vmatmul.mubr.msk.bf16.gmra.mxu0 %vm18284_vm10, %v15747_v57  ;;  %vm18285_vm14 = vmmov %vm18261_vm9  ;;  %v16074_v31 = vpop.f32.mrf.mxu0  ;;  %v10993_v57 = vpop.f32.mrf.mxu1  ;;  %v8482_v37 = vshrl.u32 %v15930_v46, 16 }
 0x36d   : > { %11148 = vmatmul.mubr.msk.bf16.gmra.mxu1 %vm18285_vm14, %v15737_v3  ;;  %vm18286_vm7 = vmmov %vm18261_vm9 }
 0x36e   : > { %11197 = vmatprep.mubr.msk.bf16.mxu0 %vm18286_vm7, %v15754_v60  ;;  %vm18287_vm9 = vmmov %vm18286_vm7  ;;  %v16078_v33 = vpop.f32.mrf.mxu0  ;;  %v16097_v60 = vadd.f32 %v15914_v58, %v10993_v57  ;;  %v8010_v58 = vld [vmem:[#allocation3 + $0x10] sm:$0xc] }
 0x36f   : > { %11151 = vmatprep.mubr.msk.bf16.mxu1 %vm18287_vm9, %v15744_v5  ;;  %vm18288_vm8 = vmmov %vm18286_vm7 }
 0x370   : > { %vm18289_vm1 = vmmov %vm18286_vm7  ;;  %v16086_v3 = vpop.f32.mrf.mxu0 }
 0x371   : > { %vm18290_vm2 = vmmov %vm18289_vm1 }
 0x372   : > { %vm18291_vm5 = vmmov %vm18289_vm1  ;;  %v16088_v5 = vpop.f32.mrf.mxu0 }
 0x373   : > { %vm18292_vm4 = vmmov %vm18289_vm1 }
 0x374   : > { %11198 = vmatmul.mubr.msk.bf16.gmra.mxu0 %vm18288_vm8, %v15771_v45  ;;  %vm18293_vm15 = vmmov %vm18289_vm1  ;;  %vm18305_vm8 = vcmask 1045504  }
 0x375   : > { %11152 = vmatmul.mubr.msk.bf16.gmra.mxu1 %vm18289_vm1, %v15763_v34  ;;  %11201 = vmatprep.mubr.msk.bf16.mxu0 %vm18290_vm2, %v15774_v56  ;;  %vm18294_vm11 = vmmov %vm18289_vm1  ;;  %v16099_v34 = vpop.f32.mrf.mxu0  ;;  %vm18307_vm2 = vsmask.f32 5376 }
 0x376   : > { %11155 = vmatprep.mubr.msk.bf16.mxu1 %vm18291_vm5, %v15768_v20  ;;  %vm18295_vm13 = vmmov %vm18289_vm1  ;;  %v6140_v20 = vpop.f32.mrf.mxu1 }
 0x377   : > { %v16104_v45 = vadd.f32 %v15920_v14, %v6140_v20  ;;  %vm18296_vm12 = vmmov %vm18289_vm1  ;;  %v16125_v14 = vcombine.low %v8010_v58, %v15926_v51 }
 0x378   : > { %v10994_v56 = vpop.f32.mrf.mxu1  ;;  %vm18297_vm3 = vmmov %vm18289_vm1 }
 0x379   : > { %vm18298_vm0 = vmmov %vm18289_vm1 }
 0x37a   : > { %v6143_v2 = vpop.f32.mrf.mxu1  ;;  %vm18299_vm6 = vmmov %vm18298_vm0 }
 0x37b   : > { %vm18300_vm10 = vmmov %vm18298_vm0 }
 0x37c   : > { %11202 = vmatmul.mubr.msk.bf16.gmra.mxu0 %vm18292_vm4, %v15795_v48  ;;  %v16107_v48 = vadd.f32 %v15940_v38, %v10994_v56  ;;  %v8464_v38 = vshrl.u32 %v15916_v13, 16  ;;  %vm18301_vm14 = vmmov %vm18298_vm0  ;;  %v10997_v20 = vpop.f32.mrf.mxu1 }
 0x37d   : > { %11156 = vmatmul.mubr.msk.bf16.gmra.mxu1 %vm18293_vm15, %v15785_v29  ;;  %11205 = vmatprep.mubr.msk.bf16.mxu0 %vm18294_vm11, %v15802_v19  ;;  %v16109_v29 = vpop.f32.mrf.mxu0  ;;  %v16112_v19 = vadd.f32 %v15967_v50, %v6143_v2  ;;  %v8467_v50 = vshll.u32 %v15916_v13, 16  ;;  %vm18302_vm7 = vmmov %vm18298_vm0  ;;  %v16144_v58 = vadd.f32 %v16019_v36, %v10997_v20  ;;  %v18304_v20 = vrot.slane %v15812_v12, 2 }
 0x37e   : > { %11159 = vmatprep.mubr.msk.bf16.mxu1 %vm18295_vm13, %v15792_v8  ;;  %vm18303_vm9 = vmmov %vm18298_vm0 }
 0x37f   : > { %v16120_v8 = vpop.f32.mrf.mxu0  ;;  %v8469_v57 = vrot.slane %v8467_v50, 3  ;;  %v6156_v50 = vpop.f32.mrf.mxu1  ;;  %vm18306_vm1 = vmmov %vm18298_vm0 }
 0x380   : > { %vm18308_vm5 = vmmov %vm18298_vm0 }
 0x381   : > { %v16129_v1 = vpop.f32.mrf.mxu0  ;;  %vm18309_vm4 = vmmov %vm18298_vm0 }
 0x382   : > { %vm18310_vm15 = vmmov %vm18298_vm0 }
 0x383   : > { %v16139_v51 = vpop.f32.mrf.mxu0  ;;  %vm18311_vm11 = vmmov %vm18307_vm2 }
 0x384   : > { %11206 = vmatmul.mubr.msk.bf16.gmra.mxu0 %vm18296_vm12, %v15823_v35  ;;  %v8456_v35 = vshrl.u32 %v16125_v14, 16  ;;  %vm18312_vm13 = vmmov %vm18298_vm0 }
 0x385   : > { %11160 = vmatmul.mubr.msk.bf16.gmra.mxu1 %vm18297_vm3, %v15815_v32  ;;  %11209 = vmatprep.mubr.msk.bf16.mxu0 %vm18298_vm0, %v15826_v4  ;;  %v8459_v32 = vshll.u32 %v16125_v14, 16  ;;  %v8466_v4 = vrot.slane %v8464_v38, 2  ;;  %v8476_v38 = vshll.u32 %v15928_v39, 16  ;;  %vm18313_vm12 = vmmov %vm18307_vm2 }
 0x386   : > { %11163 = vmatprep.mubr.msk.bf16.mxu1 %vm18299_vm6, %v15820_v28  ;;  %v11529_v28 = vld [vmem:[#allocation3 + $0x98] ss:$0 sps:$4 sm:$0x33]   ;;  %v8458_v56 = vrot.slane %v8456_v35, 2  ;;  %vm18314_vm3 = vmmov %vm18298_vm0 }
 0x387   : > { %v8461_v2 = vrot.slane %v8459_v32, 3  ;;  %v7738_v22 = vrot.slane %v11529_v28, 2  ;;  %v10998_v32 = vpop.f32.mrf.mxu1  ;;  %vm18315_vm6 = vmmov %vm18298_vm0 }
 0x388   : > { %v16161_v9 = vadd.f32 %v16053_v47, %v10998_v32 }
 0x389   : > { %v8462_v36 = vor.u32 %v8461_v2, %v8458_v56  ;;  %v7739_v0 = vsel %vm18305_vm8, %v18304_v20, %v7738_v22  ;;  %v6159_v15 = vpop.f32.mrf.mxu1  ;;  %v8494_v22 = vshll.u32 %v15934_v24, 16  ;;  %v8503_v56 = vshll.u32 %v15936_v42, 16  ;;  %vm18320_vm8 = vmmov %vm18298_vm0 }
 0x38a   : > { %v16171_v12 = vadd.f32 %v16072_v21, %v6159_v15 }
 0x38b   : > { %v8505_v32 = vrot.slane %v8503_v56, 3  ;;  %v11001_v20 = vpop.f32.mrf.mxu1  ;;  %v8521_v56 = vshll.u32 %v15942_v59, 16 }
 0x38c   : > { %11210 = vmatmul.mubr.msk.bf16.gmra.mxu0 %vm18300_vm10, %v15843_v41  ;;  %v8473_v41 = vshrl.u32 %v15928_v39, 16  ;;  %vm18316_vm10 = vsmask.f32 6400 }
 0x38d   : > { %11164 = vmatmul.mubr.msk.bf16.gmra.mxu1 %vm18301_vm14, %v15833_v18  ;;  %11213 = vmatprep.mubr.msk.bf16.mxu0 %vm18302_vm7, %v15852_v61  ;;  %v16148_v18 = vpop.f32.mrf.mxu0  ;;  %v8470_v61 = vor.u32 %v8469_v57, %v8466_v4  ;;  %v8478_v57 = vrot.slane %v8476_v38, 3  ;;  %vm18317_vm14 = vmmov %vm18307_vm2 }
 0x38e   : > { %11167 = vmatprep.mubr.msk.bf16.mxu1 %vm18303_vm9, %v15840_v26  ;;  %v16153_v26 = vadd.f32 %v16045_v30, %v6156_v50  ;;  %v8475_v4 = vrot.slane %v8473_v41, 2  ;;  %v8484_v30 = vrot.slane %v8482_v37, 2  ;;  %v8487_v50 = vrot.slane %v8485_v6, 3  ;;  %vm18318_vm7 = vmmov %vm18298_vm0 }
 0x38f   : > { %v16155_v35 = vpop.f32.mrf.mxu0  ;;  %v8471_v52 = vsel %vm18307_vm2, %v8462_v36, %v8470_v61  ;;  %v8500_v6 = vshrl.u32 %v15936_v42, 16  ;;  %v8496_v41 = vrot.slane %v8494_v22, 3  ;;  %vm18319_vm9 = vmmov %vm18307_vm2 }
 0x390   : > { %v8479_v47 = vor.u32 %v8478_v57, %v8475_v4  ;;  %v8488_v37 = vor.u32 %v8487_v50, %v8484_v30  ;;  %v8509_v50 = vshrl.u32 %v15938_v49, 16  ;;  %vm18322_vm2 = vmmov %vm18298_vm0 }
 0x391   : > { %v16165_v17 = vpop.f32.mrf.mxu0  ;;  %v8502_v36 = vrot.slane %v8500_v6, 2  ;;  %v8518_v6 = vshrl.u32 %v15942_v59, 16 }
 0x392   : > { %v8480_v15 = vsel %vm18311_vm11, %v8470_v61, %v8479_v47  ;;  %v6172_v61 = vpop.f32.mrf.mxu1  ;;  %vm18326_vm11 = vmmov %vm18319_vm9 }
 0x393   : > { %v16179_v2 = vpop.f32.mrf.mxu0  ;;  %v8506_v22 = vor.u32 %v8505_v32, %v8502_v36 }
 0x394   : > { %11214 = vmatmul.mubr.msk.bf16.gmra.mxu0 %vm18306_vm1, %v7739_v0  ;;  %v8491_v0 = vshrl.u32 %v15934_v24, 16  ;;  %vm18321_vm1 = vcmask 1045504  }
 0x395   : > { %11168 = vmatmul.mubr.msk.bf16.gmra.mxu1 %vm18308_vm5, %v15861_v54  ;;  %11257 = vmatprep.mubr.msk.bf16.mxu0 %vm18309_vm4, %v8471_v52  ;;  %v7419_v54 = vshrl.u32 %v11529_v28, 16  ;;  %v7422_v52 = vshll.u32 %v11529_v28, 16  ;;  %v16182_v38 = vpop.f32.mrf.mxu0  ;;  %v16192_v28 = vadd.f32 %v16074_v31, %v11001_v20  ;;  %v8143_v31 = vrot.slane %v15916_v13, 2  ;;  %vm18323_vm5 = vmmov %vm18298_vm0 }
 0x396   : > { %11171 = vmatprep.mubr.msk.bf16.mxu1 %vm18310_vm15, %v15865_v23  ;;  %v8493_v21 = vrot.slane %v8491_v0, 2  ;;  %v8489_v23 = vsel %vm18313_vm12, %v8479_v47, %v8488_v37  ;;  %v8512_v47 = vshll.u32 %v15938_v49, 16  ;;  %vm18324_vm4 = vmmov %vm18321_vm1  ;;  %vm18325_vm15 = vcmask 1041408  }
 0x397   : > { %v7421_v4 = vrot.slane %v7419_v54, 1  ;;  %v7424_v57 = vrot.slane %v7422_v52, 2  ;;  %v16196_v0 = vpop.f32.mrf.mxu0  ;;  %v11002_v54 = vpop.f32.mrf.mxu1  ;;  %v8142_v52 = vrot.slane %v16125_v14, 2  ;;  %v8520_v14 = vrot.slane %v8518_v6, 2  ;;  %vm18328_vm12 = vmmov %vm18319_vm9 }
 0x398   : > { %v8497_v30 = vor.u32 %v8496_v41, %v8493_v21  ;;  %v8514_v36 = vrot.slane %v8512_v47, 3  ;;  %v8539_v47 = vshll.u32 %v15948_v10, 16 }
 0x399   : > { %v6175_v41 = vpop.f32.mrf.mxu1  ;;  %v16211_v32 = vpop.f32.mrf.mxu0 }
 0x39a   : > { %v16214_v20 = vadd.f32 %v16088_v5, %v6175_v41  ;;  %v8507_v13 = vsel %vm18319_vm9, %v8497_v30, %v8506_v22  ;;  %v8527_v5 = vshrl.u32 %v15946_v27, 16 }
 0x39b   : > { %v11005_v6 = vpop.f32.mrf.mxu1 }
 0x39c   : > { %11258 = vmatmul.mubr.msk.bf16.vlgmr.msra.gmra.mxu0 %vm18312_vm13, %v8480_v15  ;;  %v16206_v15 = vadd.f32 %v16086_v3, %v11002_v54  ;;  %v8523_v3 = vrot.slane %v8521_v56, 3  ;;  %v8147_v56 = vrot.slane %v15930_v46, 2  ;;  %vm18327_vm13 = vmmov %vm18298_vm0 }
 0x39d   : > { %11172 = vmatmul.mubr.msk.bf16.gmra.mxu1 %vm18314_vm3, %v15873_v40  ;;  %11261 = vmatprep.mubr.msk.bf16.mxu0 %vm18298_vm0, %v8489_v23  ;;  %v16199_v40 = vadd.f32 %v16078_v33, %v6172_v61  ;;  %v8498_v33 = vsel %vm18317_vm14, %v8488_v37, %v8497_v30  ;;  %v8511_v23 = vrot.slane %v8509_v50, 2  ;;  %v8145_v37 = vrot.slane %v15928_v39, 2  ;;  %vm18329_vm3 = vmmov %vm18298_vm0 }
 0x39e   : > { %11175 = vmatprep.mubr.msk.bf16.mxu1 %vm18315_vm6, %v15879_v25  ;;  %v7425_v25 = vor.u32 %v7424_v57, %v7421_v4  ;;  %v16223_v57 = vpop.f32.mrf.mxu0  ;;  %v8530_v61 = vshll.u32 %v15946_v27, 16  ;;  %v8524_v30 = vor.u32 %v8523_v3, %v8520_v14  ;;  %v8536_v50 = vshrl.u32 %v15948_v10, 16  ;;  %vm18330_vm0 = vmmov %vm18321_vm1 }
 0x39f   : > { %v8515_v4 = vor.u32 %v8514_v36, %v8511_v23  ;;  %v8146_v39 = vsel %vm18324_vm4, %v8143_v31, %v8145_v37  ;;  %vm18331_vm6 = vmmov %vm18322_vm2  ;;  %v8149_v3 = vrot.slane %v15934_v24, 2 }
 0x3a0   : > { %v7426_v21 = vsel %vm18316_vm10, %v15867_v16, %v7425_v25  ;;  %v8144_v16 = vsel %vm18321_vm1, %v8142_v52, %v8143_v31  ;;  %v16231_v25 = vadd.f32 %v16099_v34, %v11005_v6  ;;  %v16234_v54 = vpop.f32.mrf.mxu0  ;;  %v8993_v52 = vsel %vm18325_vm15, %v15986_v7, 0  ;;  %vm18332_vm10 = vmmov %vm18322_vm2 }
 0x3a1   : > { %v8516_v41 = vsel %vm18326_vm11, %v8506_v22, %v8515_v4  ;;  %v8532_v23 = vrot.slane %v8530_v61, 3  ;;  %v8525_v46 = vsel %vm18328_vm12, %v8515_v4, %v8524_v30  ;;  %v8538_v34 = vrot.slane %v8536_v50, 2  ;;  %vm18333_vm14 = vmmov %vm18319_vm9 }
 0x3a2   : > { %v8148_v31 = vsel %vm18330_vm0, %v8145_v37, %v8147_v56  ;;  %v8545_v4 = vshrl.u32 %v15950_v44, 16  ;;  %v8554_v50 = vshrl.u32 %v15952_v11, 16  ;;  %vm18335_vm9 = vmmov %vm18322_vm2 }
 0x3a3   : > { %vm18337_vm1 = vmmov %vm18322_vm2 }
 0x3a4   : > { %11262 = vmatmul.mubr.msk.bf16.gmra.mxu0 %vm18318_vm7, %v8498_v33  ;;  %v8529_v33 = vrot.slane %v8527_v5, 2  ;;  %v8548_v5 = vshll.u32 %v15950_v44, 16  ;;  %v8547_v24 = vrot.slane %v8545_v4, 2  ;;  %vm18334_vm7 = vmmov %vm18330_vm0 }
 0x3a5   : > { %11176 = vmatmul.mubr.msk.bf16.gmra.mxu1 %vm18320_vm8, %v7426_v21  ;;  %11265 = vmatprep.mubr.msk.bf16.mxu0 %vm18322_vm2, %v8507_v13  ;;  %v6188_v21 = vpop.f32.mrf.mxu1  ;;  %v8541_v13 = vrot.slane %v8539_v47, 3  ;;  %v8557_v47 = vshll.u32 %v15952_v11, 16  ;;  %vm18336_vm8 = vmmov %vm18326_vm11 }
 0x3a6   : > { %11219 = vmatprep.mubr.msk.bf16.mxu1 %vm18323_vm5, %v8144_v16  ;;  %v16240_v36 = vadd.f32 %v16109_v29, %v6188_v21  ;;  %v16251_v29 = vpop.f32.mrf.mxu0  ;;  %v8533_v16 = vor.u32 %v8532_v23, %v8529_v33  ;;  %v8150_v21 = vsel %vm18334_vm7, %v8147_v56, %v8149_v3  ;;  %vm18338_vm2 = vmmov %vm18330_vm0 }
 0x3a7   : > { %v11006_v14 = vpop.f32.mrf.mxu1  ;;  %v8542_v61 = vor.u32 %v8541_v13, %v8538_v34  ;;  %v8559_v33 = vrot.slane %v8557_v47, 3  ;;  %vm18339_vm5 = vmmov %vm18337_vm1  ;;  %v8153_v34 = vrot.slane %v15938_v49, 2  ;;  %v8155_v47 = vrot.slane %v15942_v59, 2 }
 0x3a8   : > { %v16249_v7 = vadd.f32 %v16120_v8, %v11006_v14  ;;  %v8151_v8 = vrot.slane %v15936_v42, 2  ;;  %v16262_v6 = vpop.f32.mrf.mxu0  ;;  %vm18340_vm4 = vmmov %vm18337_vm1  ;;  %v8566_v14 = vshll.u32 %v15954_v55, 16 }
 0x3a9   : > { %v6191_v22 = vpop.f32.mrf.mxu1  ;;  %vm18342_vm15 = vmmov %vm18330_vm0 }
 0x3aa   : > { %v16257_v37 = vadd.f32 %v16129_v1, %v6191_v22  ;;  %v8543_v1 = vsel %vm18336_vm8, %v8533_v16, %v8542_v61  ;;  %vm18343_vm11 = vmmov %vm18336_vm8 }
 0x3ab   : > { %v11009_v23 = vpop.f32.mrf.mxu1  ;;  %vm18345_vm12 = vmmov %vm18336_vm8 }
 0x3ac   : > { %11266 = vmatmul.mubr.msk.bf16.gmra.mxu0 %vm18327_vm13, %v8516_v41  ;;  %v8556_v41 = vrot.slane %v8554_v50, 2  ;;  %v16272_v42 = vadd.f32 %v16139_v51, %v11009_v23  ;;  %v18341_v51 = vld [vmem:[#allocation40_spill] sm:$0xff]  ;;  %vm18344_vm13 = vmmov %vm18337_vm1 }
 0x3ad   : > { %11220 = vmatmul.mubr.msk.bf16.vlgmr.msra.gmra.mxu1 %vm18329_vm3, %v8146_v39  ;;  %11269 = vmatprep.mubr.msk.bf16.mxu0 %vm18331_vm6, %v8525_v46  ;;  %v8534_v39 = vsel %vm18333_vm14, %v8524_v30, %v8533_v16  ;;  %v8152_v46 = vsel %vm18338_vm2, %v8149_v3, %v8151_v8  ;;  %v16275_v30 = vpop.f32.mrf.mxu0  ;;  %v6204_v56 = vpop.f32.mrf.mxu1  ;;  %v8572_v4 = vshrl.u32 %v18341_v51, 16  ;;  %vm18346_vm3 = vmmov %vm18337_vm1 }
 0x3ae   : > { %11294 = vmatpush3.bf16.msra.mxu1 %v8993_v52  ;;  %11223 = vmatprep.mubr.msk.bf16.mxu1 %vm18332_vm10, %v8148_v31  ;;  %v8550_v52 = vrot.slane %v8548_v5, 3  ;;  %v8563_v31 = vshrl.u32 %v15954_v55, 16  ;;  %v16281_v22 = vadd.f32 %v16148_v18, %v6204_v56  ;;  %v8560_v3 = vor.u32 %v8559_v33, %v8556_v41  ;;  %vm18347_vm6 = vmmov %vm18337_vm1 }
 0x3af   : > { %v16283_v16 = vpop.f32.mrf.mxu0  ;;  %v8575_v5 = vshll.u32 %v18341_v51, 16  ;;  %v11010_v50 = vpop.f32.mrf.mxu1  ;;  %v8574_v59 = vrot.slane %v8572_v4, 2  ;;  %vm18348_vm10 = vmmov %vm18337_vm1 }
 0x3b0   : > { %v8551_v13 = vor.u32 %v8550_v52, %v8547_v24  ;;  %v16289_v49 = vadd.f32 %v16155_v35, %v11010_v50  ;;  %v8154_v24 = vsel %vm18342_vm15, %v8151_v8, %v8153_v34  ;;  %v8565_v18 = vrot.slane %v8563_v31, 2  ;;  %vm18350_vm14 = vmmov %vm18330_vm0 }
 0x3b1   : > { %v16298_v33 = vpop.f32.mrf.mxu0  ;;  %v8577_v23 = vrot.slane %v8575_v5, 3  ;;  %v8156_v8 = vsel %vm18330_vm0, %v8153_v34, %v8155_v47  ;;  %v8590_v50 = vshrl.u32 %v15969_v62, 16  ;;  %vm18351_vm7 = vmmov %vm18336_vm8 }
 0x3b2   : > { %v8552_v52 = vsel %vm18343_vm11, %v8542_v61, %v8551_v13  ;;  %v8561_v41 = vsel %vm18345_vm12, %v8551_v13, %v8560_v3  ;;  %v18349_v13 = vld [vmem:[#allocation38_spill] sm:$0xff]  ;;  %vm18353_vm8 = vmmov %vm18351_vm7 }
 0x3b3   : > { %v8581_v31 = vshrl.u32 %v18349_v13, 16  ;;  %v16313_v5 = vpop.f32.mrf.mxu0  ;;  %v8578_v34 = vor.u32 %v8577_v23, %v8574_v59  ;;  %vm18354_vm2 = vmmov %vm18330_vm0 }
 0x3b4   : > { %11270 = vmatmul.mubr.msk.bf16.gmra.mxu0 %vm18335_vm9, %v8534_v39  ;;  %v6207_v39 = vpop.f32.mrf.mxu1  ;;  %vm18352_vm9 = vmmov %vm18337_vm1 }
 0x3b5   : > { %11224 = vmatmul.mubr.msk.bf16.gmra.mxu1 %vm18337_vm1, %v8150_v21  ;;  %11273 = vmatprep.mubr.msk.bf16.mxu0 %vm18339_vm5, %v8543_v1  ;;  %v8568_v21 = vrot.slane %v8566_v14, 3  ;;  %v16294_v1 = vadd.f32 %v16165_v17, %v6207_v39  ;;  %v8584_v14 = vshll.u32 %v18349_v13, 16  ;;  %v16326_v59 = vpop.f32.mrf.mxu0  ;;  %vm18355_vm5 = vmmov %vm18337_vm1 }
 0x3b6   : > { %11227 = vmatprep.mubr.msk.bf16.mxu1 %vm18340_vm4, %v8152_v46  ;;  %v11013_v35 = vpop.f32.mrf.mxu1  ;;  %v8157_v46 = vrot.slane %v15946_v27, 2  ;;  %vm18356_vm4 = vmmov %vm18337_vm1 }
 0x3b7   : > { %v16304_v61 = vadd.f32 %v16179_v2, %v11013_v35  ;;  %v8569_v56 = vor.u32 %v8568_v21, %v8565_v18  ;;  %v8593_v2 = vshll.u32 %v15969_v62, 16  ;;  %vm18357_vm15 = vmmov %vm18351_vm7 }
 0x3b8   : > { %v6220_v17 = vpop.f32.mrf.mxu1  ;;  %v8158_v18 = vsel %vm18350_vm14, %v8155_v47, %v8157_v46  ;;  %vm18358_vm11 = vmmov %vm18330_vm0 }
 0x3b9   : > { %v16311_v4 = vadd.f32 %v16182_v38, %v6220_v17  ;;  %v8570_v21 = vsel %vm18351_vm7, %v8560_v3, %v8569_v56  ;;  %v8583_v38 = vrot.slane %v8581_v31, 2  ;;  %v8579_v23 = vsel %vm18353_vm8, %v8569_v56, %v8578_v34  ;;  %vm18360_vm12 = vmmov %vm18351_vm7 }
 0x3ba   : > { %v11014_v39 = vpop.f32.mrf.mxu1  ;;  %v8599_v56 = vshrl.u32 %v16003_v63, 16  ;;  %vm18365_vm14 = vmmov %vm18351_vm7 }
 0x3bb   : > { %v16319_v27 = vadd.f32 %v16196_v0, %v11014_v39  ;;  %vm18366_vm7 = vmmov %vm18330_vm0 }
 0x3bc   : > { %11274 = vmatmul.mubr.msk.bf16.gmra.mxu0 %vm18344_vm13, %v8552_v52  ;;  %v6223_v52 = vpop.f32.mrf.mxu1  ;;  %vm18359_vm13 = vmmov %vm18337_vm1 }
 0x3bd   : > { %11228 = vmatmul.mubr.msk.bf16.gmra.mxu1 %vm18346_vm3, %v8154_v24  ;;  %11277 = vmatprep.mubr.msk.bf16.mxu0 %vm18347_vm6, %v8561_v41  ;;  %v8159_v24 = vrot.slane %v15948_v10, 2  ;;  %v8586_v41 = vrot.slane %v8584_v14, 3  ;;  %v16324_v35 = vadd.f32 %v16211_v32, %v6223_v52  ;;  %v8592_v10 = vrot.slane %v8590_v50, 2  ;;  %v16337_v32 = vpop.f32.mrf.mxu0  ;;  %vm18361_vm3 = vmmov %vm18337_vm1 }
 0x3be   : > { %11231 = vmatprep.mubr.msk.bf16.mxu1 %vm18348_vm10, %v8156_v8  ;;  %v8595_v8 = vrot.slane %v8593_v2, 3  ;;  %v11017_v0 = vpop.f32.mrf.mxu1  ;;  %v8602_v14 = vshll.u32 %v16003_v63, 16  ;;  %vm18362_vm6 = vmmov %vm18337_vm1 }
 0x3bf   : > { %v8160_v47 = vsel %vm18354_vm2, %v8157_v46, %v8159_v24  ;;  %v16334_v3 = vadd.f32 %v16223_v57, %v11017_v0  ;;  %v8587_v31 = vor.u32 %v8586_v41, %v8583_v38  ;;  %v8161_v46 = vrot.slane %v15950_v44, 2  ;;  %v11064_v2 = vpop.f32.mrf.mxu0  ;;  %vm18364_vm10 = vmmov %vm18337_vm1 }
 0x3c0   : > { %v6236_v17 = vpop.f32.mrf.mxu1  ;;  %v8596_v39 = vor.u32 %v8595_v8, %v8592_v10  ;;  %v8163_v57 = vrot.slane %v15952_v11, 2  ;;  %v8608_v38 = vshrl.u32 %v16005_v53, 16  ;;  %v8611_v41 = vshll.u32 %v16005_v53, 16  ;;  %vm18368_vm2 = vmmov %vm18330_vm0 }
 0x3c1   : > { %v16342_v50 = vadd.f32 %v16234_v54, %v6236_v17  ;;  %v8588_v0 = vsel %vm18357_vm15, %v8578_v34, %v8587_v31  ;;  %v8601_v54 = vrot.slane %v8599_v56, 2  ;;  %v8162_v10 = vsel %vm18358_vm11, %v8159_v24, %v8161_v46  ;;  %vm18371_vm15 = vmmov %vm18353_vm8 }
 0x3c2   : > { %v11018_v52 = vpop.f32.mrf.mxu1  ;;  %v8597_v11 = vsel %vm18360_vm12, %v8587_v31, %v8596_v39  ;;  %v8164_v17 = vsel %vm18330_vm0, %v8161_v46, %v8163_v57  ;;  %v8610_v24 = vrot.slane %v8608_v38, 2  ;;  %v8613_v56 = vrot.slane %v8611_v41, 3  ;;  %vm18372_vm11 = vmmov %vm18330_vm0 }
 0x3c3   : > { %v8620_v31 = vshll.u32 %v15988_v43, 16  ;;  %v8165_v46 = vrot.slane %v15954_v55, 2  ;;  %vm18374_vm12 = vmmov %vm18337_vm1 }
 0x3c4   : > { %11278 = vmatmul.mubr.msk.bf16.gmra.mxu0 %vm18352_vm9, %v8570_v21  ;;  %v6487_v21 = vpop.f32.mrf.mxu0  ;;  %v8614_v41 = vor.u32 %v8613_v56, %v8610_v24  ;;  %vm18367_vm9 = vmmov %vm18337_vm1 }
 0x3c5   : > { %11232 = vmatmul.mubr.msk.bf16.gmra.mxu1 %vm18337_vm1, %v8158_v18  ;;  %11281 = vmatprep.mubr.msk.bf16.mxu0 %vm18355_vm5, %v8579_v23  ;;  %v16347_v18 = vadd.f32 %v16251_v29, %v11018_v52  ;;  %v6239_v23 = vpop.f32.mrf.mxu1  ;;  %vm18369_vm5 = vmmov %vm18337_vm1 }
 0x3c6   : > { %11235 = vmatprep.mubr.msk.bf16.mxu1 %vm18356_vm4, %v8160_v47  ;;  %v8604_v47 = vrot.slane %v8602_v14, 3  ;;  %v16353_v44 = vadd.f32 %v16262_v6, %v6239_v23  ;;  %v16356_v8 = vpop.f32.mrf.mxu0  ;;  %v8617_v23 = vshrl.u32 %v15988_v43, 16  ;;  %vm18370_vm4 = vmmov %vm18337_vm1 }
 0x3c7   : > { %v11021_v29 = vpop.f32.mrf.mxu1 }
 0x3c8   : > { %v16364_v34 = vadd.f32 %v16275_v30, %v11021_v29  ;;  %v7072_v6 = vpop.f32.mrf.mxu0  ;;  %v8605_v52 = vor.u32 %v8604_v47, %v8601_v54  ;;  %v8167_v30 = vrot.slane %v18341_v51, 2  ;;  %v8619_v47 = vrot.slane %v8617_v23, 2 }
 0x3c9   : > { %v6252_v14 = vpop.f32.mrf.mxu1 }
 0x3ca   : > { %18363 = vst [vmem:[#allocation18_spill] sm:$0xff] %v16364_v34  ;;  %v8606_v54 = vsel %vm18365_vm14, %v8596_v39, %v8605_v52  ;;  %v8622_v34 = vrot.slane %v8620_v31, 3  ;;  %v8615_v51 = vsel %vm18353_vm8, %v8605_v52, %v8614_v41  ;;  %v8169_v52 = vrot.slane %v18349_v13, 2  ;;  %vm18379_vm14 = vmmov %vm18368_vm2 }
 0x3cc   : > { %11282 = vmatmul.mubr.msk.bf16.gmra.mxu0 %vm18359_vm13, %v8588_v0  ;;  %v16370_v0 = vadd.f32 %v16283_v16, %v6252_v14  ;;  %v8166_v16 = vsel %vm18366_vm7, %v8163_v57, %v8165_v46  ;;  %v8623_v57 = vor.u32 %v8622_v34, %v8619_v47  ;;  %vm18373_vm13 = vmmov %vm18337_vm1 }
 0x3cd   : > { %11236 = vmatmul.mubr.msk.bf16.gmra.mxu1 %vm18361_vm3, %v8162_v10  ;;  %11285 = vmatprep.mubr.msk.bf16.mxu0 %vm18362_vm6, %v8597_v11  ;;  %v11108_v10 = vpop.f32.mrf.mxu0  ;;  %v11022_v11 = vpop.f32.mrf.mxu1  ;;  %vm18375_vm3 = vmmov %vm18330_vm0 }
 0x3ce   : > { %11239 = vmatprep.mubr.msk.bf16.mxu1 %vm18364_vm10, %v8164_v17  ;;  %v16375_v29 = vadd.f32 %v16298_v33, %v11022_v11  ;;  %v8168_v33 = vsel %vm18368_vm2, %v8165_v46, %v8167_v30  ;;  %v8171_v11 = vrot.slane %v15969_v62, 2  ;;  %vm18376_vm0 = vmmov %vm18337_vm1 }
 0x3cf   : > { %v7075_v38 = vpop.f32.mrf.mxu0  ;;  %v6255_v17 = vpop.f32.mrf.mxu1  ;;  %vm18377_vm6 = vmmov %vm18368_vm2 }
 0x3d0   : > { %v16379_v43 = vadd.f32 %v16313_v5, %v6255_v17  ;;  %v8172_v13 = vsel %vm18375_vm3, %v8169_v52, %v8171_v11  ;;  %vm18378_vm10 = vmmov %vm18376_vm0 }
 0x3d1   : > { %v11111_v55 = vpop.f32.mrf.mxu0  ;;  %v11025_v14 = vpop.f32.mrf.mxu1  ;;  %vm18380_vm7 = vmmov %vm18376_vm0 }
 0x3d2   : > { %v16388_v39 = vadd.f32 %v16326_v59, %v11025_v14  ;;  %v8624_v59 = vsel %vm18371_vm15, %v8614_v41, %v8623_v57  ;;  %vm18382_vm8 = vmmov %vm18376_vm0 }
 0x3d3   : > { %v7088_v5 = vpop.f32.mrf.mxu0  ;;  %v6268_v24 = vpop.f32.mrf.mxu1  ;;  %vm18392_vm15 = vmmov %vm18376_vm0 }
 0x3d4   : > { %11286 = vmatmul.mubr.msk.bf16.gmra.mxu0 %vm18367_vm9, %v8606_v54  ;;  %v16392_v56 = vadd.f32 %v16337_v32, %v6268_v24  ;;  %vm18381_vm9 = vmmov %vm18368_vm2 }
 0x3d5   : > { %11240 = vmatmul.mubr.msk.bf16.gmra.mxu1 %vm18337_vm1, %v8166_v16  ;;  %11289 = vmatprep.mubr.msk.bf16.mxu0 %vm18369_vm5, %v8615_v51  ;;  %v11112_v23 = vpop.f32.mrf.mxu0  ;;  %v11026_v31 = vpop.f32.mrf.mxu1  ;;  %v8170_v51 = vsel %vm18372_vm11, %v8167_v30, %v8169_v52  ;;  %vm18384_vm1 = vmmov %vm18376_vm0 }
 0x3d6   : > { %11243 = vmatprep.mubr.msk.bf16.mxu1 %vm18370_vm4, %v8168_v33  ;;  %v16396_v46 = vadd.f32 %v11064_v2, %v11026_v31  ;;  %vm18386_vm2 = vmmov %vm18376_vm0 }
 0x3d7   : > { %v7091_v17 = vpop.f32.mrf.mxu0  ;;  %v6271_v54 = vpop.f32.mrf.mxu1  ;;  %vm18388_vm5 = vmmov %vm18376_vm0 }
 0x3d8   : > { %v16399_v16 = vadd.f32 %v6487_v21, %v6271_v54  ;;  %v8173_v21 = vrot.slane %v16003_v63, 2  ;;  %vm18390_vm4 = vmmov %vm18376_vm0 }
 0x3d9   : > { %v11115_v34 = vpop.f32.mrf.mxu0  ;;  %v11069_v32 = vpop.f32.mrf.mxu1  ;;  %vm18394_vm11 = vmmov %vm18376_vm0 }
 0x3da   : > { %v6778_v62 = vadd.f32 %v11069_v32, %v16097_v60  ;;  %v8175_v60 = vrot.slane %v16005_v53, 2  ;;  %vm18400_vm3 = vmmov %vm18376_vm0 }
 0x3db   : > { %v7104_v2 = vpop.f32.mrf.mxu0  ;;  %v6633_v47 = vpop.f32.mrf.mxu1 }
 0x3dc   : > { %11290 = vmatmul.mubr.msk.bf16.gmra.mxu0 %vm18373_vm13, %v8624_v59  ;;  %v6776_v41 = vadd.f32 %v6633_v47, %v16104_v45  ;;  %v16410_v30 = vadd.f32 %v16356_v8, %v6778_v62  ;;  %v8174_v59 = vsel %vm18377_vm6, %v8171_v11, %v8173_v21  ;;  %v11549_v45 = vld [vmem:[#allocation3 + $0xa0] ss:$0 sps:$4 sm:$0x33]   ;;  %v8176_v8 = vsel %vm18379_vm14, %v8173_v21, %v8175_v60  ;;  %vm18396_vm13 = vmmov %vm18376_vm0 }
 0x3dd   : > { %11244 = vmatmul.mubr.msk.bf16.gmra.mxu1 %vm18374_vm12, %v8170_v51  ;;  %v11116_v14 = vpop.f32.mrf.mxu0  ;;  %v11070_v33 = vpop.f32.mrf.mxu1  ;;  %v8177_v11 = vrot.slane %v11549_v45, 2  ;;  %vm18398_vm12 = vmmov %vm18376_vm0 }
 0x3de   : > { %11247 = vmatprep.mubr.msk.bf16.mxu1 %vm18376_vm0, %v8172_v13  ;;  %v6779_v24 = vadd.f32 %v11070_v33, %v16107_v48  ;;  %v16413_v31 = vadd.f32 %v7072_v6, %v6776_v41  ;;  %vm18404_vm6 = vmmov %vm18376_vm0 }
 0x3df   : > { %v7107_v57 = vpop.f32.mrf.mxu0  ;;  %v6636_v52 = vpop.f32.mrf.mxu1  ;;  %vm18408_vm14 = vmmov %vm18376_vm0 }
 0x3e0   : > { %v6777_v54 = vadd.f32 %v6636_v52, %v16112_v19  ;;  %v16418_v63 = vadd.f32 %v11108_v10, %v6779_v24  ;;  %v8178_v52 = vsel %vm18381_vm9, %v8175_v60, %v8177_v11  ;;  %vm18412_vm9 = vmmov %vm18376_vm0 }
 0x3e1   : > { %v11119_v51 = vpop.f32.mrf.mxu0  ;;  %v11073_v32 = vpop.f32.mrf.mxu1 }
 0x3e2   : > { %v6782_v48 = vadd.f32 %v11073_v32, %v16144_v58  ;;  %v16424_v13 = vadd.f32 %v7075_v38, %v6777_v54 }
 0x3e3   : > { %v7120_v6 = vpop.f32.mrf.mxu0  ;;  %v6649_v53 = vpop.f32.mrf.mxu1 }
 0x3e4   : > { %v6780_v19 = vadd.f32 %v6649_v53, %v16153_v26  ;;  %v16427_v47 = vadd.f32 %v11111_v55, %v6782_v48  ;;  %v18383_v55 = vld [vmem:[#allocation54_spill] sm:$0xff] }
 0x3e5   : > { %11248 = vmatmul.mubr.msk.bf16.gmra.mxu1 %vm18378_vm10, %v8174_v59  ;;  %v11120_v62 = vpop.f32.mrf.mxu0  ;;  %v11074_v10 = vpop.f32.mrf.mxu1  ;;  %vm18406_vm10 = vmmov %vm18376_vm0 }
 0x3e6   : > { %11251 = vmatprep.mubr.msk.bf16.mxu1 %vm18380_vm7, %v8176_v8  ;;  %v6783_v41 = vadd.f32 %v11074_v10, %v16161_v9  ;;  %v16430_v24 = vadd.f32 %v7088_v5, %v6780_v19  ;;  %vm18410_vm7 = vmmov %vm18376_vm0 }
 0x3e7   : > { %v7123_v33 = vpop.f32.mrf.mxu0  ;;  %v6652_v21 = vpop.f32.mrf.mxu1 }
 0x3e8   : > { %v6781_v58 = vadd.f32 %v6652_v21, %v16171_v12  ;;  %v16434_v54 = vadd.f32 %v11112_v23, %v6783_v41  ;;  %v18385_v41 = vld [vmem:[#allocation44_spill] sm:$0xff] }
 0x3e9   : > { %v11123_v38 = vpop.f32.mrf.mxu0  ;;  %v11077_v59 = vpop.f32.mrf.mxu1 }
 0x3ea   : > { %v6786_v26 = vadd.f32 %v11077_v59, %v16192_v28  ;;  %v16440_v45 = vadd.f32 %v7091_v17, %v6781_v58 }
 0x3eb   : > { %v7136_v9 = vpop.f32.mrf.mxu0  ;;  %v6665_v5 = vpop.f32.mrf.mxu1 }
 0x3ec   : > { %v6784_v32 = vadd.f32 %v6665_v5, %v16199_v40  ;;  %v16443_v8 = vadd.f32 %v11115_v34, %v6786_v26  ;;  %v18387_v34 = vld [vmem:[#allocation39_spill] sm:$0xff] }
 0x3ed   : > { %11252 = vmatmul.mubr.msk.bf16.gmra.mxu1 %vm18382_vm8, %v8178_v52  ;;  %v11124_v12 = vpop.f32.mrf.mxu0  ;;  %v11078_v60 = vpop.f32.mrf.mxu1  ;;  %vm18414_vm8 = vmmov %vm18376_vm0 }
 0x3ee   : > { %11295 = vmatprep.mubr.msk.bf16.mxu1 %vm18384_vm1, %v18383_v55  ;;  %v6787_v23 = vadd.f32 %v11078_v60, %v16206_v15  ;;  %v16446_v53 = vadd.f32 %v7104_v2, %v6784_v32  ;;  %vm18416_vm1 = vmmov %vm18376_vm0 }
 0x3ef   : > { %v7139_v48 = vpop.f32.mrf.mxu0  ;;  %v6668_v19 = vpop.f32.mrf.mxu1 }
 0x3f0   : > { %v6785_v28 = vadd.f32 %v6668_v19, %v16214_v20  ;;  %v16449_v10 = vadd.f32 %v11116_v14, %v6787_v23  ;;  %v18389_v23 = vld [vmem:[#allocation77_spill] sm:$0xff] }
 0x3f1   : > { %v11127_v11 = vpop.f32.mrf.mxu0  ;;  %v11081_v17 = vpop.f32.mrf.mxu1 }
 0x3f2   : > { %v6790_v40 = vadd.f32 %v11081_v17, %v16231_v25  ;;  %v16456_v15 = vadd.f32 %v7107_v57, %v6785_v28 }
 0x3f3   : > { %v7152_v21 = vpop.f32.mrf.mxu0  ;;  %v6681_v2 = vpop.f32.mrf.mxu1 }
 0x3f4   : > { %v6788_v58 = vadd.f32 %v6681_v2, %v16240_v36  ;;  %v16459_v20 = vadd.f32 %v11119_v51, %v6790_v40  ;;  %v18391_v51 = vld [vmem:[#allocation56_spill] sm:$0xff] }
 0x3f5   : > { %11296 = vmatmul.mubr.msk.bf16.vlgmr.msra.gmra.mxu1 %vm18386_vm2, %v18385_v41  ;;  %v11128_v52 = vpop.f32.mrf.mxu0  ;;  %v11082_v14 = vpop.f32.mrf.mxu1  ;;  %vm18418_vm2 = vmmov %vm18376_vm0 }
 0x3f6   : > { %11299 = vmatprep.mubr.msk.bf16.mxu1 %vm18388_vm5, %v18387_v34  ;;  %v6791_v59 = vadd.f32 %v11082_v14, %v16249_v7  ;;  %v16462_v55 = vadd.f32 %v7120_v6, %v6788_v58  ;;  %vm9276_vm5 = vcmask 31746  }
 0x3f7   : > { %v7155_v26 = vpop.f32.mrf.mxu0  ;;  %v6684_v5 = vpop.f32.mrf.mxu1 }
 0x3f8   : > { %v6789_v25 = vadd.f32 %v6684_v5, %v16257_v37  ;;  %v16465_v60 = vadd.f32 %v11120_v62, %v6791_v59  ;;  %v18393_v59 = vld [vmem:[#allocation50_spill] sm:$0xff] }
 0x3f9   : > { %v11131_v32 = vpop.f32.mrf.mxu0 }
 0x3fa   : > { %v16472_v7 = vadd.f32 %v7123_v33, %v6789_v25 }
 0x3fb   : > { %v11085_v57 = vpop.f32.mrf.mxu1  ;;  %v7168_v19 = vpop.f32.mrf.mxu0 }
 0x3fc   : > { %v6794_v36 = vadd.f32 %v11085_v57, %v16272_v42 }
 0x3fd   : > { %11300 = vmatmul.mubr.msk.bf16.gmra.mxu1 %vm18390_vm4, %v18389_v23  ;;  %v6697_v6 = vpop.f32.mrf.mxu1  ;;  %v11132_v17 = vpop.f32.mrf.mxu0  ;;  %vm18428_vm4 = vcmask 1041408  }
 0x3fe   : > { %11303 = vmatprep.mubr.msk.bf16.mxu1 %vm18392_vm15, %v18391_v51  ;;  %v6792_v28 = vadd.f32 %v6697_v6, %v16281_v22  ;;  %v16475_v37 = vadd.f32 %v11123_v38, %v6794_v36  ;;  %v18395_v38 = vld [vmem:[#allocation41_spill] sm:$0xff]  ;;  %vm18429_vm15 = vmmov %vm18376_vm0 }
 0x3ff   : > { %v11086_v62 = vpop.f32.mrf.mxu1  ;;  %v7171_v40 = vpop.f32.mrf.mxu0 }
 0x400   : > { %v6795_v41 = vadd.f32 %v11086_v62, %v16289_v49  ;;  %v16478_v34 = vadd.f32 %v7136_v9, %v6792_v28 }
 0x401   : > { %v6700_v2 = vpop.f32.mrf.mxu1  ;;  %v11135_v58 = vpop.f32.mrf.mxu0 }
 0x402   : > { %v6793_v42 = vadd.f32 %v6700_v2, %v16294_v1  ;;  %v16481_v14 = vadd.f32 %v11124_v12, %v6795_v41  ;;  %v18397_v41 = vld [vmem:[#allocation57_spill] sm:$0xff] }
 0x403   : > { %v11089_v33 = vpop.f32.mrf.mxu1  ;;  %v7184_v5 = vpop.f32.mrf.mxu0 }
 0x404   : > { %v6798_v22 = vadd.f32 %v11089_v33, %v16304_v61  ;;  %v16488_v49 = vadd.f32 %v7139_v48, %v6793_v42 }
 0x405   : > { %11304 = vmatmul.mubr.msk.bf16.gmra.mxu1 %vm18394_vm11, %v18393_v59  ;;  %v6713_v9 = vpop.f32.mrf.mxu1  ;;  %v11136_v57 = vpop.f32.mrf.mxu0  ;;  %vm9321_vm11 = vcmask 31750  }
 0x406   : > { %11307 = vmatprep.mubr.msk.bf16.mxu1 %vm18396_vm13, %v18395_v38  ;;  %v6796_v25 = vadd.f32 %v6713_v9, %v16311_v4  ;;  %v16491_v1 = vadd.f32 %v11127_v11, %v6798_v22  ;;  %v18399_v11 = vld [vmem:[#allocation52_spill] sm:$0xff]  ;;  %vm9285_vm13 = vcmask 1043456  }
 0x407   : > { %v11090_v12 = vpop.f32.mrf.mxu1  ;;  %v7187_v36 = vpop.f32.mrf.mxu0 }
 0x408   : > { %v6799_v23 = vadd.f32 %v11090_v12, %v16319_v27  ;;  %v16494_v51 = vadd.f32 %v7152_v21, %v6796_v25 }
 0x409   : > { %v6716_v6 = vpop.f32.mrf.mxu1  ;;  %v11139_v28 = vpop.f32.mrf.mxu0 }
 0x40a   : > { %v6797_v61 = vadd.f32 %v6716_v6, %v16324_v35  ;;  %v16497_v62 = vadd.f32 %v11128_v52, %v6799_v23  ;;  %v18401_v23 = vld [vmem:[#allocation45_spill] sm:$0xff] }
 0x40b   : > { %v11093_v48 = vpop.f32.mrf.mxu1  ;;  %v7200_v2 = vpop.f32.mrf.mxu0 }
 0x40c   : > { %v6802_v4 = vadd.f32 %v11093_v48, %v16334_v3  ;;  %v16504_v27 = vadd.f32 %v7155_v26, %v6797_v61 }
 0x40d   : > { %11308 = vmatmul.mubr.msk.bf16.gmra.mxu1 %vm18398_vm12, %v18397_v41  ;;  %v6729_v21 = vpop.f32.mrf.mxu1  ;;  %v11140_v33 = vpop.f32.mrf.mxu0  ;;  %vm18430_vm12 = vmmov %vm18376_vm0 }
 0x40e   : > { %11311 = vmatprep.mubr.msk.bf16.mxu1 %vm18400_vm3, %v18399_v11  ;;  %v6800_v42 = vadd.f32 %v6729_v21, %v16342_v50  ;;  %v16507_v35 = vadd.f32 %v11131_v32, %v6802_v4  ;;  %v18402_v50 = vld [vmem:[#allocation18_spill] sm:$0xff]  ;;  %v18403_v32 = vld [vmem:[#allocation59_spill] sm:$0xff]  ;;  %vm18431_vm3 = vcmask 1045504  }
 0x40f   : > { %v11094_v52 = vpop.f32.mrf.mxu1  ;;  %v7203_v22 = vpop.f32.mrf.mxu0 }
 0x410   : > { %v6803_v59 = vadd.f32 %v11094_v52, %v16347_v18  ;;  %v16510_v38 = vadd.f32 %v7168_v19, %v6800_v42 }
 0x411   : > { %v6732_v9 = vpop.f32.mrf.mxu1  ;;  %v11183_v25 = vpop.f32.mrf.mxu0 }
 0x412   : > { %v6801_v3 = vadd.f32 %v6732_v9, %v16353_v44  ;;  %v16513_v12 = vadd.f32 %v11132_v17, %v6803_v59 }
 0x413   : > { %v11097_v26 = vpop.f32.mrf.mxu1  ;;  %v7831_v61 = vpop.f32.mrf.mxu0 }
 0x414   : > { %v6806_v6 = vadd.f32 %v11097_v26, %v18402_v50  ;;  %v16520_v18 = vadd.f32 %v7171_v40, %v6801_v3  ;;  %v18405_v3 = vld [vmem:[#allocation55_spill] sm:$0xff] }
 0x415   : > { %11312 = vmatmul.mubr.msk.bf16.gmra.mxu1 %vm18376_vm0, %v18401_v23  ;;  %v6745_v19 = vpop.f32.mrf.mxu1  ;;  %v11184_v41 = vpop.f32.mrf.mxu0 }
 0x416   : > { %11315 = vmatprep.mubr.msk.bf16.mxu1 %vm18404_vm6, %v18403_v32  ;;  %v6804_v48 = vadd.f32 %v6745_v19, %v16370_v0  ;;  %v16523_v44 = vadd.f32 %v11135_v58, %v6806_v6  ;;  %v18407_v58 = vld [vmem:[#allocation48_spill] sm:$0xff]  ;;  %vm9299_vm6 = vcmask 31748  }
 0x417   : > { %v11098_v17 = vpop.f32.mrf.mxu1  ;;  %v7834_v11 = vpop.f32.mrf.mxu0 }
 0x418   : > { %v6807_v4 = vadd.f32 %v11098_v17, %v16375_v29  ;;  %v16526_v21 = vadd.f32 %v7184_v5, %v6804_v48 }
 0x419   : > { %v6748_v42 = vpop.f32.mrf.mxu1  ;;  %v11187_v59 = vpop.f32.mrf.mxu0 }
 0x41a   : > { %v6805_v52 = vadd.f32 %v6748_v42, %v16379_v43  ;;  %v16529_v9 = vadd.f32 %v11136_v57, %v6807_v4  ;;  %v18409_v42 = vld [vmem:[#allocation4_spill] sm:$0xff] }
 0x41b   : > { %v11101_v40 = vpop.f32.mrf.mxu1  ;;  %v7847_v26 = vpop.f32.mrf.mxu0 }
 0x41c   : > { %v6810_v0 = vadd.f32 %v11101_v40, %v16388_v39  ;;  %v16536_v29 = vadd.f32 %v7187_v36, %v6805_v52 }
 0x41d   : > { %11316 = vmatmul.mubr.msk.bf16.gmra.mxu1 %vm18406_vm10, %v18405_v3  ;;  %v6761_v5 = vpop.f32.mrf.mxu1  ;;  %v11188_v50 = vpop.f32.mrf.mxu0  ;;  %vm18432_vm10 = vcmask 27648  }
 0x41e   : > { %11319 = vmatprep.mubr.msk.bf16.mxu1 %vm18408_vm14, %v18407_v58  ;;  %v6808_v23 = vadd.f32 %v6761_v5, %v16392_v56  ;;  %v16539_v43 = vadd.f32 %v11139_v28, %v6810_v0  ;;  %v18411_v28 = vld [vmem:[#allocation60_spill] sm:$0xff]  ;;  %vm18433_vm14 = vcmask 25600  }
 0x41f   : > { %v11102_v57 = vpop.f32.mrf.mxu1  ;;  %v7850_v32 = vpop.f32.mrf.mxu0 }
 0x420   : > { %v6811_v6 = vadd.f32 %v11102_v57, %v16396_v46  ;;  %v16542_v19 = vadd.f32 %v7200_v2, %v6808_v23 }
 0x421   : > { %v6764_v48 = vpop.f32.mrf.mxu1  ;;  %v11191_v17 = vpop.f32.mrf.mxu0 }
 0x422   : > { %v6809_v39 = vadd.f32 %v6764_v48, %v16399_v16  ;;  %v16545_v4 = vadd.f32 %v11140_v33, %v6811_v6  ;;  %v18413_v48 = vld [vmem:[#allocation58_spill] sm:$0xff] }
 0x423   : > { %v11145_v36 = vpop.f32.mrf.mxu1  ;;  %v7863_v52 = vpop.f32.mrf.mxu0 }
 0x424   : > { %v7663_v56 = vadd.f32 %v11145_v36, %v16410_v30  ;;  %v16552_v46 = vadd.f32 %v7203_v22, %v6809_v39 }
 0x425   : > { %11320 = vmatmul.mubr.msk.bf16.gmra.mxu1 %vm18410_vm7, %v18409_v42  ;;  %v7518_v2 = vpop.f32.mrf.mxu1  ;;  %v11192_v3 = vpop.f32.mrf.mxu0  ;;  %vm18434_vm7 = vmmov %vm18376_vm0 }
 0x426   : > { %11323 = vmatprep.mubr.msk.bf16.mxu1 %vm18412_vm9, %v18411_v28  ;;  %v7661_v40 = vadd.f32 %v7518_v2, %v16413_v31  ;;  %v16555_v16 = vadd.f32 %v11183_v25, %v7663_v56  ;;  %v18415_v25 = vld [vmem:[#allocation51_spill] sm:$0xff]  ;;  %vm18435_vm9 = vmmov %vm18376_vm0 }
 0x427   : > { %v11146_v33 = vpop.f32.mrf.mxu1  ;;  %v7866_v58 = vpop.f32.mrf.mxu0 }
 0x428   : > { %v7664_v0 = vadd.f32 %v11146_v33, %v16418_v63  ;;  %v16558_v5 = vadd.f32 %v7831_v61, %v7661_v40 }
 0x429   : > { %v7521_v23 = vpop.f32.mrf.mxu1 }
 0x42a   : > { %v7662_v30 = vadd.f32 %v7521_v23, %v16424_v13  ;;  %v16561_v6 = vadd.f32 %v11184_v41, %v7664_v0  ;;  %v18417_v23 = vld [vmem:[#allocation5_spill] sm:$0xff] }
 0x42c   : > { %v11195_v57 = vpop.f32.mrf.mxu0  ;;  %v16568_v63 = vadd.f32 %v7834_v11, %v7662_v30 }
 0x42d   : > { %v11149_v22 = vpop.f32.mrf.mxu1  ;;  %11324 = vmatmul.mubr.msk.bf16.gmra.mxu1 %vm18414_vm8, %v18413_v48  ;;  %vm9324_vm8 = vcmask 29696  }
 0x42e   : > { %v7667_v31 = vadd.f32 %v11149_v22, %v16427_v47  ;;  %11327 = vmatprep.mubr.msk.bf16.mxu1 %vm18416_vm1, %v18415_v25  ;;  %v7879_v39 = vpop.f32.mrf.mxu0  ;;  %vm18436_vm1 = vmmov %vm18376_vm0 }
 0x42f   : > { %v7534_v61 = vpop.f32.mrf.mxu1 }
 0x430   : > { %v7665_v36 = vadd.f32 %v7534_v61, %v16430_v24  ;;  %v11196_v42 = vpop.f32.mrf.mxu0  ;;  %v16571_v13 = vadd.f32 %v11187_v59, %v7667_v31 }
 0x431   : > { %v11150_v41 = vpop.f32.mrf.mxu1 }
 0x432   : > { %v7668_v56 = vadd.f32 %v11150_v41, %v16434_v54  ;;  %v7882_v28 = vpop.f32.mrf.mxu0  ;;  %v16574_v2 = vadd.f32 %v7847_v26, %v7665_v36 }
 0x433   : > { %v7537_v40 = vpop.f32.mrf.mxu1 }
 0x434   : > { %v7666_v47 = vadd.f32 %v7537_v40, %v16440_v45  ;;  %v11199_v33 = vpop.f32.mrf.mxu0  ;;  %v16577_v0 = vadd.f32 %v11188_v50, %v7668_v56 }
 0x435   : > { %v11153_v11 = vpop.f32.mrf.mxu1  ;;  %11328 = vmatmul.mubr.msk.bf16.gmra.mxu1 %vm18418_vm2, %v18417_v23  ;;  %vm18437_vm2 = vmmov %vm18428_vm4 }
 0x436   : > { %v7671_v24 = vadd.f32 %v11153_v11, %v16443_v8  ;;  %v7895_v59 = vpop.f32.mrf.mxu0  ;;  %v16582_v30 = vadd.f32 %v7850_v32, %v7666_v47 }
 0x437   : > { %v7550_v22 = vpop.f32.mrf.mxu1 }
 0x438   : > { %v7669_v54 = vadd.f32 %v7550_v22, %v16446_v53  ;;  %v11200_v26 = vpop.f32.mrf.mxu0  ;;  %v16585_v48 = vadd.f32 %v11191_v17, %v7671_v24 }
 0x439   : > { %v11154_v31 = vpop.f32.mrf.mxu1 }
 0x43a   : > { %v7672_v45 = vadd.f32 %v11154_v31, %v16449_v10  ;;  %v7898_v50 = vpop.f32.mrf.mxu0  ;;  %v16588_v25 = vadd.f32 %v7863_v52, %v7669_v54 }
 0x43b   : > { %v7553_v61 = vpop.f32.mrf.mxu1 }
 0x43c   : > { %v7670_v36 = vadd.f32 %v7553_v61, %v16456_v15  ;;  %v11203_v41 = vpop.f32.mrf.mxu0  ;;  %v16591_v8 = vadd.f32 %v11192_v3, %v7672_v45 }
 0x43d   : > { %v11157_v32 = vpop.f32.mrf.mxu1 }
 0x43e   : > { %v7675_v56 = vadd.f32 %v11157_v32, %v16459_v20  ;;  %v7911_v40 = vpop.f32.mrf.mxu0  ;;  %v16594_v53 = vadd.f32 %v7866_v58, %v7670_v36 }
 0x43f   : > { %v7566_v17 = vpop.f32.mrf.mxu1 }
 0x440   : > { %v7673_v47 = vadd.f32 %v7566_v17, %v16462_v55  ;;  %v11204_v11 = vpop.f32.mrf.mxu0  ;;  %v16597_v10 = vadd.f32 %v11195_v57, %v7675_v56 }
 0x441   : > { %v11158_v52 = vpop.f32.mrf.mxu1 }
 0x442   : > { %v7676_v23 = vadd.f32 %v11158_v52, %v16465_v60  ;;  %v7914_v24 = vpop.f32.mrf.mxu0  ;;  %v16600_v15 = vadd.f32 %v7879_v39, %v7673_v47 }
 0x443   : > { %v7569_v3 = vpop.f32.mrf.mxu1 }
 0x444   : > { %v7674_v22 = vadd.f32 %v7569_v3, %v16472_v7  ;;  %v11207_v54 = vpop.f32.mrf.mxu0  ;;  %v16603_v20 = vadd.f32 %v11196_v42, %v7676_v23 }
 0x445   : > { %v11161_v58 = vpop.f32.mrf.mxu1 }
 0x446   : > { %v7679_v31 = vadd.f32 %v11161_v58, %v16475_v37  ;;  %v7927_v45 = vpop.f32.mrf.mxu0  ;;  %v16606_v55 = vadd.f32 %v7882_v28, %v7674_v22 }
 0x447   : > { %v7582_v57 = vpop.f32.mrf.mxu1 }
 0x448   : > { %v7677_v61 = vadd.f32 %v7582_v57, %v16478_v34  ;;  %v11208_v36 = vpop.f32.mrf.mxu0  ;;  %v16609_v60 = vadd.f32 %v11199_v33, %v7679_v31 }
 0x449   : > { %v11162_v39 = vpop.f32.mrf.mxu1 }
 0x44a   : > { %v7680_v32 = vadd.f32 %v11162_v39, %v16481_v14  ;;  %v7930_v56 = vpop.f32.mrf.mxu0  ;;  %v16612_v7 = vadd.f32 %v7895_v59, %v7677_v61 }
 0x44b   : > { %v7585_v42 = vpop.f32.mrf.mxu1 }
 0x44c   : > { %v7678_v17 = vadd.f32 %v7585_v42, %v16488_v49  ;;  %v16615_v47 = vadd.f32 %v11200_v26, %v7680_v32  ;;  %v11211_v28 = vpop.f32.mrf.mxu0 }
 0x44d   : > { %v11165_v37 = vpop.f32.mrf.mxu1 }
 0x44e   : > { %v7683_v52 = vadd.f32 %v11165_v37, %v16491_v1  ;;  %v16618_v23 = vadd.f32 %v7898_v50, %v7678_v17  ;;  %v7943_v22 = vpop.f32.mrf.mxu0 }
 0x44f   : > { %v7598_v34 = vpop.f32.mrf.mxu1 }
 0x450   : > { %v7681_v33 = vadd.f32 %v7598_v34, %v16494_v51  ;;  %v16621_v3 = vadd.f32 %v11203_v41, %v7683_v52  ;;  %v11212_v1 = vpop.f32.mrf.mxu0 }
 0x451   : > { %v11166_v14 = vpop.f32.mrf.mxu1 }
 0x452   : > { %v7684_v59 = vadd.f32 %v11166_v14, %v16497_v62  ;;  %v16624_v58 = vadd.f32 %v7911_v40, %v7681_v33  ;;  %v7946_v62 = vpop.f32.mrf.mxu0 }
 0x453   : > { %v7601_v49 = vpop.f32.mrf.mxu1 }
 0x454   : > { %v7682_v26 = vadd.f32 %v7601_v49, %v16504_v27  ;;  %v16627_v31 = vadd.f32 %v11204_v11, %v7684_v59 }
 0x455   : > { %v11169_v57 = vpop.f32.mrf.mxu1 }
 0x456   : > { %v7687_v50 = vadd.f32 %v11169_v57, %v16507_v35  ;;  %v16630_v61 = vadd.f32 %v7914_v24, %v7682_v26  ;;  %v11215_v35 = vpop.f32.mrf.mxu0 }
 0x457   : > { %v7614_v51 = vpop.f32.mrf.mxu1 }
 0x458   : > { %v7685_v41 = vadd.f32 %v7614_v51, %v16510_v38  ;;  %v16633_v39 = vadd.f32 %v11207_v54, %v7687_v50  ;;  %v7959_v33 = vpop.f32.mrf.mxu0 }
 0x459   : > { %v11170_v32 = vpop.f32.mrf.mxu1 }
 0x45a   : > { %v7688_v40 = vadd.f32 %v11170_v32, %v16513_v12  ;;  %v16636_v42 = vadd.f32 %v7927_v45, %v7685_v41  ;;  %v11216_v49 = vpop.f32.mrf.mxu0 }
 0x45b   : > { %v7617_v27 = vpop.f32.mrf.mxu1 }
 0x45c   : > { %v7686_v11 = vadd.f32 %v7617_v27, %v16520_v18  ;;  %v16639_v17 = vadd.f32 %v11208_v36, %v7688_v40  ;;  %v7962_v50 = vpop.f32.mrf.mxu0 }
 0x45d   : > { %v11173_v37 = vpop.f32.mrf.mxu1 }
 0x45e   : > { %v7691_v24 = vadd.f32 %v11173_v37, %v16523_v44  ;;  %v16642_v52 = vadd.f32 %v7930_v56, %v7686_v11  ;;  %v16665_v32 = vpop.f32.mrf.mxu0 }
 0x45f   : > { %v7630_v38 = vpop.f32.mrf.mxu1 }
 0x460   : > { %v7689_v54 = vadd.f32 %v7630_v38, %v16526_v21  ;;  %v16645_v34 = vadd.f32 %v11211_v28, %v7691_v24 }
 0x461   : > { %v11174_v12 = vpop.f32.mrf.mxu1 }
 0x462   : > { %v7692_v45 = vadd.f32 %v11174_v12, %v16529_v9  ;;  %v16648_v14 = vadd.f32 %v7943_v22, %v7689_v54 }
 0x463   : > { %v7633_v18 = vpop.f32.mrf.mxu1 }
 0x464   : > { %v7690_v36 = vadd.f32 %v7633_v18, %v16536_v29  ;;  %v16651_v59 = vadd.f32 %v11212_v1, %v7692_v45 }
 0x465   : > { %v11177_v44 = vpop.f32.mrf.mxu1 }
 0x466   : > { %v7695_v56 = vadd.f32 %v11177_v44, %v16539_v43  ;;  %v16654_v26 = vadd.f32 %v7946_v62, %v7690_v36 }
 0x467   : > { %v7646_v21 = vpop.f32.mrf.mxu1 }
 0x468   : > { %v7693_v28 = vadd.f32 %v7646_v21, %v16542_v19  ;;  %v16657_v57 = vadd.f32 %v11215_v35, %v7695_v56 }
 0x469   : > { %v11178_v9 = vpop.f32.mrf.mxu1 }
 0x46a   : > { %v7696_v22 = vadd.f32 %v11178_v9, %v16545_v4  ;;  %v16660_v51 = vadd.f32 %v7959_v33, %v7693_v28  ;;  %v16675_v4 = vpop.f32.mrf.mxu0 }
 0x46b   : > { %v7649_v29 = vpop.f32.mrf.mxu1 }
 0x46c   : > { %v7694_v1 = vadd.f32 %v7649_v29, %v16552_v46  ;;  %v16663_v41 = vadd.f32 %v11216_v49, %v7696_v22  ;;  %v16683_v24 = vpop.f32.mrf.mxu0 }
 0x46d   : > { %v11221_v43 = vpop.f32.mrf.mxu1 }
 0x46e   : > { %v16668_v62 = vadd.f32 %v11221_v43, %v16555_v16  ;;  %v16670_v19 = vadd.f32 %v7962_v50, %v7694_v1  ;;  %v16691_v33 = vpop.f32.mrf.mxu0 }
 0x46f   : > { %v8270_v40 = vpop.f32.mrf.mxu1 }
 0x470   : > { %v16673_v27 = vadd.f32 %v8270_v40, %v16558_v5  ;;  %v16699_v18 = vpop.f32.mrf.mxu0 }
 0x471   : > { %v11222_v11 = vpop.f32.mrf.mxu1 }
 0x472   : > { %v16678_v37 = vadd.f32 %v11222_v11, %v16561_v6  ;;  %v16707_v44 = vpop.f32.mrf.mxu0 }
 0x473   : > { %v8273_v46 = vpop.f32.mrf.mxu1 }
 0x474   : > { %v16681_v35 = vadd.f32 %v8273_v46, %v16568_v63  ;;  %v16715_v28 = vpop.f32.mrf.mxu0 }
 0x475   : > { %v11225_v16 = vpop.f32.mrf.mxu1 }
 0x476   : > { %v16686_v38 = vadd.f32 %v11225_v16, %v16571_v13  ;;  %v16723_v22 = vpop.f32.mrf.mxu0 }
 0x477   : > { %v8286_v54 = vpop.f32.mrf.mxu1 }
 0x478   : > { %v16689_v5 = vadd.f32 %v8286_v54, %v16574_v2  ;;  %v16731_v43 = vpop.f32.mrf.mxu0 }
 0x479   : > { %v11226_v12 = vpop.f32.mrf.mxu1 }
 0x47a   : > { %v16694_v6 = vadd.f32 %v11226_v12, %v16577_v0  ;;  %v16739_v46 = vpop.f32.mrf.mxu0 }
 0x47b   : > { %v8289_v45 = vpop.f32.mrf.mxu1 }
 0x47c   : > { %v16697_v63 = vadd.f32 %v8289_v45, %v16582_v30  ;;  %v16747_v12 = vpop.f32.mrf.mxu0 }
 0x47d   : > { %v11229_v36 = vpop.f32.mrf.mxu1 }
 0x47e   : > { %v16702_v13 = vadd.f32 %v11229_v36, %v16585_v48 }
 0x47f   : > { %v8302_v49 = vpop.f32.mrf.mxu1 }
 0x480   : > { %v16705_v2 = vadd.f32 %v8302_v49, %v16588_v25  ;;  %v16755_v49 = vpop.f32.mrf.mxu0 }
 0x481   : > { %v11230_v56 = vpop.f32.mrf.mxu1 }
 0x482   : > { %v16710_v0 = vadd.f32 %v11230_v56, %v16591_v8 }
 0x483   : > { %v8305_v21 = vpop.f32.mrf.mxu1 }
 0x484   : > { %v16713_v30 = vadd.f32 %v8305_v21, %v16594_v53 }
 0x485   : > { %v11233_v50 = vpop.f32.mrf.mxu1 }
 0x486   : > { %v16718_v48 = vadd.f32 %v11233_v50, %v16597_v10  ;;  %v16763_v50 = vpop.f32.mrf.mxu0 }
 0x487   : > { %v8318_v9 = vpop.f32.mrf.mxu1 }
 0x488   : > { %v16721_v25 = vadd.f32 %v8318_v9, %v16600_v15 }
 0x489   : > { %v11234_v29 = vpop.f32.mrf.mxu1 }
 0x48a   : > { %v16726_v8 = vadd.f32 %v11234_v29, %v16603_v20 }
 0x48b   : > { %v8321_v1 = vpop.f32.mrf.mxu1 }
 0x48c   : > { %v16729_v53 = vadd.f32 %v8321_v1, %v16606_v55  ;;  %v16771_v1 = vpop.f32.mrf.mxu0 }
 0x48d   : > { %v11237_v40 = vpop.f32.mrf.mxu1 }
 0x48e   : > { %v16734_v10 = vadd.f32 %v11237_v40, %v16609_v60 }
 0x48f   : > { %v8334_v11 = vpop.f32.mrf.mxu1 }
 0x490   : > { %v16737_v15 = vadd.f32 %v8334_v11, %v16612_v7 }
 0x491   : > { %v11238_v16 = vpop.f32.mrf.mxu1 }
 0x492   : > { %v16742_v20 = vadd.f32 %v11238_v16, %v16615_v47  ;;  %v16779_v16 = vpop.f32.mrf.mxu0 }
 0x493   : > { %v8337_v54 = vpop.f32.mrf.mxu1 }
 0x494   : > { %v16745_v55 = vadd.f32 %v8337_v54, %v16618_v23 }
 0x495   : > { %v11241_v45 = vpop.f32.mrf.mxu1 }
 0x496   : > { %v16750_v60 = vadd.f32 %v11241_v45, %v16621_v3 }
 0x497   : > { %v8350_v36 = vpop.f32.mrf.mxu1 }
 0x498   : > { %v16753_v7 = vadd.f32 %v8350_v36, %v16624_v58  ;;  %v16787_v36 = vpop.f32.mrf.mxu0 }
 0x499   : > { %v11242_v56 = vpop.f32.mrf.mxu1 }
 0x49a   : > { %v16758_v47 = vadd.f32 %v11242_v56, %v16627_v31 }
 0x49b   : > { %v8353_v21 = vpop.f32.mrf.mxu1 }
 0x49c   : > { %v16761_v23 = vadd.f32 %v8353_v21, %v16630_v61 }
 0x49d   : > { %v11245_v9 = vpop.f32.mrf.mxu1 }
 0x49e   : > { %v16766_v3 = vadd.f32 %v11245_v9, %v16633_v39  ;;  %v16795_v9 = vpop.f32.mrf.mxu0 }
 0x49f   : > { %v8366_v29 = vpop.f32.mrf.mxu1 }
 0x4a0   : > { %v16769_v58 = vadd.f32 %v8366_v29, %v16636_v42 }
 0x4a1   : > { %v11246_v40 = vpop.f32.mrf.mxu1 }
 0x4a2   : > { %v16774_v31 = vadd.f32 %v11246_v40, %v16639_v17 }
 0x4a3   : > { %v8369_v11 = vpop.f32.mrf.mxu1 }
 0x4a4   : > { %v16777_v61 = vadd.f32 %v8369_v11, %v16642_v52  ;;  %v16803_v11 = vpop.f32.mrf.mxu0 }
 0x4a5   : > { %v11249_v54 = vpop.f32.mrf.mxu1 }
 0x4a6   : > { %18419 = vst [vmem:[#allocation17_spill] sm:$0xff] %v16777_v61  ;;  %v16782_v39 = vadd.f32 %v11249_v54, %v16645_v34 }
 0x4a7   : > { %v8382_v45 = vpop.f32.mrf.mxu1 }
 0x4a8   : > { %18420 = vst [vmem:[#allocation61_spill] sm:$0xff] %v16782_v39  ;;  %v16785_v42 = vadd.f32 %v8382_v45, %v16648_v14 }
 0x4a9   : > { %v11250_v56 = vpop.f32.mrf.mxu1 }
 0x4aa   : > { %18421 = vst [vmem:[#allocation24_spill] sm:$0xff] %v16785_v42  ;;  %v16790_v17 = vadd.f32 %v11250_v56, %v16651_v59  ;;  %v10161_v56 = vld [vmem:[%s11797_s29 + $0x10] sm:$0xff] }
 0x4ab   : > { %v8385_v52 = vpop.f32.mrf.mxu1 }
 0x4ac   : > { %18422 = vst [vmem:[#allocation36_spill] sm:$0xff] %v16790_v17  ;;  %v16793_v21 = vadd.f32 %v8385_v52, %v16654_v26  ;;  %v16815_v52 = vld [vmem:[%s11797_s29 + $0x18] sm:$0xff] }
 0x4ad   : > { %v11253_v34 = vpop.f32.mrf.mxu1 }
 0x4ae   : > { %18423 = vst [vmem:[#allocation66_spill] sm:$0xff] %v16793_v21  ;;  %v16798_v29 = vadd.f32 %v11253_v34, %v16657_v57  ;;  %v8861_v57 = vadd.f32 %v16665_v32, %v16668_v62  ;;  %v16817_v34 = vpop.f32.mrf.mxu0  ;;  %v9264_v32 = vrot.slane %v16815_v52, 6  ;;  %v10171_v52 = vld [vmem:[%s11797_s29 + $0x30] sm:$0xff] }
 0x4af   : > { %v8398_v40 = vpop.f32.mrf.mxu1  ;;  %v9308_v39 = vrot.slane %v10171_v52, 2 }
 0x4b0   : > { %18424 = vst [vmem:[#allocation8_spill] sm:$0xff] %v16798_v29  ;;  %v16801_v14 = vadd.f32 %v8398_v40, %v16660_v51  ;;  %v16822_v40 = vld [vmem:[%s17130_s4] ss:$0 sm:$0xff] }
 0x4b1   : > { %v11254_v54 = vpop.f32.mrf.mxu1  ;;  %v9251_v29 = vld [vmem:[%s11797_s29] sm:$0xff] }
 0x4b2   : > { %18425 = vst [vmem:[#allocation16_spill] sm:$0xff] %v16801_v14  ;;  %v16806_v59 = vadd.f32 %v11254_v54, %v16663_v41  ;;  %v9263_v54 = vrot.slane %v10161_v56, 6  ;;  %v16830_v14 = vpop.f32.mrf.mxu0 }
 0x4b3   : > { %v8401_v45 = vpop.f32.mrf.mxu1 }
 0x4b4   : > { %18426 = vst [vmem:[#allocation10_spill] sm:$0xff] %v16806_v59  ;;  %v16810_v26 = vadd.f32 %v8401_v45, %v16670_v19  ;;  %v8859_v19 = vadd.f32 %v16675_v4, %v16673_v27  ;;  %v8862_v59 = vadd.f32 %v16683_v24, %v16678_v37  ;;  %v8860_v27 = vadd.f32 %v16691_v33, %v16681_v35  ;;  %v10167_v4 = vld [vmem:[%s11797_s29 + $0x28] sm:$0xff] }
 0x4b5   : > { %v11297_v51 = vpop.f32.mrf.mxu1  ;;  %v9265_v37 = vsel %vm18428_vm4, %v9263_v54, %v9264_v32  ;;  %v9287_v42 = vrot.slane %v10167_v4, 4  ;;  %vm18438_vm4 = vmmov %vm18376_vm0 }
 0x4b6   : > { %18427 = vst [vmem:[#allocation67_spill] sm:$0xff] %v16810_v26  ;;  %v9174_v41 = vadd.f32 %v11297_v51, %v8861_v57 }
 0x4b7   : > { %v9029_v45 = vpop.f32.mrf.mxu1 }
 0x4b8   : > { %v9217_v62 = vadd.f32 %v16822_v40, %v9174_v41  ;;  %v9172_v26 = vadd.f32 %v9029_v45, %v8859_v19  ;;  %v10166_v41 = vld [vmem:[%s11797_s29 + $0x20] sm:$0xff]  ;;  %v16851_v19 = vld [vmem:[%s11797_s29 + $0x38] sm:$0xff]  ;;  %v16853_v45 = vpop.f32.mrf.mxu0 }
 0x4b9   : > { %v11298_v21 = vpop.f32.mrf.mxu1 }
 0x4ba   : > { %v9269_v57 = vadd.f32 %v9263_v54, %v9217_v62  ;;  %v9215_v56 = vadd.f32 %v16822_v40, %v9172_v26  ;;  %v9175_v51 = vadd.f32 %v11298_v21, %v8862_v59  ;;  %v8865_v21 = vadd.f32 %v16699_v18, %v16686_v38  ;;  %v9252_v62 = vld [vmem:[%s11797_s29 + $0x8] sm:$0xff] }
 0x4bb   : > { %v9032_v24 = vpop.f32.mrf.mxu1  ;;  %v8863_v54 = vadd.f32 %v16707_v44, %v16689_v5  ;;  %v16865_v5 = vpop.f32.mrf.mxu0  ;;  %v8866_v44 = vadd.f32 %v16715_v28, %v16694_v6  ;;  %v8869_v28 = vadd.f32 %v16731_v43, %v16702_v13 }
 0x4bc   : > { %v9272_v59 = vmax.f32 %v9269_v57, 0.0  ;;  %v9253_v26 = vadd.f32 %v9251_v29, %v9215_v56  ;;  %v9218_v35 = vadd.f32 %v16822_v40, %v9175_v51  ;;  %v9173_v33 = vadd.f32 %v9032_v24, %v8860_v27 }
 0x4bd   : > { %v11301_v17 = vpop.f32.mrf.mxu1  ;;  %v9286_v51 = vrot.slane %v10166_v41, 4  ;;  %v9309_v27 = vrot.slane %v16851_v19, 2  ;;  %v8864_v41 = vadd.f32 %v16723_v22, %v16697_v63 }
 0x4be   : > { %10163 = vst.msk [vmem:[%s16843_s27 + $0xe] sm:$0xfc] %vm9276_vm5, %v9272_v59  ;;  %v9255_v38 = vmax.f32 %v9253_v26, 0.0  ;;  %v9270_v18 = vadd.f32 %v9265_v37, %v9218_v35  ;;  %v9216_v29 = vadd.f32 %v16822_v40, %v9173_v33  ;;  %v9178_v57 = vadd.f32 %v11301_v17, %v8865_v21 }
 0x4bf   : > { %v9045_v56 = vpop.f32.mrf.mxu1  ;;  %v9310_v33 = vsel %vm18431_vm3, %v9308_v39, %v9309_v27  ;;  %v9288_v22 = vsel %vm9285_vm13, %v9286_v51, %v9287_v42 }
 0x4c0   : > { %9257 = vst.msk [vmem:[%s16843_s27] sm:$0xff] %vm18429_vm15, %v9255_v38  ;;  %v9273_v24 = vmax.f32 %v9270_v18, 0.0  ;;  %v9254_v4 = vadd.f32 %v9252_v62, %v9216_v29  ;;  %v9221_v52 = vadd.f32 %v16822_v40, %v9178_v57  ;;  %v9176_v61 = vadd.f32 %v9045_v56, %v8863_v54  ;;  %v16881_v18 = vpop.f32.mrf.mxu0  ;;  %v10180_v56 = vld [vmem:[%s11797_s29 + $0x50] sm:$0xff]  ;;  %vm18439_vm15 = vmmov %vm18376_vm0 }
 0x4c1   : > { %v11302_v37 = vpop.f32.mrf.mxu1  ;;  %v8867_v57 = vadd.f32 %v16739_v46, %v16705_v2  ;;  %v16905_v2 = vld [vmem:[%s11797_s29 + $0x68] sm:$0xff] }
 0x4c2   : > { %10164 = vst.msk [vmem:[%s16843_s27 + $0x16] sm:$0xff] %vm18430_vm12, %v9273_v24  ;;  %v9256_v17 = vmax.f32 %v9254_v4, 0.0  ;;  %v9294_v21 = vadd.f32 %v9287_v42, %v9221_v52  ;;  %v9314_v59 = vadd.f32 %v9308_v39, %v9221_v52  ;;  %v9219_v26 = vadd.f32 %v16822_v40, %v9176_v61  ;;  %v10177_v52 = vld [vmem:[%s11797_s29 + $0x48] sm:$0xff]  ;;  %v16907_v46 = vpop.f32.mrf.mxu0  ;;  %vm18440_vm12 = vmmov %vm18376_vm0 }
 0x4c3   : > { %v9179_v35 = vadd.f32 %v11302_v37, %v8866_v44  ;;  %v9048_v6 = vpop.f32.mrf.mxu1  ;;  %v8870_v37 = vadd.f32 %v16747_v12, %v16710_v0  ;;  %v16913_v0 = vld [vmem:[%s11797_s29 + $0x58] sm:$0xff] }
 0x4c4   : > { %9258 = vst.msk [vmem:[%s16843_s27 + $0x8] sm:$0xff] %vm18376_vm0, %v9256_v17  ;;  %v9297_v62 = vmax.f32 %v9294_v21, 0.0  ;;  %v9317_v54 = vmax.f32 %v9314_v59, 0.0  ;;  %v9271_v61 = vadd.f32 %v9264_v32, %v9219_v26  ;;  %v9292_v38 = vadd.f32 %v9286_v51, %v9219_v26  ;;  %v16902_v17 = vld [vmem:[%s11797_s29 + $0x60] sm:$0xff]  ;;  %vm18441_vm0 = vmmov %vm18432_vm10 }
 0x4c5   : > { %v9222_v39 = vadd.f32 %v16822_v40, %v9179_v35  ;;  %v9177_v63 = vadd.f32 %v9048_v6, %v8864_v41  ;;  %v11305_v29 = vpop.f32.mrf.mxu1  ;;  %v9339_v35 = vrot.slane %v10180_v56, 6 }
 0x4c6   : > { %10170 = vst.msk [vmem:[%s16843_s27 + $0x2c] sm:$0xf] %vm18432_vm10, %v9297_v62  ;;  %v9274_v13 = vmax.f32 %v9271_v61, 0.0  ;;  %v9295_v43 = vmax.f32 %v9292_v38, 0.0  ;;  %v9182_v32 = vadd.f32 %v11305_v29, %v8869_v28  ;;  %v8868_v28 = vadd.f32 %v16755_v49, %v16713_v30  ;;  %v10176_v29 = vld [vmem:[%s11797_s29 + $0x40] sm:$0xff]  ;;  %vm18442_vm10 = vmmov %vm18433_vm14 }
 0x4c7   : > { %10173 = vst.msk [vmem:[%s16843_s27 + $0x2a] sm:$0xc0] %vm9321_vm11, %v9317_v54  ;;  %v9315_v24 = vadd.f32 %v9310_v33, %v9222_v39  ;;  %v9220_v4 = vadd.f32 %v16822_v40, %v9177_v63  ;;  %v9061_v44 = vpop.f32.mrf.mxu1  ;;  %v8873_v54 = vadd.f32 %v16763_v50, %v16718_v48  ;;  %v9359_v61 = vrot.slane %v16902_v17, 4 }
 0x4c8   : > { %10165 = vst.msk [vmem:[%s16843_s27 + $0x1e] sm:$0x3] %vm18433_vm14, %v9274_v13  ;;  %v9225_v42 = vadd.f32 %v16822_v40, %v9182_v32  ;;  %v9180_v51 = vadd.f32 %v9061_v44, %v8867_v57  ;;  %v9360_v38 = vrot.slane %v16905_v2, 4  ;;  %v8871_v50 = vadd.f32 %v16771_v1, %v16721_v25  ;;  %v10190_v57 = vld [vmem:[%s11797_s29 + $0x70] sm:$0xff]  ;;  %vm18443_vm14 = vmmov %vm18436_vm1 }
 0x4c9   : > { %10168 = vst.msk [vmem:[%s16843_s27 + $0x1c] sm:$0xf0] %vm9299_vm6, %v9295_v43  ;;  %v9318_v21 = vmax.f32 %v9315_v24, 0.0  ;;  %v9293_v59 = vadd.f32 %v9288_v22, %v9220_v4  ;;  %v11306_v26 = vpop.f32.mrf.mxu1  ;;  %v16924_v22 = vpop.f32.mrf.mxu0  ;;  %v9340_v13 = vrot.slane %v16913_v0, 6  ;;  %v8874_v4 = vadd.f32 %v16779_v16, %v16726_v8 }
 0x4ca   : > { %v9329_v33 = vadd.f32 %v10177_v52, %v9225_v42  ;;  %v9223_v41 = vadd.f32 %v16822_v40, %v9180_v51  ;;  %v9183_v6 = vadd.f32 %v11306_v26, %v8870_v37  ;;  %v9361_v56 = vsel %vm9285_vm13, %v9359_v61, %v9360_v38  ;;  %v16951_v26 = vld [vmem:[%s11797_s29 + $0x78] sm:$0xff] }
 0x4cb   : > { %10174 = vst.msk [vmem:[%s16843_s27 + $0x32] sm:$0xff] %vm18434_vm7, %v9318_v21  ;;  %v9296_v12 = vmax.f32 %v9293_v59, 0.0  ;;  %v9064_v62 = vpop.f32.mrf.mxu1  ;;  %v16942_v42 = vpop.f32.mrf.mxu0  ;;  %v9341_v51 = vsel %vm18437_vm2, %v9339_v35, %v9340_v13  ;;  %v9379_v17 = vrot.slane %v10190_v57, 2  ;;  %v8872_v2 = vadd.f32 %v16787_v36, %v16729_v53  ;;  %v10200_v57 = vld [vmem:[%s11797_s29 + $0x98] sm:$0xff]  ;;  %vm18444_vm7 = vmmov %vm18436_vm1 }
 0x4cc   : > { %v9331_v39 = vmax.f32 %v9329_v33, 0.0  ;;  %v9316_v63 = vadd.f32 %v9309_v27, %v9223_v41  ;;  %v9226_v30 = vadd.f32 %v16822_v40, %v9183_v6  ;;  %v9181_v49 = vadd.f32 %v9064_v62, %v8868_v28 }
 0x4cd   : > { %10169 = vst.msk [vmem:[%s16843_s27 + $0x24] sm:$0xff] %vm18435_vm9, %v9296_v12  ;;  %v11309_v48 = vpop.f32.mrf.mxu1  ;;  %v16956_v53 = vpop.f32.mrf.mxu0  ;;  %v8877_v36 = vadd.f32 %v16795_v9, %v16734_v10  ;;  %v9380_v12 = vrot.slane %v16951_v26, 2  ;;  %v8878_v10 = vadd.f32 %v16817_v34, %v16742_v20  ;;  %vm18445_vm9 = vmmov %vm18436_vm1 }
 0x4ce   : > { %10179 = vst.msk [vmem:[%s16843_s27 + $0x48] sm:$0xff] %vm18436_vm1, %v9331_v39  ;;  %v9319_v19 = vmax.f32 %v9316_v63, 0.0  ;;  %v9345_v27 = vadd.f32 %v9339_v35, %v9226_v30  ;;  %v9224_v43 = vadd.f32 %v16822_v40, %v9181_v49  ;;  %v9186_v32 = vadd.f32 %v11309_v48, %v8873_v54  ;;  %vm18446_vm1 = vmmov %vm18437_vm2 }
 0x4cf   : > { %v9077_v24 = vpop.f32.mrf.mxu1  ;;  %v8875_v49 = vadd.f32 %v16803_v11, %v16737_v15  ;;  %v9381_v11 = vsel %vm18431_vm3, %v9379_v17, %v9380_v12  ;;  %vm18447_vm2 = vmmov %vm18442_vm10 }
 0x4d0   : > { %10175 = vst.msk [vmem:[%s16843_s27 + $0x3a] sm:$0x3f] %vm9324_vm8, %v9319_v19  ;;  %v9348_v25 = vmax.f32 %v9345_v27, 0.0  ;;  %v9328_v1 = vadd.f32 %v10176_v29, %v9224_v43  ;;  %v9229_v52 = vadd.f32 %v16822_v40, %v9186_v32  ;;  %v9184_v44 = vadd.f32 %v9077_v24, %v8871_v50  ;;  %v10195_v19 = vld [vmem:[%s11797_s29 + $0x80] sm:$0xff]  ;;  %v16971_v27 = vpop.f32.mrf.mxu0 }
 0x4d1   : > { %v11310_v37 = vpop.f32.mrf.mxu1  ;;  %v8876_v32 = vadd.f32 %v16830_v14, %v16745_v55  ;;  %v16994_v55 = vld [vmem:[%s11797_s29 + $0xa8] sm:$0xff] }
 0x4d2   : > { %10182 = vst.msk [vmem:[%s16843_s27 + $0x4e] sm:$0xfc] %vm9276_vm5, %v9348_v25  ;;  %v9330_v8 = vmax.f32 %v9328_v1, 0.0  ;;  %v9366_v16 = vadd.f32 %v9361_v56, %v9229_v52  ;;  %v9227_v21 = vadd.f32 %v16822_v40, %v9184_v44  ;;  %v9187_v59 = vadd.f32 %v11310_v37, %v8874_v4  ;;  %v10204_v56 = vld [vmem:[%s11797_s29 + $0xa0] sm:$0xff]  ;;  %v10196_v25 = vld [vmem:[%s11797_s29 + $0x88] sm:$0xff]  ;;  %v10199_v37 = vld [vmem:[%s11797_s29 + $0x90] sm:$0xff]  ;;  %v16996_v14 = vpop.f32.mrf.mxu0 }
 0x4d3   : > { %v9080_v33 = vpop.f32.mrf.mxu1 }
 0x4d4   : > { %10178 = vst.msk [vmem:[%s16843_s27 + $0x40] sm:$0xff] %vm18438_vm4, %v9330_v8  ;;  %v9369_v41 = vmax.f32 %v9366_v16, 0.0  ;;  %v9346_v35 = vadd.f32 %v9341_v51, %v9227_v21  ;;  %v9230_v6 = vadd.f32 %v16822_v40, %v9187_v59  ;;  %v9185_v28 = vadd.f32 %v9080_v33, %v8872_v2 }
 0x4d5   : > { %v11313_v0 = vpop.f32.mrf.mxu1  ;;  %v8881_v51 = vadd.f32 %v16853_v45, %v16750_v60  ;;  %v9409_v16 = vrot.slane %v10200_v57, 6  ;;  %v9428_v21 = vrot.slane %v10204_v56, 4 }
 0x4d6   : > { %10188 = vst.msk [vmem:[%s16843_s27 + $0x64] sm:$0xff] %vm18439_vm15, %v9369_v41  ;;  %v9349_v62 = vmax.f32 %v9346_v35, 0.0  ;;  %v9367_v54 = vadd.f32 %v9360_v38, %v9230_v6  ;;  %v9385_v39 = vadd.f32 %v9379_v17, %v9230_v6  ;;  %v9228_v63 = vadd.f32 %v16822_v40, %v9185_v28  ;;  %vm18450_vm15 = vmmov %vm18438_vm4 }
 0x4d7   : > { %v9190_v30 = vadd.f32 %v11313_v0, %v8877_v36  ;;  %v9093_v29 = vpop.f32.mrf.mxu1  ;;  %v8879_v41 = vadd.f32 %v16865_v5, %v16753_v7  ;;  %v9408_v35 = vrot.slane %v10199_v37, 6  ;;  %v9429_v6 = vrot.slane %v16994_v55, 4 }
 0x4d8   : > { %10183 = vst.msk [vmem:[%s16843_s27 + $0x56] sm:$0xff] %vm18440_vm12, %v9349_v62  ;;  %v9370_v9 = vmax.f32 %v9367_v54, 0.0  ;;  %v9388_v48 = vmax.f32 %v9385_v39, 0.0  ;;  %v9347_v38 = vadd.f32 %v9340_v13, %v9228_v63  ;;  %v9365_v50 = vadd.f32 %v9359_v61, %v9228_v63  ;;  %v17005_v54 = vpop.f32.mrf.mxu0  ;;  %vm18451_vm12 = vmmov %vm18431_vm3 }
 0x4d9   : > { %v9233_v43 = vadd.f32 %v16822_v40, %v9190_v30  ;;  %v9188_v15 = vadd.f32 %v9093_v29, %v8875_v49  ;;  %v11314_v20 = vpop.f32.mrf.mxu1  ;;  %v8882_v7 = vadd.f32 %v16881_v18, %v16758_v47  ;;  %v8880_v39 = vadd.f32 %v16907_v46, %v16761_v23  ;;  %v10210_v29 = vld [vmem:[%s11797_s29 + $0xb8] sm:$0xff]  ;;  %vm18453_vm3 = vmmov %vm18446_vm1 }
 0x4da   : > { %10189 = vst.msk [vmem:[%s16843_s27 + $0x6c] sm:$0xf] %vm18441_vm0, %v9370_v9  ;;  %v9350_v34 = vmax.f32 %v9347_v38, 0.0  ;;  %v9368_v61 = vmax.f32 %v9365_v50, 0.0  ;;  %v9191_v13 = vadd.f32 %v11314_v20, %v8878_v10  ;;  %v9430_v47 = vsel %vm9285_vm13, %v9428_v21, %v9429_v6  ;;  %v10209_v50 = vld [vmem:[%s11797_s29 + $0xb0] sm:$0xff] }
 0x4db   : > { %10192 = vst.msk [vmem:[%s16843_s27 + $0x6a] sm:$0xc0] %vm9321_vm11, %v9388_v48  ;;  %v9397_v24 = vadd.f32 %v10195_v19, %v9233_v43  ;;  %v9231_v4 = vadd.f32 %v16822_v40, %v9188_v15  ;;  %v9096_v1 = vpop.f32.mrf.mxu1  ;;  %v8885_v23 = vadd.f32 %v16924_v22, %v16766_v3  ;;  %v11288_v19 = vpop.f32.mrf.mxu0  ;;  %v9410_v15 = vsel %vm18446_vm1, %v9408_v35, %v9409_v16  ;;  %vm18463_vm1 = vmmov %vm18438_vm4 }
 0x4dc   : > { %10184 = vst.msk [vmem:[%s16843_s27 + $0x5e] sm:$0x3] %vm18442_vm10, %v9350_v34  ;;  %v9234_v52 = vadd.f32 %v16822_v40, %v9191_v13  ;;  %v9189_v44 = vadd.f32 %v9096_v1, %v8876_v32  ;;  %v9449_v20 = vrot.slane %v10210_v29, 2  ;;  %v9448_v57 = vrot.slane %v10209_v50, 2  ;;  %v17040_v1 = vld [vmem:[%s11797_s29 + $0xd0] sm:$0xff]  ;;  %vm18455_vm10 = vmmov %vm18438_vm4 }
 0x4dd   : > { %10187 = vst.msk [vmem:[%s16843_s27 + $0x5c] sm:$0xf0] %vm9299_vm6, %v9368_v61  ;;  %v9399_v17 = vmax.f32 %v9397_v24, 0.0  ;;  %v9386_v2 = vadd.f32 %v9381_v11, %v9231_v4  ;;  %v11317_v8 = vpop.f32.mrf.mxu1  ;;  %v8883_v61 = vadd.f32 %v16942_v42, %v16769_v58  ;;  %v8831_v58 = vpop.f32.mrf.mxu0 }
 0x4de   : > { %v9398_v59 = vadd.f32 %v10196_v25, %v9234_v52  ;;  %v9232_v26 = vadd.f32 %v16822_v40, %v9189_v44  ;;  %v9194_v33 = vadd.f32 %v11317_v8, %v8881_v51  ;;  %v8886_v25 = vadd.f32 %v16956_v53, %v16774_v31  ;;  %v17043_v52 = vld [vmem:[%s11797_s29 + $0xd8] sm:$0xff]  ;;  %v10214_v8 = vld [vmem:[%s11797_s29 + $0xc0] sm:$0xff] }
 0x4df   : > { %10197 = vst.msk [vmem:[%s16843_s27 + $0x80] sm:$0xff] %vm18443_vm14, %v9399_v17  ;;  %v9389_v60 = vmax.f32 %v9386_v2, 0.0  ;;  %v9109_v45 = vpop.f32.mrf.mxu1  ;;  %vm18457_vm14 = vmmov %vm18438_vm4 }
 0x4e0   : > { %v9400_v28 = vmax.f32 %v9398_v59, 0.0  ;;  %v9387_v36 = vadd.f32 %v9380_v12, %v9232_v26  ;;  %v9237_v0 = vadd.f32 %v16822_v40, %v9194_v33  ;;  %v9192_v62 = vadd.f32 %v9109_v45, %v8879_v41 }
 0x4e1   : > { %10193 = vst.msk [vmem:[%s16843_s27 + $0x72] sm:$0xff] %vm18444_vm7, %v9389_v60  ;;  %v11318_v5 = vpop.f32.mrf.mxu1  ;;  %v9477_v26 = vrot.slane %v17040_v1, 6  ;;  %v9478_v33 = vrot.slane %v17043_v52, 6  ;;  %vm18460_vm7 = vmmov %vm18438_vm4 }
 0x4e2   : > { %10198 = vst.msk [vmem:[%s16843_s27 + $0x88] sm:$0xff] %vm18445_vm9, %v9400_v28  ;;  %v9390_v63 = vmax.f32 %v9387_v36, 0.0  ;;  %v9416_v12 = vadd.f32 %v9409_v16, %v9237_v0  ;;  %v9434_v30 = vadd.f32 %v9428_v21, %v9237_v0  ;;  %v9235_v49 = vadd.f32 %v16822_v40, %v9192_v62  ;;  %v18448_v16 = vld [vmem:[#allocation17_spill] sm:$0xff]  ;;  %v18452_v0 = vld [vmem:[#allocation24_spill] sm:$0xff]  ;;  %vm18461_vm9 = vmmov %vm18451_vm12 }
 0x4e3   : > { %v9195_v10 = vadd.f32 %v11318_v5, %v8882_v7  ;;  %v9112_v18 = vpop.f32.mrf.mxu1  ;;  %v8884_v31 = vadd.f32 %v16971_v27, %v18448_v16  ;;  %v18449_v21 = vld [vmem:[#allocation61_spill] sm:$0xff]  ;;  %v11291_v27 = vpop.f32.mrf.mxu0  ;;  %v8887_v62 = vadd.f32 %v17005_v54, %v18452_v0 }
 0x4e4   : > { %10194 = vst.msk [vmem:[%s16843_s27 + $0x7a] sm:$0x3f] %vm9324_vm8, %v9390_v63  ;;  %v9419_v46 = vmax.f32 %v9416_v12, 0.0  ;;  %v9437_v9 = vmax.f32 %v9434_v30, 0.0  ;;  %v9414_v48 = vadd.f32 %v9408_v35, %v9235_v49  ;;  %v9193_v38 = vadd.f32 %v9112_v18, %v8880_v39  ;;  %v10223_v39 = vld [vmem:[%s11797_s29 + $0xe0] sm:$0xff]  ;;  %v17077_v18 = vld [vmem:[%s11797_s29 + $0xf0] sm:$0xff] }
 0x4e5   : > { %v9238_v43 = vadd.f32 %v16822_v40, %v9195_v10  ;;  %v11321_v11 = vpop.f32.mrf.mxu1  ;;  %v8889_v59 = vadd.f32 %v16996_v14, %v18449_v21  ;;  %v9450_v14 = vsel %vm18451_vm12, %v9448_v57, %v9449_v20  ;;  %v9479_v12 = vsel %vm18453_vm3, %v9477_v26, %v9478_v33  ;;  %v18454_v10 = vld [vmem:[#allocation36_spill] sm:$0xff]  ;;  %v18462_v21 = vld [vmem:[#allocation10_spill] sm:$0xff] }
 0x4e6   : > { %10203 = vst.msk [vmem:[%s16843_s27 + $0x9e] sm:$0x3] %vm18447_vm2, %v9419_v46  ;;  %v9417_v3 = vmax.f32 %v9414_v48, 0.0  ;;  %v9236_v22 = vadd.f32 %v16822_v40, %v9193_v38  ;;  %v9198_v34 = vadd.f32 %v11321_v11, %v8885_v23  ;;  %v10229_v23 = vld [vmem:[%s11797_s29 + $0xf8] sm:$0xff]  ;;  %v8844_v46 = vpop.f32.mrf.mxu0  ;;  %v10215_v48 = vld [vmem:[%s11797_s29 + $0xc8] sm:$0xff]  ;;  %v9497_v50 = vrot.slane %v10223_v39, 4 }
 0x4e7   : > { %10206 = vst.msk [vmem:[%s16843_s27 + $0x9c] sm:$0xf0] %vm9299_vm6, %v9437_v9  ;;  %v9435_v13 = vadd.f32 %v9430_v47, %v9238_v43  ;;  %v9125_v32 = vpop.f32.mrf.mxu1  ;;  %v8890_v47 = vadd.f32 %v11288_v19, %v18454_v10 }
 0x4e8   : > { %10201 = vst.msk [vmem:[%s16843_s27 + $0x8e] sm:$0xfc] %vm9276_vm5, %v9417_v3  ;;  %v9415_v56 = vadd.f32 %v9410_v15, %v9236_v22  ;;  %v9241_v24 = vadd.f32 %v16822_v40, %v9198_v34  ;;  %v9196_v4 = vadd.f32 %v9125_v32, %v8883_v61  ;;  %v10224_v22 = vld [vmem:[%s11797_s29 + $0xe8] sm:$0xff]  ;;  %v9517_v61 = vrot.slane %v17077_v18, 2 }
 0x4e9   : > { %v9438_v42 = vmax.f32 %v9435_v13, 0.0  ;;  %v11322_v44 = vpop.f32.mrf.mxu1  ;;  %v9518_v13 = vrot.slane %v10229_v23, 2 }
 0x4ea   : > { %v9418_v51 = vmax.f32 %v9415_v56, 0.0  ;;  %v9456_v37 = vadd.f32 %v9449_v20, %v9241_v24  ;;  %v9239_v17 = vadd.f32 %v16822_v40, %v9196_v4  ;;  %v9199_v2 = vadd.f32 %v11322_v44, %v8886_v25  ;;  %v18456_v20 = vld [vmem:[#allocation66_spill] sm:$0xff]  ;;  %v11292_v4 = vpop.f32.mrf.mxu0  ;;  %v18458_v25 = vld [vmem:[#allocation8_spill] sm:$0xff] }
 0x4eb   : > { %10207 = vst.msk [vmem:[%s16843_s27 + $0xa4] sm:$0xff] %vm18438_vm4, %v9438_v42  ;;  %v9128_v53 = vpop.f32.mrf.mxu1  ;;  %v8888_v3 = vadd.f32 %v8831_v58, %v18456_v20  ;;  %v8893_v52 = vadd.f32 %v11291_v27, %v18458_v25  ;;  %v18459_v58 = vld [vmem:[#allocation16_spill] sm:$0xff] }
 0x4ec   : > { %10202 = vst.msk [vmem:[%s16843_s27 + $0x96] sm:$0xff] %vm18450_vm15, %v9418_v51  ;;  %v9459_v41 = vmax.f32 %v9456_v37, 0.0  ;;  %v9436_v60 = vadd.f32 %v9429_v6, %v9239_v17  ;;  %v9454_v45 = vadd.f32 %v9448_v57, %v9239_v17  ;;  %v9242_v35 = vadd.f32 %v16822_v40, %v9199_v2 }
 0x4ed   : > { %v9197_v28 = vadd.f32 %v9128_v53, %v8884_v31  ;;  %v11325_v36 = vpop.f32.mrf.mxu1  ;;  %v8891_v44 = vadd.f32 %v8844_v46, %v18459_v58  ;;  %v9498_v51 = vrot.slane %v10224_v22, 4  ;;  %v9519_v31 = vsel %vm18461_vm9, %v9517_v61, %v9518_v13 }
 0x4ee   : > { %10213 = vst.msk [vmem:[%s16843_s27 + $0xba] sm:$0x3f] %vm9324_vm8, %v9459_v41  ;;  %v9439_v7 = vmax.f32 %v9436_v60, 0.0  ;;  %v9457_v55 = vmax.f32 %v9454_v45, 0.0  ;;  %v9466_v6 = vadd.f32 %v10214_v8, %v9242_v35  ;;  %v9202_v5 = vadd.f32 %v11325_v36, %v8889_v59  ;;  %v8847_v35 = vpop.f32.mrf.mxu0 }
 0x4ef   : > { %v9240_v63 = vadd.f32 %v16822_v40, %v9197_v28  ;;  %v9141_v30 = vpop.f32.mrf.mxu1  ;;  %v8894_v59 = vadd.f32 %v11292_v4, %v18462_v21  ;;  %v9499_v28 = vsel %vm9285_vm13, %v9497_v50, %v9498_v51  ;;  %vm18465_vm13 = vmmov %vm18463_vm1 }
 0x4f0   : > { %10208 = vst.msk [vmem:[%s16843_s27 + $0xac] sm:$0xf] %vm18441_vm0, %v9439_v7  ;;  %v9468_v54 = vmax.f32 %v9466_v6, 0.0  ;;  %v9245_v49 = vadd.f32 %v16822_v40, %v9202_v5  ;;  %v9200_v29 = vadd.f32 %v9141_v30, %v8887_v62  ;;  %v18464_v7 = vld [vmem:[#allocation67_spill] sm:$0xff] }
 0x4f1   : > { %10211 = vst.msk [vmem:[%s16843_s27 + $0xaa] sm:$0xc0] %vm9321_vm11, %v9457_v55  ;;  %v9455_v9 = vadd.f32 %v9450_v14, %v9240_v63  ;;  %v11326_v38 = vpop.f32.mrf.mxu1  ;;  %v8892_v1 = vadd.f32 %v8847_v35, %v18464_v7 }
 0x4f2   : > { %10216 = vst.msk [vmem:[%s16843_s27 + $0xc0] sm:$0xff] %vm18455_vm10, %v9468_v54  ;;  %v9484_v43 = vadd.f32 %v9479_v12, %v9245_v49  ;;  %v9243_v15 = vadd.f32 %v16822_v40, %v9200_v29  ;;  %v9203_v11 = vadd.f32 %v11326_v38, %v8890_v47 }
 0x4f3   : > { %v9458_v19 = vmax.f32 %v9455_v9, 0.0  ;;  %v9144_v34 = vpop.f32.mrf.mxu1 }
 0x4f4   : > { %v9487_v32 = vmax.f32 %v9484_v43, 0.0  ;;  %v9467_v57 = vadd.f32 %v10215_v48, %v9243_v15  ;;  %v9246_v56 = vadd.f32 %v16822_v40, %v9203_v11  ;;  %v9201_v24 = vadd.f32 %v9144_v34, %v8888_v3 }
 0x4f5   : > { %10212 = vst.msk [vmem:[%s16843_s27 + $0xb2] sm:$0xff] %vm18457_vm14, %v9458_v19  ;;  %v11329_v42 = vpop.f32.mrf.mxu1 }
 0x4f6   : > { %10221 = vst.msk [vmem:[%s16843_s27 + $0xd6] sm:$0xff] %vm18460_vm7, %v9487_v32  ;;  %v9469_v37 = vmax.f32 %v9467_v57, 0.0  ;;  %v9485_v17 = vadd.f32 %v9478_v33, %v9246_v56  ;;  %v9503_v2 = vadd.f32 %v9497_v50, %v9246_v56  ;;  %v9244_v8 = vadd.f32 %v16822_v40, %v9201_v24 }
 0x4f7   : > { %v9206_v16 = vadd.f32 %v11329_v42, %v8893_v52  ;;  %v9157_v53 = vpop.f32.mrf.mxu1 }
 0x4f8   : > { %10217 = vst.msk [vmem:[%s16843_s27 + $0xc8] sm:$0xff] %vm18463_vm1, %v9469_v37  ;;  %v9488_v41 = vmax.f32 %v9485_v17, 0.0  ;;  %v9506_v60 = vmax.f32 %v9503_v2, 0.0  ;;  %v9483_v45 = vadd.f32 %v9477_v26, %v9244_v8  ;;  %v9204_v33 = vadd.f32 %v9157_v53, %v8891_v44 }
 0x4f9   : > { %v9249_v27 = vadd.f32 %v16822_v40, %v9206_v16  ;;  %v11330_v14 = vpop.f32.mrf.mxu1 }
 0x4fa   : > { %10222 = vst.msk [vmem:[%s16843_s27 + $0xde] sm:$0x3] %vm18447_vm2, %v9488_v41  ;;  %v9486_v36 = vmax.f32 %v9483_v45, 0.0  ;;  %v9247_v0 = vadd.f32 %v16822_v40, %v9204_v33  ;;  %v9207_v62 = vadd.f32 %v11330_v14, %v8894_v59 }
 0x4fb   : > { %10225 = vst.msk [vmem:[%s16843_s27 + $0xdc] sm:$0xf0] %vm9299_vm6, %v9506_v60  ;;  %v9524_v26 = vadd.f32 %v9519_v31, %v9249_v27  ;;  %v9160_v55 = vpop.f32.mrf.mxu1  ;;  %vm18466_vm6 = vmmov %vm18463_vm1 }
 0x4fc   : > { %10220 = vst.msk [vmem:[%s16843_s27 + $0xce] sm:$0xfc] %vm9276_vm5, %v9486_v36  ;;  %v9504_v6 = vadd.f32 %v9499_v28, %v9247_v0  ;;  %v9250_v5 = vadd.f32 %v16822_v40, %v9207_v62  ;;  %v9205_v39 = vadd.f32 %v9160_v55, %v8892_v1  ;;  %vm18467_vm5 = vmmov %vm18441_vm0 }
 0x4fd   : > { %v9527_v63 = vmax.f32 %v9524_v26, 0.0 }
 0x4fe   : > { %v9507_v12 = vmax.f32 %v9504_v6, 0.0  ;;  %v9525_v30 = vadd.f32 %v9518_v13, %v9250_v5  ;;  %v9248_v54 = vadd.f32 %v16822_v40, %v9205_v39 }
 0x4ff   : > { %10231 = vst.msk [vmem:[%s16843_s27 + $0xf2] sm:$0xff] %vm18465_vm13, %v9527_v63 }
 0x500   : > { %10226 = vst.msk [vmem:[%s16843_s27 + $0xe4] sm:$0xff] %vm18466_vm6, %v9507_v12  ;;  %v9528_v49 = vmax.f32 %v9525_v30, 0.0  ;;  %v9505_v29 = vadd.f32 %v9498_v51, %v9248_v54  ;;  %v9523_v10 = vadd.f32 %v9517_v61, %v9248_v54 }
 0x502   : > { %10232 = vst.msk [vmem:[%s16843_s27 + $0xfa] sm:$0x3f] %vm9324_vm8, %v9528_v49  ;;  %v9508_v47 = vmax.f32 %v9505_v29, 0.0  ;;  %v9526_v18 = vmax.f32 %v9523_v10, 0.0 }
 0x504   : > { %10227 = vst.msk [vmem:[%s16843_s27 + $0xec] sm:$0xf] %vm18467_vm5, %v9508_v47 }
 0x505   : > { %10230 = vst.msk [vmem:[%s16843_s27 + $0xea] sm:$0xc0] %vm9321_vm11, %v9526_v18 }
 0x506 PF: > { %s15_s18 = sadd.s32 1, %s11567_s18  }
 0x507   : > { %p12_p4 = scmp.ge.s32.totalorder %s15_s18, 4  }
 0x509   :  { %14 = sbr.rel (!%p12_p4) target bundleno = 1 (0x1), region = 116 }

</bundles_post_ra>
